<compile_context>
chip_gen: v5e
topology: v5e:2x2
jax: 0.10.0
libtpu: 0.0.40
codegen_flags: <defaults>
</compile_context>

<pallas_src>
import functools

import jax
import jax.numpy as jnp
import numpy as np
from jax.experimental import pallas as pl
from jax.experimental.pallas import tpu as pltpu


def _cdiv(a, b):
    return (a + b - 1) // b


def _round_up(a, b):
    return _cdiv(a, b) * b


def _pick_chunk(T, B_pad, target_rows=256, max_chunk=64):
    """Timesteps per grid step: aim for chunk*B_pad >= 256 (one full MXU pass
    for the hoisted input projection / FC) without requiring chunk | T."""
    chunk = max(1, min(max_chunk, target_rows // B_pad))
    chunk = min(chunk, T)
    num_chunks = _cdiv(T, chunk)
    return chunk, num_chunks


def _pick_vtile(V, max_vt=2048):
    """Vocab tile (multiple of 128, <= max_vt) and padded vocab size."""
    v128 = _round_up(V, 128)
    n_vt = _cdiv(v128, max_vt)
    vt = _round_up(_cdiv(v128, n_vt), 128)
    return vt, vt * n_vt, n_vt


# ----------------------------------------------------------------------------
# Fused 2-layer LSTM + FC kernel.
# Grid = (num_time_chunks, num_vocab_tiles), both sequential ("arbitrary").
# ----------------------------------------------------------------------------
def lstm_fused_kernel(x_ref, wih0_ref, wcomb_ref, b0_ref, b1_ref,
                      wfc_ref, bfc_ref,
                      logits_ref, h_out_ref, c_out_ref,
                      c_scr, hcat_scr, r0_scr, gi_scr, y_scr,
                      *, chunk, batch, hidden, t_last):
    H = hidden
    B = batch
    s = pl.program_id(0)                     # time-chunk index (sequential)
    v = pl.program_id(1)                     # vocab-tile index (inner, seq.)

    @pl.when(jnp.logical_and(s == 0, v == 0))
    def _init():
        # hidden=None in the PyTorch forward -> zero-initialized state.
        c_scr[...] = jnp.zeros_like(c_scr)
        hcat_scr[...] = jnp.zeros_like(hcat_scr)   # [h0 | h1] bf16
        r0_scr[...] = jnp.zeros_like(r0_scr)       # h0 @ Whh0 (pipelined)

    # -------------------- recurrence: only on the first vocab tile ----------
    @pl.when(v == 0)
    def _recurrence():
        # Chunk-level layer-0 input projection (hoisted out of the time loop)
        # stored to VMEM scratch so it is not live in vregs across the loop.
        gi_scr[...] = (jnp.dot(x_ref[...], wih0_ref[...],
                               preferred_element_type=jnp.float32)
                       + b0_ref[...])                       # (chunk*B, 4H) f32

        # Hoisted broadcast (JAX does not CSE broadcast_in_dim).
        b1b = jnp.broadcast_to(b1_ref[...], (B, 4 * H))

        def gate_split(g):
            # PyTorch gate layout: [i, f, g, o] along the 4H axis.
            return (jax.nn.sigmoid(g[:, 0 * H:1 * H]),
                    jax.nn.sigmoid(g[:, 1 * H:2 * H]),
                    jnp.tanh(g[:, 2 * H:3 * H]),
                    jax.nn.sigmoid(g[:, 3 * H:4 * H]))

        c0 = c_scr[0]
        c1 = c_scr[1]
        r0 = r0_scr[...]                                    # (B, 4H) f32
        h0_last = c0_last = h1_last = c1_last = None

        # chunk is small and static -> Python loop == full unroll.
        # TODO(synk): keep wcomb MXU-resident across the unrolled loop via
        # pltpu.matmul_push_rhs / matmul_acc_lhs / matmul_pop (per-N-tile) so
        # the RHS push is amortized over the whole chunk.
        for t in range(chunk):
            # layer 0: recurrent contribution r0 was produced by the previous
            # iteration's merged matmul (or carried in from the prior chunk).
            g0 = gi_scr[t * B:(t + 1) * B, :] + r0
            i0, f0, gg0, o0 = gate_split(g0)
            c0 = f0 * c0 + i0 * gg0
            h0 = o0 * jnp.tanh(c0)

            # One merged matmul per timestep:
            #   [h0_t | h1_{t-1}] @ [Wih1 | Whh0 ; Whh1 | 0]
            #   -> [:, :4H] layer-1 gate pre-acts (step t)
            #      [:, 4H:] layer-0 recurrent pre-acts (step t+1)
            hcat_scr[:, 0:H] = h0.astype(jnp.bfloat16)
            big = jnp.dot(hcat_scr[...], wcomb_ref[...],
                          preferred_element_type=jnp.float32)   # (B, 8H) f32
            r0 = big[:, 4 * H:8 * H]

            # layer 1 (nn.LSTM inter-layer dropout defaults to 0.0).
            g1 = big[:, 0:4 * H] + b1b
            i1, f1, gg1, o1 = gate_split(g1)
            c1 = f1 * c1 + i1 * gg1
            h1 = o1 * jnp.tanh(c1)

            h1b = h1.astype(jnp.bfloat16)
            hcat_scr[:, H:2 * H] = h1b                      # for next timestep
            y_scr[t * B:(t + 1) * B, :] = h1b               # static slice store

            if t == t_last:
                # Last *valid* timestep of a chunk (time axis may be padded).
                h0_last, c0_last, h1_last, c1_last = h0, c0, h1, c1

        c_scr[0] = c0
        c_scr[1] = c1
        r0_scr[...] = r0

        @pl.when(s == pl.num_programs(0) - 1)
        def _store_final_state():
            h_out_ref[0] = h0_last
            h_out_ref[1] = h1_last
            c_out_ref[0] = c0_last
            c_out_ref[1] = c1_last

    # -------------------- FC over the whole chunk, per vocab tile -----------
    # Dropout before FC is identity in eval mode.  f32 accumulation, bf16
    # lane-dense store halves logits writeback bandwidth.
    # TODO(synk): on v7x, split the FC into a second pallas_call with the
    # vocab tile as a "parallel" axis to use the second TensorCore.
    logits_ref[...] = (jnp.dot(y_scr[...], wfc_ref[...],
                               preferred_element_type=jnp.float32)
                       + bfc_ref[...]).astype(logits_ref.dtype)


def run_lstm_fused(x_flat, wih0, wcomb, b0, b1, wfc, bfc, *,
                   num_chunks, n_vt, chunk, batch_pad, hidden, vtile, t_last):
    B, H, Vt = batch_pad, hidden, vtile
    E = wih0.shape[0]
    MB = chunk * B
    M = num_chunks * MB
    V_pad = n_vt * Vt
    L = 2
    assert 0 <= t_last < chunk

    kernel = functools.partial(lstm_fused_kernel, chunk=chunk, batch=B,
                               hidden=H, t_last=t_last)

    # TODO(synk): single-buffer the grid-invariant weight/bias blocks
    # (pipeline_mode=pl.Buffered(1)) to halve their VMEM footprint.
    grid_spec = pltpu.PrefetchScalarGridSpec(
        num_scalar_prefetch=0,
        grid=(num_chunks, n_vt),
        in_specs=[
            pl.BlockSpec((MB, E), lambda s, v: (s, 0)),         # x chunk (bf16)
            pl.BlockSpec((E, 4 * H), lambda s, v: (0, 0)),      # W_ih_l0^T
            pl.BlockSpec((2 * H, 8 * H), lambda s, v: (0, 0)),  # merged W
            pl.BlockSpec((1, 4 * H), lambda s, v: (0, 0)),      # b_l0 (f32)
            pl.BlockSpec((1, 4 * H), lambda s, v: (0, 0)),      # b_l1 (f32)
            pl.BlockSpec((H, Vt), lambda s, v: (0, v)),         # W_fc^T tile
            pl.BlockSpec((1, Vt), lambda s, v: (0, v)),         # b_fc tile
        ],
        out_specs=[
            pl.BlockSpec((MB, Vt), lambda s, v: (s, v)),        # logits tile
            pl.BlockSpec((L, B, H), lambda s, v: (0, 0, 0)),    # h_n
            pl.BlockSpec((L, B, H), lambda s, v: (0, 0, 0)),    # c_n
        ],
        scratch_shapes=[
            pltpu.VMEM((L, B, H), jnp.float32),     # persistent c state
            pltpu.VMEM((B, 2 * H), jnp.bfloat16),   # persistent [h0 | h1]
            pltpu.VMEM((B, 4 * H), jnp.float32),    # pipelined h0 @ Whh0
            pltpu.VMEM((MB, 4 * H), jnp.float32),   # chunk input projection
            pltpu.VMEM((MB, H), jnp.bfloat16),      # top-layer hidden for FC
        ],
    )

    # VMEM budget (double-buffered blocks + scratch), used for the scoped
    # limit so the default (16 MiB v5e / 32 MiB v6e,v7x) never rejects us.
    resident = (2 * MB * E * 2 + 2 * E * 4 * H * 2 + 2 * 2 * H * 8 * H * 2
                + 4 * 4 * H * 4 + 2 * H * Vt * 2 + 2 * Vt * 4
                + 2 * MB * Vt * 2 + 4 * L * B * H * 4
                + L * B * H * 4 + B * 2 * H * 2 + B * 4 * H * 4
                + MB * 4 * H * 4 + MB * H * 2)
    vmem_bytes = int(min(max(2 * resident, 32 * 1024 * 1024),
                         96 * 1024 * 1024))

    return pl.pallas_call(
        kernel,
        out_shape=(jax.ShapeDtypeStruct((M, V_pad), jnp.bfloat16),
                   jax.ShapeDtypeStruct((L, B, H), jnp.float32),
                   jax.ShapeDtypeStruct((L, B, H), jnp.float32)),
        grid_spec=grid_spec,
        compiler_params=pltpu.CompilerParams(
            dimension_semantics=("arbitrary", "arbitrary"),
            vmem_limit_bytes=vmem_bytes),
    )(x_flat, wih0, wcomb, b0, b1, wfc, bfc)


# ----------------------------------------------------------------------------
# Full forward (glue in plain JAX: embedding gather, padding, weight packing).
# ----------------------------------------------------------------------------
def lstm_text_generator_forward(x_ids, params, *, hidden_size):
    B, T = x_ids.shape
    H = hidden_size
    emb = params["embedding"]                       # (V, E)
    V, E = emb.shape

    # TODO(synk): fuse the embedding row-gather into the kernel via
    # scalar-prefetched token ids + a pl.Element index_map (saves one
    # (T, B, E) HBM round trip and the transpose/pad below).
    x_emb = jnp.take(emb, x_ids, axis=0)            # (B, T, E)
    x_tm = jnp.transpose(x_emb, (1, 0, 2))          # (T, B, E) time-major

    B_pad = _round_up(B, 8)                         # sublane-full tiles
    chunk, num_chunks = _pick_chunk(T, B_pad)
    T_pad = chunk * num_chunks
    x_tm = jnp.pad(x_tm, ((0, T_pad - T), (0, B_pad - B), (0, 0)))
    x_flat = x_tm.reshape(T_pad * B_pad, E).astype(jnp.bfloat16)

    Vt, V_pad, n_vt = _pick_vtile(V)

    # bf16 MXU operands (f32 accumulation / cell state in-kernel).
    wih0 = params["wih0_t"].astype(jnp.bfloat16)                 # (E, 4H)
    # Merged per-timestep weight:
    #   [h0_t | h1_{t-1}] @ wcomb = [ layer-1 gates (t) | layer-0 recurrent
    #                                 gates (t+1) ]
    zeros_hh = jnp.zeros((H, 4 * H), jnp.float32)
    wcomb = jnp.concatenate(
        [jnp.concatenate([params["wih1_t"], params["whh0_t"]], axis=1),
         jnp.concatenate([params["whh1_t"], zeros_hh], axis=1)],
        axis=0).astype(jnp.bfloat16)                             # (2H, 8H)

    wfc = params["w_fc_t"].astype(jnp.bfloat16)                  # (H, V)
    bfc = params["b_fc"]                                         # (1, V)
    if V_pad != V:
        wfc = jnp.pad(wfc, ((0, 0), (0, V_pad - V)))
        bfc = jnp.pad(bfc, ((0, 0), (0, V_pad - V)))

    logits_flat, h_n, c_n = run_lstm_fused(
        x_flat, wih0, wcomb, params["b0"], params["b1"], wfc, bfc,
        num_chunks=num_chunks, n_vt=n_vt, chunk=chunk, batch_pad=B_pad,
        hidden=H, vtile=Vt, t_last=(T - 1) % chunk)

    # Dropout(0.3): identity in inference mode.
    # TODO(synk): emit batch-major logits from the kernel (in-kernel
    # (chunk, B) -> (B, chunk) relayout before the store) to avoid this
    # wrapper-side transpose of the largest tensor.
    logits = logits_flat.reshape(T_pad, B_pad, V_pad)[:T, :B, :V]
    logits = jnp.transpose(logits, (1, 0, 2)).astype(jnp.float32)   # (B, T, V)
    return logits, (h_n[:, :B, :], c_n[:, :B, :])


# ----------------------------------------------------------------------------
# Pure-JAX float32 reference (sanity check).
# ----------------------------------------------------------------------------
def reference_forward(x_ids, params, *, hidden_size):
    H = hidden_size
    emb = params["embedding"]
    x_emb = jnp.take(emb, x_ids, axis=0)                  # (B, T, E)
    B, T, _ = x_emb.shape

    def cell(x_t, h, c, w_ih_t, w_hh_t, b):
        gates = x_t @ w_ih_t + h @ w_hh_t + b
        i = jax.nn.sigmoid(gates[:, 0 * H:1 * H])
        f = jax.nn.sigmoid(gates[:, 1 * H:2 * H])
        g = jnp.tanh(gates[:, 2 * H:3 * H])
        o = jax.nn.sigmoid(gates[:, 3 * H:4 * H])
        c = f * c + i * g
        h = o * jnp.tanh(c)
        return h, c

    h0 = jnp.zeros((B, H)); c0 = jnp.zeros((B, H))
    h1 = jnp.zeros((B, H)); c1 = jnp.zeros((B, H))
    ys = []
    for t in range(T):
        h0, c0 = cell(x_emb[:, t], h0, c0,
                      params["wih0_t"], params["whh0_t"], params["b0"])
        h1, c1 = cell(h0, h1, c1,
                      params["wih1_t"], params["whh1_t"], params["b1"])
        ys.append(h1)
    y = jnp.stack(ys, axis=1)                             # (B, T, H)
    logits = y @ params["w_fc_t"] + params["b_fc"]
    h_n = jnp.stack([h0, h1], axis=0)
    c_n = jnp.stack([c0, c1], axis=0)
    return logits, (h_n, c_n)


def init_params(key, vocab_size, embed_size, hidden_size):
    H = hidden_size
    k = 1.0 / np.sqrt(H)
    keys = jax.random.split(key, 12)

    def u(kk, shape):
        return jax.random.uniform(kk, shape, jnp.float32, -k, k)

    # PyTorch weights are (4H, in); store transposed for the kernel matmuls.
    wih0 = u(keys[0], (4 * H, embed_size))
    whh0 = u(keys[1], (4 * H, H))
    bih0 = u(keys[2], (4 * H,))
    bhh0 = u(keys[3], (4 * H,))
    wih1 = u(keys[4], (4 * H, H))
    whh1 = u(keys[5], (4 * H, H))
    bih1 = u(keys[6], (4 * H,))
    bhh1 = u(keys[7], (4 * H,))
    w_fc = u(keys[8], (vocab_size, H))
    b_fc = u(keys[9], (vocab_size,))
    embedding = jax.random.normal(keys[10], (vocab_size, embed_size), jnp.float32)

    return {
        "embedding": embedding,
        "wih0_t": wih0.T, "whh0_t": whh0.T, "b0": (bih0 + bhh0).reshape(1, 4 * H),
        "wih1_t": wih1.T, "whh1_t": whh1.T, "b1": (bih1 + bhh1).reshape(1, 4 * H),
        "w_fc_t": w_fc.T, "b_fc": b_fc.reshape(1, vocab_size),
    }


if __name__ == "__main__":
    VOCAB = 128
    EMBED = 256
    HIDDEN = 128
    B, T = 2, 8

    key = jax.random.PRNGKey(0)
    k_param, k_ids = jax.random.split(key)
    params = init_params(k_param, VOCAB, EMBED, HIDDEN)
    x_ids = jax.random.randint(k_ids, (B, T), 0, VOCAB, dtype=jnp.int32)

    logits, (h_n, c_n) = lstm_text_generator_forward(x_ids, params,
                                                     hidden_size=HIDDEN)
    jax.block_until_ready((logits, h_n, c_n))

    assert logits.shape == (B, T, VOCAB)
    assert h_n.shape == (2, B, HIDDEN) and c_n.shape == (2, B, HIDDEN)
    assert bool(jnp.all(jnp.isfinite(logits)))

    # Compare against the float32 reference; the kernel uses bf16 MXU
    # operands and bf16 logits (f32 accumulation/state), so tolerances are
    # slightly looser.
    ref_logits, (ref_h, ref_c) = reference_forward(x_ids, params,
                                                   hidden_size=HIDDEN)
    np.testing.assert_allclose(np.asarray(logits), np.asarray(ref_logits),
                               atol=5e-2, rtol=5e-2)
    np.testing.assert_allclose(np.asarray(h_n), np.asarray(ref_h),
                               atol=5e-2, rtol=5e-2)
    np.testing.assert_allclose(np.asarray(c_n), np.asarray(ref_c),
                               atol=5e-2, rtol=5e-2)

    print("KERNEL_OK")
</pallas_src>

<mosaic_0001>
module attributes {stable_mosaic.version = 11 : i64} {
  func.func @lstm_fused_kernel(%arg0: i32, %arg1: i32, %arg2: memref<64x256xbf16, #tpu.memory_space<vmem>>, %arg3: memref<256x512xbf16, #tpu.memory_space<vmem>>, %arg4: memref<256x1024xbf16, #tpu.memory_space<vmem>>, %arg5: memref<1x512xf32, #tpu.memory_space<vmem>>, %arg6: memref<1x512xf32, #tpu.memory_space<vmem>>, %arg7: memref<128x128xbf16, #tpu.memory_space<vmem>>, %arg8: memref<1x128xf32, #tpu.memory_space<vmem>>, %arg9: memref<64x128xbf16, #tpu.memory_space<vmem>>, %arg10: memref<2x8x128xf32, #tpu.memory_space<vmem>>, %arg11: memref<2x8x128xf32, #tpu.memory_space<vmem>>, %arg12: memref<2x8x128xf32, #tpu.memory_space<vmem>>, %arg13: memref<8x256xbf16, #tpu.memory_space<vmem>>, %arg14: memref<8x512xf32, #tpu.memory_space<vmem>>, %arg15: memref<64x512xf32, #tpu.memory_space<vmem>>, %arg16: memref<64x128xbf16, #tpu.memory_space<vmem>>) attributes {dimension_semantics = [#tpu.dimension_semantics<arbitrary>, #tpu.dimension_semantics<arbitrary>], iteration_bounds = array<i64: 1, 1>, scalar_prefetch = 0 : i64, scratch_operands = 5 : i64, tpu.core_type = #tpu.core_type<tc>, window_params = [{transform_indices = @transform_0, window_bounds = array<i64: 64, 256>}, {pipeline_mode = #tpu.pipeline_mode<synchronous>, transform_indices = @transform_1, window_bounds = array<i64: 256, 512>}, {pipeline_mode = #tpu.pipeline_mode<synchronous>, transform_indices = @transform_2, window_bounds = array<i64: 256, 1024>}, {pipeline_mode = #tpu.pipeline_mode<synchronous>, transform_indices = @transform_3, window_bounds = array<i64: 1, 512>}, {pipeline_mode = #tpu.pipeline_mode<synchronous>, transform_indices = @transform_4, window_bounds = array<i64: 1, 512>}, {transform_indices = @transform_5, window_bounds = array<i64: 128, 128>}, {transform_indices = @transform_6, window_bounds = array<i64: 1, 128>}, {transform_indices = @transform_7, window_bounds = array<i64: 64, 128>}, {pipeline_mode = #tpu.pipeline_mode<synchronous>, transform_indices = @transform_8, window_bounds = array<i64: 2, 8, 128>}, {pipeline_mode = #tpu.pipeline_mode<synchronous>, transform_indices = @transform_9, window_bounds = array<i64: 2, 8, 128>}]} {
    %c0_i32 = arith.constant 0 : i32
    %0 = arith.cmpi eq, %arg0, %c0_i32 : i32
    %c0_i32_0 = arith.constant 0 : i32
    %1 = arith.cmpi eq, %arg1, %c0_i32_0 : i32
    %2 = arith.andi %0, %1 : i1
    %3 = arith.extui %2 : i1 to i32
    %c0_i32_1 = arith.constant 0 : i32
    %4 = arith.cmpi ne, %3, %c0_i32_1 : i32
    scf.if %4 {
      %cst_11 = arith.constant 0.000000e+00 : f32
      %16 = vector.broadcast %cst_11 : f32 to vector<2x8x128xf32>
      %c0_12 = arith.constant 0 : index
      %c0_13 = arith.constant 0 : index
      %c0_14 = arith.constant 0 : index
      %17 = vector.load %arg12[%c0_12, %c0_13, %c0_14] : memref<2x8x128xf32, #tpu.memory_space<vmem>>, vector<2x8x128xf32>
      tpu.vector_store %arg12[%c0_12, %c0_13, %c0_14], %16 {strides = array<i32>} : memref<2x8x128xf32, #tpu.memory_space<vmem>>, vector<2x8x128xf32>,
      %cst_15 = arith.constant 0.000000e+00 : bf16
      %18 = vector.broadcast %cst_15 : bf16 to vector<8x256xbf16>
      %c0_16 = arith.constant 0 : index
      %c0_17 = arith.constant 0 : index
      %19 = vector.load %arg13[%c0_16, %c0_17] : memref<8x256xbf16, #tpu.memory_space<vmem>>, vector<8x256xbf16>
      tpu.vector_store %arg13[%c0_16, %c0_17], %18 {strides = array<i32>} : memref<8x256xbf16, #tpu.memory_space<vmem>>, vector<8x256xbf16>,
      %cst_18 = arith.constant 0.000000e+00 : f32
      %20 = vector.broadcast %cst_18 : f32 to vector<8x512xf32>
      %c0_19 = arith.constant 0 : index
      %c0_20 = arith.constant 0 : index
      %21 = vector.load %arg14[%c0_19, %c0_20] : memref<8x512xf32, #tpu.memory_space<vmem>>, vector<8x512xf32>
      tpu.vector_store %arg14[%c0_19, %c0_20], %20 {strides = array<i32>} : memref<8x512xf32, #tpu.memory_space<vmem>>, vector<8x512xf32>,
    } else {
    }
    %c0_i32_2 = arith.constant 0 : i32
    %5 = arith.cmpi eq, %arg1, %c0_i32_2 : i32
    %6 = arith.extui %5 : i1 to i32
    %c0_i32_3 = arith.constant 0 : i32
    %7 = arith.cmpi ne, %6, %c0_i32_3 : i32
    scf.if %7 {
      %c0_11 = arith.constant 0 : index
      %c0_12 = arith.constant 0 : index
      %16 = vector.load %arg2[%c0_11, %c0_12] : memref<64x256xbf16, #tpu.memory_space<vmem>>, vector<64x256xbf16>
      %c0_13 = arith.constant 0 : index
      %c0_14 = arith.constant 0 : index
      %17 = vector.load %arg3[%c0_13, %c0_14] : memref<256x512xbf16, #tpu.memory_space<vmem>>, vector<256x512xbf16>
      %cst_15 = arith.constant dense<0.000000e+00> : vector<64x512xf32>
      %18 = tpu.matmul %16, %17, %cst_15 {dimension_numbers = #tpu.dot_dimension_numbers<[1], [0], [0], [1], [0, 0, 1, 1], [], []>} : vector<64x256xbf16>, vector<256x512xbf16>, vector<64x512xf32> -> vector<64x512xf32>
      %c0_16 = arith.constant 0 : index
      %c0_17 = arith.constant 0 : index
      %19 = vector.load %arg5[%c0_16, %c0_17] : memref<1x512xf32, #tpu.memory_space<vmem>>, vector<1x512xf32>
      %20 = vector.broadcast %19 : vector<1x512xf32> to vector<64x512xf32>
      %21 = arith.addf %18, %20 : vector<64x512xf32>
      %c0_18 = arith.constant 0 : index
      %c0_19 = arith.constant 0 : index
      %22 = vector.load %arg15[%c0_18, %c0_19] : memref<64x512xf32, #tpu.memory_space<vmem>>, vector<64x512xf32>
      tpu.vector_store %arg15[%c0_18, %c0_19], %21 {strides = array<i32>} : memref<64x512xf32, #tpu.memory_space<vmem>>, vector<64x512xf32>,
      %c0_20 = arith.constant 0 : index
      %c0_21 = arith.constant 0 : index
      %23 = vector.load %arg6[%c0_20, %c0_21] : memref<1x512xf32, #tpu.memory_space<vmem>>, vector<1x512xf32>
      %24 = vector.shape_cast %23 : vector<1x512xf32> to vector<1x512xf32>
      %25 = vector.broadcast %24 : vector<1x512xf32> to vector<8x512xf32>
      %c0_22 = arith.constant 0 : index
      %c0_23 = arith.constant 0 : index
      %c0_24 = arith.constant 0 : index
      %26 = vector.load %arg12[%c0_22, %c0_23, %c0_24] : memref<2x8x128xf32, #tpu.memory_space<vmem>>, vector<1x8x128xf32>
      %27 = vector.shape_cast %26 : vector<1x8x128xf32> to vector<8x128xf32>
      %c1 = arith.constant 1 : index
      %c0_25 = arith.constant 0 : index
      %c0_26 = arith.constant 0 : index
      %28 = vector.load %arg12[%c1, %c0_25, %c0_26] : memref<2x8x128xf32, #tpu.memory_space<vmem>>, vector<1x8x128xf32>
      %29 = vector.shape_cast %28 : vector<1x8x128xf32> to vector<8x128xf32>
      %c0_27 = arith.constant 0 : index
      %c0_28 = arith.constant 0 : index
      %30 = vector.load %arg14[%c0_27, %c0_28] : memref<8x512xf32, #tpu.memory_space<vmem>>, vector<8x512xf32>
      %c0_29 = arith.constant 0 : index
      %c0_30 = arith.constant 0 : index
      %31 = vector.load %arg15[%c0_29, %c0_30] : memref<64x512xf32, #tpu.memory_space<vmem>>, vector<8x512xf32>
      %32 = arith.addf %31, %30 : vector<8x512xf32>
      %33 = vector.extract_strided_slice %32 {offsets = [0, 0], sizes = [8, 128], strides = [1, 1]} : vector<8x512xf32> to vector<8x128xf32>
      %34 = arith.negf %33 : vector<8x128xf32>
      %35 = math.exp %34 : vector<8x128xf32>
      %cst_31 = arith.constant 1.000000e+00 : f32
      %36 = vector.broadcast %cst_31 : f32 to vector<8x128xf32>
      %37 = arith.addf %36, %35 : vector<8x128xf32>
      %38 = arith.divf %36, %37 : vector<8x128xf32>
      %39 = vector.extract_strided_slice %32 {offsets = [0, 128], sizes = [8, 128], strides = [1, 1]} : vector<8x512xf32> to vector<8x128xf32>
      %40 = arith.negf %39 : vector<8x128xf32>
      %41 = math.exp %40 : vector<8x128xf32>
      %cst_32 = arith.constant 1.000000e+00 : f32
      %42 = vector.broadcast %cst_32 : f32 to vector<8x128xf32>
      %43 = arith.addf %42, %41 : vector<8x128xf32>
      %44 = arith.divf %42, %43 : vector<8x128xf32>
      %45 = vector.extract_strided_slice %32 {offsets = [0, 256], sizes = [8, 128], strides = [1, 1]} : vector<8x512xf32> to vector<8x128xf32>
      %46 = math.tanh %45 : vector<8x128xf32>
      %47 = vector.extract_strided_slice %32 {offsets = [0, 384], sizes = [8, 128], strides = [1, 1]} : vector<8x512xf32> to vector<8x128xf32>
      %48 = arith.negf %47 : vector<8x128xf32>
      %49 = math.exp %48 : vector<8x128xf32>
      %cst_33 = arith.constant 1.000000e+00 : f32
      %50 = vector.broadcast %cst_33 : f32 to vector<8x128xf32>
      %51 = arith.addf %50, %49 : vector<8x128xf32>
      %52 = arith.divf %50, %51 : vector<8x128xf32>
      %53 = arith.mulf %44, %27 : vector<8x128xf32>
      %54 = arith.mulf %38, %46 : vector<8x128xf32>
      %55 = arith.addf %53, %54 : vector<8x128xf32>
      %56 = math.tanh %55 : vector<8x128xf32>
      %57 = arith.mulf %52, %56 : vector<8x128xf32>
      %58 = arith.truncf %57 : vector<8x128xf32> to vector<8x128xbf16>
      %c0_34 = arith.constant 0 : index
      %c0_35 = arith.constant 0 : index
      %59 = vector.load %arg13[%c0_34, %c0_35] : memref<8x256xbf16, #tpu.memory_space<vmem>>, vector<8x128xbf16>
      tpu.vector_store %arg13[%c0_34, %c0_35], %58 {strides = array<i32>} : memref<8x256xbf16, #tpu.memory_space<vmem>>, vector<8x128xbf16>,
      %c0_36 = arith.constant 0 : index
      %c0_37 = arith.constant 0 : index
      %60 = vector.load %arg13[%c0_36, %c0_37] : memref<8x256xbf16, #tpu.memory_space<vmem>>, vector<8x256xbf16>
      %c0_38 = arith.constant 0 : index
      %c0_39 = arith.constant 0 : index
      %61 = vector.load %arg4[%c0_38, %c0_39] : memref<256x1024xbf16, #tpu.memory_space<vmem>>, vector<256x1024xbf16>
      %cst_40 = arith.constant dense<0.000000e+00> : vector<8x1024xf32>
      %62 = tpu.matmul %60, %61, %cst_40 {dimension_numbers = #tpu.dot_dimension_numbers<[1], [0], [0], [1], [0, 0, 1, 1], [], []>} : vector<8x256xbf16>, vector<256x1024xbf16>, vector<8x1024xf32> -> vector<8x1024xf32>
      %63 = vector.extract_strided_slice %62 {offsets = [0, 512], sizes = [8, 512], strides = [1, 1]} : vector<8x1024xf32> to vector<8x512xf32>
      %64 = vector.extract_strided_slice %62 {offsets = [0, 0], sizes = [8, 512], strides = [1, 1]} : vector<8x1024xf32> to vector<8x512xf32>
      %65 = arith.addf %64, %25 : vector<8x512xf32>
      %66 = vector.extract_strided_slice %65 {offsets = [0, 0], sizes = [8, 128], strides = [1, 1]} : vector<8x512xf32> to vector<8x128xf32>
      %67 = arith.negf %66 : vector<8x128xf32>
      %68 = math.exp %67 : vector<8x128xf32>
      %cst_41 = arith.constant 1.000000e+00 : f32
      %69 = vector.broadcast %cst_41 : f32 to vector<8x128xf32>
      %70 = arith.addf %69, %68 : vector<8x128xf32>
      %71 = arith.divf %69, %70 : vector<8x128xf32>
      %72 = vector.extract_strided_slice %65 {offsets = [0, 128], sizes = [8, 128], strides = [1, 1]} : vector<8x512xf32> to vector<8x128xf32>
      %73 = arith.negf %72 : vector<8x128xf32>
      %74 = math.exp %73 : vector<8x128xf32>
      %cst_42 = arith.constant 1.000000e+00 : f32
      %75 = vector.broadcast %cst_42 : f32 to vector<8x128xf32>
      %76 = arith.addf %75, %74 : vector<8x128xf32>
      %77 = arith.divf %75, %76 : vector<8x128xf32>
      %78 = vector.extract_strided_slice %65 {offsets = [0, 256], sizes = [8, 128], strides = [1, 1]} : vector<8x512xf32> to vector<8x128xf32>
      %79 = math.tanh %78 : vector<8x128xf32>
      %80 = vector.extract_strided_slice %65 {offsets = [0, 384], sizes = [8, 128], strides = [1, 1]} : vector<8x512xf32> to vector<8x128xf32>
      %81 = arith.negf %80 : vector<8x128xf32>
      %82 = math.exp %81 : vector<8x128xf32>
      %cst_43 = arith.constant 1.000000e+00 : f32
      %83 = vector.broadcast %cst_43 : f32 to vector<8x128xf32>
      %84 = arith.addf %83, %82 : vector<8x128xf32>
      %85 = arith.divf %83, %84 : vector<8x128xf32>
      %86 = arith.mulf %77, %29 : vector<8x128xf32>
      %87 = arith.mulf %71, %79 : vector<8x128xf32>
      %88 = arith.addf %86, %87 : vector<8x128xf32>
      %89 = math.tanh %88 : vector<8x128xf32>
      %90 = arith.mulf %85, %89 : vector<8x128xf32>
      %91 = arith.truncf %90 : vector<8x128xf32> to vector<8x128xbf16>
      %c0_44 = arith.constant 0 : index
      %c128 = arith.constant 128 : index
      %92 = vector.load %arg13[%c0_44, %c128] : memref<8x256xbf16, #tpu.memory_space<vmem>>, vector<8x128xbf16>
      tpu.vector_store %arg13[%c0_44, %c128], %91 {strides = array<i32>} : memref<8x256xbf16, #tpu.memory_space<vmem>>, vector<8x128xbf16>,
      %c0_45 = arith.constant 0 : index
      %c0_46 = arith.constant 0 : index
      %93 = vector.load %arg16[%c0_45, %c0_46] : memref<64x128xbf16, #tpu.memory_space<vmem>>, vector<8x128xbf16>
      tpu.vector_store %arg16[%c0_45, %c0_46], %91 {strides = array<i32>} : memref<64x128xbf16, #tpu.memory_space<vmem>>, vector<8x128xbf16>,
      %c8 = arith.constant 8 : index
      %c0_47 = arith.constant 0 : index
      %94 = vector.load %arg15[%c8, %c0_47] : memref<64x512xf32, #tpu.memory_space<vmem>>, vector<8x512xf32>
      %95 = arith.addf %94, %63 : vector<8x512xf32>
      %96 = vector.extract_strided_slice %95 {offsets = [0, 0], sizes = [8, 128], strides = [1, 1]} : vector<8x512xf32> to vector<8x128xf32>
      %97 = arith.negf %96 : vector<8x128xf32>
      %98 = math.exp %97 : vector<8x128xf32>
      %cst_48 = arith.constant 1.000000e+00 : f32
      %99 = vector.broadcast %cst_48 : f32 to vector<8x128xf32>
      %100 = arith.addf %99, %98 : vector<8x128xf32>
      %101 = arith.divf %99, %100 : vector<8x128xf32>
      %102 = vector.extract_strided_slice %95 {offsets = [0, 128], sizes = [8, 128], strides = [1, 1]} : vector<8x512xf32> to vector<8x128xf32>
      %103 = arith.negf %102 : vector<8x128xf32>
      %104 = math.exp %103 : vector<8x128xf32>
      %cst_49 = arith.constant 1.000000e+00 : f32
      %105 = vector.broadcast %cst_49 : f32 to vector<8x128xf32>
      %106 = arith.addf %105, %104 : vector<8x128xf32>
      %107 = arith.divf %105, %106 : vector<8x128xf32>
      %108 = vector.extract_strided_slice %95 {offsets = [0, 256], sizes = [8, 128], strides = [1, 1]} : vector<8x512xf32> to vector<8x128xf32>
      %109 = math.tanh %108 : vector<8x128xf32>
      %110 = vector.extract_strided_slice %95 {offsets = [0, 384], sizes = [8, 128], strides = [1, 1]} : vector<8x512xf32> to vector<8x128xf32>
      %111 = arith.negf %110 : vector<8x128xf32>
      %112 = math.exp %111 : vector<8x128xf32>
      %cst_50 = arith.constant 1.000000e+00 : f32
      %113 = vector.broadcast %cst_50 : f32 to vector<8x128xf32>
      %114 = arith.addf %113, %112 : vector<8x128xf32>
      %115 = arith.divf %113, %114 : vector<8x128xf32>
      %116 = arith.mulf %107, %55 : vector<8x128xf32>
      %117 = arith.mulf %101, %109 : vector<8x128xf32>
      %118 = arith.addf %116, %117 : vector<8x128xf32>
      %119 = math.tanh %118 : vector<8x128xf32>
      %120 = arith.mulf %115, %119 : vector<8x128xf32>
      %121 = arith.truncf %120 : vector<8x128xf32> to vector<8x128xbf16>
      %c0_51 = arith.constant 0 : index
      %c0_52 = arith.constant 0 : index
      %122 = vector.load %arg13[%c0_51, %c0_52] : memref<8x256xbf16, #tpu.memory_space<vmem>>, vector<8x128xbf16>
      tpu.vector_store %arg13[%c0_51, %c0_52], %121 {strides = array<i32>} : memref<8x256xbf16, #tpu.memory_space<vmem>>, vector<8x128xbf16>,
      %c0_53 = arith.constant 0 : index
      %c0_54 = arith.constant 0 : index
      %123 = vector.load %arg13[%c0_53, %c0_54] : memref<8x256xbf16, #tpu.memory_space<vmem>>, vector<8x256xbf16>
      %c0_55 = arith.constant 0 : index
      %c0_56 = arith.constant 0 : index
      %124 = vector.load %arg4[%c0_55, %c0_56] : memref<256x1024xbf16, #tpu.memory_space<vmem>>, vector<256x1024xbf16>
      %cst_57 = arith.constant dense<0.000000e+00> : vector<8x1024xf32>
      %125 = tpu.matmul %123, %124, %cst_57 {dimension_numbers = #tpu.dot_dimension_numbers<[1], [0], [0], [1], [0, 0, 1, 1], [], []>} : vector<8x256xbf16>, vector<256x1024xbf16>, vector<8x1024xf32> -> vector<8x1024xf32>
      %126 = vector.extract_strided_slice %125 {offsets = [0, 512], sizes = [8, 512], strides = [1, 1]} : vector<8x1024xf32> to vector<8x512xf32>
      %127 = vector.extract_strided_slice %125 {offsets = [0, 0], sizes = [8, 512], strides = [1, 1]} : vector<8x1024xf32> to vector<8x512xf32>
      %128 = arith.addf %127, %25 : vector<8x512xf32>
      %129 = vector.extract_strided_slice %128 {offsets = [0, 0], sizes = [8, 128], strides = [1, 1]} : vector<8x512xf32> to vector<8x128xf32>
      %130 = arith.negf %129 : vector<8x128xf32>
      %131 = math.exp %130 : vector<8x128xf32>
      %cst_58 = arith.constant 1.000000e+00 : f32
      %132 = vector.broadcast %cst_58 : f32 to vector<8x128xf32>
      %133 = arith.addf %132, %131 : vector<8x128xf32>
      %134 = arith.divf %132, %133 : vector<8x128xf32>
      %135 = vector.extract_strided_slice %128 {offsets = [0, 128], sizes = [8, 128], strides = [1, 1]} : vector<8x512xf32> to vector<8x128xf32>
      %136 = arith.negf %135 : vector<8x128xf32>
      %137 = math.exp %136 : vector<8x128xf32>
      %cst_59 = arith.constant 1.000000e+00 : f32
      %138 = vector.broadcast %cst_59 : f32 to vector<8x128xf32>
      %139 = arith.addf %138, %137 : vector<8x128xf32>
      %140 = arith.divf %138, %139 : vector<8x128xf32>
      %141 = vector.extract_strided_slice %128 {offsets = [0, 256], sizes = [8, 128], strides = [1, 1]} : vector<8x512xf32> to vector<8x128xf32>
      %142 = math.tanh %141 : vector<8x128xf32>
      %143 = vector.extract_strided_slice %128 {offsets = [0, 384], sizes = [8, 128], strides = [1, 1]} : vector<8x512xf32> to vector<8x128xf32>
      %144 = arith.negf %143 : vector<8x128xf32>
      %145 = math.exp %144 : vector<8x128xf32>
      %cst_60 = arith.constant 1.000000e+00 : f32
      %146 = vector.broadcast %cst_60 : f32 to vector<8x128xf32>
      %147 = arith.addf %146, %145 : vector<8x128xf32>
      %148 = arith.divf %146, %147 : vector<8x128xf32>
      %149 = arith.mulf %140, %88 : vector<8x128xf32>
      %150 = arith.mulf %134, %142 : vector<8x128xf32>
      %151 = arith.addf %149, %150 : vector<8x128xf32>
      %152 = math.tanh %151 : vector<8x128xf32>
      %153 = arith.mulf %148, %152 : vector<8x128xf32>
      %154 = arith.truncf %153 : vector<8x128xf32> to vector<8x128xbf16>
      %c0_61 = arith.constant 0 : index
      %c128_62 = arith.constant 128 : index
      %155 = vector.load %arg13[%c0_61, %c128_62] : memref<8x256xbf16, #tpu.memory_space<vmem>>, vector<8x128xbf16>
      tpu.vector_store %arg13[%c0_61, %c128_62], %154 {strides = array<i32>} : memref<8x256xbf16, #tpu.memory_space<vmem>>, vector<8x128xbf16>,
      %c8_63 = arith.constant 8 : index
      %c0_64 = arith.constant 0 : index
      %156 = vector.load %arg16[%c8_63, %c0_64] : memref<64x128xbf16, #tpu.memory_space<vmem>>, vector<8x128xbf16>
      tpu.vector_store %arg16[%c8_63, %c0_64], %154 {strides = array<i32>} : memref<64x128xbf16, #tpu.memory_space<vmem>>, vector<8x128xbf16>,
      %c16 = arith.constant 16 : index
      %c0_65 = arith.constant 0 : index
      %157 = vector.load %arg15[%c16, %c0_65] : memref<64x512xf32, #tpu.memory_space<vmem>>, vector<8x512xf32>
      %158 = arith.addf %157, %126 : vector<8x512xf32>
      %159 = vector.extract_strided_slice %158 {offsets = [0, 0], sizes = [8, 128], strides = [1, 1]} : vector<8x512xf32> to vector<8x128xf32>
      %160 = arith.negf %159 : vector<8x128xf32>
      %161 = math.exp %160 : vector<8x128xf32>
      %cst_66 = arith.constant 1.000000e+00 : f32
      %162 = vector.broadcast %cst_66 : f32 to vector<8x128xf32>
      %163 = arith.addf %162, %161 : vector<8x128xf32>
      %164 = arith.divf %162, %163 : vector<8x128xf32>
      %165 = vector.extract_strided_slice %158 {offsets = [0, 128], sizes = [8, 128], strides = [1, 1]} : vector<8x512xf32> to vector<8x128xf32>
      %166 = arith.negf %165 : vector<8x128xf32>
      %167 = math.exp %166 : vector<8x128xf32>
      %cst_67 = arith.constant 1.000000e+00 : f32
      %168 = vector.broadcast %cst_67 : f32 to vector<8x128xf32>
      %169 = arith.addf %168, %167 : vector<8x128xf32>
      %170 = arith.divf %168, %169 : vector<8x128xf32>
      %171 = vector.extract_strided_slice %158 {offsets = [0, 256], sizes = [8, 128], strides = [1, 1]} : vector<8x512xf32> to vector<8x128xf32>
      %172 = math.tanh %171 : vector<8x128xf32>
      %173 = vector.extract_strided_slice %158 {offsets = [0, 384], sizes = [8, 128], strides = [1, 1]} : vector<8x512xf32> to vector<8x128xf32>
      %174 = arith.negf %173 : vector<8x128xf32>
      %175 = math.exp %174 : vector<8x128xf32>
      %cst_68 = arith.constant 1.000000e+00 : f32
      %176 = vector.broadcast %cst_68 : f32 to vector<8x128xf32>
      %177 = arith.addf %176, %175 : vector<8x128xf32>
      %178 = arith.divf %176, %177 : vector<8x128xf32>
      %179 = arith.mulf %170, %118 : vector<8x128xf32>
      %180 = arith.mulf %164, %172 : vector<8x128xf32>
      %181 = arith.addf %179, %180 : vector<8x128xf32>
      %182 = math.tanh %181 : vector<8x128xf32>
      %183 = arith.mulf %178, %182 : vector<8x128xf32>
      %184 = arith.truncf %183 : vector<8x128xf32> to vector<8x128xbf16>
      %c0_69 = arith.constant 0 : index
      %c0_70 = arith.constant 0 : index
      %185 = vector.load %arg13[%c0_69, %c0_70] : memref<8x256xbf16, #tpu.memory_space<vmem>>, vector<8x128xbf16>
      tpu.vector_store %arg13[%c0_69, %c0_70], %184 {strides = array<i32>} : memref<8x256xbf16, #tpu.memory_space<vmem>>, vector<8x128xbf16>,
      %c0_71 = arith.constant 0 : index
      %c0_72 = arith.constant 0 : index
      %186 = vector.load %arg13[%c0_71, %c0_72] : memref<8x256xbf16, #tpu.memory_space<vmem>>, vector<8x256xbf16>
      %c0_73 = arith.constant 0 : index
      %c0_74 = arith.constant 0 : index
      %187 = vector.load %arg4[%c0_73, %c0_74] : memref<256x1024xbf16, #tpu.memory_space<vmem>>, vector<256x1024xbf16>
      %cst_75 = arith.constant dense<0.000000e+00> : vector<8x1024xf32>
      %188 = tpu.matmul %186, %187, %cst_75 {dimension_numbers = #tpu.dot_dimension_numbers<[1], [0], [0], [1], [0, 0, 1, 1], [], []>} : vector<8x256xbf16>, vector<256x1024xbf16>, vector<8x1024xf32> -> vector<8x1024xf32>
      %189 = vector.extract_strided_slice %188 {offsets = [0, 512], sizes = [8, 512], strides = [1, 1]} : vector<8x1024xf32> to vector<8x512xf32>
      %190 = vector.extract_strided_slice %188 {offsets = [0, 0], sizes = [8, 512], strides = [1, 1]} : vector<8x1024xf32> to vector<8x512xf32>
      %191 = arith.addf %190, %25 : vector<8x512xf32>
      %192 = vector.extract_strided_slice %191 {offsets = [0, 0], sizes = [8, 128], strides = [1, 1]} : vector<8x512xf32> to vector<8x128xf32>
      %193 = arith.negf %192 : vector<8x128xf32>
      %194 = math.exp %193 : vector<8x128xf32>
      %cst_76 = arith.constant 1.000000e+00 : f32
      %195 = vector.broadcast %cst_76 : f32 to vector<8x128xf32>
      %196 = arith.addf %195, %194 : vector<8x128xf32>
      %197 = arith.divf %195, %196 : vector<8x128xf32>
      %198 = vector.extract_strided_slice %191 {offsets = [0, 128], sizes = [8, 128], strides = [1, 1]} : vector<8x512xf32> to vector<8x128xf32>
      %199 = arith.negf %198 : vector<8x128xf32>
      %200 = math.exp %199 : vector<8x128xf32>
      %cst_77 = arith.constant 1.000000e+00 : f32
      %201 = vector.broadcast %cst_77 : f32 to vector<8x128xf32>
      %202 = arith.addf %201, %200 : vector<8x128xf32>
      %203 = arith.divf %201, %202 : vector<8x128xf32>
      %204 = vector.extract_strided_slice %191 {offsets = [0, 256], sizes = [8, 128], strides = [1, 1]} : vector<8x512xf32> to vector<8x128xf32>
      %205 = math.tanh %204 : vector<8x128xf32>
      %206 = vector.extract_strided_slice %191 {offsets = [0, 384], sizes = [8, 128], strides = [1, 1]} : vector<8x512xf32> to vector<8x128xf32>
      %207 = arith.negf %206 : vector<8x128xf32>
      %208 = math.exp %207 : vector<8x128xf32>
      %cst_78 = arith.constant 1.000000e+00 : f32
      %209 = vector.broadcast %cst_78 : f32 to vector<8x128xf32>
      %210 = arith.addf %209, %208 : vector<8x128xf32>
      %211 = arith.divf %209, %210 : vector<8x128xf32>
      %212 = arith.mulf %203, %151 : vector<8x128xf32>
      %213 = arith.mulf %197, %205 : vector<8x128xf32>
      %214 = arith.addf %212, %213 : vector<8x128xf32>
      %215 = math.tanh %214 : vector<8x128xf32>
      %216 = arith.mulf %211, %215 : vector<8x128xf32>
      %217 = arith.truncf %216 : vector<8x128xf32> to vector<8x128xbf16>
      %c0_79 = arith.constant 0 : index
      %c128_80 = arith.constant 128 : index
      %218 = vector.load %arg13[%c0_79, %c128_80] : memref<8x256xbf16, #tpu.memory_space<vmem>>, vector<8x128xbf16>
      tpu.vector_store %arg13[%c0_79, %c128_80], %217 {strides = array<i32>} : memref<8x256xbf16, #tpu.memory_space<vmem>>, vector<8x128xbf16>,
      %c16_81 = arith.constant 16 : index
      %c0_82 = arith.constant 0 : index
      %219 = vector.load %arg16[%c16_81, %c0_82] : memref<64x128xbf16, #tpu.memory_space<vmem>>, vector<8x128xbf16>
      tpu.vector_store %arg16[%c16_81, %c0_82], %217 {strides = array<i32>} : memref<64x128xbf16, #tpu.memory_space<vmem>>, vector<8x128xbf16>,
      %c24 = arith.constant 24 : index
      %c0_83 = arith.constant 0 : index
      %220 = vector.load %arg15[%c24, %c0_83] : memref<64x512xf32, #tpu.memory_space<vmem>>, vector<8x512xf32>
      %221 = arith.addf %220, %189 : vector<8x512xf32>
      %222 = vector.extract_strided_slice %221 {offsets = [0, 0], sizes = [8, 128], strides = [1, 1]} : vector<8x512xf32> to vector<8x128xf32>
      %223 = arith.negf %222 : vector<8x128xf32>
      %224 = math.exp %223 : vector<8x128xf32>
      %cst_84 = arith.constant 1.000000e+00 : f32
      %225 = vector.broadcast %cst_84 : f32 to vector<8x128xf32>
      %226 = arith.addf %225, %224 : vector<8x128xf32>
      %227 = arith.divf %225, %226 : vector<8x128xf32>
      %228 = vector.extract_strided_slice %221 {offsets = [0, 128], sizes = [8, 128], strides = [1, 1]} : vector<8x512xf32> to vector<8x128xf32>
      %229 = arith.negf %228 : vector<8x128xf32>
      %230 = math.exp %229 : vector<8x128xf32>
      %cst_85 = arith.constant 1.000000e+00 : f32
      %231 = vector.broadcast %cst_85 : f32 to vector<8x128xf32>
      %232 = arith.addf %231, %230 : vector<8x128xf32>
      %233 = arith.divf %231, %232 : vector<8x128xf32>
      %234 = vector.extract_strided_slice %221 {offsets = [0, 256], sizes = [8, 128], strides = [1, 1]} : vector<8x512xf32> to vector<8x128xf32>
      %235 = math.tanh %234 : vector<8x128xf32>
      %236 = vector.extract_strided_slice %221 {offsets = [0, 384], sizes = [8, 128], strides = [1, 1]} : vector<8x512xf32> to vector<8x128xf32>
      %237 = arith.negf %236 : vector<8x128xf32>
      %238 = math.exp %237 : vector<8x128xf32>
      %cst_86 = arith.constant 1.000000e+00 : f32
      %239 = vector.broadcast %cst_86 : f32 to vector<8x128xf32>
      %240 = arith.addf %239, %238 : vector<8x128xf32>
      %241 = arith.divf %239, %240 : vector<8x128xf32>
      %242 = arith.mulf %233, %181 : vector<8x128xf32>
      %243 = arith.mulf %227, %235 : vector<8x128xf32>
      %244 = arith.addf %242, %243 : vector<8x128xf32>
      %245 = math.tanh %244 : vector<8x128xf32>
      %246 = arith.mulf %241, %245 : vector<8x128xf32>
      %247 = arith.truncf %246 : vector<8x128xf32> to vector<8x128xbf16>
      %c0_87 = arith.constant 0 : index
      %c0_88 = arith.constant 0 : index
      %248 = vector.load %arg13[%c0_87, %c0_88] : memref<8x256xbf16, #tpu.memory_space<vmem>>, vector<8x128xbf16>
      tpu.vector_store %arg13[%c0_87, %c0_88], %247 {strides = array<i32>} : memref<8x256xbf16, #tpu.memory_space<vmem>>, vector<8x128xbf16>,
      %c0_89 = arith.constant 0 : index
      %c0_90 = arith.constant 0 : index
      %249 = vector.load %arg13[%c0_89, %c0_90] : memref<8x256xbf16, #tpu.memory_space<vmem>>, vector<8x256xbf16>
      %c0_91 = arith.constant 0 : index
      %c0_92 = arith.constant 0 : index
      %250 = vector.load %arg4[%c0_91, %c0_92] : memref<256x1024xbf16, #tpu.memory_space<vmem>>, vector<256x1024xbf16>
      %cst_93 = arith.constant dense<0.000000e+00> : vector<8x1024xf32>
      %251 = tpu.matmul %249, %250, %cst_93 {dimension_numbers = #tpu.dot_dimension_numbers<[1], [0], [0], [1], [0, 0, 1, 1], [], []>} : vector<8x256xbf16>, vector<256x1024xbf16>, vector<8x1024xf32> -> vector<8x1024xf32>
      %252 = vector.extract_strided_slice %251 {offsets = [0, 512], sizes = [8, 512], strides = [1, 1]} : vector<8x1024xf32> to vector<8x512xf32>
      %253 = vector.extract_strided_slice %251 {offsets = [0, 0], sizes = [8, 512], strides = [1, 1]} : vector<8x1024xf32> to vector<8x512xf32>
      %254 = arith.addf %253, %25 : vector<8x512xf32>
      %255 = vector.extract_strided_slice %254 {offsets = [0, 0], sizes = [8, 128], strides = [1, 1]} : vector<8x512xf32> to vector<8x128xf32>
      %256 = arith.negf %255 : vector<8x128xf32>
      %257 = math.exp %256 : vector<8x128xf32>
      %cst_94 = arith.constant 1.000000e+00 : f32
      %258 = vector.broadcast %cst_94 : f32 to vector<8x128xf32>
      %259 = arith.addf %258, %257 : vector<8x128xf32>
      %260 = arith.divf %258, %259 : vector<8x128xf32>
      %261 = vector.extract_strided_slice %254 {offsets = [0, 128], sizes = [8, 128], strides = [1, 1]} : vector<8x512xf32> to vector<8x128xf32>
      %262 = arith.negf %261 : vector<8x128xf32>
      %263 = math.exp %262 : vector<8x128xf32>
      %cst_95 = arith.constant 1.000000e+00 : f32
      %264 = vector.broadcast %cst_95 : f32 to vector<8x128xf32>
      %265 = arith.addf %264, %263 : vector<8x128xf32>
      %266 = arith.divf %264, %265 : vector<8x128xf32>
      %267 = vector.extract_strided_slice %254 {offsets = [0, 256], sizes = [8, 128], strides = [1, 1]} : vector<8x512xf32> to vector<8x128xf32>
      %268 = math.tanh %267 : vector<8x128xf32>
      %269 = vector.extract_strided_slice %254 {offsets = [0, 384], sizes = [8, 128], strides = [1, 1]} : vector<8x512xf32> to vector<8x128xf32>
      %270 = arith.negf %269 : vector<8x128xf32>
      %271 = math.exp %270 : vector<8x128xf32>
      %cst_96 = arith.constant 1.000000e+00 : f32
      %272 = vector.broadcast %cst_96 : f32 to vector<8x128xf32>
      %273 = arith.addf %272, %271 : vector<8x128xf32>
      %274 = arith.divf %272, %273 : vector<8x128xf32>
      %275 = arith.mulf %266, %214 : vector<8x128xf32>
      %276 = arith.mulf %260, %268 : vector<8x128xf32>
      %277 = arith.addf %275, %276 : vector<8x128xf32>
      %278 = math.tanh %277 : vector<8x128xf32>
      %279 = arith.mulf %274, %278 : vector<8x128xf32>
      %280 = arith.truncf %279 : vector<8x128xf32> to vector<8x128xbf16>
      %c0_97 = arith.constant 0 : index
      %c128_98 = arith.constant 128 : index
      %281 = vector.load %arg13[%c0_97, %c128_98] : memref<8x256xbf16, #tpu.memory_space<vmem>>, vector<8x128xbf16>
      tpu.vector_store %arg13[%c0_97, %c128_98], %280 {strides = array<i32>} : memref<8x256xbf16, #tpu.memory_space<vmem>>, vector<8x128xbf16>,
      %c24_99 = arith.constant 24 : index
      %c0_100 = arith.constant 0 : index
      %282 = vector.load %arg16[%c24_99, %c0_100] : memref<64x128xbf16, #tpu.memory_space<vmem>>, vector<8x128xbf16>
      tpu.vector_store %arg16[%c24_99, %c0_100], %280 {strides = array<i32>} : memref<64x128xbf16, #tpu.memory_space<vmem>>, vector<8x128xbf16>,
      %c32 = arith.constant 32 : index
      %c0_101 = arith.constant 0 : index
      %283 = vector.load %arg15[%c32, %c0_101] : memref<64x512xf32, #tpu.memory_space<vmem>>, vector<8x512xf32>
      %284 = arith.addf %283, %252 : vector<8x512xf32>
      %285 = vector.extract_strided_slice %284 {offsets = [0, 0], sizes = [8, 128], strides = [1, 1]} : vector<8x512xf32> to vector<8x128xf32>
      %286 = arith.negf %285 : vector<8x128xf32>
      %287 = math.exp %286 : vector<8x128xf32>
      %cst_102 = arith.constant 1.000000e+00 : f32
      %288 = vector.broadcast %cst_102 : f32 to vector<8x128xf32>
      %289 = arith.addf %288, %287 : vector<8x128xf32>
      %290 = arith.divf %288, %289 : vector<8x128xf32>
      %291 = vector.extract_strided_slice %284 {offsets = [0, 128], sizes = [8, 128], strides = [1, 1]} : vector<8x512xf32> to vector<8x128xf32>
      %292 = arith.negf %291 : vector<8x128xf32>
      %293 = math.exp %292 : vector<8x128xf32>
      %cst_103 = arith.constant 1.000000e+00 : f32
      %294 = vector.broadcast %cst_103 : f32 to vector<8x128xf32>
      %295 = arith.addf %294, %293 : vector<8x128xf32>
      %296 = arith.divf %294, %295 : vector<8x128xf32>
      %297 = vector.extract_strided_slice %284 {offsets = [0, 256], sizes = [8, 128], strides = [1, 1]} : vector<8x512xf32> to vector<8x128xf32>
      %298 = math.tanh %297 : vector<8x128xf32>
      %299 = vector.extract_strided_slice %284 {offsets = [0, 384], sizes = [8, 128], strides = [1, 1]} : vector<8x512xf32> to vector<8x128xf32>
      %300 = arith.negf %299 : vector<8x128xf32>
      %301 = math.exp %300 : vector<8x128xf32>
      %cst_104 = arith.constant 1.000000e+00 : f32
      %302 = vector.broadcast %cst_104 : f32 to vector<8x128xf32>
      %303 = arith.addf %302, %301 : vector<8x128xf32>
      %304 = arith.divf %302, %303 : vector<8x128xf32>
      %305 = arith.mulf %296, %244 : vector<8x128xf32>
      %306 = arith.mulf %290, %298 : vector<8x128xf32>
      %307 = arith.addf %305, %306 : vector<8x128xf32>
      %308 = math.tanh %307 : vector<8x128xf32>
      %309 = arith.mulf %304, %308 : vector<8x128xf32>
      %310 = arith.truncf %309 : vector<8x128xf32> to vector<8x128xbf16>
      %c0_105 = arith.constant 0 : index
      %c0_106 = arith.constant 0 : index
      %311 = vector.load %arg13[%c0_105, %c0_106] : memref<8x256xbf16, #tpu.memory_space<vmem>>, vector<8x128xbf16>
      tpu.vector_store %arg13[%c0_105, %c0_106], %310 {strides = array<i32>} : memref<8x256xbf16, #tpu.memory_space<vmem>>, vector<8x128xbf16>,
      %c0_107 = arith.constant 0 : index
      %c0_108 = arith.constant 0 : index
      %312 = vector.load %arg13[%c0_107, %c0_108] : memref<8x256xbf16, #tpu.memory_space<vmem>>, vector<8x256xbf16>
      %c0_109 = arith.constant 0 : index
      %c0_110 = arith.constant 0 : index
      %313 = vector.load %arg4[%c0_109, %c0_110] : memref<256x1024xbf16, #tpu.memory_space<vmem>>, vector<256x1024xbf16>
      %cst_111 = arith.constant dense<0.000000e+00> : vector<8x1024xf32>
      %314 = tpu.matmul %312, %313, %cst_111 {dimension_numbers = #tpu.dot_dimension_numbers<[1], [0], [0], [1], [0, 0, 1, 1], [], []>} : vector<8x256xbf16>, vector<256x1024xbf16>, vector<8x1024xf32> -> vector<8x1024xf32>
      %315 = vector.extract_strided_slice %314 {offsets = [0, 512], sizes = [8, 512], strides = [1, 1]} : vector<8x1024xf32> to vector<8x512xf32>
      %316 = vector.extract_strided_slice %314 {offsets = [0, 0], sizes = [8, 512], strides = [1, 1]} : vector<8x1024xf32> to vector<8x512xf32>
      %317 = arith.addf %316, %25 : vector<8x512xf32>
      %318 = vector.extract_strided_slice %317 {offsets = [0, 0], sizes = [8, 128], strides = [1, 1]} : vector<8x512xf32> to vector<8x128xf32>
      %319 = arith.negf %318 : vector<8x128xf32>
      %320 = math.exp %319 : vector<8x128xf32>
      %cst_112 = arith.constant 1.000000e+00 : f32
      %321 = vector.broadcast %cst_112 : f32 to vector<8x128xf32>
      %322 = arith.addf %321, %320 : vector<8x128xf32>
      %323 = arith.divf %321, %322 : vector<8x128xf32>
      %324 = vector.extract_strided_slice %317 {offsets = [0, 128], sizes = [8, 128], strides = [1, 1]} : vector<8x512xf32> to vector<8x128xf32>
      %325 = arith.negf %324 : vector<8x128xf32>
      %326 = math.exp %325 : vector<8x128xf32>
      %cst_113 = arith.constant 1.000000e+00 : f32
      %327 = vector.broadcast %cst_113 : f32 to vector<8x128xf32>
      %328 = arith.addf %327, %326 : vector<8x128xf32>
      %329 = arith.divf %327, %328 : vector<8x128xf32>
      %330 = vector.extract_strided_slice %317 {offsets = [0, 256], sizes = [8, 128], strides = [1, 1]} : vector<8x512xf32> to vector<8x128xf32>
      %331 = math.tanh %330 : vector<8x128xf32>
      %332 = vector.extract_strided_slice %317 {offsets = [0, 384], sizes = [8, 128], strides = [1, 1]} : vector<8x512xf32> to vector<8x128xf32>
      %333 = arith.negf %332 : vector<8x128xf32>
      %334 = math.exp %333 : vector<8x128xf32>
      %cst_114 = arith.constant 1.000000e+00 : f32
      %335 = vector.broadcast %cst_114 : f32 to vector<8x128xf32>
      %336 = arith.addf %335, %334 : vector<8x128xf32>
      %337 = arith.divf %335, %336 : vector<8x128xf32>
      %338 = arith.mulf %329, %277 : vector<8x128xf32>
      %339 = arith.mulf %323, %331 : vector<8x128xf32>
      %340 = arith.addf %338, %339 : vector<8x128xf32>
      %341 = math.tanh %340 : vector<8x128xf32>
      %342 = arith.mulf %337, %341 : vector<8x128xf32>
      %343 = arith.truncf %342 : vector<8x128xf32> to vector<8x128xbf16>
      %c0_115 = arith.constant 0 : index
      %c128_116 = arith.constant 128 : index
      %344 = vector.load %arg13[%c0_115, %c128_116] : memref<8x256xbf16, #tpu.memory_space<vmem>>, vector<8x128xbf16>
      tpu.vector_store %arg13[%c0_115, %c128_116], %343 {strides = array<i32>} : memref<8x256xbf16, #tpu.memory_space<vmem>>, vector<8x128xbf16>,
      %c32_117 = arith.constant 32 : index
      %c0_118 = arith.constant 0 : index
      %345 = vector.load %arg16[%c32_117, %c0_118] : memref<64x128xbf16, #tpu.memory_space<vmem>>, vector<8x128xbf16>
      tpu.vector_store %arg16[%c32_117, %c0_118], %343 {strides = array<i32>} : memref<64x128xbf16, #tpu.memory_space<vmem>>, vector<8x128xbf16>,
      %c40 = arith.constant 40 : index
      %c0_119 = arith.constant 0 : index
      %346 = vector.load %arg15[%c40, %c0_119] : memref<64x512xf32, #tpu.memory_space<vmem>>, vector<8x512xf32>
      %347 = arith.addf %346, %315 : vector<8x512xf32>
      %348 = vector.extract_strided_slice %347 {offsets = [0, 0], sizes = [8, 128], strides = [1, 1]} : vector<8x512xf32> to vector<8x128xf32>
      %349 = arith.negf %348 : vector<8x128xf32>
      %350 = math.exp %349 : vector<8x128xf32>
      %cst_120 = arith.constant 1.000000e+00 : f32
      %351 = vector.broadcast %cst_120 : f32 to vector<8x128xf32>
      %352 = arith.addf %351, %350 : vector<8x128xf32>
      %353 = arith.divf %351, %352 : vector<8x128xf32>
      %354 = vector.extract_strided_slice %347 {offsets = [0, 128], sizes = [8, 128], strides = [1, 1]} : vector<8x512xf32> to vector<8x128xf32>
      %355 = arith.negf %354 : vector<8x128xf32>
      %356 = math.exp %355 : vector<8x128xf32>
      %cst_121 = arith.constant 1.000000e+00 : f32
      %357 = vector.broadcast %cst_121 : f32 to vector<8x128xf32>
      %358 = arith.addf %357, %356 : vector<8x128xf32>
      %359 = arith.divf %357, %358 : vector<8x128xf32>
      %360 = vector.extract_strided_slice %347 {offsets = [0, 256], sizes = [8, 128], strides = [1, 1]} : vector<8x512xf32> to vector<8x128xf32>
      %361 = math.tanh %360 : vector<8x128xf32>
      %362 = vector.extract_strided_slice %347 {offsets = [0, 384], sizes = [8, 128], strides = [1, 1]} : vector<8x512xf32> to vector<8x128xf32>
      %363 = arith.negf %362 : vector<8x128xf32>
      %364 = math.exp %363 : vector<8x128xf32>
      %cst_122 = arith.constant 1.000000e+00 : f32
      %365 = vector.broadcast %cst_122 : f32 to vector<8x128xf32>
      %366 = arith.addf %365, %364 : vector<8x128xf32>
      %367 = arith.divf %365, %366 : vector<8x128xf32>
      %368 = arith.mulf %359, %307 : vector<8x128xf32>
      %369 = arith.mulf %353, %361 : vector<8x128xf32>
      %370 = arith.addf %368, %369 : vector<8x128xf32>
      %371 = math.tanh %370 : vector<8x128xf32>
      %372 = arith.mulf %367, %371 : vector<8x128xf32>
      %373 = arith.truncf %372 : vector<8x128xf32> to vector<8x128xbf16>
      %c0_123 = arith.constant 0 : index
      %c0_124 = arith.constant 0 : index
      %374 = vector.load %arg13[%c0_123, %c0_124] : memref<8x256xbf16, #tpu.memory_space<vmem>>, vector<8x128xbf16>
      tpu.vector_store %arg13[%c0_123, %c0_124], %373 {strides = array<i32>} : memref<8x256xbf16, #tpu.memory_space<vmem>>, vector<8x128xbf16>,
      %c0_125 = arith.constant 0 : index
      %c0_126 = arith.constant 0 : index
      %375 = vector.load %arg13[%c0_125, %c0_126] : memref<8x256xbf16, #tpu.memory_space<vmem>>, vector<8x256xbf16>
      %c0_127 = arith.constant 0 : index
      %c0_128 = arith.constant 0 : index
      %376 = vector.load %arg4[%c0_127, %c0_128] : memref<256x1024xbf16, #tpu.memory_space<vmem>>, vector<256x1024xbf16>
      %cst_129 = arith.constant dense<0.000000e+00> : vector<8x1024xf32>
      %377 = tpu.matmul %375, %376, %cst_129 {dimension_numbers = #tpu.dot_dimension_numbers<[1], [0], [0], [1], [0, 0, 1, 1], [], []>} : vector<8x256xbf16>, vector<256x1024xbf16>, vector<8x1024xf32> -> vector<8x1024xf32>
      %378 = vector.extract_strided_slice %377 {offsets = [0, 512], sizes = [8, 512], strides = [1, 1]} : vector<8x1024xf32> to vector<8x512xf32>
      %379 = vector.extract_strided_slice %377 {offsets = [0, 0], sizes = [8, 512], strides = [1, 1]} : vector<8x1024xf32> to vector<8x512xf32>
      %380 = arith.addf %379, %25 : vector<8x512xf32>
      %381 = vector.extract_strided_slice %380 {offsets = [0, 0], sizes = [8, 128], strides = [1, 1]} : vector<8x512xf32> to vector<8x128xf32>
      %382 = arith.negf %381 : vector<8x128xf32>
      %383 = math.exp %382 : vector<8x128xf32>
      %cst_130 = arith.constant 1.000000e+00 : f32
      %384 = vector.broadcast %cst_130 : f32 to vector<8x128xf32>
      %385 = arith.addf %384, %383 : vector<8x128xf32>
      %386 = arith.divf %384, %385 : vector<8x128xf32>
      %387 = vector.extract_strided_slice %380 {offsets = [0, 128], sizes = [8, 128], strides = [1, 1]} : vector<8x512xf32> to vector<8x128xf32>
      %388 = arith.negf %387 : vector<8x128xf32>
      %389 = math.exp %388 : vector<8x128xf32>
      %cst_131 = arith.constant 1.000000e+00 : f32
      %390 = vector.broadcast %cst_131 : f32 to vector<8x128xf32>
      %391 = arith.addf %390, %389 : vector<8x128xf32>
      %392 = arith.divf %390, %391 : vector<8x128xf32>
      %393 = vector.extract_strided_slice %380 {offsets = [0, 256], sizes = [8, 128], strides = [1, 1]} : vector<8x512xf32> to vector<8x128xf32>
      %394 = math.tanh %393 : vector<8x128xf32>
      %395 = vector.extract_strided_slice %380 {offsets = [0, 384], sizes = [8, 128], strides = [1, 1]} : vector<8x512xf32> to vector<8x128xf32>
      %396 = arith.negf %395 : vector<8x128xf32>
      %397 = math.exp %396 : vector<8x128xf32>
      %cst_132 = arith.constant 1.000000e+00 : f32
      %398 = vector.broadcast %cst_132 : f32 to vector<8x128xf32>
      %399 = arith.addf %398, %397 : vector<8x128xf32>
      %400 = arith.divf %398, %399 : vector<8x128xf32>
      %401 = arith.mulf %392, %340 : vector<8x128xf32>
      %402 = arith.mulf %386, %394 : vector<8x128xf32>
      %403 = arith.addf %401, %402 : vector<8x128xf32>
      %404 = math.tanh %403 : vector<8x128xf32>
      %405 = arith.mulf %400, %404 : vector<8x128xf32>
      %406 = arith.truncf %405 : vector<8x128xf32> to vector<8x128xbf16>
      %c0_133 = arith.constant 0 : index
      %c128_134 = arith.constant 128 : index
      %407 = vector.load %arg13[%c0_133, %c128_134] : memref<8x256xbf16, #tpu.memory_space<vmem>>, vector<8x128xbf16>
      tpu.vector_store %arg13[%c0_133, %c128_134], %406 {strides = array<i32>} : memref<8x256xbf16, #tpu.memory_space<vmem>>, vector<8x128xbf16>,
      %c40_135 = arith.constant 40 : index
      %c0_136 = arith.constant 0 : index
      %408 = vector.load %arg16[%c40_135, %c0_136] : memref<64x128xbf16, #tpu.memory_space<vmem>>, vector<8x128xbf16>
      tpu.vector_store %arg16[%c40_135, %c0_136], %406 {strides = array<i32>} : memref<64x128xbf16, #tpu.memory_space<vmem>>, vector<8x128xbf16>,
      %c48 = arith.constant 48 : index
      %c0_137 = arith.constant 0 : index
      %409 = vector.load %arg15[%c48, %c0_137] : memref<64x512xf32, #tpu.memory_space<vmem>>, vector<8x512xf32>
      %410 = arith.addf %409, %378 : vector<8x512xf32>
      %411 = vector.extract_strided_slice %410 {offsets = [0, 0], sizes = [8, 128], strides = [1, 1]} : vector<8x512xf32> to vector<8x128xf32>
      %412 = arith.negf %411 : vector<8x128xf32>
      %413 = math.exp %412 : vector<8x128xf32>
      %cst_138 = arith.constant 1.000000e+00 : f32
      %414 = vector.broadcast %cst_138 : f32 to vector<8x128xf32>
      %415 = arith.addf %414, %413 : vector<8x128xf32>
      %416 = arith.divf %414, %415 : vector<8x128xf32>
      %417 = vector.extract_strided_slice %410 {offsets = [0, 128], sizes = [8, 128], strides = [1, 1]} : vector<8x512xf32> to vector<8x128xf32>
      %418 = arith.negf %417 : vector<8x128xf32>
      %419 = math.exp %418 : vector<8x128xf32>
      %cst_139 = arith.constant 1.000000e+00 : f32
      %420 = vector.broadcast %cst_139 : f32 to vector<8x128xf32>
      %421 = arith.addf %420, %419 : vector<8x128xf32>
      %422 = arith.divf %420, %421 : vector<8x128xf32>
      %423 = vector.extract_strided_slice %410 {offsets = [0, 256], sizes = [8, 128], strides = [1, 1]} : vector<8x512xf32> to vector<8x128xf32>
      %424 = math.tanh %423 : vector<8x128xf32>
      %425 = vector.extract_strided_slice %410 {offsets = [0, 384], sizes = [8, 128], strides = [1, 1]} : vector<8x512xf32> to vector<8x128xf32>
      %426 = arith.negf %425 : vector<8x128xf32>
      %427 = math.exp %426 : vector<8x128xf32>
      %cst_140 = arith.constant 1.000000e+00 : f32
      %428 = vector.broadcast %cst_140 : f32 to vector<8x128xf32>
      %429 = arith.addf %428, %427 : vector<8x128xf32>
      %430 = arith.divf %428, %429 : vector<8x128xf32>
      %431 = arith.mulf %422, %370 : vector<8x128xf32>
      %432 = arith.mulf %416, %424 : vector<8x128xf32>
      %433 = arith.addf %431, %432 : vector<8x128xf32>
      %434 = math.tanh %433 : vector<8x128xf32>
      %435 = arith.mulf %430, %434 : vector<8x128xf32>
      %436 = arith.truncf %435 : vector<8x128xf32> to vector<8x128xbf16>
      %c0_141 = arith.constant 0 : index
      %c0_142 = arith.constant 0 : index
      %437 = vector.load %arg13[%c0_141, %c0_142] : memref<8x256xbf16, #tpu.memory_space<vmem>>, vector<8x128xbf16>
      tpu.vector_store %arg13[%c0_141, %c0_142], %436 {strides = array<i32>} : memref<8x256xbf16, #tpu.memory_space<vmem>>, vector<8x128xbf16>,
      %c0_143 = arith.constant 0 : index
      %c0_144 = arith.constant 0 : index
      %438 = vector.load %arg13[%c0_143, %c0_144] : memref<8x256xbf16, #tpu.memory_space<vmem>>, vector<8x256xbf16>
      %c0_145 = arith.constant 0 : index
      %c0_146 = arith.constant 0 : index
      %439 = vector.load %arg4[%c0_145, %c0_146] : memref<256x1024xbf16, #tpu.memory_space<vmem>>, vector<256x1024xbf16>
      %cst_147 = arith.constant dense<0.000000e+00> : vector<8x1024xf32>
      %440 = tpu.matmul %438, %439, %cst_147 {dimension_numbers = #tpu.dot_dimension_numbers<[1], [0], [0], [1], [0, 0, 1, 1], [], []>} : vector<8x256xbf16>, vector<256x1024xbf16>, vector<8x1024xf32> -> vector<8x1024xf32>
      %441 = vector.extract_strided_slice %440 {offsets = [0, 512], sizes = [8, 512], strides = [1, 1]} : vector<8x1024xf32> to vector<8x512xf32>
      %442 = vector.extract_strided_slice %440 {offsets = [0, 0], sizes = [8, 512], strides = [1, 1]} : vector<8x1024xf32> to vector<8x512xf32>
      %443 = arith.addf %442, %25 : vector<8x512xf32>
      %444 = vector.extract_strided_slice %443 {offsets = [0, 0], sizes = [8, 128], strides = [1, 1]} : vector<8x512xf32> to vector<8x128xf32>
      %445 = arith.negf %444 : vector<8x128xf32>
      %446 = math.exp %445 : vector<8x128xf32>
      %cst_148 = arith.constant 1.000000e+00 : f32
      %447 = vector.broadcast %cst_148 : f32 to vector<8x128xf32>
      %448 = arith.addf %447, %446 : vector<8x128xf32>
      %449 = arith.divf %447, %448 : vector<8x128xf32>
      %450 = vector.extract_strided_slice %443 {offsets = [0, 128], sizes = [8, 128], strides = [1, 1]} : vector<8x512xf32> to vector<8x128xf32>
      %451 = arith.negf %450 : vector<8x128xf32>
      %452 = math.exp %451 : vector<8x128xf32>
      %cst_149 = arith.constant 1.000000e+00 : f32
      %453 = vector.broadcast %cst_149 : f32 to vector<8x128xf32>
      %454 = arith.addf %453, %452 : vector<8x128xf32>
      %455 = arith.divf %453, %454 : vector<8x128xf32>
      %456 = vector.extract_strided_slice %443 {offsets = [0, 256], sizes = [8, 128], strides = [1, 1]} : vector<8x512xf32> to vector<8x128xf32>
      %457 = math.tanh %456 : vector<8x128xf32>
      %458 = vector.extract_strided_slice %443 {offsets = [0, 384], sizes = [8, 128], strides = [1, 1]} : vector<8x512xf32> to vector<8x128xf32>
      %459 = arith.negf %458 : vector<8x128xf32>
      %460 = math.exp %459 : vector<8x128xf32>
      %cst_150 = arith.constant 1.000000e+00 : f32
      %461 = vector.broadcast %cst_150 : f32 to vector<8x128xf32>
      %462 = arith.addf %461, %460 : vector<8x128xf32>
      %463 = arith.divf %461, %462 : vector<8x128xf32>
      %464 = arith.mulf %455, %403 : vector<8x128xf32>
      %465 = arith.mulf %449, %457 : vector<8x128xf32>
      %466 = arith.addf %464, %465 : vector<8x128xf32>
      %467 = math.tanh %466 : vector<8x128xf32>
      %468 = arith.mulf %463, %467 : vector<8x128xf32>
      %469 = arith.truncf %468 : vector<8x128xf32> to vector<8x128xbf16>
      %c0_151 = arith.constant 0 : index
      %c128_152 = arith.constant 128 : index
      %470 = vector.load %arg13[%c0_151, %c128_152] : memref<8x256xbf16, #tpu.memory_space<vmem>>, vector<8x128xbf16>
      tpu.vector_store %arg13[%c0_151, %c128_152], %469 {strides = array<i32>} : memref<8x256xbf16, #tpu.memory_space<vmem>>, vector<8x128xbf16>,
      %c48_153 = arith.constant 48 : index
      %c0_154 = arith.constant 0 : index
      %471 = vector.load %arg16[%c48_153, %c0_154] : memref<64x128xbf16, #tpu.memory_space<vmem>>, vector<8x128xbf16>
      tpu.vector_store %arg16[%c48_153, %c0_154], %469 {strides = array<i32>} : memref<64x128xbf16, #tpu.memory_space<vmem>>, vector<8x128xbf16>,
      %c56 = arith.constant 56 : index
      %c0_155 = arith.constant 0 : index
      %472 = vector.load %arg15[%c56, %c0_155] : memref<64x512xf32, #tpu.memory_space<vmem>>, vector<8x512xf32>
      %473 = arith.addf %472, %441 : vector<8x512xf32>
      %474 = vector.extract_strided_slice %473 {offsets = [0, 0], sizes = [8, 128], strides = [1, 1]} : vector<8x512xf32> to vector<8x128xf32>
      %475 = arith.negf %474 : vector<8x128xf32>
      %476 = math.exp %475 : vector<8x128xf32>
      %cst_156 = arith.constant 1.000000e+00 : f32
      %477 = vector.broadcast %cst_156 : f32 to vector<8x128xf32>
      %478 = arith.addf %477, %476 : vector<8x128xf32>
      %479 = arith.divf %477, %478 : vector<8x128xf32>
      %480 = vector.extract_strided_slice %473 {offsets = [0, 128], sizes = [8, 128], strides = [1, 1]} : vector<8x512xf32> to vector<8x128xf32>
      %481 = arith.negf %480 : vector<8x128xf32>
      %482 = math.exp %481 : vector<8x128xf32>
      %cst_157 = arith.constant 1.000000e+00 : f32
      %483 = vector.broadcast %cst_157 : f32 to vector<8x128xf32>
      %484 = arith.addf %483, %482 : vector<8x128xf32>
      %485 = arith.divf %483, %484 : vector<8x128xf32>
      %486 = vector.extract_strided_slice %473 {offsets = [0, 256], sizes = [8, 128], strides = [1, 1]} : vector<8x512xf32> to vector<8x128xf32>
      %487 = math.tanh %486 : vector<8x128xf32>
      %488 = vector.extract_strided_slice %473 {offsets = [0, 384], sizes = [8, 128], strides = [1, 1]} : vector<8x512xf32> to vector<8x128xf32>
      %489 = arith.negf %488 : vector<8x128xf32>
      %490 = math.exp %489 : vector<8x128xf32>
      %cst_158 = arith.constant 1.000000e+00 : f32
      %491 = vector.broadcast %cst_158 : f32 to vector<8x128xf32>
      %492 = arith.addf %491, %490 : vector<8x128xf32>
      %493 = arith.divf %491, %492 : vector<8x128xf32>
      %494 = arith.mulf %485, %433 : vector<8x128xf32>
      %495 = arith.mulf %479, %487 : vector<8x128xf32>
      %496 = arith.addf %494, %495 : vector<8x128xf32>
      %497 = math.tanh %496 : vector<8x128xf32>
      %498 = arith.mulf %493, %497 : vector<8x128xf32>
      %499 = arith.truncf %498 : vector<8x128xf32> to vector<8x128xbf16>
      %c0_159 = arith.constant 0 : index
      %c0_160 = arith.constant 0 : index
      %500 = vector.load %arg13[%c0_159, %c0_160] : memref<8x256xbf16, #tpu.memory_space<vmem>>, vector<8x128xbf16>
      tpu.vector_store %arg13[%c0_159, %c0_160], %499 {strides = array<i32>} : memref<8x256xbf16, #tpu.memory_space<vmem>>, vector<8x128xbf16>,
      %c0_161 = arith.constant 0 : index
      %c0_162 = arith.constant 0 : index
      %501 = vector.load %arg13[%c0_161, %c0_162] : memref<8x256xbf16, #tpu.memory_space<vmem>>, vector<8x256xbf16>
      %c0_163 = arith.constant 0 : index
      %c0_164 = arith.constant 0 : index
      %502 = vector.load %arg4[%c0_163, %c0_164] : memref<256x1024xbf16, #tpu.memory_space<vmem>>, vector<256x1024xbf16>
      %cst_165 = arith.constant dense<0.000000e+00> : vector<8x1024xf32>
      %503 = tpu.matmul %501, %502, %cst_165 {dimension_numbers = #tpu.dot_dimension_numbers<[1], [0], [0], [1], [0, 0, 1, 1], [], []>} : vector<8x256xbf16>, vector<256x1024xbf16>, vector<8x1024xf32> -> vector<8x1024xf32>
      %504 = vector.extract_strided_slice %503 {offsets = [0, 512], sizes = [8, 512], strides = [1, 1]} : vector<8x1024xf32> to vector<8x512xf32>
      %505 = vector.extract_strided_slice %503 {offsets = [0, 0], sizes = [8, 512], strides = [1, 1]} : vector<8x1024xf32> to vector<8x512xf32>
      %506 = arith.addf %505, %25 : vector<8x512xf32>
      %507 = vector.extract_strided_slice %506 {offsets = [0, 0], sizes = [8, 128], strides = [1, 1]} : vector<8x512xf32> to vector<8x128xf32>
      %508 = arith.negf %507 : vector<8x128xf32>
      %509 = math.exp %508 : vector<8x128xf32>
      %cst_166 = arith.constant 1.000000e+00 : f32
      %510 = vector.broadcast %cst_166 : f32 to vector<8x128xf32>
      %511 = arith.addf %510, %509 : vector<8x128xf32>
      %512 = arith.divf %510, %511 : vector<8x128xf32>
      %513 = vector.extract_strided_slice %506 {offsets = [0, 128], sizes = [8, 128], strides = [1, 1]} : vector<8x512xf32> to vector<8x128xf32>
      %514 = arith.negf %513 : vector<8x128xf32>
      %515 = math.exp %514 : vector<8x128xf32>
      %cst_167 = arith.constant 1.000000e+00 : f32
      %516 = vector.broadcast %cst_167 : f32 to vector<8x128xf32>
      %517 = arith.addf %516, %515 : vector<8x128xf32>
      %518 = arith.divf %516, %517 : vector<8x128xf32>
      %519 = vector.extract_strided_slice %506 {offsets = [0, 256], sizes = [8, 128], strides = [1, 1]} : vector<8x512xf32> to vector<8x128xf32>
      %520 = math.tanh %519 : vector<8x128xf32>
      %521 = vector.extract_strided_slice %506 {offsets = [0, 384], sizes = [8, 128], strides = [1, 1]} : vector<8x512xf32> to vector<8x128xf32>
      %522 = arith.negf %521 : vector<8x128xf32>
      %523 = math.exp %522 : vector<8x128xf32>
      %cst_168 = arith.constant 1.000000e+00 : f32
      %524 = vector.broadcast %cst_168 : f32 to vector<8x128xf32>
      %525 = arith.addf %524, %523 : vector<8x128xf32>
      %526 = arith.divf %524, %525 : vector<8x128xf32>
      %527 = arith.mulf %518, %466 : vector<8x128xf32>
      %528 = arith.mulf %512, %520 : vector<8x128xf32>
      %529 = arith.addf %527, %528 : vector<8x128xf32>
      %530 = math.tanh %529 : vector<8x128xf32>
      %531 = arith.mulf %526, %530 : vector<8x128xf32>
      %532 = arith.truncf %531 : vector<8x128xf32> to vector<8x128xbf16>
      %c0_169 = arith.constant 0 : index
      %c128_170 = arith.constant 128 : index
      %533 = vector.load %arg13[%c0_169, %c128_170] : memref<8x256xbf16, #tpu.memory_space<vmem>>, vector<8x128xbf16>
      tpu.vector_store %arg13[%c0_169, %c128_170], %532 {strides = array<i32>} : memref<8x256xbf16, #tpu.memory_space<vmem>>, vector<8x128xbf16>,
      %c56_171 = arith.constant 56 : index
      %c0_172 = arith.constant 0 : index
      %534 = vector.load %arg16[%c56_171, %c0_172] : memref<64x128xbf16, #tpu.memory_space<vmem>>, vector<8x128xbf16>
      tpu.vector_store %arg16[%c56_171, %c0_172], %532 {strides = array<i32>} : memref<64x128xbf16, #tpu.memory_space<vmem>>, vector<8x128xbf16>,
      %c0_173 = arith.constant 0 : index
      %c0_174 = arith.constant 0 : index
      %c0_175 = arith.constant 0 : index
      %535 = vector.load %arg12[%c0_173, %c0_174, %c0_175] : memref<2x8x128xf32, #tpu.memory_space<vmem>>, vector<1x8x128xf32>
      %536 = vector.shape_cast %535 : vector<1x8x128xf32> to vector<8x128xf32>
      %537 = vector.shape_cast %496 : vector<8x128xf32> to vector<1x8x128xf32>
      tpu.vector_store %arg12[%c0_173, %c0_174, %c0_175], %537 {strides = array<i32>} : memref<2x8x128xf32, #tpu.memory_space<vmem>>, vector<1x8x128xf32>,
      %c1_176 = arith.constant 1 : index
      %c0_177 = arith.constant 0 : index
      %c0_178 = arith.constant 0 : index
      %538 = vector.load %arg12[%c1_176, %c0_177, %c0_178] : memref<2x8x128xf32, #tpu.memory_space<vmem>>, vector<1x8x128xf32>
      %539 = vector.shape_cast %538 : vector<1x8x128xf32> to vector<8x128xf32>
      %540 = vector.shape_cast %529 : vector<8x128xf32> to vector<1x8x128xf32>
      tpu.vector_store %arg12[%c1_176, %c0_177, %c0_178], %540 {strides = array<i32>} : memref<2x8x128xf32, #tpu.memory_space<vmem>>, vector<1x8x128xf32>,
      %c0_179 = arith.constant 0 : index
      %c0_180 = arith.constant 0 : index
      %541 = vector.load %arg14[%c0_179, %c0_180] : memref<8x512xf32, #tpu.memory_space<vmem>>, vector<8x512xf32>
      tpu.vector_store %arg14[%c0_179, %c0_180], %504 {strides = array<i32>} : memref<8x512xf32, #tpu.memory_space<vmem>>, vector<8x512xf32>,
      %c0_i32_181 = arith.constant 0 : i32
      %542 = arith.cmpi eq, %arg0, %c0_i32_181 : i32
      %543 = arith.extui %542 : i1 to i32
      %c0_i32_182 = arith.constant 0 : i32
      %544 = arith.cmpi ne, %543, %c0_i32_182 : i32
      scf.if %544 {
        %c0_183 = arith.constant 0 : index
        %c0_184 = arith.constant 0 : index
        %c0_185 = arith.constant 0 : index
        %545 = vector.load %arg10[%c0_183, %c0_184, %c0_185] : memref<2x8x128xf32, #tpu.memory_space<vmem>>, vector<1x8x128xf32>
        %546 = vector.shape_cast %545 : vector<1x8x128xf32> to vector<8x128xf32>
        %547 = vector.shape_cast %498 : vector<8x128xf32> to vector<1x8x128xf32>
        tpu.vector_store %arg10[%c0_183, %c0_184, %c0_185], %547 {strides = array<i32>} : memref<2x8x128xf32, #tpu.memory_space<vmem>>, vector<1x8x128xf32>,
        %c1_186 = arith.constant 1 : index
        %c0_187 = arith.constant 0 : index
        %c0_188 = arith.constant 0 : index
        %548 = vector.load %arg10[%c1_186, %c0_187, %c0_188] : memref<2x8x128xf32, #tpu.memory_space<vmem>>, vector<1x8x128xf32>
        %549 = vector.shape_cast %548 : vector<1x8x128xf32> to vector<8x128xf32>
        %550 = vector.shape_cast %531 : vector<8x128xf32> to vector<1x8x128xf32>
        tpu.vector_store %arg10[%c1_186, %c0_187, %c0_188], %550 {strides = array<i32>} : memref<2x8x128xf32, #tpu.memory_space<vmem>>, vector<1x8x128xf32>,
        %c0_189 = arith.constant 0 : index
        %c0_190 = arith.constant 0 : index
        %c0_191 = arith.constant 0 : index
        %551 = vector.load %arg11[%c0_189, %c0_190, %c0_191] : memref<2x8x128xf32, #tpu.memory_space<vmem>>, vector<1x8x128xf32>
        %552 = vector.shape_cast %551 : vector<1x8x128xf32> to vector<8x128xf32>
        %553 = vector.shape_cast %496 : vector<8x128xf32> to vector<1x8x128xf32>
        tpu.vector_store %arg11[%c0_189, %c0_190, %c0_191], %553 {strides = array<i32>} : memref<2x8x128xf32, #tpu.memory_space<vmem>>, vector<1x8x128xf32>,
        %c1_192 = arith.constant 1 : index
        %c0_193 = arith.constant 0 : index
        %c0_194 = arith.constant 0 : index
        %554 = vector.load %arg11[%c1_192, %c0_193, %c0_194] : memref<2x8x128xf32, #tpu.memory_space<vmem>>, vector<1x8x128xf32>
        %555 = vector.shape_cast %554 : vector<1x8x128xf32> to vector<8x128xf32>
        %556 = vector.shape_cast %529 : vector<8x128xf32> to vector<1x8x128xf32>
        tpu.vector_store %arg11[%c1_192, %c0_193, %c0_194], %556 {strides = array<i32>} : memref<2x8x128xf32, #tpu.memory_space<vmem>>, vector<1x8x128xf32>,
      } else {
      }
    } else {
    }
    %c0 = arith.constant 0 : index
    %c0_4 = arith.constant 0 : index
    %8 = vector.load %arg16[%c0, %c0_4] : memref<64x128xbf16, #tpu.memory_space<vmem>>, vector<64x128xbf16>
    %c0_5 = arith.constant 0 : index
    %c0_6 = arith.constant 0 : index
    %9 = vector.load %arg7[%c0_5, %c0_6] : memref<128x128xbf16, #tpu.memory_space<vmem>>, vector<128x128xbf16>
    %cst = arith.constant dense<0.000000e+00> : vector<64x128xf32>
    %10 = tpu.matmul %8, %9, %cst {dimension_numbers = #tpu.dot_dimension_numbers<[1], [0], [0], [1], [0, 0, 1, 1], [], []>} : vector<64x128xbf16>, vector<128x128xbf16>, vector<64x128xf32> -> vector<64x128xf32>
    %c0_7 = arith.constant 0 : index
    %c0_8 = arith.constant 0 : index
    %11 = vector.load %arg8[%c0_7, %c0_8] : memref<1x128xf32, #tpu.memory_space<vmem>>, vector<1x128xf32>
    %12 = vector.broadcast %11 : vector<1x128xf32> to vector<64x128xf32>
    %13 = arith.addf %10, %12 : vector<64x128xf32>
    %14 = arith.truncf %13 : vector<64x128xf32> to vector<64x128xbf16>
    %c0_9 = arith.constant 0 : index
    %c0_10 = arith.constant 0 : index
    %15 = vector.load %arg9[%c0_9, %c0_10] : memref<64x128xbf16, #tpu.memory_space<vmem>>, vector<64x128xbf16>
    tpu.vector_store %arg9[%c0_9, %c0_10], %14 {strides = array<i32>} : memref<64x128xbf16, #tpu.memory_space<vmem>>, vector<64x128xbf16>,
    return
  }
  func.func @transform_0(%arg0: i32, %arg1: i32) -> (i32, i32) {
    %c0_i32 = arith.constant 0 : i32
    %c0_i32_0 = arith.constant 0 : i32
    return %arg0, %c0_i32 : i32, i32
  }
  func.func @transform_1(%arg0: i32, %arg1: i32) -> (i32, i32) {
    %c0_i32 = arith.constant 0 : i32
    %c0_i32_0 = arith.constant 0 : i32
    %c0_i32_1 = arith.constant 0 : i32
    return %c0_i32, %c0_i32_0 : i32, i32
  }
  func.func @transform_2(%arg0: i32, %arg1: i32) -> (i32, i32) {
    %c0_i32 = arith.constant 0 : i32
    %c0_i32_0 = arith.constant 0 : i32
    %c0_i32_1 = arith.constant 0 : i32
    return %c0_i32, %c0_i32_0 : i32, i32
  }
  func.func @transform_3(%arg0: i32, %arg1: i32) -> (i32, i32) {
    %c0_i32 = arith.constant 0 : i32
    %c0_i32_0 = arith.constant 0 : i32
    %c0_i32_1 = arith.constant 0 : i32
    return %c0_i32, %c0_i32_0 : i32, i32
  }
  func.func @transform_4(%arg0: i32, %arg1: i32) -> (i32, i32) {
    %c0_i32 = arith.constant 0 : i32
    %c0_i32_0 = arith.constant 0 : i32
    %c0_i32_1 = arith.constant 0 : i32
    return %c0_i32, %c0_i32_0 : i32, i32
  }
  func.func @transform_5(%arg0: i32, %arg1: i32) -> (i32, i32) {
    %c0_i32 = arith.constant 0 : i32
    %c0_i32_0 = arith.constant 0 : i32
    return %c0_i32, %arg1 : i32, i32
  }
  func.func @transform_6(%arg0: i32, %arg1: i32) -> (i32, i32) {
    %c0_i32 = arith.constant 0 : i32
    %c0_i32_0 = arith.constant 0 : i32
    return %c0_i32, %arg1 : i32, i32
  }
  func.func @transform_7(%arg0: i32, %arg1: i32) -> (i32, i32) {
    %c0_i32 = arith.constant 0 : i32
    return %arg0, %arg1 : i32, i32
  }
  func.func @transform_8(%arg0: i32, %arg1: i32) -> (i32, i32, i32) {
    %c0_i32 = arith.constant 0 : i32
    %c0_i32_0 = arith.constant 0 : i32
    %c0_i32_1 = arith.constant 0 : i32
    %c0_i32_2 = arith.constant 0 : i32
    return %c0_i32, %c0_i32_0, %c0_i32_1 : i32, i32, i32
  }
  func.func @transform_9(%arg0: i32, %arg1: i32) -> (i32, i32, i32) {
    %c0_i32 = arith.constant 0 : i32
    %c0_i32_0 = arith.constant 0 : i32
    %c0_i32_1 = arith.constant 0 : i32
    %c0_i32_2 = arith.constant 0 : i32
    return %c0_i32, %c0_i32_0, %c0_i32_1 : i32, i32, i32
  }
}

</mosaic_0001>

<bundles_post_ra>
// kernel: tpu_custom_call.1
= control target key start
LH: loop header
LB: loop body
LE: loop exit
PB: predicated region body
PF: predicated region fallthrough
CT: control target
= control target key end

     0   :  { %15 = vsyncpa [#allocation8], 0  ;;  %s17721_s0 = inlined_call_operand.hbm [shape: bf16[64,256], index: 0, kind: input, shape index: {}]   ;;  %s17722_s1 = inlined_call_operand.hbm [shape: bf16[256,512], index: 1, kind: input, shape index: {}]   ;;  %s17723_s2 = inlined_call_operand.hbm [shape: bf16[256,1024], index: 2, kind: input, shape index: {}]   ;;  %s17724_s3 = inlined_call_operand.hbm [shape: f32[1,512], index: 3, kind: input, shape index: {}]   ;;  %s17725_s4 = inlined_call_operand.hbm [shape: f32[1,512], index: 4, kind: input, shape index: {}]   ;;  %s17726_s5 = inlined_call_operand.hbm [shape: bf16[128,128], index: 5, kind: input, shape index: {}]   ;;  %s17727_s6 = inlined_call_operand.vmem [shape: f32[1,128], index: 6, kind: input, shape index: {}]   ;;  %s17728_s7 = inlined_call_operand.hbm [shape: bf16[64,128], index: 7, kind: output, shape index: {0}]   ;;  %s17729_s8 = inlined_call_operand.hbm [shape: f32[2,8,128], index: 8, kind: output, shape index: {1}]   ;;  %s17730_s9 = inlined_call_operand.hbm [shape: f32[2,8,128], index: 9, kind: output, shape index: {2}]  }
   0x1   :  { %16 = vsyncpa [#allocation11], 0 }
   0x2   :  { %17 = vsyncpa [#allocation14], 0 }
   0x3   :  { %18 = vsyncpa [#allocation17], 0 }
   0x4   :  { %19 = vsyncpa [#allocation9], 0  ;;  %s38_s11 = sshll.u32 %s17722_s1, 4  ;;  %s39_s11 = int_to_ptr.hbm [resolvable:$true] %s38_s11 }
   0x5   :  { %20 = vsyncpa [#allocation20], 0  ;;  %s16216_s12 = smov [#allocation10]   ;;  %s65_s16 = sshll.u32 %s17724_s3, 4  ;;  %s66_s16 = int_to_ptr.hbm [resolvable:$true] %s65_s16 }
   0x6   :  { %s40_s13 = sshll.u32 %s16216_s12, 4  ;;  %s16217_s17 = smov 256   ;;  %s41_s13 = int_to_ptr.vmem [resolvable:$true] %s40_s13 }
   0x7   :  { %s16218_s18 = smov 16   ;;  %s16219_s19 = smov [#allocation13]  }
   0x8   :  { %46 = dma.hbm_to_vmem [thread:$0]  %s39_s11, 8192, %s41_s13, [#allocation11], %s16217_s17, %s16217_s17, %s16218_s18  }
   0x9   :  { %s67_s20 = sshll.u32 %s16219_s19, 4  ;;  %s25_s23 = sshll.u32 %s17721_s0, 4  ;;  %s68_s20 = int_to_ptr.vmem [resolvable:$true] %s67_s20  ;;  %s26_s23 = int_to_ptr.hbm [resolvable:$true] %s25_s23 }
   0xa   :  { %70 = dma.hbm_to_vmem [thread:$0]  %s66_s16, 64, %s68_s20, [#allocation14]  }
   0xb   :  { %s16220_s1 = smov [#allocation7]   ;;  %s51_s3 = sshll.u32 %s17723_s2, 4  ;;  %s52_s3 = int_to_ptr.hbm [resolvable:$true] %s51_s3 }
   0xc   :  { %s27_s24 = sshll.u32 %s16220_s1, 4  ;;  %s16221_s27 = smov 128   ;;  %s28_s24 = int_to_ptr.vmem [resolvable:$true] %s27_s24 }
   0xd   :  { %s16222_s28 = smov 8   ;;  %s16223_s29 = smov [#allocation12]  }
   0xe   :  { %33 = dma.hbm_to_vmem [thread:$0]  %s26_s23, 1024, %s28_s24, [#allocation8], %s16221_s27, %s16221_s27, %s16222_s28  }
   0xf   :  { %s53_s30 = sshll.u32 %s16223_s29, 4  ;;  %s16224_s0 = smov 512   ;;  %s54_s30 = int_to_ptr.vmem [resolvable:$true] %s53_s30 }
  0x10   :  { %s16225_s10 = smov 32   ;;  %s76_s13 = sshll.u32 %s17725_s4, 4  ;;  %s77_s13 = int_to_ptr.hbm [resolvable:$true] %s76_s13 }
  0x11   :  { %59 = dma.hbm_to_vmem [thread:$0]  %s52_s3, 16384, %s54_s30, [#allocation11], %s16224_s0, %s16224_s0, %s16225_s10  }
  0x12   :  { %s16226_s14 = smov [#allocation15]   ;;  %s86_s17 = sshll.u32 %s17726_s5, 4  ;;  %s87_s17 = int_to_ptr.hbm [resolvable:$true] %s86_s17 }
  0x13   :  { %s78_s2 = sshll.u32 %s16226_s14, 4  ;;  %s16227_s18 = smov [#allocation16]   ;;  %s79_s2 = int_to_ptr.vmem [resolvable:$true] %s78_s2 }
  0x14   :  { %81 = dma.hbm_to_vmem [thread:$0]  %s77_s13, 64, %s79_s2, [#allocation14]  }
  0x15   :  { %s88_s19 = sshll.u32 %s16227_s18, 4  ;;  %s16228_s20 = smov 64   ;;  %s89_s19 = int_to_ptr.vmem [resolvable:$true] %s88_s19 }
  0x16   :  { %s16229_s21 = smov 4  }
  0x17   :  { %94 = dma.hbm_to_vmem [thread:$0]  %s87_s17, 1024, %s89_s19, [#allocation17], %s16228_s20, %s16228_s20, %s16229_s21  }
  0x18   :  { %16204 = dma.done.wait [#allocation8], 1024  }
  0x19   :  { %16205 = vsyncadd [#allocation8], 4294966272 }
  0x1a   :  { %16206 = dma.done.wait [#allocation11], 24576  }
  0x1b   :  { %16207 = vsyncadd [#allocation11], 4294942720 }
  0x1c   :  { %16208 = dma.done.wait [#allocation14], 128  }
  0x1d   :  { %16209 = vsyncadd [#allocation14], 4294967168 }
  0x1e   :  { %16210 = dma.done.wait [#allocation17], 1024  }
  0x1f   :  { %16211 = vsyncadd [#allocation17], 4294966272  ;;  %v10240_v0 = vld [vmem:[#allocation10 + $0xe0] sm:$0xf]  ;;  %v14612_v1 = vld [vmem:[#allocation10 + $0xec] sm:$0xf0] }
  0x20   :  { %v10224_v2 = vld [vmem:[#allocation10 + $0xc0] sm:$0xf]  ;;  %v10241_v3 = vor.u32 %v14612_v1, %v10240_v0  ;;  %v14608_v4 = vld [vmem:[#allocation10 + $0xcc] sm:$0xf0]  ;;  %v14642_v8 = vld [vmem:[#allocation10 + $0x1e4] sm:$0xf] }
  0x21   :  { %v10225_v5 = vor.u32 %v14608_v4, %v10224_v2  ;;  %v10208_v6 = vld [vmem:[#allocation10 + $0xa0] sm:$0xf]  ;;  %v14604_v7 = vld [vmem:[#allocation10 + $0xac] sm:$0xf0]  ;;  %v10370_v9 = vld [vmem:[#allocation10 + $0x1f0] sm:$0xf0] }
  0x22   :  { %580 = vmatpush.bf16.msra.mxu1 %v10241_v3  ;;  %15705 = vmatpush.bf16.msra.mxu2 %v10241_v3  ;;  %v10373_v10 = vor.u32 %v14642_v8, %v10370_v9  ;;  %v14638_v11 = vld [vmem:[#allocation10 + $0x1c4] sm:$0xf]  ;;  %v10354_v12 = vld [vmem:[#allocation10 + $0x1d0] sm:$0xf0]  ;;  %v10209_v13 = vor.u32 %v14604_v7, %v10208_v6  ;;  %v10192_v14 = vld [vmem:[#allocation10 + $0x80] sm:$0xf] }
  0x23   :  { %v14600_v15 = vld [vmem:[#allocation10 + $0x8c] sm:$0xf0]  ;;  %v10357_v16 = vor.u32 %v14638_v11, %v10354_v12  ;;  %v14634_v17 = vld [vmem:[#allocation10 + $0x1a4] sm:$0xf]  ;;  %v10338_v18 = vld [vmem:[#allocation10 + $0x1b0] sm:$0xf0] }
  0x24   :  { %667 = vmatpush.bf16.msra.mxu3 %v10373_v10  ;;  %v10193_v19 = vor.u32 %v14600_v15, %v10192_v14  ;;  %v10176_v20 = vld [vmem:[#allocation10 + $0x60] sm:$0xf]  ;;  %v14596_v21 = vld [vmem:[#allocation10 + $0x6c] sm:$0xf0]  ;;  %v10341_v22 = vor.u32 %v14634_v17, %v10338_v18  ;;  %v14630_v23 = vld [vmem:[#allocation10 + $0x184] sm:$0xf] }
  0x25   :  { %v10322_v24 = vld [vmem:[#allocation10 + $0x190] sm:$0xf0]  ;;  %v10177_v25 = vor.u32 %v14596_v21, %v10176_v20  ;;  %v10160_v26 = vld [vmem:[#allocation10 + $0x40] sm:$0xf]  ;;  %v14592_v27 = vld [vmem:[#allocation10 + $0x4c] sm:$0xf0] }
  0x26   :  { %581 = vmatpush.bf16.msra.mxu1 %v10225_v5  ;;  %15706 = vmatpush.bf16.msra.mxu2 %v10225_v5  ;;  %v10325_v28 = vor.u32 %v14630_v23, %v10322_v24  ;;  %v14626_v29 = vld [vmem:[#allocation10 + $0x164] sm:$0xf]  ;;  %v10306_v30 = vld [vmem:[#allocation10 + $0x170] sm:$0xf0]  ;;  %v10161_v31 = vor.u32 %v14592_v27, %v10160_v26  ;;  %v10144_v32 = vld [vmem:[#allocation10 + $0x20] sm:$0xf] }
  0x27   :  { %v14588_v33 = vld [vmem:[#allocation10 + $0x2c] sm:$0xf0]  ;;  %v10309_v34 = vor.u32 %v14626_v29, %v10306_v30  ;;  %v14622_v35 = vld [vmem:[#allocation10 + $0x144] sm:$0xf]  ;;  %v10290_v36 = vld [vmem:[#allocation10 + $0x150] sm:$0xf0] }
  0x28   :  { %668 = vmatpush.bf16.msra.mxu3 %v10357_v16  ;;  %v10145_v37 = vor.u32 %v14588_v33, %v10144_v32  ;;  %v10128_v38 = vld [vmem:[#allocation10] sm:$0xf]  ;;  %v14584_v39 = vld [vmem:[#allocation10 + $0xc] sm:$0xf0]  ;;  %v10293_v41 = vor.u32 %v14622_v35, %v10290_v36  ;;  %v14610_v43 = vld [vmem:[#allocation10 + $0xe4] sm:$0xf] }
  0x29   :  { %v10368_v40 = vld [vmem:[#allocation10 + $0x1e0] sm:$0xf]  ;;  %v14644_v42 = vld [vmem:[#allocation10 + $0x1ec] sm:$0xf0]  ;;  %v10242_v44 = vld [vmem:[#allocation10 + $0xf0] sm:$0xf0]  ;;  %v10129_v48 = vor.u32 %v14584_v39, %v10128_v38 }
  0x2a   :  { %582 = vmatpush.bf16.msra.mxu1 %v10209_v13  ;;  %15707 = vmatpush.bf16.msra.mxu2 %v10209_v13  ;;  %v10096_v45 = vld [vmem:[#allocation7] sm:$0xf]  ;;  %v14618_v46 = vld [vmem:[#allocation10 + $0x124] sm:$0xf]  ;;  %v10274_v47 = vld [vmem:[#allocation10 + $0x130] sm:$0xf0]  ;;  %v10369_v52 = vor.u32 %v14644_v42, %v10368_v40  ;;  %v10245_v53 = vor.u32 %v14610_v43, %v10242_v44 }
  0x2b   :  { %v14575_v49 = vld [vmem:[#allocation7 + $0x4] sm:$0xf0]  ;;  %v10112_v50 = vld [vmem:[#allocation7 + $0x20] sm:$0xf]  ;;  %v14640_v55 = vld [vmem:[#allocation10 + $0x1cc] sm:$0xf0]  ;;  %v10277_v58 = vor.u32 %v14618_v46, %v10274_v47 }
  0x2c   :  { %669 = vmatpush.bf16.msra.mxu3 %v10341_v22  ;;  %v14579_v51 = vld [vmem:[#allocation7 + $0x24] sm:$0xf0]  ;;  %v10352_v54 = vld [vmem:[#allocation10 + $0x1c0] sm:$0xf]  ;;  %v14606_v56 = vld [vmem:[#allocation10 + $0xc4] sm:$0xf]  ;;  %v16308_v59 = vor.u32 %v14575_v49, %v10096_v45 }
  0x2d   :  { %v10226_v57 = vld [vmem:[#allocation10 + $0xd0] sm:$0xf0]  ;;  %v16310_v60 = vor.u32 %v14579_v51, %v10112_v50  ;;  %v14614_v61 = vld [vmem:[#allocation10 + $0x104] sm:$0xf]  ;;  %v10353_v63 = vor.u32 %v14640_v55, %v10352_v54  ;;  %v10336_v1 = vld [vmem:[#allocation10 + $0x1a0] sm:$0xf] }
  0x2e   :  { %583 = vmatpush.bf16.msra.mxu1 %v10193_v19  ;;  %15708 = vmatpush.bf16.msra.mxu2 %v10193_v19  ;;  %v10258_v62 = vld [vmem:[#allocation10 + $0x110] sm:$0xf0]  ;;  %v10229_v0 = vor.u32 %v14606_v56, %v10226_v57  ;;  %v14636_v2 = vld [vmem:[#allocation10 + $0x1ac] sm:$0xf0]  ;;  %v14602_v3 = vld [vmem:[#allocation10 + $0xa4] sm:$0xf] }
  0x2f   :  { %v10210_v4 = vld [vmem:[#allocation10 + $0xb0] sm:$0xf0]  ;;  %v10261_v5 = vor.u32 %v14614_v61, %v10258_v62  ;;  %v14574_v6 = vld [vmem:[#allocation7 + $0x4] sm:$0xf]  ;;  %v10098_v7 = vld [vmem:[#allocation7 + $0x8] sm:$0xf0]  ;;  %v10337_v8 = vor.u32 %v14636_v2, %v10336_v1 }
  0x30   :  { %670 = vmatpush.bf16.msra.mxu3 %v10325_v28  ;;  %v10213_v9 = vor.u32 %v14602_v3, %v10210_v4  ;;  %v10320_v10 = vld [vmem:[#allocation10 + $0x180] sm:$0xf]  ;;  %v14632_v11 = vld [vmem:[#allocation10 + $0x18c] sm:$0xf0]  ;;  %v14598_v12 = vld [vmem:[#allocation10 + $0x84] sm:$0xf]  ;;  %v16314_v14 = vor.u32 %v14574_v6, %v10098_v7 }
  0x31   :  { %v10194_v13 = vld [vmem:[#allocation10 + $0x90] sm:$0xf0]  ;;  %v10321_v15 = vor.u32 %v14632_v11, %v10320_v10  ;;  %v10304_v17 = vld [vmem:[#allocation10 + $0x160] sm:$0xf]  ;;  %v14628_v18 = vld [vmem:[#allocation10 + $0x16c] sm:$0xf0] }
  0x32   :  { %584 = vmatpush.bf16.msra.mxu1 %v10177_v25  ;;  %15709 = vmatpush.bf16.msra.mxu2 %v10177_v25  ;;  %v10197_v16 = vor.u32 %v14598_v12, %v10194_v13  ;;  %v14594_v19 = vld [vmem:[#allocation10 + $0x64] sm:$0xf]  ;;  %v10178_v20 = vld [vmem:[#allocation10 + $0x70] sm:$0xf0]  ;;  %v10104_v21 = vld [vmem:[#allocation7 + $0x10] sm:$0xf]  ;;  %v10305_v25 = vor.u32 %v14628_v18, %v10304_v17 }
  0x33   :  { %v14577_v22 = vld [vmem:[#allocation7 + $0x14] sm:$0xf0]  ;;  %v10120_v23 = vld [vmem:[#allocation7 + $0x30] sm:$0xf]  ;;  %v10181_v26 = vor.u32 %v14594_v19, %v10178_v20  ;;  %v10288_v27 = vld [vmem:[#allocation10 + $0x140] sm:$0xf] }
  0x34   :  { %671 = vmatpush.bf16.msra.mxu3 %v10309_v34  ;;  %v14581_v24 = vld [vmem:[#allocation7 + $0x34] sm:$0xf0]  ;;  %v14624_v28 = vld [vmem:[#allocation10 + $0x14c] sm:$0xf0]  ;;  %v14590_v29 = vld [vmem:[#allocation10 + $0x44] sm:$0xf] }
  0x35   :  { %v10162_v30 = vld [vmem:[#allocation10 + $0x50] sm:$0xf0]  ;;  %v16319_v32 = vor.u32 %v14581_v24, %v10120_v23  ;;  %v10289_v33 = vor.u32 %v14624_v28, %v10288_v27  ;;  %v10272_v35 = vld [vmem:[#allocation10 + $0x120] sm:$0xf]  ;;  %v14620_v36 = vld [vmem:[#allocation10 + $0x12c] sm:$0xf0] }
  0x36   :  { %585 = vmatpush.bf16.msra.mxu1 %v10161_v31  ;;  %15710 = vmatpush.bf16.msra.mxu2 %v10161_v31  ;;  %v16317_v31 = vor.u32 %v14577_v22, %v10104_v21  ;;  %v10165_v34 = vor.u32 %v14590_v29, %v10162_v30  ;;  %v10146_v38 = vld [vmem:[#allocation10 + $0x30] sm:$0xf0]  ;;  %v10106_v40 = vld [vmem:[#allocation7 + $0x18] sm:$0xf0]  ;;  %v10273_v42 = vor.u32 %v14620_v36, %v10272_v35  ;;  %v10248_v44 = vld [vmem:[#allocation10 + $0xe8] sm:$0xf] }
  0x37   :  { %v14576_v39 = vld [vmem:[#allocation7 + $0x14] sm:$0xf]  ;;  %v10378_v43 = vld [vmem:[#allocation10 + $0x1f8] sm:$0xf0]  ;;  %v14613_v45 = vld [vmem:[#allocation10 + $0xf4] sm:$0xf0] }
  0x38   :  { %672 = vmatpush.bf16.msra.mxu3 %v10293_v41  ;;  %v14643_v41 = vld [vmem:[#allocation10 + $0x1ec] sm:$0xf]  ;;  %v10256_v47 = vld [vmem:[#allocation10 + $0x100] sm:$0xf]  ;;  %v10249_v49 = vor.u32 %v14613_v45, %v10248_v44  ;;  %v10362_v51 = vld [vmem:[#allocation10 + $0x1d8] sm:$0xf0]  ;;  %v16323_v55 = vor.u32 %v14576_v39, %v10106_v40 }
  0x39   :  { %v14639_v50 = vld [vmem:[#allocation10 + $0x1cc] sm:$0xf]  ;;  %v10130_v54 = vld [vmem:[#allocation10 + $0x10] sm:$0xf0]  ;;  %v10376_v61 = vld [vmem:[#allocation10 + $0x1e8] sm:$0xf] }
  0x3a   :  { %586 = vmatpush.bf16.msra.mxu1 %v10145_v37  ;;  %15711 = vmatpush.bf16.msra.mxu2 %v10145_v37  ;;  %v14586_v37 = vld [vmem:[#allocation10 + $0x24] sm:$0xf]  ;;  %v10365_v56 = vor.u32 %v14639_v50, %v10362_v51  ;;  %v14645_v62 = vld [vmem:[#allocation10 + $0x1f4] sm:$0xf0]  ;;  %v10114_v1 = vld [vmem:[#allocation7 + $0x28] sm:$0xf0] }
  0x3b   :  { %v10149_v46 = vor.u32 %v14586_v37, %v10146_v38  ;;  %696 = vmatpush.bf16.msra.mxu0 %v10249_v49  ;;  %v10377_v2 = vor.u32 %v14645_v62, %v10376_v61  ;;  %v10250_v3 = vld [vmem:[#allocation10 + $0xf8] sm:$0xf0]  ;;  %v14609_v6 = vld [vmem:[#allocation10 + $0xd4] sm:$0xf0]  ;;  %v14635_v7 = vld [vmem:[#allocation10 + $0x1ac] sm:$0xf] }
  0x3c   :  { %673 = vmatpush.bf16.msra.mxu3 %v10277_v58  ;;  %v10360_v10 = vld [vmem:[#allocation10 + $0x1c8] sm:$0xf]  ;;  %v14641_v11 = vld [vmem:[#allocation10 + $0x1d4] sm:$0xf0]  ;;  %v14631_v21 = vld [vmem:[#allocation10 + $0x18c] sm:$0xf] }
  0x3d   :  { %v10361_v13 = vor.u32 %v14641_v11, %v10360_v10  ;;  %v10216_v17 = vld [vmem:[#allocation10 + $0xa8] sm:$0xf]  ;;  %v14605_v20 = vld [vmem:[#allocation10 + $0xb4] sm:$0xf0]  ;;  %v10330_v22 = vld [vmem:[#allocation10 + $0x198] sm:$0xf0] }
  0x3e   :  { %587 = vmatpush.bf16.msra.mxu1 %v10129_v48  ;;  %15712 = vmatpush.bf16.msra.mxu2 %v10129_v48  ;;  %v10381_v48 = vor.u32 %v14643_v41, %v10378_v43  ;;  %v10217_v23 = vor.u32 %v14605_v20, %v10216_v17  ;;  %v10333_v24 = vor.u32 %v14631_v21, %v10330_v22  ;;  %v14603_v27 = vld [vmem:[#allocation10 + $0xac] sm:$0xf]  ;;  %v10218_v29 = vld [vmem:[#allocation10 + $0xb8] sm:$0xf0]  ;;  %v10328_v38 = vld [vmem:[#allocation10 + $0x188] sm:$0xf] }
  0x3f   :  { %v10221_v30 = vor.u32 %v14603_v27, %v10218_v29  ;;  %v14627_v35 = vld [vmem:[#allocation10 + $0x16c] sm:$0xf]  ;;  %v10314_v37 = vld [vmem:[#allocation10 + $0x178] sm:$0xf0]  ;;  %v14633_v39 = vld [vmem:[#allocation10 + $0x194] sm:$0xf0] }
  0x40   :  { %674 = vmatpush.bf16.msra.mxu3 %v10261_v5  ;;  %v10232_v5 = vld [vmem:[#allocation10 + $0xc8] sm:$0xf]  ;;  %v10317_v40 = vor.u32 %v14627_v35, %v10314_v37  ;;  %v14599_v41 = vld [vmem:[#allocation10 + $0x8c] sm:$0xf]  ;;  %v10329_v44 = vor.u32 %v14633_v39, %v10328_v38  ;;  %v14597_v45 = vld [vmem:[#allocation10 + $0x74] sm:$0xf0] }
  0x41   :  { %588 = vmatmul.bf16.vlgmr.msra.gmra.mxu1 %v16308_v59  ;;  %598 = vmatmul.bf16.vlgmr.msra.gmra.mxu2 %v16310_v60  ;;  %v10184_v43 = vld [vmem:[#allocation10 + $0x68] sm:$0xf]  ;;  %v14587_v20 = vld [vmem:[#allocation10 + $0x2c] sm:$0xf]  ;;  %s16231_s4 = smov [#allocation19]   ;;  %s10056_s1 = sshll.u32 %s17729_s8, 4  ;;  %s10057_s1 = int_to_ptr.hbm [resolvable:$true] %s10056_s1 }
  0x42   :  { %609 = vmatpush.bf16.msrb.mxu1 %v10369_v52  ;;  %638 = vmatpush.bf16.msrb.mxu2 %v10245_v53  ;;  %v14616_v52 = vld [vmem:[#allocation10 + $0x10c] sm:$0xf0]  ;;  %v14582_v53 = vld [vmem:[#allocation10 + $0x4] sm:$0xf]  ;;  %v10185_v49 = vor.u32 %v14597_v45, %v10184_v43  ;;  %v10312_v51 = vld [vmem:[#allocation10 + $0x168] sm:$0xf] }
  0x43   :  { %675 = vmatmul.bf16.vlgmr.msra.gmra.mxu3 %v16314_v14  ;;  %v10257_v57 = vor.u32 %v14616_v52, %v10256_v47  ;;  %v10133_v58 = vor.u32 %v14582_v53, %v10130_v54  ;;  %v14623_v47 = vld [vmem:[#allocation10 + $0x14c] sm:$0xf]  ;;  %v14629_v52 = vld [vmem:[#allocation10 + $0x174] sm:$0xf0]  ;;  %v14580_v54 = vld [vmem:[#allocation7 + $0x34] sm:$0xf] }
  0x44   :  { %783 = vmatpush.bf16.msrb.mxu3 %v10381_v48  ;;  %v10298_v48 = vld [vmem:[#allocation10 + $0x158] sm:$0xf0]  ;;  %v14595_v53 = vld [vmem:[#allocation10 + $0x6c] sm:$0xf]  ;;  %v10168_v62 = vld [vmem:[#allocation10 + $0x48] sm:$0xf] }
  0x45   :  { %v10301_v50 = vor.u32 %v14623_v47, %v10298_v48  ;;  %v10280_v17 = vld [vmem:[#allocation10 + $0x128] sm:$0xf]  ;;  %s10054_s5 = sshll.u32 %s16231_s4, 4  ;;  %s16232_s24 = smov [#allocation21]   ;;  %s10055_s5 = int_to_ptr.vmem [resolvable:$true] %s10054_s5 }
  0x46   :  { %610 = vmatpush.bf16.msrb.mxu1 %v10353_v63  ;;  %639 = vmatpush.bf16.msrb.mxu2 %v10229_v0  ;;  %v14611_v63 = vld [vmem:[#allocation10 + $0xec] sm:$0xf]  ;;  %v14578_v0 = vld [vmem:[#allocation7 + $0x24] sm:$0xf]  ;;  %v10264_v27 = vld [vmem:[#allocation10 + $0x108] sm:$0xf] }
  0x47   :  { %v10253_v4 = vor.u32 %v14611_v63, %v10250_v3  ;;  %v16328_v18 = vor.u32 %v14578_v0, %v10114_v1  ;;  %v14593_v63 = vld [vmem:[#allocation10 + $0x54] sm:$0xf0]  ;;  %v14619_v0 = vld [vmem:[#allocation10 + $0x12c] sm:$0xf]  ;;  %v10296_v3 = vld [vmem:[#allocation10 + $0x148] sm:$0xf] }
  0x48   :  { %784 = vmatpush.bf16.msrb.mxu3 %v10365_v56  ;;  %v10122_v56 = vld [vmem:[#allocation7 + $0x38] sm:$0xf0]  ;;  %v10169_v1 = vor.u32 %v14593_v63, %v10168_v62  ;;  %v10867_v62 = vld [vmem:[#allocation12 + $0x3c0] sm:$0xf]  ;;  %s10067_s25 = sshll.u32 %s16232_s24, 4  ;;  %s10069_s29 = sshll.u32 %s17730_s9, 4  ;;  %s10068_s25 = int_to_ptr.vmem [resolvable:$true] %s10067_s25  ;;  %s10070_s29 = int_to_ptr.hbm [resolvable:$true] %s10069_s29 }
  0x49   :  { %v10125_v10 = vor.u32 %v14580_v54, %v10122_v56  ;;  %s10043_s0 = sshll.u32 %s17728_s7, 4  ;;  %s10044_s0 = int_to_ptr.hbm [resolvable:$true] %s10043_s0 }
  0x4a   :  { %611 = vmatpush.bf16.msrb.mxu1 %v10337_v8  ;;  %640 = vmatpush.bf16.msrb.mxu2 %v10213_v9  ;;  %v10233_v8 = vor.u32 %v14609_v6, %v10232_v5  ;;  %v10346_v9 = vld [vmem:[#allocation10 + $0x1b8] sm:$0xf0] }
  0x4b   :  { %v10349_v12 = vor.u32 %v14635_v7, %v10346_v9  ;;  %v14591_v7 = vld [vmem:[#allocation10 + $0x4c] sm:$0xf]  ;;  %v10152_v9 = vld [vmem:[#allocation10 + $0x28] sm:$0xf] }
  0x4c   :  { %697 = vmatpush.bf16.msra.mxu0 %v10233_v8  ;;  %v10170_v8 = vld [vmem:[#allocation10 + $0x58] sm:$0xf0] }
  0x4d   :  { %785 = vmatpush.bf16.msrb.mxu3 %v10349_v12  ;;  %v10173_v11 = vor.u32 %v14591_v7, %v10170_v8  ;;  %v14589_v12 = vld [vmem:[#allocation10 + $0x34] sm:$0xf0] }
  0x4e   :  { %612 = vmatpush.bf16.msrb.mxu1 %v10321_v15  ;;  %641 = vmatpush.bf16.msrb.mxu2 %v10197_v16  ;;  %v14607_v15 = vld [vmem:[#allocation10 + $0xcc] sm:$0xf]  ;;  %v10234_v16 = vld [vmem:[#allocation10 + $0xd8] sm:$0xf0] }
  0x4f   :  { %v10237_v19 = vor.u32 %v14607_v15, %v10234_v16  ;;  %v10266_v15 = vld [vmem:[#allocation10 + $0x118] sm:$0xf0]  ;;  %v10153_v16 = vor.u32 %v14589_v12, %v10152_v9 }
  0x50   :  { %698 = vmatpush.bf16.msra.mxu0 %v10217_v23  ;;  %v10154_v23 = vld [vmem:[#allocation10 + $0x38] sm:$0xf0] }
  0x51   :  { %593 = vmatmul.bf16.gmra.mxu1 %v16317_v31  ;;  %603 = vmatmul.bf16.gmra.mxu2 %v16319_v32 }
  0x52   :  { %613 = vmatpush.bf16.msrb.mxu1 %v10305_v25  ;;  %642 = vmatpush.bf16.msrb.mxu2 %v10181_v26  ;;  %v10344_v25 = vld [vmem:[#allocation10 + $0x1a8] sm:$0xf]  ;;  %v14637_v26 = vld [vmem:[#allocation10 + $0x1b4] sm:$0xf0] }
  0x53   :  { %680 = vmatmul.bf16.gmra.mxu3 %v16323_v55  ;;  %v10345_v28 = vor.u32 %v14637_v26, %v10344_v25  ;;  %v14585_v25 = vld [vmem:[#allocation10 + $0x14] sm:$0xf0]  ;;  %v10157_v26 = vor.u32 %v14587_v20, %v10154_v23  ;;  %v10581_v23 = vld [vmem:[#allocation12 + $0x1a0] sm:$0xf0] }
  0x54   :  { %786 = vmatpush.bf16.msrb.mxu3 %v10333_v24  ;;  %v10136_v24 = vld [vmem:[#allocation10 + $0x8] sm:$0xf] }
  0x55   :  { %v10137_v29 = vor.u32 %v14585_v25, %v10136_v24  ;;  %v14758_v24 = vld [vmem:[#allocation12 + $0x384] sm:$0xf] }
  0x56   :  { %614 = vmatpush.bf16.msrb.mxu1 %v10289_v33  ;;  %643 = vmatpush.bf16.msrb.mxu2 %v10165_v34  ;;  %v10200_v33 = vld [vmem:[#allocation10 + $0x88] sm:$0xf]  ;;  %v14601_v34 = vld [vmem:[#allocation10 + $0x94] sm:$0xf0] }
  0x57   :  { %v10201_v36 = vor.u32 %v14601_v34, %v10200_v33  ;;  %v10138_v33 = vld [vmem:[#allocation10 + $0x18] sm:$0xf0] }
  0x58   :  { %787 = vmatpush.bf16.msrb.mxu3 %v10317_v40 }
  0x59   :  { %699 = vmatpush.bf16.msra.mxu0 %v10201_v36  ;;  %v16347_v36 = vld [vmem:[#allocation13] sm:$0xf] }
  0x5a   :  { %615 = vmatpush.bf16.msrb.mxu1 %v10273_v42  ;;  %644 = vmatpush.bf16.msrb.mxu2 %v10149_v46  ;;  %v10202_v42 = vld [vmem:[#allocation10 + $0x98] sm:$0xf0]  ;;  %v16350_v38 = vperm.slane %v16347_v36, 0 }
  0x5b   :  { %v10205_v46 = vor.u32 %v14599_v41, %v10202_v42 }
  0x5c   :  { %788 = vmatpush.bf16.msrb.mxu3 %v10301_v50 }
  0x5d   :  { %700 = vmatpush.bf16.msra.mxu0 %v10185_v49 }
  0x5e   :  { %616 = vmatpush.bf16.msrb.mxu1 %v10257_v57  ;;  %645 = vmatpush.bf16.msrb.mxu2 %v10133_v58  ;;  %v10313_v57 = vor.u32 %v14629_v52, %v10312_v51  ;;  %v10186_v58 = vld [vmem:[#allocation10 + $0x78] sm:$0xf0]  ;;  %v16377_v51 = vperm.slane %v16347_v36, 1 }
  0x5f   :  { %v10189_v61 = vor.u32 %v14595_v53, %v10186_v58  ;;  %v10611_v58 = vld [vmem:[#allocation12 + $0x1c0] sm:$0xf] }
  0x61   :  { %617 = vmatmul.bf16.vlgmr.msrb.gmra.mxu1 %v16314_v14  ;;  %646 = vmatmul.bf16.vlgmr.msrb.gmra.mxu2 %v16308_v59 }
  0x62   :  { %725 = vmatpush.bf16.msra.mxu1 %v10377_v2  ;;  %754 = vmatpush.bf16.msra.mxu2 %v10253_v4  ;;  %v10282_v2 = vld [vmem:[#allocation10 + $0x138] sm:$0xf0]  ;;  %v14625_v4 = vld [vmem:[#allocation10 + $0x154] sm:$0xf0] }
  0x63   :  { %685 = vmatmul.bf16.gmra.mxu3 %v16328_v18  ;;  %v10285_v5 = vor.u32 %v14619_v0, %v10282_v2  ;;  %v10297_v6 = vor.u32 %v14625_v4, %v10296_v3  ;;  %701 = vmatpush.bf16.msra.mxu0 %v10169_v1  ;;  %v14770_v0 = vld [vmem:[#allocation12 + $0x3dc] sm:$0xf0]  ;;  %v14702_v1 = vld [vmem:[#allocation12 + $0x1c4] sm:$0xf] }
  0x64   :  { %v10613_v2 = vld [vmem:[#allocation12 + $0x1e0] sm:$0xf0]  ;;  %v10868_v3 = vor.u32 %v14770_v0, %v10867_v62 }
  0x65   :  { %789 = vmatpush.bf16.msrb.mxu3 %v10285_v5  ;;  %v10616_v4 = vor.u32 %v14702_v1, %v10613_v2  ;;  %v14766_v5 = vld [vmem:[#allocation12 + $0x3c4] sm:$0xf] }
  0x66   :  { %726 = vmatpush.bf16.msra.mxu1 %v10361_v13  ;;  %755 = vmatpush.bf16.msra.mxu2 %v10237_v19  ;;  %v14615_v13 = vld [vmem:[#allocation10 + $0x10c] sm:$0xf]  ;;  %v14621_v19 = vld [vmem:[#allocation10 + $0x134] sm:$0xf0]  ;;  %v14678_v0 = vld [vmem:[#allocation12 + $0x104] sm:$0xf] }
  0x67   :  { %v10269_v21 = vor.u32 %v14615_v13, %v10266_v15  ;;  %v10281_v22 = vor.u32 %v14621_v19, %v10280_v17  ;;  %702 = vmatpush.bf16.msra.mxu0 %v10153_v16  ;;  %v10835_v16 = vld [vmem:[#allocation12 + $0x380] sm:$0xf] }
  0x68   :  { %v14762_v17 = vld [vmem:[#allocation12 + $0x39c] sm:$0xf0] }
  0x69   :  { %790 = vmatpush.bf16.msrb.mxu3 %v10269_v21  ;;  %v10836_v21 = vor.u32 %v14762_v17, %v10835_v16  ;;  %v14738_v17 = vld [vmem:[#allocation12 + $0x2dc] sm:$0xf0] }
  0x6a   :  { %727 = vmatpush.bf16.msra.mxu1 %v10345_v28  ;;  %756 = vmatpush.bf16.msra.mxu2 %v10221_v30  ;;  %v14617_v28 = vld [vmem:[#allocation10 + $0x114] sm:$0xf0]  ;;  %v14583_v30 = vld [vmem:[#allocation10 + $0xc] sm:$0xf] }
  0x6b   :  { %v10265_v34 = vor.u32 %v14617_v28, %v10264_v27  ;;  %v10141_v35 = vor.u32 %v14583_v30, %v10138_v33  ;;  %703 = vmatpush.bf16.msra.mxu0 %v10137_v29  ;;  %v10837_v27 = vld [vmem:[#allocation12 + $0x3a0] sm:$0xf0]  ;;  %v10547_v29 = vld [vmem:[#allocation12 + $0x140] sm:$0xf] }
  0x6c   :  { %v10840_v28 = vor.u32 %v14758_v24, %v10837_v27  ;;  %v14690_v30 = vld [vmem:[#allocation12 + $0x15c] sm:$0xf0] }
  0x6d   :  { %v10803_v33 = vld [vmem:[#allocation12 + $0x340] sm:$0xf] }
  0x6e   :  { %728 = vmatpush.bf16.msra.mxu1 %v10329_v44  ;;  %757 = vmatpush.bf16.msra.mxu2 %v10205_v46 }
  0x6f   :  { %704 = vmatmul.bf16.vlgmr.msra.gmra.mxu0 %v16308_v59 }
  0x71   :  { %622 = vmatmul.bf16.gmra.mxu1 %v16323_v55  ;;  %651 = vmatmul.bf16.gmra.mxu2 %v16317_v31 }
  0x72   :  { %729 = vmatpush.bf16.msra.mxu1 %v10313_v57  ;;  %758 = vmatpush.bf16.msra.mxu2 %v10189_v61  ;;  %v14706_v61 = vld [vmem:[#allocation12 + $0x1dc] sm:$0xf0] }
  0x73   :  { %690 = vmatmul.bf16.gmra.mxu3 %v10125_v10  ;;  %v10612_v63 = vor.u32 %v14706_v61, %v10611_v58  ;;  %v10771_v58 = vld [vmem:[#allocation12 + $0x300] sm:$0xf] }
  0x75   :  { %1710 = vmatpush.bf16.msrb.mxu0 %v10612_v63  ;;  %v14746_v63 = vld [vmem:[#allocation12 + $0x31c] sm:$0xf0] }
  0x76   :  { %730 = vmatpush.bf16.msra.mxu1 %v10297_v6  ;;  %759 = vmatpush.bf16.msra.mxu2 %v10173_v11  ;;  %v10869_v6 = vld [vmem:[#allocation12 + $0x3e0] sm:$0xf0]  ;;  %v14698_v11 = vld [vmem:[#allocation12 + $0x19c] sm:$0xf0]  ;;  %v10772_v2 = vor.u32 %v14746_v63, %v10771_v58 }
  0x77   :  { %v10872_v7 = vor.u32 %v14766_v5, %v10869_v6  ;;  %v10773_v5 = vld [vmem:[#allocation12 + $0x320] sm:$0xf0]  ;;  %v14658_v58 = vld [vmem:[#allocation12 + $0x5c] sm:$0xf0] }
  0x78   :  { %v14722_v63 = vld [vmem:[#allocation12 + $0x25c] sm:$0xf0] }
  0x79   :  { %1749 = vmatpush.bf16.msra.mxu3 %v10872_v7 }
  0x7a   :  { %731 = vmatpush.bf16.msra.mxu1 %v10281_v22  ;;  %760 = vmatpush.bf16.msra.mxu2 %v10157_v26  ;;  %v14694_v22 = vld [vmem:[#allocation12 + $0x184] sm:$0xf] }
  0x7b   :  { %v10584_v26 = vor.u32 %v14694_v22, %v10581_v23  ;;  %v10741_v23 = vld [vmem:[#allocation12 + $0x2e0] sm:$0xf0] }
  0x7d   :  { %1750 = vmatpush.bf16.msra.mxu3 %v10840_v28  ;;  %v10451_v28 = vld [vmem:[#allocation12 + $0x80] sm:$0xf] }
  0x7e   :  { %732 = vmatpush.bf16.msra.mxu1 %v10265_v34  ;;  %761 = vmatpush.bf16.msra.mxu2 %v10141_v35  ;;  %v10548_v35 = vor.u32 %v14690_v30, %v10547_v29  ;;  %v14666_v29 = vld [vmem:[#allocation12 + $0x9c] sm:$0xf0]  ;;  %v16230_v30 = vmov 0  }
  0x7f   :  { %709 = vmatmul.bf16.gmra.mxu0 %v16317_v31  ;;  %130 = vst [vmem:[#allocation3] sm:$0xff] %v16230_v30 }
  0x81   :  { %627 = vmatmul.bf16.gmra.mxu1 %v16328_v18  ;;  %656 = vmatmul.bf16.gmra.mxu2 %v16310_v60 }
  0x82   :  { %1723 = vmatpush.bf16.msrb.mxu1 %v10868_v3  ;;  %1736 = vmatpush.bf16.msrb.mxu2 %v10616_v4  ;;  %v10517_v3 = vld [vmem:[#allocation12 + $0x120] sm:$0xf0] }
  0x83   :  { %791 = vmatmul.bf16.vlgmr.msrb.gmra.mxu3 %v16314_v14  ;;  %v14742_v4 = vld [vmem:[#allocation12 + $0x304] sm:$0xf] }
  0x86   :  { %1724 = vmatpush.bf16.msrb.mxu1 %v10836_v21  ;;  %1737 = vmatpush.bf16.msrb.mxu2 %v10584_v26 }
  0x8f   :  { %714 = vmatmul.bf16.gmra.mxu0 %v16310_v60 }
  0x91   :  { %632 = vmatmul.bf16.gmra.mxu1 %v10125_v10  ;;  %661 = vmatmul.bf16.gmra.mxu2 %v16319_v32 }
  0x93   :  { %796 = vmatmul.bf16.gmra.mxu3 %v16323_v55 }
  0x9f   :  { %719 = vmatmul.bf16.gmra.mxu0 %v16319_v32 }
  0xa1   :  { %733 = vmatmul.bf16.vlgmr.msra.gmra.mxu1 %v16314_v14  ;;  %762 = vmatmul.bf16.vlgmr.msra.gmra.mxu2 %v16308_v59 }
  0xa3   :  { %801 = vmatmul.bf16.gmra.mxu3 %v16328_v18 }
  0xb1   :  { %767 = vmatmul.bf16.gmra.mxu2 %v16317_v31  ;;  %738 = vmatmul.bf16.gmra.mxu1 %v16323_v55 }
  0xb3   :  { %806 = vmatmul.bf16.gmra.mxu3 %v10125_v10 }
  0xbe   :  { %v589_v37 = vpop.f32.mrf.mxu1 }
  0xbf   :  { %v590_v8 = vadd.f32 %v589_v37, %v16350_v38  ;;  %v14754_v37 = vld [vmem:[#allocation12 + $0x35c] sm:$0xf0] }
  0xc1   :  { %772 = vmatmul.bf16.gmra.mxu2 %v16310_v60  ;;  %743 = vmatmul.bf16.gmra.mxu1 %v16328_v18 }
  0xc4   :  { %v599_v59 = vpop.f32.mrf.mxu2 }
  0xc5   :  { %v600_v14 = vadd.f32 %v599_v59, %v16350_v38  ;;  %v14686_v59 = vld [vmem:[#allocation12 + $0x144] sm:$0xf] }
  0xc6   :  { %v16355_v39 = vpop.f32.mrf.mxu1  ;;  %v676_v60 = vpop.f32.mrf.mxu3 }
  0xcc   :  { %v16357_v40 = vpop.f32.mrf.mxu2 }
  0xce   :  { %v594_v31 = vpop.f32.mrf.mxu1  ;;  %v16368_v45 = vpop.f32.mrf.mxu3 }
  0xcf   :  { %v595_v55 = vadd.f32 %v594_v31, %v16350_v38  ;;  %v10549_v31 = vld [vmem:[#allocation12 + $0x160] sm:$0xf0] }
  0xd1   :  { %777 = vmatmul.bf16.gmra.mxu2 %v16319_v32  ;;  %748 = vmatmul.bf16.gmra.mxu1 %v10125_v10  ;;  %v10579_v10 = vld [vmem:[#allocation12 + $0x180] sm:$0xf] }
  0xd2   :  { %v10580_v15 = vor.u32 %v14698_v11, %v10579_v10  ;;  %v10776_v10 = vor.u32 %v14742_v4, %v10773_v5  ;;  %v10483_v11 = vld [vmem:[#allocation12 + $0xc0] sm:$0xf]  ;;  %v14718_v5 = vld [vmem:[#allocation12 + $0x244] sm:$0xf] }
  0xd4   :  { %v604_v41 = vpop.f32.mrf.mxu2  ;;  %1711 = vmatpush.bf16.msrb.mxu0 %v10580_v15  ;;  %v10739_v15 = vld [vmem:[#allocation12 + $0x2c0] sm:$0xf] }
  0xd5   :  { %v16362_v42 = vadd.f32 %v604_v41, %v16350_v38  ;;  %v10804_v41 = vor.u32 %v14754_v37, %v10803_v33  ;;  %v10740_v21 = vor.u32 %v14738_v17, %v10739_v15  ;;  %v10452_v33 = vor.u32 %v14666_v29, %v10451_v28  ;;  %v14650_v15 = vld [vmem:[#allocation12 + $0x1c] sm:$0xf0]  ;;  %v10619_v28 = vld [vmem:[#allocation12 + $0x1c8] sm:$0xf] }
  0xd6   :  { %v16364_v43 = vpop.f32.mrf.mxu1  ;;  %v681_v48 = vpop.f32.mrf.mxu3 }
  0xd7   :  { %1725 = vmatpush.bf16.msrb.mxu1 %v10804_v41  ;;  %v14726_v41 = vld [vmem:[#allocation12 + $0x284] sm:$0xf] }
  0xd8   :  { %1712 = vmatpush.bf16.msrb.mxu0 %v10548_v35  ;;  %v14730_v35 = vld [vmem:[#allocation12 + $0x29c] sm:$0xf0] }
  0xdb   :  { %1726 = vmatpush.bf16.msrb.mxu1 %v10772_v2  ;;  %v10421_v2 = vld [vmem:[#allocation12 + $0x60] sm:$0xf0] }
  0xdc   :  { %v16366_v18 = vpop.f32.mrf.mxu2 }
  0xdd   :  { %17731 = vst [vmem:[#allocation28_spill] sm:$0xff] %v16366_v18  ;;  %v10413_v18 = vld [vmem:[#allocation12 + $0x38] sm:$0xf0] }
  0xde   :  { %v618_v44 = vpop.f32.mrf.mxu1  ;;  %v16379_v52 = vpop.f32.mrf.mxu3 }
  0xdf   :  { %v619_v19 = vadd.f32 %v618_v44, %v590_v8  ;;  %v10552_v44 = vor.u32 %v14686_v59, %v10549_v31  ;;  %v10520_v8 = vor.u32 %v14678_v0, %v10517_v3  ;;  %1727 = vmatpush.bf16.msrb.mxu1 %v10740_v21  ;;  %v14662_v31 = vld [vmem:[#allocation12 + $0x84] sm:$0xf] }
  0xe0   :  { %v14654_v0 = vld [vmem:[#allocation12 + $0x44] sm:$0xf] }
  0xe1   :  { %1738 = vmatpush.bf16.msrb.mxu2 %v10552_v44  ;;  %v14646_v21 = vld [vmem:[#allocation12 + $0x4] sm:$0xf] }
  0xe4   :  { %v647_v46 = vpop.f32.mrf.mxu2 }
  0xe5   :  { %v648_v12 = vadd.f32 %v647_v46, %v16377_v51  ;;  %v10805_v46 = vld [vmem:[#allocation12 + $0x360] sm:$0xf0]  ;;  %1739 = vmatpush.bf16.msrb.mxu2 %v10520_v8 }
  0xe6   :  { %v16370_v47 = vpop.f32.mrf.mxu1  ;;  %v686_v13 = vpop.f32.mrf.mxu3  ;;  %v10677_v8 = vld [vmem:[#allocation12 + $0x260] sm:$0xf0] }
  0xe7   :  { %v677_v34 = vadd.f32 %v676_v60, %v648_v12  ;;  %v14674_v12 = vld [vmem:[#allocation12 + $0xdc] sm:$0xf0] }
  0xe8   :  { %v10484_v16 = vor.u32 %v14674_v12, %v10483_v11  ;;  %v10387_v12 = vld [vmem:[#allocation12] sm:$0xf] }
  0xe9   :  { %v10383_v61 = vmul.f32 -1.442695, %v677_v34  ;;  %v10707_v34 = vld [vmem:[#allocation12 + $0x280] sm:$0xf] }
  0xea   :  { %v10708_v59 = vor.u32 %v14730_v35, %v10707_v34  ;;  %v10875_v34 = vld [vmem:[#allocation12 + $0x3c8] sm:$0xf] }
  0xeb   :  { %v14771_v35 = vld [vmem:[#allocation12 + $0x3e4] sm:$0xf0] }
  0xec   :  { %v16372_v49 = vpop.f32.mrf.mxu2  ;;  %1728 = vmatpush.bf16.msrb.mxu1 %v10708_v59  ;;  %v10876_v59 = vor.u32 %v14771_v35, %v10875_v34  ;;  %v16431_v34 = vperm.slane %v16347_v36, 3 }
  0xee   :  { %v623_v32 = vpop.f32.mrf.mxu1  ;;  %v16397_v7 = vpop.f32.mrf.mxu3 }
  0xef   :  { %v16374_v50 = vadd.f32 %v623_v32, %v595_v55  ;;  %v10382_v55 = vmul.f32 -1.442695, %v619_v19  ;;  %17732 = vst [vmem:[#allocation29_spill] sm:$0xff] %v16397_v7  ;;  %v14670_v19 = vld [vmem:[#allocation12 + $0xc4] sm:$0xf] }
  0xf1   :  { %15732 = vpow2.f32 %v10382_v55  ;;  %v10453_v55 = vld [vmem:[#allocation12 + $0xa0] sm:$0xf0] }
  0xf2   :  { %15734 = vpow2.f32 %v10383_v61  ;;  %v10675_v61 = vld [vmem:[#allocation12 + $0x240] sm:$0xf] }
  0xf3   :  { %v10676_v4 = vor.u32 %v14722_v63, %v10675_v61  ;;  %v10843_v61 = vld [vmem:[#allocation12 + $0x388] sm:$0xf] }
  0xf4   :  { %v652_v53 = vpop.f32.mrf.mxu2 }
  0xf5   :  { %v653_v54 = vadd.f32 %v652_v53, %v16377_v51  ;;  %v10515_v53 = vld [vmem:[#allocation12 + $0x100] sm:$0xf]  ;;  %1729 = vmatpush.bf16.msrb.mxu1 %v10676_v4  ;;  %v10589_v4 = vld [vmem:[#allocation12 + $0x1a8] sm:$0xf0] }
  0xf6   :  { %v16382_v56 = vpop.f32.mrf.mxu1 }
  0xf7   :  { %v16384_v57 = vadd.f32 %v681_v48, %v653_v54  ;;  %v14682_v54 = vld [vmem:[#allocation12 + $0x11c] sm:$0xf0]  ;;  %v15733_v26 = vpop.eup %15732 }
  0xf8   :  { %v10516_v62 = vor.u32 %v14682_v54, %v10515_v53  ;;  %v15735_v44 = vpop.eup %15734  ;;  %v10419_v54 = vld [vmem:[#allocation12 + $0x40] sm:$0xf] }
  0xf9   :  { %v16406_v3 = vadd.f32 1.0, %v15735_v44 }
  0xfa   :  { %1713 = vmatpush.bf16.msrb.mxu0 %v10516_v62  ;;  %v10420_v62 = vor.u32 %v14658_v58, %v10419_v54 }
  0xfb   :  { %vm897_vm4 = vweird.f32 %v16406_v3 }
  0xfc   :  { %v16387_v9 = vpop.f32.mrf.mxu2 }
  0xfe   :  { %v628_v20 = vpop.f32.mrf.mxu1  ;;  %1714 = vmatpush.bf16.msrb.mxu0 %v10484_v16  ;;  %v10643_v16 = vld [vmem:[#allocation12 + $0x200] sm:$0xf] }
  0xff   :  { %v16390_v25 = vadd.f32 %v628_v20, %v600_v14  ;;  %v14750_v14 = vld [vmem:[#allocation12 + $0x344] sm:$0xf] }
 0x100   :  { %v10808_v48 = vor.u32 %v14750_v14, %v10805_v46  ;;  %v10485_v20 = vld [vmem:[#allocation12 + $0xe0] sm:$0xf0]  ;;  %v16401_v14 = vadd.f32 1.0, %v15733_v26 }
 0x101   :  { %v10488_v22 = vor.u32 %v14670_v19, %v10485_v20  ;;  %v10388_v19 = vor.u32 %v14650_v15, %v10387_v12  ;;  %v14714_v20 = vld [vmem:[#allocation12 + $0x21c] sm:$0xf0]  ;;  %v10645_v26 = vld [vmem:[#allocation12 + $0x220] sm:$0xf0] }
 0x102   :  { %1751 = vmatpush.bf16.msra.mxu3 %v10808_v48  ;;  %1715 = vmatpush.bf16.msrb.mxu0 %v10452_v33  ;;  %v10456_v48 = vor.u32 %v14662_v31, %v10453_v55  ;;  %15736 = vrcp.f32 %v16401_v14  ;;  %v14707_v33 = vld [vmem:[#allocation12 + $0x1e4] sm:$0xf0]  ;;  %v14703_v31 = vld [vmem:[#allocation12 + $0x1cc] sm:$0xf]  ;;  %vm878_vm1 = vweird.f32 %v16401_v14 }
 0x103   :  { %1740 = vmatpush.bf16.msrb.mxu2 %v10488_v22  ;;  %v10389_v22 = vld [vmem:[#allocation12 + $0x20] sm:$0xf0]  ;;  %15738 = vrcp.f32 %v16406_v3  ;;  %v10621_v55 = vld [vmem:[#allocation12 + $0x1e8] sm:$0xf0] }
 0x104   :  { %v657_v32 = vpop.f32.mrf.mxu2  ;;  %v10624_v44 = vor.u32 %v14703_v31, %v10621_v55  ;;  %v14683_v31 = vld [vmem:[#allocation12 + $0x124] sm:$0xf0] }
 0x105   :  { %v658_v60 = vadd.f32 %v657_v32, %v16377_v51  ;;  %v10709_v32 = vld [vmem:[#allocation12 + $0x2a0] sm:$0xf0]  ;;  %v10779_v55 = vld [vmem:[#allocation12 + $0x308] sm:$0xf] }
 0x106   :  { %v16393_v1 = vpop.f32.mrf.mxu1  ;;  %1752 = vmatpush.bf16.msra.mxu3 %v10776_v10  ;;  %v10712_v53 = vor.u32 %v14726_v41, %v10709_v32  ;;  %1716 = vmatpush.bf16.msrb.mxu0 %v10420_v62  ;;  %v10680_v10 = vor.u32 %v14718_v5, %v10677_v8  ;;  %v14767_v41 = vld [vmem:[#allocation12 + $0x3cc] sm:$0xf]  ;;  %v10587_v32 = vld [vmem:[#allocation12 + $0x188] sm:$0xf] }
 0x107   :  { %v16395_v6 = vadd.f32 %v686_v13, %v658_v60  ;;  %v14734_v13 = vld [vmem:[#allocation12 + $0x2c4] sm:$0xf]  ;;  %v691_v60 = vpop.f32.mrf.mxu3  ;;  %1741 = vmatpush.bf16.msrb.mxu2 %v10456_v48  ;;  %v10877_v48 = vld [vmem:[#allocation12 + $0x3e8] sm:$0xf0] }
 0x108   :  { %v10744_v24 = vor.u32 %v14734_v13, %v10741_v23  ;;  %v10644_v13 = vor.u32 %v14714_v20, %v10643_v16  ;;  %v10392_v23 = vor.u32 %v14646_v21, %v10389_v22  ;;  %v10880_v54 = vor.u32 %v14767_v41, %v10877_v48  ;;  %v14695_v62 = vld [vmem:[#allocation12 + $0x18c] sm:$0xf]  ;;  %v16413_v63 = vpop.eup %15736  ;;  %v10555_v16 = vld [vmem:[#allocation12 + $0x148] sm:$0xf]  ;;  %v705_v41 = vpop.f32.mrf.mxu0 }
 0x109   :  { %v10845_v5 = vld [vmem:[#allocation12 + $0x3a8] sm:$0xf0]  ;;  %v16417_v8 = vpop.eup %15738  ;;  %v10592_v12 = vor.u32 %v14695_v62, %v10589_v4  ;;  %v14755_v21 = vld [vmem:[#allocation12 + $0x364] sm:$0xf0]  ;;  %vm879_vm0 = vweird.f32 %v16413_v63 }
 0x10a   :  { %1753 = vmatpush.bf16.msra.mxu3 %v10744_v24  ;;  %v14710_v24 = vld [vmem:[#allocation12 + $0x204] sm:$0xf]  ;;  %1717 = vmatpush.bf16.msrb.mxu0 %v10388_v19  ;;  %v10811_v19 = vld [vmem:[#allocation12 + $0x348] sm:$0xf]  ;;  %v14687_v22 = vld [vmem:[#allocation12 + $0x14c] sm:$0xf]  ;;  %vm898_vm3 = vweird.f32 %v16417_v8 }
 0x10b   :  { %v10648_v30 = vor.u32 %v14710_v24, %v10645_v26  ;;  %1730 = vmatpush.bf16.msrb.mxu1 %v10644_v13  ;;  %v10557_v13 = vld [vmem:[#allocation12 + $0x168] sm:$0xf0]  ;;  %v893_v24 = vmul.f32 %v16417_v8, %v16406_v3  ;;  %v10812_v26 = vor.u32 %v14755_v21, %v10811_v19  ;;  %v14747_v48 = vld [vmem:[#allocation12 + $0x324] sm:$0xf0]  ;;  %vm16442_vm2 = vmor %vm878_vm1, %vm879_vm0 }
 0x10c   :  { %v16399_v27 = vpop.f32.mrf.mxu2  ;;  %v10560_v35 = vor.u32 %v14687_v22, %v10557_v13  ;;  %v14739_v21 = vld [vmem:[#allocation12 + $0x2e4] sm:$0xf0]  ;;  %v14671_v22 = vld [vmem:[#allocation12 + $0xcc] sm:$0xf]  ;;  %vm16454_vm5 = vmor %vm897_vm4, %vm898_vm3 }
 0x10d   :  { %17733 = vst [vmem:[#allocation30_spill] sm:$0xff] %v16399_v27  ;;  %v894_v62 = vsub.f32 1.0, %v893_v24  ;;  %v10493_v13 = vld [vmem:[#allocation12 + $0xe8] sm:$0xf0] }
 0x10e   :  { %v633_v37 = vpop.f32.mrf.mxu1  ;;  %1754 = vmatpush.bf16.msra.mxu3 %v10712_v53  ;;  %v14699_v53 = vld [vmem:[#allocation12 + $0x1a4] sm:$0xf0]  ;;  %v14735_v24 = vld [vmem:[#allocation12 + $0x2cc] sm:$0xf] }
 0x10f   :  { %v16404_v46 = vadd.f32 %v633_v37, %v16362_v42  ;;  %v10424_v42 = vor.u32 %v14654_v0, %v10421_v2  ;;  %v10620_v37 = vor.u32 %v14707_v33, %v10619_v28  ;;  %v10588_v58 = vor.u32 %v14699_v53, %v10587_v32  ;;  %v16415_v0 = vpop.f32.mrf.mxu3  ;;  %1775 = vmatpush.bf16.msra.mxu1 %v10876_v59  ;;  %v14751_v28 = vld [vmem:[#allocation12 + $0x34c] sm:$0xf]  ;;  %v10523_v59 = vld [vmem:[#allocation12 + $0x108] sm:$0xf] }
 0x110   :  { %17736 = vst [vmem:[#allocation33_spill] sm:$0xff] %v16415_v0  ;;  %v16428_v33 = vperm.slane %v16347_v36, 2  ;;  %v14679_v32 = vld [vmem:[#allocation12 + $0x10c] sm:$0xf]  ;;  %v14765_v0 = vld [vmem:[#allocation12 + $0x3b4] sm:$0xf0] }
 0x111   :  { %17734 = vst [vmem:[#allocation31_spill] sm:$0xff] %v16404_v46  ;;  %1742 = vmatpush.bf16.msrb.mxu2 %v10424_v42  ;;  %1762 = vmatpush.bf16.msra.mxu0 %v10620_v37  ;;  %v14759_v42 = vld [vmem:[#allocation12 + $0x38c] sm:$0xf] }
 0x112   :  { %1755 = vmatpush.bf16.msra.mxu3 %v10680_v10  ;;  %v10848_v15 = vor.u32 %v14759_v42, %v10845_v5  ;;  %v10525_v53 = vld [vmem:[#allocation12 + $0x128] sm:$0xf0]  ;;  %v706_v42 = vadd.f32 %v705_v41, %v16428_v33  ;;  %v14667_v41 = vld [vmem:[#allocation12 + $0xa4] sm:$0xf0] }
 0x114   :  { %v662_v11 = vpop.f32.mrf.mxu2 }
 0x115   :  { %v663_v17 = vadd.f32 %v662_v11, %v16377_v51  ;;  %1743 = vmatpush.bf16.msrb.mxu2 %v10392_v23  ;;  %1763 = vmatpush.bf16.msra.mxu0 %v10588_v58  ;;  %v874_v23 = vmul.f32 %v16413_v63, %v16401_v14  ;;  %v10528_v58 = vor.u32 %v14679_v32, %v10525_v53  ;;  %v10715_v53 = vld [vmem:[#allocation12 + $0x288] sm:$0xf] }
 0x116   :  { %1756 = vmatpush.bf16.msra.mxu3 %v10648_v30  ;;  %v16419_v10 = vpop.f32.mrf.mxu1  ;;  %v10813_v30 = vld [vmem:[#allocation12 + $0x368] sm:$0xf0] }
 0x117   :  { %v16411_v29 = vadd.f32 %v691_v60, %v663_v17  ;;  %v14763_v60 = vld [vmem:[#allocation12 + $0x3a4] sm:$0xf0]  ;;  %17737 = vst [vmem:[#allocation34_spill] sm:$0xff] %v16419_v10  ;;  %v10816_v37 = vor.u32 %v14751_v28, %v10813_v30  ;;  %v875_v36 = vsub.f32 1.0, %v874_v23  ;;  %v792_v19 = vpop.f32.mrf.mxu3  ;;  %v10749_v28 = vld [vmem:[#allocation12 + $0x2e8] sm:$0xf0] }
 0x118   :  { %v10844_v2 = vor.u32 %v14763_v60, %v10843_v61  ;;  %v14691_v17 = vld [vmem:[#allocation12 + $0x164] sm:$0xf0]  ;;  %v14743_v61 = vld [vmem:[#allocation12 + $0x30c] sm:$0xf]  ;;  %v882_v30 = vand.u32 2147483647, %v16401_v14 }
 0x119   :  { %17735 = vst [vmem:[#allocation32_spill] sm:$0xff] %v16411_v29  ;;  %1788 = vmatpush.bf16.msra.mxu2 %v10624_v44  ;;  %v10556_v20 = vor.u32 %v14691_v17, %v10555_v16  ;;  %v10524_v44 = vor.u32 %v14683_v31, %v10523_v59  ;;  %v10781_v60 = vld [vmem:[#allocation12 + $0x328] sm:$0xf0]  ;;  %v10747_v16 = vld [vmem:[#allocation12 + $0x2c8] sm:$0xf] }
 0x11a   :  { %1801 = vmatpush.bf16.msrb.mxu3 %v10880_v54  ;;  %1776 = vmatpush.bf16.msra.mxu1 %v10844_v2  ;;  %v10780_v54 = vor.u32 %v14747_v48, %v10779_v55  ;;  %v10784_v4 = vor.u32 %v14743_v61, %v10781_v60  ;;  %v10748_v23 = vor.u32 %v14739_v21, %v10747_v16  ;;  %v10459_v55 = vld [vmem:[#allocation12 + $0x88] sm:$0xf]  ;;  %v10461_v60 = vld [vmem:[#allocation12 + $0xa8] sm:$0xf0]  ;;  %vm883_vm6 = vcmp.eq.f32.partialorder %v882_v30, 8.507059e+37 }
 0x11b   :  { %1764 = vmatpush.bf16.msra.mxu0 %v10556_v20  ;;  %v876_v48 = vmul.f32 %v16413_v63, %v875_v36  ;;  %v10460_v32 = vor.u32 %v14667_v41, %v10459_v55  ;;  %v901_v36 = vand.u32 2147483647, %v16406_v3  ;;  %v10683_v16 = vld [vmem:[#allocation12 + $0x248] sm:$0xf]  ;;  %v14649_v10 = vld [vmem:[#allocation12 + $0x1c] sm:$0xf] }
 0x11c   :  { %v16421_v11 = vpop.f32.mrf.mxu2  ;;  %v14723_v21 = vld [vmem:[#allocation12 + $0x264] sm:$0xf0]  ;;  %v14713_v29 = vld [vmem:[#allocation12 + $0x21c] sm:$0xf] }
 0x11d   :  { %17738 = vst [vmem:[#allocation35_spill] sm:$0xff] %v16421_v11  ;;  %1789 = vmatpush.bf16.msra.mxu2 %v10592_v12  ;;  %v10491_v12 = vld [vmem:[#allocation12 + $0xc8] sm:$0xf]  ;;  %vm902_vm7 = vcmp.eq.f32.partialorder %v901_v36, 8.507059e+37  ;;  %v14697_v11 = vld [vmem:[#allocation12 + $0x19c] sm:$0xf] }
 0x11e   :  { %1802 = vmatpush.bf16.msrb.mxu3 %v10848_v15  ;;  %1777 = vmatpush.bf16.msra.mxu1 %v10812_v26  ;;  %v14675_v15 = vld [vmem:[#allocation12 + $0xe4] sm:$0xf0]  ;;  %v734_v17 = vpop.f32.mrf.mxu1 }
 0x11f   :  { %1765 = vmatpush.bf16.msra.mxu0 %v10524_v44  ;;  %v10492_v20 = vor.u32 %v14675_v15, %v10491_v12  ;;  %v735_v59 = vadd.f32 %v734_v17, %v706_v42  ;;  %v895_v44 = vmul.f32 %v16417_v8, %v894_v62  ;;  %v10427_v12 = vld [vmem:[#allocation12 + $0x48] sm:$0xf]  ;;  %v877_v17 = vadd.f32 %v16413_v63, %v876_v48 }
 0x120   :  { %v14659_v15 = vld [vmem:[#allocation12 + $0x64] sm:$0xf0] }
 0x121   :  { %1790 = vmatpush.bf16.msra.mxu2 %v10560_v35  ;;  %v10496_v35 = vor.u32 %v14671_v22, %v10493_v13  ;;  %v14655_v22 = vld [vmem:[#allocation12 + $0x4c] sm:$0xf]  ;;  %v10395_v55 = vld [vmem:[#allocation12 + $0x8] sm:$0xf] }
 0x122   :  { %1803 = vmatpush.bf16.msrb.mxu3 %v10816_v37  ;;  %1778 = vmatpush.bf16.msra.mxu1 %v10780_v54  ;;  %v10752_v37 = vor.u32 %v14735_v24, %v10749_v28  ;;  %v14731_v54 = vld [vmem:[#allocation12 + $0x2a4] sm:$0xf0]  ;;  %v10429_v13 = vld [vmem:[#allocation12 + $0x68] sm:$0xf0]  ;;  %v903_v24 = vand.u32 2147483648, %v16406_v3  ;;  %v10684_v28 = vor.u32 %v14723_v21, %v10683_v16 }
 0x123   :  { %1766 = vmatpush.bf16.msra.mxu0 %v10492_v20  ;;  %v10716_v61 = vor.u32 %v14731_v54, %v10715_v53  ;;  %v10428_v20 = vor.u32 %v14659_v15, %v10427_v12  ;;  %v14651_v41 = vld [vmem:[#allocation12 + $0x24] sm:$0xf0]  ;;  %v14647_v53 = vld [vmem:[#allocation12 + $0xc] sm:$0xf] }
 0x124   :  { %v763_v2 = vpop.f32.mrf.mxu2  ;;  %v10397_v54 = vld [vmem:[#allocation12 + $0x28] sm:$0xf0]  ;;  %v904_v12 = vor.u32 1.1754944e-38, %v903_v24 }
 0x125   :  { %v764_v5 = vadd.f32 %v763_v2, %v16431_v34  ;;  %1791 = vmatpush.bf16.msra.mxu2 %v10528_v58  ;;  %v14663_v58 = vld [vmem:[#allocation12 + $0x8c] sm:$0xf]  ;;  %v10400_v16 = vor.u32 %v14647_v53, %v10397_v54 }
 0x126   :  { %1804 = vmatpush.bf16.msrb.mxu3 %v10784_v4  ;;  %1779 = vmatpush.bf16.msra.mxu1 %v10748_v23  ;;  %v14727_v2 = vld [vmem:[#allocation12 + $0x28c] sm:$0xf]  ;;  %v10464_v42 = vor.u32 %v14663_v58, %v10461_v60  ;;  %v881_v58 = vsel %vm16442_vm2, %v16413_v63, %v877_v17  ;;  %v10396_v60 = vor.u32 %v14651_v41, %v10395_v55  ;;  %v14708_v55 = vld [vmem:[#allocation12 + $0x1ec] sm:$0xf0] }
 0x127   :  { %v793_v26 = vadd.f32 %v792_v19, %v764_v5  ;;  %v10717_v4 = vld [vmem:[#allocation12 + $0x2a8] sm:$0xf0]  ;;  %v896_v19 = vadd.f32 %v16417_v8, %v895_v44  ;;  %1767 = vmatpush.bf16.msra.mxu0 %v10460_v32  ;;  %v10651_v44 = vld [vmem:[#allocation12 + $0x208] sm:$0xf]  ;;  %v10883_v41 = vld [vmem:[#allocation12 + $0x3d0] sm:$0xf] }
 0x128   :  { %v10720_v5 = vor.u32 %v14727_v2, %v10717_v4  ;;  %v14715_v32 = vld [vmem:[#allocation12 + $0x224] sm:$0xf0]  ;;  %v14711_v2 = vld [vmem:[#allocation12 + $0x20c] sm:$0xf] }
 0x129   :  { %v10384_v31 = vmul.f32 -1.442695, %v793_v26  ;;  %1792 = vmatpush.bf16.msra.mxu2 %v10496_v35  ;;  %v884_v26 = vand.u32 2147483648, %v16401_v14  ;;  %v10432_v35 = vor.u32 %v14655_v22, %v10429_v13  ;;  %v900_v3 = vsel %vm16454_vm5, %v16417_v8, %v896_v19  ;;  %v10653_v4 = vld [vmem:[#allocation12 + $0x228] sm:$0xf0] }
 0x12a   :  { %1805 = vmatpush.bf16.msrb.mxu3 %v10752_v37  ;;  %1780 = vmatpush.bf16.msra.mxu1 %v10716_v61  ;;  %v14719_v37 = vld [vmem:[#allocation12 + $0x24c] sm:$0xf]  ;;  %v10652_v15 = vor.u32 %v14715_v32, %v10651_v44  ;;  %v10656_v63 = vor.u32 %v14711_v2, %v10653_v4  ;;  %v905_v62 = vsel %vm902_vm7, %v904_v12, %v900_v3  ;;  %v14704_v32 = vld [vmem:[#allocation12 + $0x1d4] sm:$0xf]  ;;  %v14700_v12 = vld [vmem:[#allocation12 + $0x1ac] sm:$0xf0] }
 0x12b   :  { %15740 = vpow2.f32 %v10384_v31  ;;  %1768 = vmatpush.bf16.msra.mxu0 %v10428_v20  ;;  %v927_v19 = vmul.f32 0.0, %v905_v62  ;;  %v14768_v3 = vld [vmem:[#allocation12 + $0x3d4] sm:$0xf] }
 0x12c   :  { %15742 = vtanh.f32 %v735_v59  ;;  %v10685_v59 = vld [vmem:[#allocation12 + $0x268] sm:$0xf0]  ;;  %v14696_v62 = vld [vmem:[#allocation12 + $0x194] sm:$0xf] }
 0x12d   :  { %1793 = vmatpush.bf16.msra.mxu2 %v10464_v42  ;;  %v10688_v31 = vor.u32 %v14719_v37, %v10685_v59 }
 0x12e   :  { %1806 = vmatpush.bf16.msrb.mxu3 %v10720_v5  ;;  %v885_v5 = vor.u32 1.1754944e-38, %v884_v26  ;;  %1781 = vmatpush.bf16.msra.mxu1 %v10684_v28 }
 0x12f   :  { %1769 = vmatpush.bf16.msra.mxu0 %v10396_v60 }
 0x130   :  { %v886_v8 = vsel %vm883_vm6, %v885_v5, %v881_v58  ;;  %v10629_v58 = vld [vmem:[#allocation12 + $0x1f0] sm:$0xf0]  ;;  %v10595_v5 = vld [vmem:[#allocation12 + $0x190] sm:$0xf] }
 0x131   :  { %v15741_v48 = vpop.eup %15740  ;;  %1794 = vmatpush.bf16.msra.mxu2 %v10432_v35 }
 0x132   :  { %v911_v61 = vadd.f32 1.0, %v15741_v48  ;;  %v15743_v42 = vpop.eup %15742  ;;  %1807 = vmatpush.bf16.msrb.mxu3 %v10688_v31  ;;  %1782 = vmatpush.bf16.msra.mxu1 %v10652_v15  ;;  %v10627_v31 = vld [vmem:[#allocation12 + $0x1d0] sm:$0xf]  ;;  %v10632_v15 = vor.u32 %v14704_v32, %v10629_v58  ;;  %v14680_v58 = vld [vmem:[#allocation12 + $0x114] sm:$0xf] }
 0x133   :  { %v928_v17 = vmul.f32 %v15743_v42, %v886_v8  ;;  %v14772_v48 = vld [vmem:[#allocation12 + $0x3ec] sm:$0xf0]  ;;  %v10628_v4 = vor.u32 %v14708_v55, %v10627_v31 }
 0x134   :  { %15744 = vrcp.f32 %v911_v61  ;;  %v923_v14 = vand.u32 2147483648, %v911_v61  ;;  %v921_v36 = vand.u32 2147483647, %v911_v61  ;;  %vm917_vm9 = vweird.f32 %v911_v61  ;;  %v14764_v8 = vld [vmem:[#allocation12 + $0x3ac] sm:$0xf0] }
 0x135   :  { %1795 = vmatpush.bf16.msra.mxu2 %v10400_v16  ;;  %v16467_v21 = vadd.f32 %v928_v17, %v927_v19  ;;  %v10884_v42 = vor.u32 %v14772_v48, %v10883_v41  ;;  %v10597_v17 = vld [vmem:[#allocation12 + $0x1b0] sm:$0xf0]  ;;  %v10531_v41 = vld [vmem:[#allocation12 + $0x110] sm:$0xf] }
 0x136   :  { %1808 = vmatpush.bf16.msrb.mxu3 %v10656_v63  ;;  %v924_v23 = vor.u32 1.1754944e-38, %v923_v14  ;;  %vm922_vm11 = vcmp.eq.f32.partialorder %v921_v36, 8.507059e+37  ;;  %v10851_v63 = vld [vmem:[#allocation12 + $0x390] sm:$0xf]  ;;  %v14760_v19 = vld [vmem:[#allocation12 + $0x394] sm:$0xf]  ;;  %v10600_v36 = vor.u32 %v14696_v62, %v10597_v17 }
 0x137   :  { %15746 = vtanh.f32 %v16467_v21  ;;  %v10563_v14 = vld [vmem:[#allocation12 + $0x150] sm:$0xf]  ;;  %v14672_v17 = vld [vmem:[#allocation12 + $0xd4] sm:$0xf] }
 0x138   :  { %v14740_v62 = vld [vmem:[#allocation12 + $0x2ec] sm:$0xf0] }
 0x13a   :  { %v15745_v20 = vpop.eup %15744 }
 0x13b   :  { %v913_v22 = vmul.f32 %v15745_v20, %v911_v61  ;;  %vm918_vm8 = vweird.f32 %v15745_v20  ;;  %v10885_v61 = vld [vmem:[#allocation12 + $0x3f0] sm:$0xf0] }
 0x13c   :  { %vm919_vm10 = vmor %vm917_vm9, %vm918_vm8  ;;  %v10888_v16 = vor.u32 %v14768_v3, %v10885_v61  ;;  %v10533_v3 = vld [vmem:[#allocation12 + $0x130] sm:$0xf0] }
 0x13d   :  { %v914_v13 = vsub.f32 1.0, %v913_v22  ;;  %v15747_v28 = vpop.eup %15746  ;;  %v10596_v22 = vor.u32 %v14700_v12, %v10595_v5  ;;  %v14744_v61 = vld [vmem:[#allocation12 + $0x314] sm:$0xf]  ;;  %v10499_v12 = vld [vmem:[#allocation12 + $0xd0] sm:$0xf] }
 0x13f   :  { %v915_v30 = vmul.f32 %v15745_v20, %v914_v13  ;;  %v10852_v13 = vor.u32 %v14764_v8, %v10851_v63  ;;  %v10755_v8 = vld [vmem:[#allocation12 + $0x2d0] sm:$0xf] }
 0x141   :  { %v916_v26 = vadd.f32 %v15745_v20, %v915_v30  ;;  %v14692_v30 = vld [vmem:[#allocation12 + $0x16c] sm:$0xf0] }
 0x142   :  { %v10564_v31 = vor.u32 %v14692_v30, %v10563_v14  ;;  %v10756_v14 = vor.u32 %v14740_v62, %v10755_v8  ;;  %v10467_v30 = vld [vmem:[#allocation12 + $0x90] sm:$0xf] }
 0x143   :  { %v920_v24 = vsel %vm919_vm10, %v15745_v20, %v916_v26  ;;  %v10853_v20 = vld [vmem:[#allocation12 + $0x3b0] sm:$0xf0]  ;;  %v14716_v8 = vld [vmem:[#allocation12 + $0x22c] sm:$0xf0] }
 0x144   :  { %v925_v35 = vsel %vm922_vm11, %v924_v23, %v920_v24  ;;  %v10856_v26 = vor.u32 %v14760_v19, %v10853_v20  ;;  %v10819_v23 = vld [vmem:[#allocation12 + $0x350] sm:$0xf]  ;;  %v10501_v19 = vld [vmem:[#allocation12 + $0xf0] sm:$0xf0] }
 0x145   :  { %v931_v37 = vmul.f32 %v15747_v28, %v925_v35  ;;  %v14756_v24 = vld [vmem:[#allocation12 + $0x36c] sm:$0xf0]  ;;  %v14688_v28 = vld [vmem:[#allocation12 + $0x154] sm:$0xf] }
 0x146   :  { %v10565_v35 = vld [vmem:[#allocation12 + $0x170] sm:$0xf0]  ;;  %v10820_v55 = vor.u32 %v14756_v24, %v10819_v23  ;;  %v10723_v24 = vld [vmem:[#allocation12 + $0x290] sm:$0xf] }
 0x147   :  { %v932_v59 = vpack.c.bf16 %v931_v37, %v931_v37  ;;  %v14752_v37 = vld [vmem:[#allocation12 + $0x354] sm:$0xf]  ;;  %v10568_v48 = vor.u32 %v14688_v28, %v10565_v35  ;;  %v14732_v28 = vld [vmem:[#allocation12 + $0x2ac] sm:$0xf0] }
 0x148   :  { %v14736_v20 = vld [vmem:[#allocation12 + $0x2d4] sm:$0xf] }
 0x149   :  { %933 = vst [vmem:[#allocation3] sm:$0xf] %v932_v59  ;;  %v10821_v59 = vld [vmem:[#allocation12 + $0x370] sm:$0xf0] }
 0x14a   :  { %v10824_v32 = vor.u32 %v14752_v37, %v10821_v59  ;;  %v14664_v35 = vld [vmem:[#allocation12 + $0x94] sm:$0xf] }
 0x14b   :  { %v10469_v37 = vld [vmem:[#allocation12 + $0xb0] sm:$0xf0] }
 0x14c   :  { %v14728_v59 = vld [vmem:[#allocation12 + $0x294] sm:$0xf] }
 0x150   :  { %v934_v44 = vld [vmem:[#allocation3] sm:$0xff] }
 0x151   :  { %v1064_v53 = vunpack.c.l.b16 %v934_v44  ;;  %v1065_v54 = vunpack.c.h.b16 %v934_v44  ;;  %v14684_v44 = vld [vmem:[#allocation12 + $0x12c] sm:$0xf0] }
 0x153   :  { %v16470_v60 = vpack.c.b16 %v1064_v53, %v1064_v53  ;;  %v16472_v2 = vpack.c.b16 %v1065_v54, %v1065_v54  ;;  %v10787_v53 = vld [vmem:[#allocation12 + $0x310] sm:$0xf] }
 0x154   :  { %v14748_v54 = vld [vmem:[#allocation12 + $0x32c] sm:$0xf0] }
 0x155   :  { %1718 = vmatmul.bf16.vlgmr.msrb.gmra.mxu0 %v16470_v60  ;;  %1731 = vmatmul.bf16.vlgmr.msrb.gmra.mxu1 %v16472_v2  ;;  %v10788_v5 = vor.u32 %v14748_v54, %v10787_v53  ;;  %v10691_v54 = vld [vmem:[#allocation12 + $0x250] sm:$0xf] }
 0x156   :  { %1744 = vmatmul.bf16.vlgmr.msrb.gmra.mxu2 %v16470_v60  ;;  %1757 = vmatmul.bf16.vlgmr.msra.gmra.mxu3 %v16472_v2 }
 0x157   :  { %1814 = vmatpush.bf16.msrb.mxu0 %v10628_v4  ;;  %1827 = vmatpush.bf16.msrb.mxu1 %v10884_v42  ;;  %v10789_v4 = vld [vmem:[#allocation12 + $0x330] sm:$0xf0]  ;;  %v10532_v42 = vor.u32 %v14684_v44, %v10531_v41  ;;  %v10724_v41 = vor.u32 %v14732_v28, %v10723_v24  ;;  %v10435_v44 = vld [vmem:[#allocation12 + $0x50] sm:$0xf]  ;;  %v16488_v24 = vpop.f32.mrf.mxu1  ;;  %v10891_v28 = vld [vmem:[#allocation12 + $0x3d8] sm:$0xf] }
 0x158   :  { %1840 = vmatpush.bf16.msrb.mxu2 %v10632_v15  ;;  %1853 = vmatpush.bf16.msra.mxu3 %v10888_v16  ;;  %v14676_v15 = vld [vmem:[#allocation12 + $0xec] sm:$0xf0]  ;;  %v10536_v16 = vor.u32 %v14680_v58, %v10533_v3  ;;  %v10792_v63 = vor.u32 %v14744_v61, %v10789_v4  ;;  %v14656_v3 = vld [vmem:[#allocation12 + $0x54] sm:$0xf] }
 0x159   :  { %v14724_v58 = vld [vmem:[#allocation12 + $0x26c] sm:$0xf0]  ;;  %v10437_v61 = vld [vmem:[#allocation12 + $0x70] sm:$0xf0] }
 0x15a   :  { %v14720_v4 = vld [vmem:[#allocation12 + $0x254] sm:$0xf]  ;;  %v10440_v62 = vor.u32 %v14656_v3, %v10437_v61  ;;  %v14701_v3 = vld [vmem:[#allocation12 + $0x1b4] sm:$0xf0] }
 0x15b   :  { %1815 = vmatpush.bf16.msrb.mxu0 %v10596_v22  ;;  %1828 = vmatpush.bf16.msrb.mxu1 %v10852_v13  ;;  %v10757_v22 = vld [vmem:[#allocation12 + $0x2f0] sm:$0xf0]  ;;  %v10500_v13 = vor.u32 %v14676_v15, %v10499_v12  ;;  %v10692_v15 = vor.u32 %v14724_v58, %v10691_v54  ;;  %v10603_v58 = vld [vmem:[#allocation12 + $0x198] sm:$0xf] }
 0x15c   :  { %1841 = vmatpush.bf16.msrb.mxu2 %v10600_v36  ;;  %1854 = vmatpush.bf16.msra.mxu3 %v10856_v26  ;;  %v14668_v36 = vld [vmem:[#allocation12 + $0xac] sm:$0xf0]  ;;  %v10504_v26 = vor.u32 %v14672_v17, %v10501_v19  ;;  %v10760_v23 = vor.u32 %v14736_v20, %v10757_v22  ;;  %v14648_v19 = vld [vmem:[#allocation12 + $0x14] sm:$0xf] }
 0x15d   :  { %v10405_v20 = vld [vmem:[#allocation12 + $0x30] sm:$0xf0] }
 0x15e   :  { %v14712_v22 = vld [vmem:[#allocation12 + $0x214] sm:$0xf] }
 0x15f   :  { %1816 = vmatpush.bf16.msrb.mxu0 %v10564_v31  ;;  %1829 = vmatpush.bf16.msrb.mxu1 %v10820_v55  ;;  %v10725_v31 = vld [vmem:[#allocation12 + $0x2b0] sm:$0xf0]  ;;  %v10468_v55 = vor.u32 %v14668_v36, %v10467_v30  ;;  %v10635_v36 = vld [vmem:[#allocation12 + $0x1d8] sm:$0xf] }
 0x160   :  { %1842 = vmatpush.bf16.msrb.mxu2 %v10568_v48  ;;  %1855 = vmatpush.bf16.msra.mxu3 %v10824_v32  ;;  %v14660_v48 = vld [vmem:[#allocation12 + $0x6c] sm:$0xf0]  ;;  %v10472_v32 = vor.u32 %v14664_v35, %v10469_v37  ;;  %v10728_v53 = vor.u32 %v14728_v59, %v10725_v31  ;;  %v10661_v30 = vld [vmem:[#allocation12 + $0x230] sm:$0xf0]  ;;  %v14773_v35 = vld [vmem:[#allocation12 + $0x3f4] sm:$0xf0] }
 0x161   :  { %v10436_v12 = vor.u32 %v14660_v48, %v10435_v44  ;;  %v14705_v37 = vld [vmem:[#allocation12 + $0x1dc] sm:$0xf]  ;;  %v10408_v48 = vor.u32 %v14648_v19, %v10405_v20  ;;  %v10892_v54 = vor.u32 %v14773_v35, %v10891_v28 }
 0x162   :  { %v10893_v44 = vld [vmem:[#allocation12 + $0x3f8] sm:$0xf0] }
 0x163   :  { %1817 = vmatpush.bf16.msrb.mxu0 %v10532_v42  ;;  %1830 = vmatpush.bf16.msrb.mxu1 %v10788_v5  ;;  %v10693_v42 = vld [vmem:[#allocation12 + $0x270] sm:$0xf0]  ;;  %v10403_v5 = vld [vmem:[#allocation12 + $0x10] sm:$0xf] }
 0x164   :  { %1843 = vmatpush.bf16.msrb.mxu2 %v10536_v16  ;;  %1856 = vmatpush.bf16.msra.mxu3 %v10792_v63  ;;  %v14652_v16 = vld [vmem:[#allocation12 + $0x2c] sm:$0xf0]  ;;  %v10696_v17 = vor.u32 %v14720_v4, %v10693_v42  ;;  %v10859_v42 = vld [vmem:[#allocation12 + $0x398] sm:$0xf] }
 0x165   :  { %1770 = vmatmul.bf16.vlgmr.msra.gmra.mxu0 %v16470_v60  ;;  %1783 = vmatmul.bf16.vlgmr.msra.gmra.mxu1 %v16472_v2  ;;  %v10659_v63 = vld [vmem:[#allocation12 + $0x210] sm:$0xf]  ;;  %v10404_v59 = vor.u32 %v14652_v16, %v10403_v5  ;;  %v10605_v5 = vld [vmem:[#allocation12 + $0x1b8] sm:$0xf0]  ;;  %v10604_v16 = vor.u32 %v14701_v3, %v10603_v58  ;;  %v10795_v3 = vld [vmem:[#allocation12 + $0x318] sm:$0xf] }
 0x166   :  { %1796 = vmatmul.bf16.vlgmr.msra.gmra.mxu2 %v16470_v60  ;;  %1809 = vmatmul.bf16.vlgmr.msrb.gmra.mxu3 %v16472_v2  ;;  %v10660_v31 = vor.u32 %v14716_v8, %v10659_v63  ;;  %v10860_v63 = vor.u32 %v14765_v0, %v10859_v42  ;;  %v10571_v8 = vld [vmem:[#allocation12 + $0x158] sm:$0xf]  ;;  %v10608_v20 = vor.u32 %v14697_v11, %v10605_v5  ;;  %v10573_v0 = vld [vmem:[#allocation12 + $0x178] sm:$0xf0] }
 0x167   :  { %1818 = vmatpush.bf16.msrb.mxu0 %v10500_v13  ;;  %1831 = vmatpush.bf16.msrb.mxu1 %v10756_v14  ;;  %v16482_v13 = vpop.f32.mrf.mxu3  ;;  %v16484_v14 = vpop.f32.mrf.mxu2  ;;  %v10541_v42 = vld [vmem:[#allocation12 + $0x138] sm:$0xf0] }
 0x168   :  { %1844 = vmatpush.bf16.msrb.mxu2 %v10504_v26  ;;  %1857 = vmatpush.bf16.msra.mxu3 %v10760_v23  ;;  %v14709_v26 = vld [vmem:[#allocation12 + $0x1f4] sm:$0xf0]  ;;  %v16486_v23 = vpop.f32.mrf.mxu0  ;;  %v14745_v5 = vld [vmem:[#allocation12 + $0x31c] sm:$0xf] }
 0x16b   :  { %1819 = vmatpush.bf16.msrb.mxu0 %v10468_v55  ;;  %1832 = vmatpush.bf16.msrb.mxu1 %v10724_v41  ;;  %v10637_v55 = vld [vmem:[#allocation12 + $0x1f8] sm:$0xf0] }
 0x16c   :  { %1845 = vmatpush.bf16.msrb.mxu2 %v10472_v32  ;;  %1858 = vmatpush.bf16.msra.mxu3 %v10728_v53  ;;  %v14769_v41 = vld [vmem:[#allocation12 + $0x3dc] sm:$0xf]  ;;  %v10664_v32 = vor.u32 %v14712_v22, %v10661_v30  ;;  %v10636_v53 = vor.u32 %v14709_v26, %v10635_v36  ;;  %v10640_v61 = vor.u32 %v14705_v37, %v10637_v55  ;;  %v10827_v30 = vld [vmem:[#allocation12 + $0x358] sm:$0xf]  ;;  %v739_v37 = vpop.f32.mrf.mxu1 }
 0x16d   :  { %v10896_v4 = vor.u32 %v14769_v41, %v10893_v44  ;;  %v14757_v36 = vld [vmem:[#allocation12 + $0x374] sm:$0xf0]  ;;  %v14689_v26 = vld [vmem:[#allocation12 + $0x15c] sm:$0xf] }
 0x16e   :  { %v10828_v44 = vor.u32 %v14757_v36, %v10827_v30  ;;  %v14741_v30 = vld [vmem:[#allocation12 + $0x2f4] sm:$0xf0]  ;;  %v14673_v36 = vld [vmem:[#allocation12 + $0xdc] sm:$0xf] }
 0x16f   :  { %1820 = vmatpush.bf16.msrb.mxu0 %v10436_v12  ;;  %1833 = vmatpush.bf16.msrb.mxu1 %v10692_v15  ;;  %v14761_v12 = vld [vmem:[#allocation12 + $0x39c] sm:$0xf]  ;;  %v797_v19 = vpop.f32.mrf.mxu3 }
 0x170   :  { %1846 = vmatpush.bf16.msrb.mxu2 %v10440_v62  ;;  %1859 = vmatpush.bf16.msra.mxu3 %v10696_v17  ;;  %v10861_v15 = vld [vmem:[#allocation12 + $0x3b8] sm:$0xf0]  ;;  %v14693_v62 = vld [vmem:[#allocation12 + $0x174] sm:$0xf0]  ;;  %v768_v17 = vpop.f32.mrf.mxu2  ;;  %v710_v35 = vpop.f32.mrf.mxu0 }
 0x171   :  { %v10864_v22 = vor.u32 %v14761_v12, %v10861_v15  ;;  %v769_v28 = vadd.f32 %v768_v17, %v16431_v34  ;;  %v711_v55 = vadd.f32 %v710_v35, %v16428_v33  ;;  %v10572_v41 = vor.u32 %v14693_v62, %v10571_v8  ;;  %v10797_v12 = vld [vmem:[#allocation12 + $0x338] sm:$0xf0]  ;;  %v14677_v8 = vld [vmem:[#allocation12 + $0xf4] sm:$0xf0] }
 0x172   :  { %v10509_v35 = vld [vmem:[#allocation12 + $0xf8] sm:$0xf0] }
 0x173   :  { %1821 = vmatpush.bf16.msrb.mxu0 %v10404_v59  ;;  %1834 = vmatpush.bf16.msrb.mxu1 %v10660_v31  ;;  %v14753_v59 = vld [vmem:[#allocation12 + $0x35c] sm:$0xf]  ;;  %v16496_v11 = vadd.f32 %v797_v19, %v769_v28 }
 0x174   :  { %1847 = vmatpush.bf16.msrb.mxu2 %v10408_v48  ;;  %1860 = vmatpush.bf16.msra.mxu3 %v10664_v32  ;;  %v10829_v31 = vld [vmem:[#allocation12 + $0x378] sm:$0xf0]  ;;  %v10539_v48 = vld [vmem:[#allocation12 + $0x118] sm:$0xf]  ;;  %v16506_v28 = vpop.f32.mrf.mxu1 }
 0x175   :  { %v14685_v32 = vld [vmem:[#allocation12 + $0x134] sm:$0xf0]  ;;  %v10832_v58 = vor.u32 %v14753_v59, %v10829_v31 }
 0x176   :  { %1822 = vmatmul.bf16.vlgmr.msrb.gmra.mxu0 %v16470_v60  ;;  %1835 = vmatmul.bf16.vlgmr.msrb.gmra.mxu1 %v16472_v2  ;;  %v10540_v15 = vor.u32 %v14685_v32, %v10539_v48  ;;  %v10731_v32 = vld [vmem:[#allocation12 + $0x298] sm:$0xf] }
 0x177   :  { %1866 = vmatpush.bf16.msra.mxu0 %v10636_v53  ;;  %1879 = vmatpush.bf16.msra.mxu1 %v10892_v54  ;;  %v16498_v53 = vadd.f32 %v739_v37, %v711_v55  ;;  %v10576_v54 = vor.u32 %v14689_v26, %v10573_v0  ;;  %v16502_v17 = vpop.f32.mrf.mxu3  ;;  %v14737_v37 = vld [vmem:[#allocation12 + $0x2dc] sm:$0xf]  ;;  %v10475_v55 = vld [vmem:[#allocation12 + $0x98] sm:$0xf] }
 0x178   :  { %1892 = vmatpush.bf16.msra.mxu2 %v10640_v61  ;;  %1905 = vmatpush.bf16.msrb.mxu3 %v10896_v4  ;;  %v14749_v61 = vld [vmem:[#allocation12 + $0x334] sm:$0xf0]  ;;  %v14681_v4 = vld [vmem:[#allocation12 + $0x11c] sm:$0xf]  ;;  %v16500_v62 = vpop.f32.mrf.mxu2  ;;  %v16504_v26 = vpop.f32.mrf.mxu0 }
 0x179   :  { %1848 = vmatmul.bf16.vlgmr.msrb.gmra.mxu2 %v16470_v60  ;;  %1861 = vmatmul.bf16.vlgmr.msra.gmra.mxu3 %v16472_v2  ;;  %v10544_v19 = vor.u32 %v14681_v4, %v10541_v42  ;;  %v10765_v0 = vld [vmem:[#allocation12 + $0x2f8] sm:$0xf0] }
 0x17a   :  { %v10768_v48 = vor.u32 %v14737_v37, %v10765_v0  ;;  %v10733_v4 = vld [vmem:[#allocation12 + $0x2b8] sm:$0xf0] }
 0x17b   :  { %1867 = vmatpush.bf16.msra.mxu0 %v10604_v16  ;;  %1880 = vmatpush.bf16.msra.mxu1 %v10860_v63  ;;  %v10796_v16 = vor.u32 %v14749_v61, %v10795_v3  ;;  %v10507_v63 = vld [vmem:[#allocation12 + $0xd8] sm:$0xf]  ;;  %v10477_v3 = vld [vmem:[#allocation12 + $0xb8] sm:$0xf0] }
 0x17c   :  { %1893 = vmatpush.bf16.msra.mxu2 %v10608_v20  ;;  %1906 = vmatpush.bf16.msrb.mxu3 %v10864_v22  ;;  %v10800_v20 = vor.u32 %v14745_v5, %v10797_v12  ;;  %v10763_v22 = vld [vmem:[#allocation12 + $0x2d8] sm:$0xf]  ;;  %v10508_v59 = vor.u32 %v14677_v8, %v10507_v63  ;;  %v14729_v61 = vld [vmem:[#allocation12 + $0x29c] sm:$0xf]  ;;  %v744_v37 = vpop.f32.mrf.mxu1 }
 0x17d   :  { %v10764_v31 = vor.u32 %v14741_v30, %v10763_v22  ;;  %v10443_v12 = vld [vmem:[#allocation12 + $0x58] sm:$0xf]  ;;  %v14657_v30 = vld [vmem:[#allocation12 + $0x5c] sm:$0xf] }
 0x17e   :  { %v14725_v22 = vld [vmem:[#allocation12 + $0x274] sm:$0xf0]  ;;  %v10445_v0 = vld [vmem:[#allocation12 + $0x78] sm:$0xf0] }
 0x17f   :  { %1868 = vmatpush.bf16.msra.mxu0 %v10572_v41  ;;  %1881 = vmatpush.bf16.msra.mxu1 %v10828_v44  ;;  %v14669_v41 = vld [vmem:[#allocation12 + $0xb4] sm:$0xf0]  ;;  %v10512_v44 = vor.u32 %v14673_v36, %v10509_v35  ;;  %v802_v63 = vpop.f32.mrf.mxu3 }
 0x180   :  { %1894 = vmatpush.bf16.msra.mxu2 %v10576_v54  ;;  %1907 = vmatpush.bf16.msrb.mxu3 %v10832_v58  ;;  %v14733_v54 = vld [vmem:[#allocation12 + $0x2b4] sm:$0xf0]  ;;  %v14665_v58 = vld [vmem:[#allocation12 + $0x9c] sm:$0xf]  ;;  %v10476_v42 = vor.u32 %v14669_v41, %v10475_v55  ;;  %v715_v35 = vpop.f32.mrf.mxu0 }
 0x181   :  { %v10732_v5 = vor.u32 %v14733_v54, %v10731_v32  ;;  %v10480_v8 = vor.u32 %v14665_v58, %v10477_v3  ;;  %v716_v55 = vadd.f32 %v715_v35, %v16428_v33  ;;  %v10411_v32 = vld [vmem:[#allocation12 + $0x18] sm:$0xf]  ;;  %v10448_v3 = vor.u32 %v14657_v30, %v10445_v0  ;;  %v10669_v35 = vld [vmem:[#allocation12 + $0x238] sm:$0xf0] }
 0x182   :  { %v14653_v54 = vld [vmem:[#allocation12 + $0x34] sm:$0xf0] }
 0x183   :  { %1869 = vmatpush.bf16.msra.mxu0 %v10540_v15  ;;  %1882 = vmatpush.bf16.msra.mxu1 %v10796_v16  ;;  %v14661_v15 = vld [vmem:[#allocation12 + $0x74] sm:$0xf0]  ;;  %v773_v16 = vpop.f32.mrf.mxu2  ;;  %v16512_v58 = vadd.f32 %v744_v37, %v716_v55  ;;  %v844_v55 = vld [vmem:[#allocation15] sm:$0xf] }
 0x184   :  { %1895 = vmatpush.bf16.msra.mxu2 %v10544_v19  ;;  %1908 = vmatpush.bf16.msrb.mxu3 %v10800_v20  ;;  %v10736_v19 = vor.u32 %v14729_v61, %v10733_v4  ;;  %v10699_v20 = vld [vmem:[#allocation12 + $0x258] sm:$0xf]  ;;  %v774_v36 = vadd.f32 %v773_v16, %v16431_v34 }
 0x185   :  { %v10667_v4 = vld [vmem:[#allocation12 + $0x218] sm:$0xf] }
 0x186   :  { %v16510_v41 = vadd.f32 %v802_v63, %v774_v36  ;;  %v14717_v16 = vld [vmem:[#allocation12 + $0x234] sm:$0xf0]  ;;  %v10416_v63 = vor.u32 %v14649_v10, %v10413_v18 }
 0x187   :  { %1870 = vmatpush.bf16.msra.mxu0 %v10508_v59  ;;  %1883 = vmatpush.bf16.msra.mxu1 %v10764_v31  ;;  %v14721_v59 = vld [vmem:[#allocation12 + $0x25c] sm:$0xf] }
 0x188   :  { %1896 = vmatpush.bf16.msra.mxu2 %v10512_v44  ;;  %1909 = vmatpush.bf16.msrb.mxu3 %v10768_v48  ;;  %v10701_v31 = vld [vmem:[#allocation12 + $0x278] sm:$0xf0]  ;;  %v10444_v44 = vor.u32 %v14661_v15, %v10443_v12  ;;  %v10700_v48 = vor.u32 %v14725_v22, %v10699_v20  ;;  %v16516_v15 = vpop.f32.mrf.mxu3  ;;  %v16520_v20 = vpop.f32.mrf.mxu1 }
 0x189   :  { %v10704_v61 = vor.u32 %v14721_v59, %v10701_v31  ;;  %17744 = vst [vmem:[#allocation37_spill] sm:$0xff] %v16516_v15 }
 0x18a   :  { %17746 = vst [vmem:[#allocation39_spill] sm:$0xff] %v16520_v20  ;;  %v14822_v20 = vld [vmem:[#allocation12 + $0x184] sm:$0xf] }
 0x18b   :  { %1871 = vmatpush.bf16.msra.mxu0 %v10476_v42  ;;  %1884 = vmatpush.bf16.msra.mxu1 %v10732_v5  ;;  %v10412_v42 = vor.u32 %v14653_v54, %v10411_v32  ;;  %v10668_v5 = vor.u32 %v14717_v16, %v10667_v4  ;;  %v16514_v12 = vpop.f32.mrf.mxu2  ;;  %v16543_v4 = vperm.slane %v844_v55, 1 }
 0x18c   :  { %1897 = vmatpush.bf16.msra.mxu2 %v10480_v8  ;;  %1910 = vmatpush.bf16.msrb.mxu3 %v10736_v19  ;;  %17743 = vst [vmem:[#allocation36_spill] sm:$0xff] %v16514_v12  ;;  %v10672_v8 = vor.u32 %v14713_v29, %v10669_v35  ;;  %v16518_v19 = vpop.f32.mrf.mxu0  ;;  %v11131_v12 = vld [vmem:[#allocation12 + $0x1e0] sm:$0xf0] }
 0x18d   :  { %17745 = vst [vmem:[#allocation38_spill] sm:$0xff] %v16518_v19 }
 0x18f   :  { %1872 = vmatpush.bf16.msra.mxu0 %v10444_v44  ;;  %1885 = vmatpush.bf16.msra.mxu1 %v10700_v48  ;;  %v16540_v44 = vperm.slane %v844_v55, 0 }
 0x190   :  { %1898 = vmatpush.bf16.msra.mxu2 %v10448_v3  ;;  %1911 = vmatpush.bf16.msrb.mxu3 %v10704_v61  ;;  %v807_v10 = vpop.f32.mrf.mxu3  ;;  %v749_v37 = vpop.f32.mrf.mxu1 }
 0x193   :  { %1873 = vmatpush.bf16.msra.mxu0 %v10412_v42  ;;  %1886 = vmatpush.bf16.msra.mxu1 %v10668_v5  ;;  %v778_v22 = vpop.f32.mrf.mxu2 }
 0x194   :  { %1899 = vmatpush.bf16.msra.mxu2 %v10416_v63  ;;  %1912 = vmatpush.bf16.msrb.mxu3 %v10672_v8  ;;  %v779_v18 = vadd.f32 %v778_v22, %v16431_v34  ;;  %v720_v29 = vpop.f32.mrf.mxu0 }
 0x195   :  { %v721_v30 = vadd.f32 %v720_v29, %v16428_v33 }
 0x196   :  { %1874 = vmatmul.bf16.vlgmr.msra.gmra.mxu0 %v16470_v60  ;;  %1887 = vmatmul.bf16.vlgmr.msra.gmra.mxu1 %v16472_v2  ;;  %v16528_v36 = vadd.f32 %v807_v10, %v779_v18 }
 0x197   :  { %1900 = vmatmul.bf16.vlgmr.msra.gmra.mxu2 %v16470_v60  ;;  %1913 = vmatmul.bf16.vlgmr.msrb.gmra.mxu3 %v16472_v2  ;;  %v16530_v0 = vadd.f32 %v749_v37, %v721_v30 }
 0x198   :  { %17747 = vst [vmem:[#allocation40_spill] sm:$0xff] %v16528_v36  ;;  %v16534_v31 = vpop.f32.mrf.mxu1  ;;  %v16538_v2 = vpop.f32.mrf.mxu3  ;;  %v14898_v36 = vld [vmem:[#allocation12 + $0x3dc] sm:$0xf0] }
 0x199   :  { %17748 = vst [vmem:[#allocation41_spill] sm:$0xff] %v16530_v0  ;;  %v14830_v0 = vld [vmem:[#allocation12 + $0x1c4] sm:$0xf] }
 0x19a   :  { %17750 = vst [vmem:[#allocation43_spill] sm:$0xff] %v16534_v31 }
 0x19b   :  { %v16536_v60 = vpop.f32.mrf.mxu2  ;;  %17752 = vst [vmem:[#allocation45_spill] sm:$0xff] %v16538_v2  ;;  %v14834_v2 = vld [vmem:[#allocation12 + $0x1dc] sm:$0xf0] }
 0x19c   :  { %v16532_v59 = vpop.f32.mrf.mxu0  ;;  %17751 = vst [vmem:[#allocation44_spill] sm:$0xff] %v16536_v60 }
 0x19d   :  { %17749 = vst [vmem:[#allocation42_spill] sm:$0xff] %v16532_v59  ;;  %v11385_v59 = vld [vmem:[#allocation12 + $0x3c0] sm:$0xf] }
 0x19e   :  { %v11386_v15 = vor.u32 %v14898_v36, %v11385_v59  ;;  %v11097_v59 = vld [vmem:[#allocation12 + $0x180] sm:$0xf] }
 0x1a0   :  { %2850 = vmatpush.bf16.msrb.mxu1 %v11386_v15  ;;  %v11099_v15 = vld [vmem:[#allocation12 + $0x1a0] sm:$0xf0] }
 0x1d2   :  { %v1719_v48 = vpop.f32.mrf.mxu0  ;;  %v1732_v32 = vpop.f32.mrf.mxu1 }
 0x1d3   :  { %v1733_v54 = vadd.f32 %v1732_v32, %v1719_v48 }
 0x1d5   :  { %v1918_v3 = vadd.f32 %v1733_v54, %v16540_v44 }
 0x1d7   :  { %v10897_v61 = vmul.f32 -1.442695, %v1918_v3 }
 0x1d9   :  { %15748 = vpow2.f32 %v10897_v61  ;;  %v1745_v16 = vpop.f32.mrf.mxu2  ;;  %v1758_v35 = vpop.f32.mrf.mxu3  ;;  %v16553_v61 = vperm.slane %v844_v55, 3 }
 0x1da   :  { %v1759_v42 = vadd.f32 %v1758_v35, %v1745_v16  ;;  %v1721_v5 = vpop.f32.mrf.mxu0  ;;  %v1734_v63 = vpop.f32.mrf.mxu1 }
 0x1dc   :  { %v1919_v8 = vadd.f32 %v1759_v42, %v16543_v4 }
 0x1de   :  { %v10898_v22 = vmul.f32 -1.442695, %v1919_v8 }
 0x1df   :  { %v15749_v18 = vpop.eup %15748 }
 0x1e0   :  { %v16546_v29 = vadd.f32 1.0, %v15749_v18  ;;  %15750 = vpow2.f32 %v10898_v22  ;;  %v16558_v18 = vperm.slane %v844_v55, 2 }
 0x1e1   :  { %v1747_v10 = vpop.f32.mrf.mxu2  ;;  %v1760_v30 = vpop.f32.mrf.mxu3 }
 0x1e2   :  { %15752 = vrcp.f32 %v16546_v29  ;;  %v1771_v37 = vpop.f32.mrf.mxu0  ;;  %v1784_v48 = vpop.f32.mrf.mxu1  ;;  %v1937_v10 = vand.u32 2147483648, %v16546_v29  ;;  %vm1931_vm13 = vweird.f32 %v16546_v29 }
 0x1e3   :  { %v1785_v60 = vadd.f32 %v1784_v48, %v1771_v37  ;;  %v14826_v48 = vld [vmem:[#allocation12 + $0x19c] sm:$0xf0] }
 0x1e4   :  { %v1938_v7 = vor.u32 1.1754944e-38, %v1937_v10 }
 0x1e6   :  { %v15751_v32 = vpop.eup %15750 }
 0x1e7   :  { %v16549_v54 = vadd.f32 1.0, %v15751_v32  ;;  %v11129_v32 = vld [vmem:[#allocation12 + $0x1c0] sm:$0xf] }
 0x1e8   :  { %v16551_v3 = vpop.eup %15752  ;;  %v11130_v31 = vor.u32 %v14834_v2, %v11129_v32  ;;  %v592_v2 = vadd.f32 %v16355_v39, %v16350_v38  ;;  %v1920_v32 = vadd.f32 %v1785_v60, %v16558_v18  ;;  %v11102_v60 = vor.u32 %v14822_v20, %v11099_v15  ;;  %v14878_v15 = vld [vmem:[#allocation12 + $0x344] sm:$0xf] }
 0x1e9   :  { %v1927_v16 = vmul.f32 %v16551_v3, %v16546_v29  ;;  %15754 = vrcp.f32 %v16549_v54  ;;  %v1797_v35 = vpop.f32.mrf.mxu2  ;;  %v1810_v42 = vpop.f32.mrf.mxu3  ;;  %v1956_v55 = vand.u32 2147483648, %v16549_v54  ;;  %vm1932_vm12 = vweird.f32 %v16551_v3 }
 0x1ea   :  { %v1811_v5 = vadd.f32 %v1810_v42, %v1797_v35  ;;  %v1773_v63 = vpop.f32.mrf.mxu0  ;;  %v1786_v8 = vpop.f32.mrf.mxu1  ;;  %v14894_v35 = vld [vmem:[#allocation12 + $0x3c4] sm:$0xf]  ;;  %2837 = vmatpush.bf16.msrb.mxu0 %v11130_v31  ;;  %v621_v39 = vadd.f32 %v16370_v47, %v592_v2  ;;  %vm1950_vm15 = vweird.f32 %v16549_v54  ;;  %vm16584_vm0 = vmor %vm1931_vm13, %vm1932_vm12 }
 0x1eb   :  { %v1928_v22 = vsub.f32 1.0, %v1927_v16  ;;  %v11387_v8 = vld [vmem:[#allocation12 + $0x3e0] sm:$0xf0] }
 0x1ec   :  { %v1921_v30 = vadd.f32 %v1811_v5, %v16553_v61  ;;  %v11134_v5 = vor.u32 %v14830_v0, %v11131_v12  ;;  %v11390_v36 = vor.u32 %v14894_v35, %v11387_v8  ;;  %v11098_v12 = vor.u32 %v14826_v48, %v11097_v59  ;;  %v14890_v0 = vld [vmem:[#allocation12 + $0x39c] sm:$0xf0]  ;;  %v14886_v35 = vld [vmem:[#allocation12 + $0x384] sm:$0xf] }
 0x1ed   :  { %v1929_v16 = vmul.f32 %v16551_v3, %v1928_v22  ;;  %v1954_v22 = vand.u32 2147483647, %v16549_v54  ;;  %v1957_v8 = vor.u32 1.1754944e-38, %v1956_v55  ;;  %v11321_v55 = vld [vmem:[#allocation12 + $0x340] sm:$0xf] }
 0x1ee   :  { %v10899_v46 = vmul.f32 -1.442695, %v1921_v30  ;;  %v11353_v30 = vld [vmem:[#allocation12 + $0x380] sm:$0xf]  ;;  %2863 = vmatpush.bf16.msrb.mxu2 %v11134_v5  ;;  %2876 = vmatpush.bf16.msra.mxu3 %v11390_v36  ;;  %v14814_v48 = vld [vmem:[#allocation12 + $0x144] sm:$0xf] }
 0x1ef   :  { %v16562_v42 = vpop.eup %15754  ;;  %v1930_v27 = vadd.f32 %v16551_v3, %v1929_v16  ;;  %2838 = vmatpush.bf16.msrb.mxu0 %v11098_v12  ;;  %v14818_v36 = vld [vmem:[#allocation12 + $0x15c] sm:$0xf0]  ;;  %vm16589_vm1 = vcmp.eq.f32.partialorder %v1954_v22, 8.507059e+37 }
 0x1f0   :  { %v1946_v37 = vmul.f32 %v16562_v42, %v16549_v54  ;;  %15756 = vpow2.f32 %v10899_v46  ;;  %v11354_v46 = vor.u32 %v14890_v0, %v11353_v30  ;;  %vm1951_vm14 = vweird.f32 %v16562_v42  ;;  %v14882_v59 = vld [vmem:[#allocation12 + $0x35c] sm:$0xf0] }
 0x1f1   :  { %v1799_v63 = vpop.f32.mrf.mxu2  ;;  %v1812_v31 = vpop.f32.mrf.mxu3  ;;  %15758 = vtanh.f32 %v1920_v32  ;;  %v11322_v32 = vor.u32 %v14882_v59, %v11321_v55  ;;  %vm1952_vm2 = vmor %vm1950_vm15, %vm1951_vm14 }
 0x1f2   :  { %v1947_v19 = vsub.f32 1.0, %v1946_v37  ;;  %v11355_v63 = vld [vmem:[#allocation12 + $0x3a0] sm:$0xf0]  ;;  %2851 = vmatpush.bf16.msrb.mxu1 %v11354_v46  ;;  %v11065_v37 = vld [vmem:[#allocation12 + $0x140] sm:$0xf]  ;;  %2864 = vmatpush.bf16.msrb.mxu2 %v11102_v60  ;;  %v1934_v60 = vsel %vm16584_vm0, %v16551_v3, %v1930_v27 }
 0x1f3   :  { %v1823_v47 = vpop.f32.mrf.mxu0  ;;  %v1836_v10 = vpop.f32.mrf.mxu1  ;;  %v11358_v2 = vor.u32 %v14886_v35, %v11355_v63  ;;  %v11066_v20 = vor.u32 %v14818_v36, %v11065_v37  ;;  %v11323_v35 = vld [vmem:[#allocation12 + $0x360] sm:$0xf0]  ;;  %v14810_v37 = vld [vmem:[#allocation12 + $0x11c] sm:$0xf0]  ;;  %v17757_v27 = vand.u32 2147483647, %v16546_v29 }
 0x1f4   :  { %v1948_v5 = vmul.f32 %v16562_v42, %v1947_v19  ;;  %v1837_v16 = vadd.f32 %v1836_v10, %v1823_v47  ;;  %v11067_v19 = vld [vmem:[#allocation12 + $0x160] sm:$0xf0]  ;;  %v650_v47 = vadd.f32 %v16372_v49, %v16377_v51  ;;  %v11289_v36 = vld [vmem:[#allocation12 + $0x300] sm:$0xf] }
 0x1f5   :  { %2877 = vmatpush.bf16.msra.mxu3 %v11358_v2  ;;  %v11070_v46 = vor.u32 %v14814_v48, %v11067_v19  ;;  %2839 = vmatpush.bf16.msrb.mxu0 %v11066_v20  ;;  %v11033_v2 = vld [vmem:[#allocation12 + $0x100] sm:$0xf]  ;;  %vm1936_vm3 = vcmp.eq.f32.partialorder %v17757_v27, 8.507059e+37  ;;  %v14870_v31 = vld [vmem:[#allocation12 + $0x304] sm:$0xf] }
 0x1f6   :  { %v15757_v30 = vpop.eup %15756  ;;  %v1949_v12 = vadd.f32 %v16562_v42, %v1948_v5  ;;  %v1992_v22 = vadd.f32 %v1837_v16, %v621_v39  ;;  %v11326_v5 = vor.u32 %v14878_v15, %v11323_v35  ;;  %2852 = vmatpush.bf16.msrb.mxu1 %v11322_v32  ;;  %v14874_v3 = vld [vmem:[#allocation12 + $0x31c] sm:$0xf0]  ;;  %v14806_v39 = vld [vmem:[#allocation12 + $0x104] sm:$0xf]  ;;  %v1939_v55 = vsel %vm1936_vm3, %v1938_v7, %v1934_v60 }
 0x1f7   :  { %v16600_v63 = vadd.f32 1.0, %v15757_v30  ;;  %2865 = vmatpush.bf16.msrb.mxu2 %v11070_v46  ;;  %v11034_v49 = vor.u32 %v14810_v37, %v11033_v2  ;;  %v15759_v20 = vpop.eup %15758  ;;  %v11290_v30 = vor.u32 %v14874_v3, %v11289_v36  ;;  %v11001_v7 = vld [vmem:[#allocation12 + $0xc0] sm:$0xf]  ;;  %v14798_v2 = vld [vmem:[#allocation12 + $0xc4] sm:$0xf] }
 0x1f8   :  { %v1953_v10 = vsel %vm1952_vm2, %v16562_v42, %v1949_v12  ;;  %v10900_v16 = vmul.f32 -1.442695, %v1992_v22  ;;  %v11035_v42 = vld [vmem:[#allocation12 + $0x120] sm:$0xf0]  ;;  %v14802_v15 = vld [vmem:[#allocation12 + $0xdc] sm:$0xf0]  ;;  %v1981_v35 = vmul.f32 %v15759_v20, %v1939_v55 }
 0x1f9   :  { %v1958_v54 = vsel %vm16589_vm1, %v1957_v8, %v1953_v10  ;;  %15760 = vrcp.f32 %v16600_v63  ;;  %2878 = vmatpush.bf16.msra.mxu3 %v11326_v5  ;;  %v11038_v29 = vor.u32 %v14806_v39, %v11035_v42  ;;  %v11291_v12 = vld [vmem:[#allocation12 + $0x320] sm:$0xf0]  ;;  %v679_v8 = vadd.f32 %v16368_v45, %v650_v47  ;;  %2840 = vmatpush.bf16.msrb.mxu0 %v11034_v49  ;;  %v11257_v5 = vld [vmem:[#allocation12 + $0x2c0] sm:$0xf] }
 0x1fa   :  { %v1980_v59 = vmul.f32 0.0, %v1958_v54  ;;  %15762 = vpow2.f32 %v10900_v16  ;;  %2853 = vmatpush.bf16.msrb.mxu1 %v11290_v30  ;;  %v11294_v60 = vor.u32 %v14870_v31, %v11291_v12  ;;  %v11002_v22 = vor.u32 %v14802_v15, %v11001_v7  ;;  %v14866_v10 = vld [vmem:[#allocation12 + $0x2dc] sm:$0xf0]  ;;  %v11003_v27 = vld [vmem:[#allocation12 + $0xe0] sm:$0xf0] }
 0x1fb   :  { %v1825_v32 = vpop.f32.mrf.mxu0  ;;  %v1838_v46 = vpop.f32.mrf.mxu1  ;;  %2866 = vmatpush.bf16.msrb.mxu2 %v11038_v29  ;;  %v11258_v36 = vor.u32 %v14866_v10, %v11257_v5  ;;  %v14862_v54 = vld [vmem:[#allocation12 + $0x2c4] sm:$0xf]  ;;  %v11006_v39 = vor.u32 %v14798_v2, %v11003_v27  ;;  %v10969_v42 = vld [vmem:[#allocation12 + $0x80] sm:$0xf]  ;;  %vm1970_vm5 = vweird.f32 %v16600_v63 }
 0x1fc   :  { %v1849_v48 = vpop.f32.mrf.mxu2  ;;  %v1862_v19 = vpop.f32.mrf.mxu3  ;;  %v11259_v45 = vld [vmem:[#allocation12 + $0x2e0] sm:$0xf0]  ;;  %v16613_v3 = vadd.f32 %v1981_v35, %v1980_v59  ;;  %v14794_v20 = vld [vmem:[#allocation12 + $0x9c] sm:$0xf0]  ;;  %v1976_v32 = vand.u32 2147483648, %v16600_v63 }
 0x1fd   :  { %v1863_v0 = vadd.f32 %v1862_v19, %v1849_v48  ;;  %2879 = vmatpush.bf16.msra.mxu3 %v11294_v60  ;;  %v11262_v16 = vor.u32 %v14862_v54, %v11259_v45  ;;  %2841 = vmatpush.bf16.msrb.mxu0 %v11002_v22  ;;  %v1974_v48 = vand.u32 2147483647, %v16600_v63  ;;  %v10970_v19 = vor.u32 %v14794_v20, %v10969_v42  ;;  %v11225_v30 = vld [vmem:[#allocation12 + $0x280] sm:$0xf]  ;;  %v14854_v60 = vld [vmem:[#allocation12 + $0x284] sm:$0xf] }
 0x1fe   :  { %2854 = vmatpush.bf16.msrb.mxu1 %v11258_v36  ;;  %v14858_v29 = vld [vmem:[#allocation12 + $0x29c] sm:$0xf0]  ;;  %v11227_v22 = vld [vmem:[#allocation12 + $0x2a0] sm:$0xf0]  ;;  %v1977_v42 = vor.u32 1.1754944e-38, %v1976_v32 }
 0x1ff   :  { %v1993_v37 = vadd.f32 %v1863_v0, %v679_v8  ;;  %v16611_v47 = vpop.eup %15760  ;;  %2867 = vmatpush.bf16.msrb.mxu2 %v11006_v39  ;;  %v11226_v12 = vor.u32 %v14858_v29, %v11225_v30  ;;  %v14790_v8 = vld [vmem:[#allocation12 + $0x84] sm:$0xf]  ;;  %v11230_v10 = vor.u32 %v14854_v60, %v11227_v22  ;;  %v10937_v2 = vld [vmem:[#allocation12 + $0x40] sm:$0xf]  ;;  %vm1975_vm7 = vcmp.eq.f32.partialorder %v1974_v48, 8.507059e+37 }
 0x200   :  { %v1966_v55 = vmul.f32 %v16611_v47, %v16600_v63  ;;  %v15763_v31 = vpop.eup %15762  ;;  %v10971_v0 = vld [vmem:[#allocation12 + $0xa0] sm:$0xf0]  ;;  %vm1971_vm4 = vweird.f32 %v16611_v47  ;;  %v11193_v36 = vld [vmem:[#allocation12 + $0x240] sm:$0xf] }
 0x201   :  { %v10901_v49 = vmul.f32 -1.442695, %v1993_v37  ;;  %v16620_v46 = vadd.f32 1.0, %v15763_v31  ;;  %2880 = vmatpush.bf16.msra.mxu3 %v11262_v16  ;;  %v10974_v35 = vor.u32 %v14790_v8, %v10971_v0  ;;  %2842 = vmatpush.bf16.msrb.mxu0 %v10970_v19  ;;  %v14786_v37 = vld [vmem:[#allocation12 + $0x5c] sm:$0xf0]  ;;  %vm1972_vm6 = vmor %vm1970_vm5, %vm1971_vm4 }
 0x202   :  { %v1967_v59 = vsub.f32 1.0, %v1966_v55  ;;  %2855 = vmatpush.bf16.msrb.mxu1 %v11226_v12  ;;  %v14850_v27 = vld [vmem:[#allocation12 + $0x25c] sm:$0xf0]  ;;  %v10938_v45 = vor.u32 %v14786_v37, %v10937_v2  ;;  %v14782_v16 = vld [vmem:[#allocation12 + $0x44] sm:$0xf] }
 0x203   :  { %15764 = vpow2.f32 %v10901_v49  ;;  %2868 = vmatpush.bf16.msrb.mxu2 %v10974_v35  ;;  %v11194_v39 = vor.u32 %v14850_v27, %v11193_v36  ;;  %v10939_v55 = vld [vmem:[#allocation12 + $0x60] sm:$0xf0]  ;;  %v14778_v63 = vld [vmem:[#allocation12 + $0x1c] sm:$0xf0]  ;;  %v11137_v37 = vld [vmem:[#allocation12 + $0x1c8] sm:$0xf]  ;;  %vm2005_vm9 = vweird.f32 %v16620_v46 }
 0x204   :  { %15766 = vtanh.f32 %v16613_v3  ;;  %v1851_v7 = vpop.f32.mrf.mxu2  ;;  %v1864_v15 = vpop.f32.mrf.mxu3  ;;  %v1968_v5 = vmul.f32 %v16611_v47, %v1967_v59  ;;  %v14846_v49 = vld [vmem:[#allocation12 + $0x244] sm:$0xf]  ;;  %v10942_v20 = vor.u32 %v14782_v16, %v10939_v55  ;;  %v10905_v59 = vld [vmem:[#allocation12] sm:$0xf]  ;;  %v14899_v16 = vld [vmem:[#allocation12 + $0x3e4] sm:$0xf0]  ;;  %v708_v55 = vadd.f32 %v16486_v23, %v16428_v33 }
 0x205   :  { %15768 = vrcp.f32 %v16620_v46  ;;  %2881 = vmatpush.bf16.msra.mxu3 %v11230_v10  ;;  %v11195_v19 = vld [vmem:[#allocation12 + $0x260] sm:$0xf0]  ;;  %2843 = vmatpush.bf16.msrb.mxu0 %v10938_v45  ;;  %v11161_v12 = vld [vmem:[#allocation12 + $0x200] sm:$0xf]  ;;  %v2011_v15 = vand.u32 2147483648, %v16620_v46  ;;  %v10906_v48 = vor.u32 %v14778_v63, %v10905_v59 }
 0x206   :  { %v1969_v54 = vadd.f32 %v16611_v47, %v1968_v5  ;;  %v11198_v31 = vor.u32 %v14846_v49, %v11195_v19  ;;  %2856 = vmatpush.bf16.msrb.mxu1 %v11194_v39  ;;  %v14842_v32 = vld [vmem:[#allocation12 + $0x21c] sm:$0xf0]  ;;  %v14774_v35 = vld [vmem:[#allocation12 + $0x4] sm:$0xf]  ;;  %v14835_v45 = vld [vmem:[#allocation12 + $0x1e4] sm:$0xf0] }
 0x207   :  { %2869 = vmatpush.bf16.msrb.mxu2 %v10942_v20  ;;  %v11162_v22 = vor.u32 %v14842_v32, %v11161_v12  ;;  %v10907_v5 = vld [vmem:[#allocation12 + $0x20] sm:$0xf0]  ;;  %v11393_v39 = vld [vmem:[#allocation12 + $0x3c8] sm:$0xf]  ;;  %v2009_v49 = vand.u32 2147483647, %v16620_v46  ;;  %v11138_v20 = vor.u32 %v14835_v45, %v11137_v37 }
 0x208   :  { %v1973_v29 = vsel %vm1972_vm6, %v16611_v47, %v1969_v54  ;;  %v14838_v47 = vld [vmem:[#allocation12 + $0x204] sm:$0xf]  ;;  %v10910_v54 = vor.u32 %v14774_v35, %v10907_v5  ;;  %v14831_v19 = vld [vmem:[#allocation12 + $0x1cc] sm:$0xf]  ;;  %v11394_v59 = vor.u32 %v14899_v16, %v11393_v39  ;;  %v11105_v23 = vld [vmem:[#allocation12 + $0x188] sm:$0xf] }
 0x209   :  { %v15765_v30 = vpop.eup %15764  ;;  %v1978_v0 = vsel %vm1975_vm7, %v1977_v42, %v1973_v29  ;;  %v11163_v10 = vld [vmem:[#allocation12 + $0x220] sm:$0xf0]  ;;  %2882 = vmatpush.bf16.msra.mxu3 %v11198_v31  ;;  %2844 = vmatpush.bf16.msrb.mxu0 %v10906_v48  ;;  %v16641_v31 = vor.u32 1.1754944e-38, %v2011_v15  ;;  %v14895_v12 = vld [vmem:[#allocation12 + $0x3cc] sm:$0xf]  ;;  %vm2010_vm15 = vcmp.eq.f32.partialorder %v2009_v49, 8.507059e+37 }
 0x20a   :  { %v15767_v8 = vpop.eup %15766  ;;  %v16630_v7 = vadd.f32 1.0, %v15765_v30  ;;  %2857 = vmatpush.bf16.msrb.mxu1 %v11162_v22  ;;  %v11166_v42 = vor.u32 %v14838_v47, %v11163_v10  ;;  %v11139_v30 = vld [vmem:[#allocation12 + $0x1e8] sm:$0xf0]  ;;  %v14827_v48 = vld [vmem:[#allocation12 + $0x1a4] sm:$0xf0] }
 0x20b   :  { %v1984_v60 = vmul.f32 %v15767_v8, %v1978_v0  ;;  %v16633_v2 = vpop.eup %15768  ;;  %2870 = vmatpush.bf16.msrb.mxu2 %v10910_v54  ;;  %v11142_v63 = vor.u32 %v14831_v19, %v11139_v30  ;;  %v11395_v8 = vld [vmem:[#allocation12 + $0x3e8] sm:$0xf0]  ;;  %v11361_v32 = vld [vmem:[#allocation12 + $0x388] sm:$0xf]  ;;  %v11106_v47 = vor.u32 %v14827_v48, %v11105_v23  ;;  %v737_v54 = vadd.f32 %v16488_v24, %v708_v55 }
 0x20c   :  { %15770 = vrcp.f32 %v16630_v7  ;;  %v2001_v27 = vmul.f32 %v16633_v2, %v16620_v46  ;;  %v11398_v0 = vor.u32 %v14895_v12, %v11395_v8  ;;  %v14891_v35 = vld [vmem:[#allocation12 + $0x3a4] sm:$0xf0]  ;;  %vm2006_vm8 = vweird.f32 %v16633_v2  ;;  %v14823_v37 = vld [vmem:[#allocation12 + $0x18c] sm:$0xf] }
 0x20d   :  { %v1985_v36 = vpack.c.bf16 %v1984_v60, %v1984_v60  ;;  %2883 = vmatpush.bf16.msra.mxu3 %v11166_v42  ;;  %2889 = vmatpush.bf16.msra.mxu0 %v11138_v20  ;;  %v11362_v10 = vor.u32 %v14891_v35, %v11361_v32  ;;  %v11363_v16 = vld [vmem:[#allocation12 + $0x3a8] sm:$0xf0]  ;;  %v11073_v42 = vld [vmem:[#allocation12 + $0x148] sm:$0xf]  ;;  %v2028_v19 = vand.u32 2147483647, %v16630_v7  ;;  %vm16657_vm10 = vmor %vm2005_vm9, %vm2006_vm8  ;;  %v766_v35 = vadd.f32 %v16484_v14, %v16431_v34 }
 0x20e   :  { %v2002_v29 = vsub.f32 1.0, %v2001_v27  ;;  %2902 = vmatpush.bf16.msra.mxu1 %v11394_v59  ;;  %v14887_v27 = vld [vmem:[#allocation12 + $0x38c] sm:$0xf]  ;;  %v14819_v20 = vld [vmem:[#allocation12 + $0x164] sm:$0xf0]  ;;  %v2030_v24 = vand.u32 2147483648, %v16630_v7  ;;  %vm2024_vm12 = vweird.f32 %v16630_v7 }
 0x20f   :  { %1986 = vst [vmem:[#allocation3 + $0x4] sm:$0xf] %v1985_v36  ;;  %2915 = vmatpush.bf16.msra.mxu2 %v11142_v63  ;;  %v11074_v59 = vor.u32 %v14819_v20, %v11073_v42  ;;  %v11329_v63 = vld [vmem:[#allocation12 + $0x348] sm:$0xf]  ;;  %v14815_v48 = vld [vmem:[#allocation12 + $0x14c] sm:$0xf] }
 0x210   :  { %1987 = vst [vmem:[#allocation6] sm:$0xf] %v1985_v36  ;;  %v2003_v5 = vmul.f32 %v16633_v2, %v2002_v29  ;;  %v11107_v36 = vld [vmem:[#allocation12 + $0x1a8] sm:$0xf0]  ;;  %v11366_v29 = vor.u32 %v14887_v27, %v11363_v16  ;;  %v14883_v12 = vld [vmem:[#allocation12 + $0x364] sm:$0xf0] }
 0x211   :  { %2928 = vmatpush.bf16.msrb.mxu3 %v11398_v0  ;;  %2890 = vmatpush.bf16.msra.mxu0 %v11106_v47  ;;  %v11110_v30 = vor.u32 %v14823_v37, %v11107_v36  ;;  %v11330_v0 = vor.u32 %v14883_v12, %v11329_v63  ;;  %v11075_v32 = vld [vmem:[#allocation12 + $0x168] sm:$0xf0]  ;;  %v11041_v36 = vld [vmem:[#allocation12 + $0x108] sm:$0xf]  ;;  %vm16674_vm14 = vcmp.eq.f32.partialorder %v2028_v19, 8.507059e+37 }
 0x212   :  { %v16643_v60 = vpop.eup %15770  ;;  %2903 = vmatpush.bf16.msra.mxu1 %v11362_v10  ;;  %v14879_v47 = vld [vmem:[#allocation12 + $0x34c] sm:$0xf]  ;;  %v11009_v19 = vld [vmem:[#allocation12 + $0xc8] sm:$0xf] }
 0x213   :  { %v1875_v22 = vpop.f32.mrf.mxu0  ;;  %v1888_v15 = vpop.f32.mrf.mxu1  ;;  %v2020_v45 = vmul.f32 %v16643_v60, %v16630_v7  ;;  %vm2025_vm11 = vweird.f32 %v16643_v60  ;;  %2916 = vmatpush.bf16.msra.mxu2 %v11110_v30  ;;  %v11331_v37 = vld [vmem:[#allocation12 + $0x368] sm:$0xf0]  ;;  %v2031_v30 = vor.u32 1.1754944e-38, %v2030_v24  ;;  %v10977_v49 = vld [vmem:[#allocation12 + $0x88] sm:$0xf] }
 0x214   :  { %v1889_v39 = vadd.f32 %v1888_v15, %v1875_v22  ;;  %v2004_v22 = vadd.f32 %v16633_v2, %v2003_v5  ;;  %v11078_v15 = vor.u32 %v14815_v48, %v11075_v32  ;;  %v11334_v10 = vor.u32 %v14879_v47, %v11331_v37  ;;  %v14807_v16 = vld [vmem:[#allocation12 + $0x10c] sm:$0xf]  ;;  %vm16669_vm13 = vmor %vm2024_vm12, %vm2025_vm11  ;;  %v11233_v63 = vld [vmem:[#allocation12 + $0x288] sm:$0xf] }
 0x215   :  { %v2021_v8 = vsub.f32 1.0, %v2020_v45  ;;  %2929 = vmatpush.bf16.msrb.mxu3 %v11366_v29  ;;  %v11297_v45 = vld [vmem:[#allocation12 + $0x308] sm:$0xf]  ;;  %2891 = vmatpush.bf16.msra.mxu0 %v11074_v59  ;;  %v11043_v42 = vld [vmem:[#allocation12 + $0x128] sm:$0xf0] }
 0x216   :  { %v1994_v55 = vadd.f32 %v1889_v39, %v737_v54  ;;  %v14811_v54 = vld [vmem:[#allocation12 + $0x124] sm:$0xf0]  ;;  %v14871_v5 = vld [vmem:[#allocation12 + $0x30c] sm:$0xf]  ;;  %2904 = vmatpush.bf16.msra.mxu1 %v11330_v0  ;;  %v2008_v48 = vsel %vm16657_vm10, %v16633_v2, %v2004_v22  ;;  %v11046_v37 = vor.u32 %v14807_v16, %v11043_v42 }
 0x217   :  { %v2022_v27 = vmul.f32 %v16643_v60, %v2021_v8  ;;  %v14875_v39 = vld [vmem:[#allocation12 + $0x324] sm:$0xf0]  ;;  %v11042_v14 = vor.u32 %v14811_v54, %v11041_v36  ;;  %v11299_v8 = vld [vmem:[#allocation12 + $0x328] sm:$0xf0]  ;;  %2917 = vmatpush.bf16.msra.mxu2 %v11078_v15  ;;  %v2013_v42 = vsel %vm2010_vm15, %v16641_v31, %v2008_v48 }
 0x218   :  { %15772 = vtanh.f32 %v1994_v55  ;;  %v11298_v59 = vor.u32 %v14875_v39, %v11297_v45  ;;  %v795_v55 = vadd.f32 %v16482_v13, %v766_v35  ;;  %v14803_v36 = vld [vmem:[#allocation12 + $0xe4] sm:$0xf0]  ;;  %v11302_v54 = vor.u32 %v14871_v5, %v11299_v8  ;;  %v14799_v13 = vld [vmem:[#allocation12 + $0xcc] sm:$0xf] }
 0x219   :  { %v2023_v29 = vadd.f32 %v16643_v60, %v2022_v27  ;;  %v11265_v27 = vld [vmem:[#allocation12 + $0x2c8] sm:$0xf]  ;;  %2930 = vmatpush.bf16.msrb.mxu3 %v11334_v10  ;;  %v11011_v35 = vld [vmem:[#allocation12 + $0xe8] sm:$0xf0]  ;;  %2892 = vmatpush.bf16.msra.mxu0 %v11042_v14  ;;  %v11010_v22 = vor.u32 %v14803_v36, %v11009_v19 }
 0x21a   :  { %v1901_v12 = vpop.f32.mrf.mxu2  ;;  %v1914_v7 = vpop.f32.mrf.mxu3  ;;  %v14867_v45 = vld [vmem:[#allocation12 + $0x2e4] sm:$0xf0]  ;;  %v14863_v15 = vld [vmem:[#allocation12 + $0x2cc] sm:$0xf]  ;;  %2905 = vmatpush.bf16.msra.mxu1 %v11298_v59  ;;  %v11014_v46 = vor.u32 %v14799_v13, %v11011_v35 }
 0x21b   :  { %v1915_v32 = vadd.f32 %v1914_v7, %v1901_v12  ;;  %v1877_v47 = vpop.f32.mrf.mxu0  ;;  %v1890_v24 = vpop.f32.mrf.mxu1  ;;  %v2027_v0 = vsel %vm16669_vm13, %v16643_v60, %v2023_v29  ;;  %v11267_v39 = vld [vmem:[#allocation12 + $0x2e8] sm:$0xf0]  ;;  %v11266_v10 = vor.u32 %v14867_v45, %v11265_v27  ;;  %2918 = vmatpush.bf16.msra.mxu2 %v11046_v37  ;;  %v14795_v29 = vld [vmem:[#allocation12 + $0xa4] sm:$0xf0] }
 0x21c   :  { %v2032_v2 = vsel %vm16674_vm14, %v2031_v30, %v2027_v0  ;;  %v11270_v30 = vor.u32 %v14863_v15, %v11267_v39  ;;  %v14859_v14 = vld [vmem:[#allocation12 + $0x2a4] sm:$0xf0]  ;;  %v14791_v12 = vld [vmem:[#allocation12 + $0x8c] sm:$0xf]  ;;  %v10978_v31 = vor.u32 %v14795_v29, %v10977_v49 }
 0x21d   :  { %v1995_v23 = vadd.f32 %v1915_v32, %v795_v55  ;;  %v2054_v60 = vmul.f32 %v2032_v2, %v16467_v21  ;;  %2931 = vmatpush.bf16.msrb.mxu3 %v11302_v54  ;;  %2893 = vmatpush.bf16.msra.mxu0 %v11010_v22  ;;  %v10979_v8 = vld [vmem:[#allocation12 + $0xa8] sm:$0xf0]  ;;  %v11234_v32 = vor.u32 %v14859_v14, %v11233_v63  ;;  %v10945_v24 = vld [vmem:[#allocation12 + $0x48] sm:$0xf] }
 0x21e   :  { %v15773_v16 = vpop.eup %15772  ;;  %v14855_v21 = vld [vmem:[#allocation12 + $0x28c] sm:$0xf]  ;;  %2906 = vmatpush.bf16.msra.mxu1 %v11266_v10  ;;  %v10982_v47 = vor.u32 %v14791_v12, %v10979_v8  ;;  %v14787_v37 = vld [vmem:[#allocation12 + $0x64] sm:$0xf0] }
 0x21f   :  { %v2055_v5 = vmul.f32 %v15773_v16, %v2013_v42  ;;  %v10902_v20 = vmul.f32 -1.442695, %v1995_v23  ;;  %v11235_v59 = vld [vmem:[#allocation12 + $0x2a8] sm:$0xf0]  ;;  %2919 = vmatpush.bf16.msra.mxu2 %v11014_v46  ;;  %v11201_v19 = vld [vmem:[#allocation12 + $0x248] sm:$0xf]  ;;  %v10946_v45 = vor.u32 %v14787_v37, %v10945_v24 }
 0x220   :  { %v11238_v36 = vor.u32 %v14855_v21, %v11235_v59  ;;  %v14851_v27 = vld [vmem:[#allocation12 + $0x264] sm:$0xf0]  ;;  %v14783_v0 = vld [vmem:[#allocation12 + $0x4c] sm:$0xf] }
 0x221   :  { %v16691_v7 = vadd.f32 %v2055_v5, %v2054_v60  ;;  %15774 = vpow2.f32 %v10902_v20  ;;  %2932 = vmatpush.bf16.msrb.mxu3 %v11270_v30  ;;  %v10947_v54 = vld [vmem:[#allocation12 + $0x68] sm:$0xf0]  ;;  %2894 = vmatpush.bf16.msra.mxu0 %v10978_v31  ;;  %v11202_v2 = vor.u32 %v14851_v27, %v11201_v19  ;;  %v10913_v23 = vld [vmem:[#allocation12 + $0x8] sm:$0xf]  ;;  %v11145_v27 = vld [vmem:[#allocation12 + $0x1d0] sm:$0xf] }
 0x222   :  { %v1903_v55 = vpop.f32.mrf.mxu2  ;;  %v1916_v48 = vpop.f32.mrf.mxu3  ;;  %v14847_v13 = vld [vmem:[#allocation12 + $0x24c] sm:$0xf]  ;;  %2907 = vmatpush.bf16.msra.mxu1 %v11234_v32  ;;  %v14779_v22 = vld [vmem:[#allocation12 + $0x24] sm:$0xf0]  ;;  %v10950_v39 = vor.u32 %v14783_v0, %v10947_v54  ;;  %v14836_v0 = vld [vmem:[#allocation12 + $0x1ec] sm:$0xf0] }
 0x223   :  { %v11203_v35 = vld [vmem:[#allocation12 + $0x268] sm:$0xf0]  ;;  %2920 = vmatpush.bf16.msra.mxu2 %v10982_v47  ;;  %v11169_v16 = vld [vmem:[#allocation12 + $0x208] sm:$0xf]  ;;  %v10914_v46 = vor.u32 %v14779_v22, %v10913_v23  ;;  %v11401_v54 = vld [vmem:[#allocation12 + $0x3d0] sm:$0xf] }
 0x224   :  { %v14843_v42 = vld [vmem:[#allocation12 + $0x224] sm:$0xf0]  ;;  %v11206_v10 = vor.u32 %v14847_v13, %v11203_v35  ;;  %v14775_v5 = vld [vmem:[#allocation12 + $0xc] sm:$0xf]  ;;  %v14900_v13 = vld [vmem:[#allocation12 + $0x3ec] sm:$0xf0] }
 0x225   :  { %2933 = vmatpush.bf16.msrb.mxu3 %v11238_v36  ;;  %v10915_v20 = vld [vmem:[#allocation12 + $0x28] sm:$0xf0]  ;;  %2895 = vmatpush.bf16.msra.mxu0 %v10946_v45  ;;  %v11170_v30 = vor.u32 %v14843_v42, %v11169_v16  ;;  %v14832_v35 = vld [vmem:[#allocation12 + $0x1d4] sm:$0xf] }
 0x226   :  { %v14839_v49 = vld [vmem:[#allocation12 + $0x20c] sm:$0xf]  ;;  %2908 = vmatpush.bf16.msra.mxu1 %v11202_v2  ;;  %v10918_v63 = vor.u32 %v14775_v5, %v10915_v20  ;;  %v11147_v22 = vld [vmem:[#allocation12 + $0x1f0] sm:$0xf0]  ;;  %v11113_v5 = vld [vmem:[#allocation12 + $0x190] sm:$0xf] }
 0x227   :  { %v15775_v15 = vpop.eup %15774  ;;  %v11171_v29 = vld [vmem:[#allocation12 + $0x228] sm:$0xf0]  ;;  %2921 = vmatpush.bf16.msra.mxu2 %v10950_v39  ;;  %v11403_v39 = vld [vmem:[#allocation12 + $0x3f0] sm:$0xf0]  ;;  %v14828_v20 = vld [vmem:[#allocation12 + $0x1ac] sm:$0xf0] }
 0x228   :  { %v2038_v60 = vadd.f32 1.0, %v15775_v15  ;;  %v11174_v14 = vor.u32 %v14839_v49, %v11171_v29  ;;  %v14896_v15 = vld [vmem:[#allocation12 + $0x3d4] sm:$0xf]  ;;  %v11369_v29 = vld [vmem:[#allocation12 + $0x390] sm:$0xf] }
 0x229   :  { %2934 = vmatpush.bf16.msrb.mxu3 %v11206_v10  ;;  %2896 = vmatpush.bf16.msra.mxu0 %v10914_v46  ;;  %v11402_v10 = vor.u32 %v14900_v13, %v11401_v54  ;;  %v11150_v46 = vor.u32 %v14832_v35, %v11147_v22  ;;  %v11406_v49 = vor.u32 %v14896_v15, %v11403_v39  ;;  %v14812_v13 = vld [vmem:[#allocation12 + $0x12c] sm:$0xf0]  ;;  %v14808_v15 = vld [vmem:[#allocation12 + $0x114] sm:$0xf] }
 0x22a   :  { %15776 = vrcp.f32 %v2038_v60  ;;  %2909 = vmatpush.bf16.msra.mxu1 %v11170_v30  ;;  %v2050_v21 = vand.u32 2147483648, %v2038_v60  ;;  %v2048_v55 = vand.u32 2147483647, %v2038_v60  ;;  %vm2044_vm1 = vweird.f32 %v2038_v60  ;;  %v14892_v30 = vld [vmem:[#allocation12 + $0x3ac] sm:$0xf0] }
 0x22b   :  { %2922 = vmatpush.bf16.msra.mxu2 %v10918_v63  ;;  %15778 = vtanh.f32 %v16691_v7  ;;  %v14824_v63 = vld [vmem:[#allocation12 + $0x194] sm:$0xf]  ;;  %v14876_v22 = vld [vmem:[#allocation12 + $0x32c] sm:$0xf0] }
 0x22c   :  { %v2051_v32 = vor.u32 1.1754944e-38, %v2050_v21  ;;  %vm2049_vm3 = vcmp.eq.f32.partialorder %v2048_v55, 8.507059e+37  ;;  %v11370_v21 = vor.u32 %v14892_v30, %v11369_v29  ;;  %v14820_v55 = vld [vmem:[#allocation12 + $0x16c] sm:$0xf0]  ;;  %v11051_v39 = vld [vmem:[#allocation12 + $0x130] sm:$0xf0] }
 0x22d   :  { %2935 = vmatpush.bf16.msrb.mxu3 %v11174_v14  ;;  %v11115_v14 = vld [vmem:[#allocation12 + $0x1b0] sm:$0xf0]  ;;  %v11054_v29 = vor.u32 %v14808_v15, %v11051_v39  ;;  %v11209_v15 = vld [vmem:[#allocation12 + $0x250] sm:$0xf] }
 0x22e   :  { %v14852_v39 = vld [vmem:[#allocation12 + $0x26c] sm:$0xf0] }
 0x230   :  { %v15777_v12 = vpop.eup %15776 }
 0x231   :  { %v2040_v31 = vmul.f32 %v15777_v12, %v2038_v60  ;;  %vm2045_vm0 = vweird.f32 %v15777_v12  ;;  %v15779_v24 = vpop.eup %15778  ;;  %v11146_v60 = vor.u32 %v14836_v0, %v11145_v27  ;;  %v11339_v27 = vld [vmem:[#allocation12 + $0x370] sm:$0xf0] }
 0x232   :  { %vm2046_vm2 = vmor %vm2044_vm1, %vm2045_vm0 }
 0x233   :  { %v2041_v8 = vsub.f32 1.0, %v2040_v31  ;;  %v11371_v31 = vld [vmem:[#allocation12 + $0x3b0] sm:$0xf0] }
 0x235   :  { %v2042_v59 = vmul.f32 %v15777_v12, %v2041_v8  ;;  %v11114_v8 = vor.u32 %v14828_v20, %v11113_v5 }
 0x237   :  { %v2043_v48 = vadd.f32 %v15777_v12, %v2042_v59  ;;  %v11081_v59 = vld [vmem:[#allocation12 + $0x150] sm:$0xf] }
 0x238   :  { %v11082_v0 = vor.u32 %v14820_v55, %v11081_v59 }
 0x239   :  { %v2047_v47 = vsel %vm2046_vm2, %v15777_v12, %v2043_v48  ;;  %v14888_v12 = vld [vmem:[#allocation12 + $0x394] sm:$0xf]  ;;  %v11118_v48 = vor.u32 %v14824_v63, %v11115_v14  ;;  %v11273_v63 = vld [vmem:[#allocation12 + $0x2d0] sm:$0xf] }
 0x23a   :  { %v2052_v37 = vsel %vm2049_vm3, %v2051_v32, %v2047_v47  ;;  %v11374_v32 = vor.u32 %v14888_v12, %v11371_v31  ;;  %v11337_v47 = vld [vmem:[#allocation12 + $0x350] sm:$0xf]  ;;  %v14800_v12 = vld [vmem:[#allocation12 + $0xd4] sm:$0xf] }
 0x23b   :  { %v2058_v19 = vmul.f32 %v15779_v24, %v2052_v37  ;;  %v14884_v24 = vld [vmem:[#allocation12 + $0x36c] sm:$0xf0]  ;;  %v14816_v37 = vld [vmem:[#allocation12 + $0x154] sm:$0xf] }
 0x23c   :  { %v11338_v54 = vor.u32 %v14884_v24, %v11337_v47  ;;  %v14868_v14 = vld [vmem:[#allocation12 + $0x2ec] sm:$0xf0]  ;;  %v11019_v31 = vld [vmem:[#allocation12 + $0xf0] sm:$0xf0] }
 0x23d   :  { %v2059_v36 = vpack.c.bf16 %v2058_v19, %v2058_v19  ;;  %v11083_v19 = vld [vmem:[#allocation12 + $0x170] sm:$0xf0]  ;;  %v11274_v55 = vor.u32 %v14868_v14, %v11273_v63  ;;  %v11022_v47 = vor.u32 %v14800_v12, %v11019_v31  ;;  %v11177_v63 = vld [vmem:[#allocation12 + $0x210] sm:$0xf] }
 0x23e   :  { %v11086_v35 = vor.u32 %v14816_v37, %v11083_v19  ;;  %v11241_v37 = vld [vmem:[#allocation12 + $0x290] sm:$0xf] }
 0x23f   :  { %2060 = vst [vmem:[#allocation3] sm:$0xf] %v2059_v36  ;;  %v14880_v36 = vld [vmem:[#allocation12 + $0x354] sm:$0xf]  ;;  %v14860_v19 = vld [vmem:[#allocation12 + $0x2ac] sm:$0xf0] }
 0x240   :  { %v14844_v14 = vld [vmem:[#allocation12 + $0x22c] sm:$0xf0] }
 0x246   :  { %v2061_v45 = vld [vmem:[#allocation3] sm:$0xff] }
 0x247   :  { %v2191_v2 = vunpack.c.l.b16 %v2061_v45  ;;  %v2192_v23 = vunpack.c.h.b16 %v2061_v45  ;;  %v11049_v45 = vld [vmem:[#allocation12 + $0x110] sm:$0xf] }
 0x248   :  { %v11050_v5 = vor.u32 %v14812_v13, %v11049_v45  ;;  %v11242_v13 = vor.u32 %v14860_v19, %v11241_v37  ;;  %v14833_v37 = vld [vmem:[#allocation12 + $0x1dc] sm:$0xf] }
 0x249   :  { %v16694_v16 = vpack.c.b16 %v2191_v2, %v2191_v2  ;;  %v16696_v42 = vpack.c.b16 %v2192_v23, %v2192_v23  ;;  %v11342_v2 = vor.u32 %v14880_v36, %v11339_v27  ;;  %v11305_v23 = vld [vmem:[#allocation12 + $0x310] sm:$0xf]  ;;  %v14792_v36 = vld [vmem:[#allocation12 + $0x94] sm:$0xf] }
 0x24a   :  { %v11306_v20 = vor.u32 %v14876_v22, %v11305_v23  ;;  %v10987_v27 = vld [vmem:[#allocation12 + $0xb0] sm:$0xf0] }
 0x24b   :  { %2845 = vmatmul.bf16.vlgmr.msrb.gmra.mxu0 %v16694_v16  ;;  %2858 = vmatmul.bf16.vlgmr.msrb.gmra.mxu1 %v16696_v42  ;;  %v10990_v23 = vor.u32 %v14792_v36, %v10987_v27  ;;  %v11178_v36 = vor.u32 %v14844_v14, %v11177_v63  ;;  %v11155_v27 = vld [vmem:[#allocation12 + $0x1f8] sm:$0xf0]  ;;  %v11089_v63 = vld [vmem:[#allocation12 + $0x158] sm:$0xf] }
 0x24c   :  { %2871 = vmatmul.bf16.vlgmr.msrb.gmra.mxu2 %v16694_v16  ;;  %2884 = vmatmul.bf16.vlgmr.msra.gmra.mxu3 %v16696_v42  ;;  %v14821_v14 = vld [vmem:[#allocation12 + $0x174] sm:$0xf0] }
 0x24d   :  { %2941 = vmatpush.bf16.msrb.mxu0 %v11146_v60  ;;  %2954 = vmatpush.bf16.msrb.mxu1 %v11402_v10  ;;  %v14872_v60 = vld [vmem:[#allocation12 + $0x314] sm:$0xf] }
 0x24e   :  { %2967 = vmatpush.bf16.msrb.mxu2 %v11150_v46  ;;  %2980 = vmatpush.bf16.msra.mxu3 %v11406_v49  ;;  %v11307_v10 = vld [vmem:[#allocation12 + $0x330] sm:$0xf0]  ;;  %v11017_v46 = vld [vmem:[#allocation12 + $0xd0] sm:$0xf] }
 0x24f   :  { %v14804_v49 = vld [vmem:[#allocation12 + $0xec] sm:$0xf0]  ;;  %v11310_v30 = vor.u32 %v14872_v60, %v11307_v10  ;;  %v14784_v60 = vld [vmem:[#allocation12 + $0x54] sm:$0xf] }
 0x250   :  { %v11018_v59 = vor.u32 %v14804_v49, %v11017_v46  ;;  %v10955_v10 = vld [vmem:[#allocation12 + $0x70] sm:$0xf0]  ;;  %v10921_v46 = vld [vmem:[#allocation12 + $0x10] sm:$0xf] }
 0x251   :  { %2942 = vmatpush.bf16.msrb.mxu0 %v11114_v8  ;;  %2955 = vmatpush.bf16.msrb.mxu1 %v11370_v21  ;;  %v14864_v8 = vld [vmem:[#allocation12 + $0x2d4] sm:$0xf]  ;;  %v10958_v12 = vor.u32 %v14784_v60, %v10955_v10  ;;  %v11377_v60 = vld [vmem:[#allocation12 + $0x398] sm:$0xf] }
 0x252   :  { %2968 = vmatpush.bf16.msrb.mxu2 %v11118_v48  ;;  %2981 = vmatpush.bf16.msra.mxu3 %v11374_v32  ;;  %v11275_v21 = vld [vmem:[#allocation12 + $0x2f0] sm:$0xf0]  ;;  %v10985_v48 = vld [vmem:[#allocation12 + $0x90] sm:$0xf]  ;;  %v14893_v10 = vld [vmem:[#allocation12 + $0x3b4] sm:$0xf0] }
 0x253   :  { %v14796_v32 = vld [vmem:[#allocation12 + $0xac] sm:$0xf0]  ;;  %v11278_v24 = vor.u32 %v14864_v8, %v11275_v21  ;;  %v14776_v8 = vld [vmem:[#allocation12 + $0x14] sm:$0xf] }
 0x254   :  { %v10986_v45 = vor.u32 %v14796_v32, %v10985_v48  ;;  %v10923_v21 = vld [vmem:[#allocation12 + $0x30] sm:$0xf0]  ;;  %v11153_v48 = vld [vmem:[#allocation12 + $0x1d8] sm:$0xf] }
 0x255   :  { %2943 = vmatpush.bf16.msrb.mxu0 %v11082_v0  ;;  %2956 = vmatpush.bf16.msrb.mxu1 %v11338_v54  ;;  %v14856_v0 = vld [vmem:[#allocation12 + $0x294] sm:$0xf]  ;;  %v14837_v32 = vld [vmem:[#allocation12 + $0x1f4] sm:$0xf0] }
 0x256   :  { %2969 = vmatpush.bf16.msrb.mxu2 %v11086_v35  ;;  %2982 = vmatpush.bf16.msra.mxu3 %v11342_v2  ;;  %v11243_v54 = vld [vmem:[#allocation12 + $0x2b0] sm:$0xf0]  ;;  %v10953_v35 = vld [vmem:[#allocation12 + $0x50] sm:$0xf] }
 0x257   :  { %v14788_v2 = vld [vmem:[#allocation12 + $0x6c] sm:$0xf0]  ;;  %v11246_v22 = vor.u32 %v14856_v0, %v11243_v54  ;;  %v14897_v0 = vld [vmem:[#allocation12 + $0x3dc] sm:$0xf] }
 0x258   :  { %v10954_v49 = vor.u32 %v14788_v2, %v10953_v35  ;;  %v11411_v54 = vld [vmem:[#allocation12 + $0x3f8] sm:$0xf0]  ;;  %v11154_v35 = vor.u32 %v14837_v32, %v11153_v48 }
 0x259   :  { %2944 = vmatpush.bf16.msrb.mxu0 %v11050_v5  ;;  %2957 = vmatpush.bf16.msrb.mxu1 %v11306_v20  ;;  %v14848_v5 = vld [vmem:[#allocation12 + $0x254] sm:$0xf]  ;;  %v14881_v48 = vld [vmem:[#allocation12 + $0x35c] sm:$0xf] }
 0x25a   :  { %2970 = vmatpush.bf16.msrb.mxu2 %v11054_v29  ;;  %2983 = vmatpush.bf16.msra.mxu3 %v11310_v30  ;;  %v11211_v20 = vld [vmem:[#allocation12 + $0x270] sm:$0xf0]  ;;  %v11210_v29 = vor.u32 %v14852_v39, %v11209_v15  ;;  %v14780_v30 = vld [vmem:[#allocation12 + $0x2c] sm:$0xf0]  ;;  %v11158_v15 = vor.u32 %v14833_v37, %v11155_v27  ;;  %v11414_v39 = vor.u32 %v14897_v0, %v11411_v54  ;;  %v11347_v32 = vld [vmem:[#allocation12 + $0x378] sm:$0xf0] }
 0x25b   :  { %2897 = vmatmul.bf16.vlgmr.msra.gmra.mxu0 %v16694_v16  ;;  %2910 = vmatmul.bf16.vlgmr.msra.gmra.mxu1 %v16696_v42  ;;  %v11214_v31 = vor.u32 %v14848_v5, %v11211_v20  ;;  %v10922_v19 = vor.u32 %v14780_v30, %v10921_v46  ;;  %v14825_v5 = vld [vmem:[#allocation12 + $0x19c] sm:$0xf]  ;;  %v11378_v30 = vor.u32 %v14893_v10, %v11377_v60  ;;  %v11057_v37 = vld [vmem:[#allocation12 + $0x118] sm:$0xf] }
 0x25c   :  { %2923 = vmatmul.bf16.vlgmr.msra.gmra.mxu2 %v16694_v16  ;;  %2936 = vmatmul.bf16.vlgmr.msrb.gmra.mxu3 %v16696_v42  ;;  %v11123_v20 = vld [vmem:[#allocation12 + $0x1b8] sm:$0xf0]  ;;  %v11350_v27 = vor.u32 %v14881_v48, %v11347_v32  ;;  %v11313_v0 = vld [vmem:[#allocation12 + $0x318] sm:$0xf] }
 0x25d   :  { %2945 = vmatpush.bf16.msrb.mxu0 %v11018_v59  ;;  %2958 = vmatpush.bf16.msrb.mxu1 %v11274_v55  ;;  %v14840_v59 = vld [vmem:[#allocation12 + $0x214] sm:$0xf]  ;;  %v14889_v46 = vld [vmem:[#allocation12 + $0x39c] sm:$0xf]  ;;  %v14877_v54 = vld [vmem:[#allocation12 + $0x334] sm:$0xf0] }
 0x25e   :  { %2971 = vmatpush.bf16.msrb.mxu2 %v11022_v47  ;;  %2984 = vmatpush.bf16.msra.mxu3 %v11278_v24  ;;  %v11179_v55 = vld [vmem:[#allocation12 + $0x230] sm:$0xf0]  ;;  %v11409_v47 = vld [vmem:[#allocation12 + $0x3d8] sm:$0xf]  ;;  %v14793_v48 = vld [vmem:[#allocation12 + $0x9c] sm:$0xf] }
 0x25f   :  { %v14901_v24 = vld [vmem:[#allocation12 + $0x3f4] sm:$0xf0]  ;;  %v10995_v32 = vld [vmem:[#allocation12 + $0xb8] sm:$0xf0] }
 0x260   :  { %v11410_v2 = vor.u32 %v14901_v24, %v11409_v47  ;;  %v11090_v47 = vor.u32 %v14821_v14, %v11089_v63 }
 0x261   :  { %2946 = vmatpush.bf16.msrb.mxu0 %v10986_v45  ;;  %2959 = vmatpush.bf16.msrb.mxu1 %v11242_v13  ;;  %v10926_v45 = vor.u32 %v14776_v8, %v10923_v21  ;;  %v11182_v13 = vor.u32 %v14840_v59, %v11179_v55  ;;  %v11345_v8 = vld [vmem:[#allocation12 + $0x358] sm:$0xf]  ;;  %v14817_v59 = vld [vmem:[#allocation12 + $0x15c] sm:$0xf] }
 0x262   :  { %2972 = vmatpush.bf16.msrb.mxu2 %v10990_v23  ;;  %2985 = vmatpush.bf16.msra.mxu3 %v11246_v22  ;;  %v11121_v23 = vld [vmem:[#allocation12 + $0x198] sm:$0xf]  ;;  %v11091_v55 = vld [vmem:[#allocation12 + $0x178] sm:$0xf0] }
 0x263   :  { %v14829_v22 = vld [vmem:[#allocation12 + $0x1b4] sm:$0xf0] }
 0x264   :  { %v14885_v21 = vld [vmem:[#allocation12 + $0x374] sm:$0xf0] }
 0x265   :  { %2947 = vmatpush.bf16.msrb.mxu0 %v10954_v49  ;;  %2960 = vmatpush.bf16.msrb.mxu1 %v11210_v29  ;;  %v11379_v49 = vld [vmem:[#allocation12 + $0x3b8] sm:$0xf0]  ;;  %v11122_v29 = vor.u32 %v14829_v22, %v11121_v23  ;;  %v11346_v24 = vor.u32 %v14885_v21, %v11345_v8  ;;  %v11314_v22 = vor.u32 %v14877_v54, %v11313_v0 }
 0x266   :  { %2973 = vmatpush.bf16.msrb.mxu2 %v10958_v12  ;;  %2986 = vmatpush.bf16.msra.mxu3 %v11214_v31  ;;  %v11126_v12 = vor.u32 %v14825_v5, %v11123_v20  ;;  %v11382_v31 = vor.u32 %v14889_v46, %v11379_v49  ;;  %v11281_v5 = vld [vmem:[#allocation12 + $0x2d8] sm:$0xf]  ;;  %v14801_v46 = vld [vmem:[#allocation12 + $0xdc] sm:$0xf]  ;;  %v10998_v0 = vor.u32 %v14793_v48, %v10995_v32 }
 0x267   :  { %v14869_v20 = vld [vmem:[#allocation12 + $0x2f4] sm:$0xf0]  ;;  %v11027_v49 = vld [vmem:[#allocation12 + $0xf8] sm:$0xf0] }
 0x268   :  { %v11282_v14 = vor.u32 %v14869_v20, %v11281_v5  ;;  %v11030_v8 = vor.u32 %v14801_v46, %v11027_v49  ;;  %v11185_v46 = vld [vmem:[#allocation12 + $0x218] sm:$0xf] }
 0x269   :  { %2948 = vmatpush.bf16.msrb.mxu0 %v10922_v19  ;;  %2961 = vmatpush.bf16.msrb.mxu1 %v11178_v36  ;;  %v14813_v19 = vld [vmem:[#allocation12 + $0x134] sm:$0xf0]  ;;  %v11094_v36 = vor.u32 %v14817_v59, %v11091_v55 }
 0x26a   :  { %2974 = vmatpush.bf16.msrb.mxu2 %v10926_v45  ;;  %2987 = vmatpush.bf16.msra.mxu3 %v11182_v13  ;;  %v14809_v45 = vld [vmem:[#allocation12 + $0x11c] sm:$0xf]  ;;  %v11058_v23 = vor.u32 %v14813_v19, %v11057_v37  ;;  %v11249_v59 = vld [vmem:[#allocation12 + $0x298] sm:$0xf] }
 0x26b   :  { %v11059_v13 = vld [vmem:[#allocation12 + $0x138] sm:$0xf0]  ;;  %v14861_v55 = vld [vmem:[#allocation12 + $0x2b4] sm:$0xf0] }
 0x26c   :  { %2949 = vmatmul.bf16.vlgmr.msrb.gmra.mxu0 %v16694_v16  ;;  %2962 = vmatmul.bf16.vlgmr.msrb.gmra.mxu1 %v16696_v42  ;;  %v11062_v60 = vor.u32 %v14809_v45, %v11059_v13  ;;  %v11250_v19 = vor.u32 %v14861_v55, %v11249_v59  ;;  %v11217_v45 = vld [vmem:[#allocation12 + $0x258] sm:$0xf] }
 0x26d   :  { %2993 = vmatpush.bf16.msra.mxu0 %v11154_v35  ;;  %3006 = vmatpush.bf16.msra.mxu1 %v11410_v2  ;;  %v14873_v35 = vld [vmem:[#allocation12 + $0x31c] sm:$0xf]  ;;  %v14853_v13 = vld [vmem:[#allocation12 + $0x274] sm:$0xf0] }
 0x26e   :  { %3019 = vmatpush.bf16.msra.mxu2 %v11158_v15  ;;  %3032 = vmatpush.bf16.msrb.mxu3 %v11414_v39  ;;  %v11315_v2 = vld [vmem:[#allocation12 + $0x338] sm:$0xf0]  ;;  %v11025_v15 = vld [vmem:[#allocation12 + $0xd8] sm:$0xf] }
 0x26f   :  { %2975 = vmatmul.bf16.vlgmr.msrb.gmra.mxu2 %v16694_v16  ;;  %2988 = vmatmul.bf16.vlgmr.msra.gmra.mxu3 %v16696_v42  ;;  %v14805_v39 = vld [vmem:[#allocation12 + $0xf4] sm:$0xf0]  ;;  %v11318_v10 = vor.u32 %v14873_v35, %v11315_v2  ;;  %v14785_v35 = vld [vmem:[#allocation12 + $0x5c] sm:$0xf] }
 0x270   :  { %v11026_v63 = vor.u32 %v14805_v39, %v11025_v15  ;;  %v10963_v2 = vld [vmem:[#allocation12 + $0x78] sm:$0xf0]  ;;  %v11218_v39 = vor.u32 %v14853_v13, %v11217_v45  ;;  %v14845_v49 = vld [vmem:[#allocation12 + $0x234] sm:$0xf0] }
 0x271   :  { %2994 = vmatpush.bf16.msra.mxu0 %v11122_v29  ;;  %3007 = vmatpush.bf16.msra.mxu1 %v11378_v30  ;;  %v14865_v29 = vld [vmem:[#allocation12 + $0x2dc] sm:$0xf]  ;;  %v10966_v5 = vor.u32 %v14785_v35, %v10963_v2 }
 0x272   :  { %3020 = vmatpush.bf16.msra.mxu2 %v11126_v12  ;;  %3033 = vmatpush.bf16.msrb.mxu3 %v11382_v31  ;;  %v11283_v30 = vld [vmem:[#allocation12 + $0x2f8] sm:$0xf0]  ;;  %v10993_v12 = vld [vmem:[#allocation12 + $0x98] sm:$0xf] }
 0x273   :  { %v14797_v31 = vld [vmem:[#allocation12 + $0xb4] sm:$0xf0]  ;;  %v11286_v21 = vor.u32 %v14865_v29, %v11283_v30  ;;  %v14777_v29 = vld [vmem:[#allocation12 + $0x1c] sm:$0xf] }
 0x274   :  { %v10994_v37 = vor.u32 %v14797_v31, %v10993_v12  ;;  %v10931_v30 = vld [vmem:[#allocation12 + $0x38] sm:$0xf0]  ;;  %v11186_v31 = vor.u32 %v14845_v49, %v11185_v46 }
 0x275   :  { %2995 = vmatpush.bf16.msra.mxu0 %v11090_v47  ;;  %3008 = vmatpush.bf16.msra.mxu1 %v11346_v24  ;;  %v14857_v47 = vld [vmem:[#allocation12 + $0x29c] sm:$0xf] }
 0x276   :  { %3021 = vmatpush.bf16.msra.mxu2 %v11094_v36  ;;  %3034 = vmatpush.bf16.msrb.mxu3 %v11350_v27  ;;  %v11251_v24 = vld [vmem:[#allocation12 + $0x2b8] sm:$0xf0]  ;;  %v10961_v36 = vld [vmem:[#allocation12 + $0x58] sm:$0xf] }
 0x277   :  { %v14789_v27 = vld [vmem:[#allocation12 + $0x74] sm:$0xf0]  ;;  %v11254_v54 = vor.u32 %v14857_v47, %v11251_v24 }
 0x278   :  { %v10962_v15 = vor.u32 %v14789_v27, %v10961_v36 }
 0x279   :  { %2996 = vmatpush.bf16.msra.mxu0 %v11058_v23  ;;  %3009 = vmatpush.bf16.msra.mxu1 %v11314_v22  ;;  %v14849_v23 = vld [vmem:[#allocation12 + $0x25c] sm:$0xf] }
 0x27a   :  { %3022 = vmatpush.bf16.msra.mxu2 %v11062_v60  ;;  %3035 = vmatpush.bf16.msrb.mxu3 %v11318_v10  ;;  %v11219_v22 = vld [vmem:[#allocation12 + $0x278] sm:$0xf0]  ;;  %v10929_v60 = vld [vmem:[#allocation12 + $0x18] sm:$0xf] }
 0x27b   :  { %v14781_v10 = vld [vmem:[#allocation12 + $0x34] sm:$0xf0]  ;;  %v11222_v20 = vor.u32 %v14849_v23, %v11219_v22 }
 0x27c   :  { %v10930_v12 = vor.u32 %v14781_v10, %v10929_v60 }
 0x27d   :  { %2997 = vmatpush.bf16.msra.mxu0 %v11026_v63  ;;  %3010 = vmatpush.bf16.msra.mxu1 %v11282_v14  ;;  %v14841_v63 = vld [vmem:[#allocation12 + $0x21c] sm:$0xf] }
 0x27e   :  { %3023 = vmatpush.bf16.msra.mxu2 %v11030_v8  ;;  %3036 = vmatpush.bf16.msrb.mxu3 %v11286_v21  ;;  %v11187_v14 = vld [vmem:[#allocation12 + $0x238] sm:$0xf0]  ;;  %v10934_v8 = vor.u32 %v14777_v29, %v10931_v30 }
 0x27f   :  { %v11190_v21 = vor.u32 %v14841_v63, %v11187_v14  ;;  %v11647_v63 = vld [vmem:[#allocation12 + $0x1c0] sm:$0xf] }
 0x280   :  { %v14962_v14 = vld [vmem:[#allocation12 + $0x1dc] sm:$0xf0] }
 0x281   :  { %2998 = vmatpush.bf16.msra.mxu0 %v10994_v37  ;;  %3011 = vmatpush.bf16.msra.mxu1 %v11250_v19 }
 0x282   :  { %3024 = vmatpush.bf16.msra.mxu2 %v10998_v0  ;;  %3037 = vmatpush.bf16.msrb.mxu3 %v11254_v54 }
 0x285   :  { %2999 = vmatpush.bf16.msra.mxu0 %v10962_v15  ;;  %3012 = vmatpush.bf16.msra.mxu1 %v11218_v39 }
 0x286   :  { %3025 = vmatpush.bf16.msra.mxu2 %v10966_v5  ;;  %3038 = vmatpush.bf16.msrb.mxu3 %v11222_v20 }
 0x289   :  { %3000 = vmatpush.bf16.msra.mxu0 %v10930_v12  ;;  %3013 = vmatpush.bf16.msra.mxu1 %v11186_v31  ;;  %v11648_v31 = vor.u32 %v14962_v14, %v11647_v63  ;;  %v11617_v63 = vld [vmem:[#allocation12 + $0x1a0] sm:$0xf0] }
 0x28a   :  { %3026 = vmatpush.bf16.msra.mxu2 %v10934_v8  ;;  %3039 = vmatpush.bf16.msrb.mxu3 %v11190_v21  ;;  %v11903_v8 = vld [vmem:[#allocation12 + $0x3c0] sm:$0xf]  ;;  %v15014_v14 = vld [vmem:[#allocation12 + $0x384] sm:$0xf] }
 0x28b   :  { %v15026_v21 = vld [vmem:[#allocation12 + $0x3dc] sm:$0xf0] }
 0x28c   :  { %3001 = vmatmul.bf16.vlgmr.msra.gmra.mxu0 %v16694_v16  ;;  %3014 = vmatmul.bf16.vlgmr.msra.gmra.mxu1 %v16696_v42 }
 0x28d   :  { %3027 = vmatmul.bf16.vlgmr.msra.gmra.mxu2 %v16694_v16  ;;  %3040 = vmatmul.bf16.vlgmr.msrb.gmra.mxu3 %v16696_v42 }
 0x28e   :  { %3964 = vmatpush.bf16.msrb.mxu0 %v11648_v31 }
 0x2c8   :  { %v2846_v59 = vpop.f32.mrf.mxu0  ;;  %v2859_v55 = vpop.f32.mrf.mxu1 }
 0x2c9   :  { %v2860_v48 = vadd.f32 %v2859_v55, %v2846_v59  ;;  %v14958_v59 = vld [vmem:[#allocation12 + $0x1c4] sm:$0xf] }
 0x2cb   :  { %v3045_v32 = vadd.f32 %v2860_v48, %v16540_v44  ;;  %v11904_v48 = vor.u32 %v15026_v21, %v11903_v8  ;;  %v11873_v21 = vld [vmem:[#allocation12 + $0x3a0] sm:$0xf0] }
 0x2cd   :  { %v11415_v47 = vmul.f32 -1.442695, %v3045_v32  ;;  %v11649_v32 = vld [vmem:[#allocation12 + $0x1e0] sm:$0xf0]  ;;  %3977 = vmatpush.bf16.msrb.mxu1 %v11904_v48  ;;  %v11876_v48 = vor.u32 %v15014_v14, %v11873_v21  ;;  %v11551_v14 = vld [vmem:[#allocation12 + $0x100] sm:$0xf] }
 0x2ce   :  { %v11807_v21 = vld [vmem:[#allocation12 + $0x300] sm:$0xf] }
 0x2cf   :  { %15780 = vpow2.f32 %v11415_v47  ;;  %v2872_v24 = vpop.f32.mrf.mxu2  ;;  %v2885_v37 = vpop.f32.mrf.mxu3  ;;  %v15022_v47 = vld [vmem:[#allocation12 + $0x3c4] sm:$0xf] }
 0x2d0   :  { %v2886_v19 = vadd.f32 %v2885_v37, %v2872_v24  ;;  %v2848_v36 = vpop.f32.mrf.mxu0  ;;  %v2861_v27 = vpop.f32.mrf.mxu1 }
 0x2d1   :  { %v11652_v27 = vor.u32 %v14958_v59, %v11649_v32  ;;  %v11583_v32 = vld [vmem:[#allocation12 + $0x140] sm:$0xf] }
 0x2d2   :  { %v3046_v0 = vadd.f32 %v2886_v19, %v16543_v4 }
 0x2d3   :  { %3990 = vmatpush.bf16.msrb.mxu2 %v11652_v27 }
 0x2d4   :  { %v11416_v54 = vmul.f32 -1.442695, %v3046_v0  ;;  %v11905_v0 = vld [vmem:[#allocation12 + $0x3e0] sm:$0xf0] }
 0x2d5   :  { %v15781_v45 = vpop.eup %15780 }
 0x2d6   :  { %v16716_v13 = vadd.f32 1.0, %v15781_v45  ;;  %15782 = vpow2.f32 %v11416_v54  ;;  %v11908_v45 = vor.u32 %v15022_v47, %v11905_v0  ;;  %v14946_v47 = vld [vmem:[#allocation12 + $0x15c] sm:$0xf0] }
 0x2d7   :  { %v2874_v16 = vpop.f32.mrf.mxu2  ;;  %v2887_v42 = vpop.f32.mrf.mxu3  ;;  %v11584_v27 = vor.u32 %v14946_v47, %v11583_v32  ;;  %v15010_v0 = vld [vmem:[#allocation12 + $0x35c] sm:$0xf0] }
 0x2d8   :  { %15784 = vrcp.f32 %v16716_v13  ;;  %v2898_v35 = vpop.f32.mrf.mxu0  ;;  %v2911_v2 = vpop.f32.mrf.mxu1  ;;  %v3064_v29 = vand.u32 2147483648, %v16716_v13  ;;  %v3062_v36 = vand.u32 2147483647, %v16716_v13  ;;  %v11615_v16 = vld [vmem:[#allocation12 + $0x180] sm:$0xf]  ;;  %4003 = vmatpush.bf16.msra.mxu3 %v11908_v45  ;;  %vm3058_vm6 = vweird.f32 %v16716_v13 }
 0x2d9   :  { %v2912_v12 = vadd.f32 %v2911_v2, %v2898_v35  ;;  %v14954_v42 = vld [vmem:[#allocation12 + $0x19c] sm:$0xf0]  ;;  %v11585_v45 = vld [vmem:[#allocation12 + $0x160] sm:$0xf0] }
 0x2da   :  { %v11871_v35 = vld [vmem:[#allocation12 + $0x380] sm:$0xf]  ;;  %vm3063_vm11 = vcmp.eq.f32.partialorder %v3062_v36, 8.507059e+37 }
 0x2db   :  { %v3047_v2 = vadd.f32 %v2912_v12, %v16558_v18 }
 0x2dc   :  { %v15783_v23 = vpop.eup %15782  ;;  %4004 = vmatpush.bf16.msra.mxu3 %v11876_v48 }
 0x2dd   :  { %v16719_v22 = vadd.f32 1.0, %v15783_v23 }
 0x2de   :  { %v16721_v15 = vpop.eup %15784 }
 0x2df   :  { %v3054_v39 = vmul.f32 %v16721_v15, %v16716_v13  ;;  %15786 = vrcp.f32 %v16719_v22  ;;  %v2924_v60 = vpop.f32.mrf.mxu2  ;;  %v2937_v10 = vpop.f32.mrf.mxu3  ;;  %v3083_v37 = vand.u32 2147483648, %v16719_v22  ;;  %v3081_v23 = vand.u32 2147483647, %v16719_v22 }
 0x2e0   :  { %v2938_v5 = vadd.f32 %v2937_v10, %v2924_v60  ;;  %v2900_v20 = vpop.f32.mrf.mxu0  ;;  %v2913_v46 = vpop.f32.mrf.mxu1  ;;  %v11616_v10 = vor.u32 %v14954_v42, %v11615_v16  ;;  %vm3059_vm4 = vweird.f32 %v16721_v15  ;;  %vm3077_vm7 = vweird.f32 %v16719_v22 }
 0x2e1   :  { %v3055_v49 = vsub.f32 1.0, %v3054_v39  ;;  %v14950_v20 = vld [vmem:[#allocation12 + $0x184] sm:$0xf]  ;;  %v3084_v31 = vor.u32 1.1754944e-38, %v3083_v37  ;;  %v11839_v37 = vld [vmem:[#allocation12 + $0x340] sm:$0xf]  ;;  %vm16747_vm8 = vmor %vm3058_vm6, %vm3059_vm4 }
 0x2e2   :  { %v3048_v30 = vadd.f32 %v2938_v5, %v16553_v61  ;;  %v15018_v5 = vld [vmem:[#allocation12 + $0x39c] sm:$0xf0]  ;;  %3965 = vmatpush.bf16.msrb.mxu0 %v11616_v10  ;;  %v11620_v12 = vor.u32 %v14950_v20, %v11617_v63  ;;  %vm16752_vm9 = vcmp.eq.f32.partialorder %v3081_v23, 8.507059e+37  ;;  %v15006_v10 = vld [vmem:[#allocation12 + $0x344] sm:$0xf] }
 0x2e3   :  { %v3056_v19 = vmul.f32 %v16721_v15, %v3055_v49  ;;  %v3065_v49 = vor.u32 1.1754944e-38, %v3064_v29 }
 0x2e4   :  { %v11417_v55 = vmul.f32 -1.442695, %v3048_v30  ;;  %v11872_v30 = vor.u32 %v15018_v5, %v11871_v35  ;;  %3991 = vmatpush.bf16.msrb.mxu2 %v11620_v12  ;;  %v11841_v5 = vld [vmem:[#allocation12 + $0x360] sm:$0xf0]  ;;  %v14938_v12 = vld [vmem:[#allocation12 + $0x11c] sm:$0xf0] }
 0x2e5   :  { %v16728_v24 = vpop.eup %15786  ;;  %v3057_v8 = vadd.f32 %v16721_v15, %v3056_v19 }
 0x2e6   :  { %v3073_v54 = vmul.f32 %v16728_v24, %v16719_v22  ;;  %15788 = vpow2.f32 %v11417_v55  ;;  %vm3078_vm5 = vweird.f32 %v16728_v24  ;;  %3978 = vmatpush.bf16.msrb.mxu1 %v11872_v30  ;;  %3966 = vmatpush.bf16.msrb.mxu0 %v11584_v27  ;;  %v11844_v30 = vor.u32 %v15006_v10, %v11841_v5  ;;  %v11521_v10 = vld [vmem:[#allocation12 + $0xe0] sm:$0xf0] }
 0x2e7   :  { %v2926_v39 = vpop.f32.mrf.mxu2  ;;  %v2939_v60 = vpop.f32.mrf.mxu3  ;;  %15790 = vtanh.f32 %v3047_v2  ;;  %v11840_v2 = vor.u32 %v15010_v0, %v11839_v37  ;;  %vm3079_vm10 = vmor %vm3077_vm7, %vm3078_vm5  ;;  %v3061_v20 = vsel %vm16747_vm8, %v16721_v15, %v3057_v8  ;;  %v15002_v15 = vld [vmem:[#allocation12 + $0x31c] sm:$0xf0]  ;;  %v14934_v8 = vld [vmem:[#allocation12 + $0x104] sm:$0xf] }
 0x2e8   :  { %v3074_v46 = vsub.f32 1.0, %v3073_v54  ;;  %v14942_v54 = vld [vmem:[#allocation12 + $0x144] sm:$0xf]  ;;  %4005 = vmatpush.bf16.msra.mxu3 %v11844_v30  ;;  %v11808_v13 = vor.u32 %v15002_v15, %v11807_v21  ;;  %v14922_v15 = vld [vmem:[#allocation12 + $0x9c] sm:$0xf0] }
 0x2e9   :  { %v2950_v55 = vpop.f32.mrf.mxu0  ;;  %v2963_v29 = vpop.f32.mrf.mxu1  ;;  %v11588_v60 = vor.u32 %v14942_v54, %v11585_v45  ;;  %v14998_v37 = vld [vmem:[#allocation12 + $0x304] sm:$0xf]  ;;  %v11519_v54 = vld [vmem:[#allocation12 + $0xc0] sm:$0xf] }
 0x2ea   :  { %v3075_v59 = vmul.f32 %v16728_v24, %v3074_v46  ;;  %v2964_v19 = vadd.f32 %v2963_v29, %v2950_v55  ;;  %3979 = vmatpush.bf16.msrb.mxu1 %v11840_v2  ;;  %v11552_v55 = vor.u32 %v14938_v12, %v11551_v14  ;;  %v14926_v39 = vld [vmem:[#allocation12 + $0xc4] sm:$0xf] }
 0x2eb   :  { %3992 = vmatpush.bf16.msrb.mxu2 %v11588_v60  ;;  %v14990_v5 = vld [vmem:[#allocation12 + $0x2c4] sm:$0xf] }
 0x2ec   :  { %v15789_v16 = vpop.eup %15788  ;;  %v3076_v35 = vadd.f32 %v16728_v24, %v3075_v59  ;;  %v3119_v23 = vadd.f32 %v2964_v19, %v16374_v50  ;;  %v3066_v50 = vsel %vm3063_vm11, %v3065_v49, %v3061_v20  ;;  %v11809_v19 = vld [vmem:[#allocation12 + $0x320] sm:$0xf0]  ;;  %3967 = vmatpush.bf16.msrb.mxu0 %v11552_v55  ;;  %v14930_v49 = vld [vmem:[#allocation12 + $0xdc] sm:$0xf0] }
 0x2ed   :  { %v16763_v46 = vadd.f32 1.0, %v15789_v16  ;;  %v15791_v29 = vpop.eup %15790  ;;  %v11812_v16 = vor.u32 %v14998_v37, %v11809_v19  ;;  %v11520_v42 = vor.u32 %v14930_v49, %v11519_v54  ;;  %v11777_v20 = vld [vmem:[#allocation12 + $0x2e0] sm:$0xf0]  ;;  %v11455_v49 = vld [vmem:[#allocation12 + $0x40] sm:$0xf] }
 0x2ee   :  { %v3080_v63 = vsel %vm3079_vm10, %v16728_v24, %v3076_v35  ;;  %v11418_v59 = vmul.f32 -1.442695, %v3119_v23  ;;  %v11553_v24 = vld [vmem:[#allocation12 + $0x120] sm:$0xf0]  ;;  %v3108_v45 = vmul.f32 %v15791_v29, %v3066_v50  ;;  %3980 = vmatpush.bf16.msrb.mxu1 %v11808_v13  ;;  %v11775_v35 = vld [vmem:[#allocation12 + $0x2c0] sm:$0xf]  ;;  %v11780_v14 = vor.u32 %v14990_v5, %v11777_v20 }
 0x2ef   :  { %v3085_v22 = vsel %vm16752_vm9, %v3084_v31, %v3080_v63  ;;  %15792 = vrcp.f32 %v16763_v46  ;;  %v11556_v36 = vor.u32 %v14934_v8, %v11553_v24  ;;  %4006 = vmatpush.bf16.msra.mxu3 %v11812_v16  ;;  %v11524_v63 = vor.u32 %v14926_v39, %v11521_v10  ;;  %v11743_v50 = vld [vmem:[#allocation12 + $0x280] sm:$0xf]  ;;  %v14974_v10 = vld [vmem:[#allocation12 + $0x244] sm:$0xf] }
 0x2f0   :  { %v3107_v48 = vmul.f32 %v3085_v22, %v16613_v3  ;;  %15794 = vpow2.f32 %v11418_v59  ;;  %v14994_v3 = vld [vmem:[#allocation12 + $0x2dc] sm:$0xf0]  ;;  %3968 = vmatpush.bf16.msrb.mxu0 %v11520_v42  ;;  %vm3097_vm13 = vweird.f32 %v16763_v46 }
 0x2f1   :  { %v2952_v27 = vpop.f32.mrf.mxu0  ;;  %v2965_v0 = vpop.f32.mrf.mxu1  ;;  %3993 = vmatpush.bf16.msrb.mxu2 %v11556_v36  ;;  %v11776_v60 = vor.u32 %v14994_v3, %v11775_v35  ;;  %v11487_v22 = vld [vmem:[#allocation12 + $0x80] sm:$0xf] }
 0x2f2   :  { %v2976_v32 = vpop.f32.mrf.mxu2  ;;  %v2989_v47 = vpop.f32.mrf.mxu3  ;;  %v16776_v30 = vadd.f32 %v3108_v45, %v3107_v48  ;;  %v11488_v8 = vor.u32 %v14922_v15, %v11487_v22  ;;  %v14986_v59 = vld [vmem:[#allocation12 + $0x29c] sm:$0xf0]  ;;  %v14918_v48 = vld [vmem:[#allocation12 + $0x84] sm:$0xf] }
 0x2f3   :  { %v2990_v31 = vadd.f32 %v2989_v47, %v2976_v32  ;;  %3981 = vmatpush.bf16.msrb.mxu1 %v11776_v60  ;;  %v11744_v29 = vor.u32 %v14986_v59, %v11743_v50  ;;  %v11489_v32 = vld [vmem:[#allocation12 + $0xa0] sm:$0xf0]  ;;  %v3103_v47 = vand.u32 2147483648, %v16763_v46  ;;  %4007 = vmatpush.bf16.msra.mxu3 %v11780_v14  ;;  %v14914_v45 = vld [vmem:[#allocation12 + $0x5c] sm:$0xf0] }
 0x2f4   :  { %v11492_v19 = vor.u32 %v14918_v48, %v11489_v32  ;;  %v11745_v27 = vld [vmem:[#allocation12 + $0x2a0] sm:$0xf0]  ;;  %3969 = vmatpush.bf16.msrb.mxu0 %v11488_v8  ;;  %v11711_v16 = vld [vmem:[#allocation12 + $0x240] sm:$0xf]  ;;  %v11456_v3 = vor.u32 %v14914_v45, %v11455_v49  ;;  %v11911_v49 = vld [vmem:[#allocation12 + $0x3c8] sm:$0xf] }
 0x2f5   :  { %v3120_v2 = vadd.f32 %v2990_v31, %v16384_v57  ;;  %v16774_v23 = vpop.eup %15792  ;;  %v3101_v57 = vand.u32 2147483647, %v16763_v46  ;;  %3994 = vmatpush.bf16.msrb.mxu2 %v11524_v63  ;;  %v14982_v31 = vld [vmem:[#allocation12 + $0x284] sm:$0xf]  ;;  %v14978_v42 = vld [vmem:[#allocation12 + $0x25c] sm:$0xf0] }
 0x2f6   :  { %v3093_v12 = vmul.f32 %v16774_v23, %v16763_v46  ;;  %v15795_v55 = vpop.eup %15794  ;;  %vm3098_vm12 = vweird.f32 %v16774_v23  ;;  %v11748_v54 = vor.u32 %v14982_v31, %v11745_v27  ;;  %v11712_v39 = vor.u32 %v14978_v42, %v11711_v16  ;;  %v11457_v60 = vld [vmem:[#allocation12 + $0x60] sm:$0xf0]  ;;  %v11423_v22 = vld [vmem:[#allocation12] sm:$0xf]  ;;  %v15027_v45 = vld [vmem:[#allocation12 + $0x3e4] sm:$0xf0] }
 0x2f7   :  { %v11419_v21 = vmul.f32 -1.442695, %v3120_v2  ;;  %v16783_v13 = vadd.f32 1.0, %v15795_v55  ;;  %3982 = vmatpush.bf16.msrb.mxu1 %v11744_v29  ;;  %v14910_v2 = vld [vmem:[#allocation12 + $0x44] sm:$0xf]  ;;  %vm3099_vm14 = vmor %vm3097_vm13, %vm3098_vm12  ;;  %vm3102_vm15 = vcmp.eq.f32.partialorder %v3101_v57, 8.507059e+37 }
 0x2f8   :  { %v3094_v24 = vsub.f32 1.0, %v3093_v12  ;;  %v3104_v5 = vor.u32 1.1754944e-38, %v3103_v47  ;;  %4008 = vmatpush.bf16.msra.mxu3 %v11748_v54  ;;  %v11460_v20 = vor.u32 %v14910_v2, %v11457_v60  ;;  %v11713_v63 = vld [vmem:[#allocation12 + $0x260] sm:$0xf0]  ;;  %3970 = vmatpush.bf16.msrb.mxu0 %v11456_v3  ;;  %v14906_v46 = vld [vmem:[#allocation12 + $0x1c] sm:$0xf0] }
 0x2f9   :  { %15796 = vpow2.f32 %v11419_v21  ;;  %3995 = vmatpush.bf16.msrb.mxu2 %v11492_v19  ;;  %v11716_v21 = vor.u32 %v14974_v10, %v11713_v63  ;;  %v11679_v15 = vld [vmem:[#allocation12 + $0x200] sm:$0xf]  ;;  %v3138_v55 = vand.u32 2147483648, %v16783_v13  ;;  %v11424_v57 = vor.u32 %v14906_v46, %v11423_v22  ;;  %v14902_v29 = vld [vmem:[#allocation12 + $0x4] sm:$0xf] }
 0x2fa   :  { %15798 = vtanh.f32 %v16776_v30  ;;  %v2978_v36 = vpop.f32.mrf.mxu2  ;;  %v2991_v37 = vpop.f32.mrf.mxu3  ;;  %v3095_v0 = vmul.f32 %v16774_v23, %v3094_v24  ;;  %v14970_v24 = vld [vmem:[#allocation12 + $0x21c] sm:$0xf0]  ;;  %v11425_v47 = vld [vmem:[#allocation12 + $0x20] sm:$0xf0]  ;;  %v11655_v19 = vld [vmem:[#allocation12 + $0x1c8] sm:$0xf]  ;;  %v11912_v10 = vor.u32 %v15027_v45, %v11911_v49  ;;  %vm3132_vm1 = vweird.f32 %v16783_v13 }
 0x2fb   :  { %15800 = vrcp.f32 %v16783_v13  ;;  %3983 = vmatpush.bf16.msrb.mxu1 %v11712_v39  ;;  %v11680_v32 = vor.u32 %v14970_v24, %v11679_v15  ;;  %v11681_v36 = vld [vmem:[#allocation12 + $0x220] sm:$0xf0]  ;;  %v14963_v54 = vld [vmem:[#allocation12 + $0x1e4] sm:$0xf0]  ;;  %v3136_v16 = vand.u32 2147483647, %v16783_v13 }
 0x2fc   :  { %v3096_v35 = vadd.f32 %v16774_v23, %v3095_v0  ;;  %4009 = vmatpush.bf16.msra.mxu3 %v11716_v21  ;;  %3971 = vmatpush.bf16.msrb.mxu0 %v11424_v57  ;;  %v11428_v0 = vor.u32 %v14902_v29, %v11425_v47  ;;  %v14959_v3 = vld [vmem:[#allocation12 + $0x1cc] sm:$0xf]  ;;  %v16802_v60 = vor.u32 1.1754944e-38, %v3138_v55  ;;  %v14955_v21 = vld [vmem:[#allocation12 + $0x1a4] sm:$0xf0] }
 0x2fd   :  { %3996 = vmatpush.bf16.msrb.mxu2 %v11460_v20  ;;  %v11657_v39 = vld [vmem:[#allocation12 + $0x1e8] sm:$0xf0]  ;;  %v11879_v22 = vld [vmem:[#allocation12 + $0x388] sm:$0xf]  ;;  %vm3137_vm7 = vcmp.eq.f32.partialorder %v3136_v16, 8.507059e+37 }
 0x2fe   :  { %v3100_v12 = vsel %vm3099_vm14, %v16774_v23, %v3096_v35  ;;  %v14966_v23 = vld [vmem:[#allocation12 + $0x204] sm:$0xf]  ;;  %v11656_v35 = vor.u32 %v14963_v54, %v11655_v19  ;;  %v15023_v20 = vld [vmem:[#allocation12 + $0x3cc] sm:$0xf]  ;;  %v15019_v46 = vld [vmem:[#allocation12 + $0x3a4] sm:$0xf0] }
 0x2ff   :  { %v15797_v14 = vpop.eup %15796  ;;  %v3105_v50 = vsel %vm3102_vm15, %v3104_v5, %v3100_v12  ;;  %3984 = vmatpush.bf16.msrb.mxu1 %v11680_v32  ;;  %v11684_v42 = vor.u32 %v14966_v23, %v11681_v36  ;;  %v11660_v5 = vor.u32 %v14959_v3, %v11657_v39  ;;  %v11913_v63 = vld [vmem:[#allocation12 + $0x3e8] sm:$0xf0]  ;;  %v11880_v24 = vor.u32 %v15019_v46, %v11879_v22  ;;  %v11591_v19 = vld [vmem:[#allocation12 + $0x148] sm:$0xf] }
 0x300   :  { %v15799_v8 = vpop.eup %15798  ;;  %v16793_v59 = vadd.f32 1.0, %v15797_v14  ;;  %4016 = vmatpush.bf16.msra.mxu0 %v11656_v35  ;;  %v11623_v14 = vld [vmem:[#allocation12 + $0x188] sm:$0xf]  ;;  %v11916_v12 = vor.u32 %v15023_v20, %v11913_v63  ;;  %v14951_v29 = vld [vmem:[#allocation12 + $0x18c] sm:$0xf] }
 0x301   :  { %v3111_v48 = vmul.f32 %v15799_v8, %v3105_v50  ;;  %v16796_v37 = vpop.eup %15800  ;;  %3997 = vmatpush.bf16.msrb.mxu2 %v11428_v0  ;;  %4010 = vmatpush.bf16.msra.mxu3 %v11684_v42  ;;  %v11624_v57 = vor.u32 %v14955_v21, %v11623_v14  ;;  %v15015_v32 = vld [vmem:[#allocation12 + $0x38c] sm:$0xf]  ;;  %v11847_v45 = vld [vmem:[#allocation12 + $0x348] sm:$0xf] }
 0x302   :  { %15802 = vrcp.f32 %v16793_v59  ;;  %v3128_v27 = vmul.f32 %v16796_v37, %v16783_v13  ;;  %vm3133_vm0 = vweird.f32 %v16796_v37  ;;  %v11881_v36 = vld [vmem:[#allocation12 + $0x3a8] sm:$0xf0]  ;;  %v15011_v42 = vld [vmem:[#allocation12 + $0x364] sm:$0xf0]  ;;  %v3157_v3 = vand.u32 2147483648, %v16793_v59 }
 0x303   :  { %v3112_v31 = vpack.c.bf16 %v3111_v48, %v3111_v48  ;;  %4029 = vmatpush.bf16.msra.mxu1 %v11912_v10  ;;  %v11625_v48 = vld [vmem:[#allocation12 + $0x1a8] sm:$0xf0]  ;;  %v11884_v54 = vor.u32 %v15015_v32, %v11881_v36  ;;  %vm16818_vm2 = vmor %vm3132_vm1, %vm3133_vm0  ;;  %v11848_v10 = vor.u32 %v15011_v42, %v11847_v45  ;;  %v11559_v21 = vld [vmem:[#allocation12 + $0x108] sm:$0xf]  ;;  %vm3151_vm4 = vweird.f32 %v16793_v59 }
 0x304   :  { %v3129_v2 = vsub.f32 1.0, %v3128_v27  ;;  %v3155_v27 = vand.u32 2147483647, %v16793_v59  ;;  %4017 = vmatpush.bf16.msra.mxu0 %v11624_v57  ;;  %v11628_v0 = vor.u32 %v14951_v29, %v11625_v48  ;;  %v11593_v20 = vld [vmem:[#allocation12 + $0x168] sm:$0xf0] }
 0x305   :  { %3113 = vst [vmem:[#allocation3 + $0x4] sm:$0xf] %v3112_v31  ;;  %4042 = vmatpush.bf16.msra.mxu2 %v11660_v5  ;;  %4055 = vmatpush.bf16.msrb.mxu3 %v11916_v12  ;;  %v14943_v5 = vld [vmem:[#allocation12 + $0x14c] sm:$0xf]  ;;  %v15003_v57 = vld [vmem:[#allocation12 + $0x324] sm:$0xf0] }
 0x306   :  { %3114 = vst [vmem:[#allocation6 + $0x4] sm:$0xf] %v3112_v31  ;;  %v3130_v55 = vmul.f32 %v16796_v37, %v3129_v2  ;;  %v14947_v31 = vld [vmem:[#allocation12 + $0x164] sm:$0xf0]  ;;  %v11596_v14 = vor.u32 %v14943_v5, %v11593_v20  ;;  %v15007_v12 = vld [vmem:[#allocation12 + $0x34c] sm:$0xf] }
 0x307   :  { %v11592_v49 = vor.u32 %v14947_v31, %v11591_v19  ;;  %4030 = vmatpush.bf16.msra.mxu1 %v11880_v24  ;;  %v14935_v29 = vld [vmem:[#allocation12 + $0x10c] sm:$0xf]  ;;  %vm16833_vm6 = vcmp.eq.f32.partialorder %v3155_v27, 8.507059e+37  ;;  %v11783_v27 = vld [vmem:[#allocation12 + $0x2c8] sm:$0xf] }
 0x308   :  { %v16804_v15 = vpop.eup %15802  ;;  %v3131_v63 = vadd.f32 %v16796_v37, %v3130_v55  ;;  %v11561_v48 = vld [vmem:[#allocation12 + $0x128] sm:$0xf0]  ;;  %v14995_v20 = vld [vmem:[#allocation12 + $0x2e4] sm:$0xf0] }
 0x309   :  { %v3002_v8 = vpop.f32.mrf.mxu0  ;;  %v3015_v50 = vpop.f32.mrf.mxu1  ;;  %v3147_v47 = vmul.f32 %v16804_v15, %v16793_v59  ;;  %vm3152_vm3 = vweird.f32 %v16804_v15  ;;  %4043 = vmatpush.bf16.msra.mxu2 %v11628_v0  ;;  %4056 = vmatpush.bf16.msrb.mxu3 %v11884_v54  ;;  %v14999_v55 = vld [vmem:[#allocation12 + $0x30c] sm:$0xf]  ;;  %v11495_v16 = vld [vmem:[#allocation12 + $0x88] sm:$0xf] }
 0x30a   :  { %v3016_v23 = vadd.f32 %v3015_v50, %v3002_v8  ;;  %v14939_v8 = vld [vmem:[#allocation12 + $0x124] sm:$0xf0]  ;;  %4018 = vmatpush.bf16.msra.mxu0 %v11592_v49  ;;  %vm16828_vm5 = vmor %vm3151_vm4, %vm3152_vm3  ;;  %v11817_v0 = vld [vmem:[#allocation12 + $0x328] sm:$0xf0]  ;;  %v3135_v54 = vsel %vm16818_vm2, %v16796_v37, %v3131_v63 }
 0x30b   :  { %v3148_v35 = vsub.f32 1.0, %v3147_v47  ;;  %v11815_v50 = vld [vmem:[#allocation12 + $0x308] sm:$0xf]  ;;  %v11560_v24 = vor.u32 %v14939_v8, %v11559_v21  ;;  %v3158_v47 = vor.u32 1.1754944e-38, %v3157_v3  ;;  %4031 = vmatpush.bf16.msra.mxu1 %v11848_v10  ;;  %v11820_v10 = vor.u32 %v14999_v55, %v11817_v0  ;;  %v11785_v21 = vld [vmem:[#allocation12 + $0x2e8] sm:$0xf0] }
 0x30c   :  { %v3121_v39 = vadd.f32 %v3016_v23, %v16498_v53  ;;  %v11849_v53 = vld [vmem:[#allocation12 + $0x368] sm:$0xf0]  ;;  %v11816_v31 = vor.u32 %v15003_v57, %v11815_v50  ;;  %v11527_v3 = vld [vmem:[#allocation12 + $0xc8] sm:$0xf]  ;;  %v11784_v8 = vor.u32 %v14995_v20, %v11783_v27 }
 0x30d   :  { %v3149_v22 = vmul.f32 %v16804_v15, %v3148_v35  ;;  %v11852_v46 = vor.u32 %v15007_v12, %v11849_v53  ;;  %4044 = vmatpush.bf16.msra.mxu2 %v11596_v14  ;;  %v11564_v35 = vor.u32 %v14935_v29, %v11561_v48  ;;  %v14927_v12 = vld [vmem:[#allocation12 + $0xcc] sm:$0xf]  ;;  %v14923_v29 = vld [vmem:[#allocation12 + $0xa4] sm:$0xf0] }
 0x30e   :  { %15804 = vtanh.f32 %v3121_v39  ;;  %v14931_v39 = vld [vmem:[#allocation12 + $0xe4] sm:$0xf0]  ;;  %v11529_v53 = vld [vmem:[#allocation12 + $0xe8] sm:$0xf0]  ;;  %4019 = vmatpush.bf16.msra.mxu0 %v11560_v24 }
 0x30f   :  { %v3150_v23 = vadd.f32 %v16804_v15, %v3149_v22  ;;  %4057 = vmatpush.bf16.msrb.mxu3 %v11852_v46  ;;  %v11528_v63 = vor.u32 %v14931_v39, %v11527_v3  ;;  %v14991_v14 = vld [vmem:[#allocation12 + $0x2cc] sm:$0xf]  ;;  %4032 = vmatpush.bf16.msra.mxu1 %v11816_v31  ;;  %v11532_v13 = vor.u32 %v14927_v12, %v11529_v53  ;;  %v14987_v24 = vld [vmem:[#allocation12 + $0x2a4] sm:$0xf0] }
 0x310   :  { %v3028_v19 = vpop.f32.mrf.mxu2  ;;  %v3041_v59 = vpop.f32.mrf.mxu3  ;;  %v11788_v48 = vor.u32 %v14991_v14, %v11785_v21  ;;  %v14919_v55 = vld [vmem:[#allocation12 + $0x8c] sm:$0xf]  ;;  %v11463_v0 = vld [vmem:[#allocation12 + $0x48] sm:$0xf] }
 0x311   :  { %v3042_v49 = vadd.f32 %v3041_v59, %v3028_v19  ;;  %v3004_v45 = vpop.f32.mrf.mxu0  ;;  %v3017_v42 = vpop.f32.mrf.mxu1  ;;  %v3154_v5 = vsel %vm16828_vm5, %v16804_v15, %v3150_v23  ;;  %v3140_v15 = vsel %vm3137_vm7, %v16802_v60, %v3135_v54  ;;  %4045 = vmatpush.bf16.msra.mxu2 %v11564_v35  ;;  %v11496_v60 = vor.u32 %v14923_v29, %v11495_v16  ;;  %v11753_v23 = vld [vmem:[#allocation12 + $0x2a8] sm:$0xf0]  ;;  %v14915_v54 = vld [vmem:[#allocation12 + $0x64] sm:$0xf0] }
 0x312   :  { %v3159_v37 = vsel %vm16833_vm6, %v3158_v47, %v3154_v5  ;;  %4020 = vmatpush.bf16.msra.mxu0 %v11528_v63  ;;  %v11497_v47 = vld [vmem:[#allocation12 + $0xa8] sm:$0xf0]  ;;  %v14979_v42 = vld [vmem:[#allocation12 + $0x264] sm:$0xf0]  ;;  %v11464_v39 = vor.u32 %v14915_v54, %v11463_v0  ;;  %v11663_v0 = vld [vmem:[#allocation12 + $0x1d0] sm:$0xf] }
 0x313   :  { %v3122_v2 = vadd.f32 %v3042_v49, %v16496_v11  ;;  %v3181_v46 = vmul.f32 %v3159_v37, %v16691_v7  ;;  %4058 = vmatpush.bf16.msrb.mxu3 %v11820_v10  ;;  %v11751_v11 = vld [vmem:[#allocation12 + $0x288] sm:$0xf]  ;;  %v14983_v7 = vld [vmem:[#allocation12 + $0x28c] sm:$0xf]  ;;  %4033 = vmatpush.bf16.msra.mxu1 %v11784_v8  ;;  %v11500_v31 = vor.u32 %v14919_v55, %v11497_v47  ;;  %v14964_v54 = vld [vmem:[#allocation12 + $0x1ec] sm:$0xf0] }
 0x314   :  { %v15805_v22 = vpop.eup %15804  ;;  %v11752_v59 = vor.u32 %v14987_v24, %v11751_v11  ;;  %v11719_v49 = vld [vmem:[#allocation12 + $0x248] sm:$0xf]  ;;  %v11756_v45 = vor.u32 %v14983_v7, %v11753_v23  ;;  %v14911_v35 = vld [vmem:[#allocation12 + $0x4c] sm:$0xf] }
 0x315   :  { %v3182_v50 = vmul.f32 %v15805_v22, %v3140_v15  ;;  %v11420_v57 = vmul.f32 -1.442695, %v3122_v2  ;;  %4046 = vmatpush.bf16.msra.mxu2 %v11532_v13  ;;  %v11465_v3 = vld [vmem:[#allocation12 + $0x68] sm:$0xf0]  ;;  %v11720_v10 = vor.u32 %v14979_v42, %v11719_v49  ;;  %v11431_v20 = vld [vmem:[#allocation12 + $0x8] sm:$0xf] }
 0x316   :  { %4021 = vmatpush.bf16.msra.mxu0 %v11496_v60  ;;  %v14975_v27 = vld [vmem:[#allocation12 + $0x24c] sm:$0xf]  ;;  %v14907_v12 = vld [vmem:[#allocation12 + $0x24] sm:$0xf0]  ;;  %v11468_v37 = vor.u32 %v14911_v35, %v11465_v3  ;;  %v11919_v49 = vld [vmem:[#allocation12 + $0x3d0] sm:$0xf] }
 0x317   :  { %v16850_v32 = vadd.f32 %v3182_v50, %v3181_v46  ;;  %15806 = vpow2.f32 %v11420_v57  ;;  %4059 = vmatpush.bf16.msrb.mxu3 %v11788_v48  ;;  %v11721_v5 = vld [vmem:[#allocation12 + $0x268] sm:$0xf0]  ;;  %4034 = vmatpush.bf16.msra.mxu1 %v11752_v59  ;;  %v11687_v2 = vld [vmem:[#allocation12 + $0x208] sm:$0xf]  ;;  %v11432_v46 = vor.u32 %v14907_v12, %v11431_v20  ;;  %v15028_v42 = vld [vmem:[#allocation12 + $0x3ec] sm:$0xf0] }
 0x318   :  { %v3030_v36 = vpop.f32.mrf.mxu2  ;;  %v3043_v19 = vpop.f32.mrf.mxu3  ;;  %v14971_v63 = vld [vmem:[#allocation12 + $0x224] sm:$0xf0]  ;;  %v11724_v21 = vor.u32 %v14975_v27, %v11721_v5  ;;  %v14903_v22 = vld [vmem:[#allocation12 + $0xc] sm:$0xf]  ;;  %v14960_v35 = vld [vmem:[#allocation12 + $0x1d4] sm:$0xf] }
 0x319   :  { %4047 = vmatpush.bf16.msra.mxu2 %v11500_v31  ;;  %v11433_v15 = vld [vmem:[#allocation12 + $0x28] sm:$0xf0]  ;;  %v11688_v57 = vor.u32 %v14971_v63, %v11687_v2  ;;  %v11665_v27 = vld [vmem:[#allocation12 + $0x1f0] sm:$0xf0]  ;;  %v11631_v2 = vld [vmem:[#allocation12 + $0x190] sm:$0xf] }
 0x31a   :  { %4022 = vmatpush.bf16.msra.mxu0 %v11464_v39  ;;  %v14967_v8 = vld [vmem:[#allocation12 + $0x20c] sm:$0xf]  ;;  %v11436_v13 = vor.u32 %v14903_v22, %v11433_v15  ;;  %v15024_v5 = vld [vmem:[#allocation12 + $0x3d4] sm:$0xf]  ;;  %v14956_v63 = vld [vmem:[#allocation12 + $0x1ac] sm:$0xf0] }
 0x31b   :  { %4060 = vmatpush.bf16.msrb.mxu3 %v11756_v45  ;;  %v11689_v50 = vld [vmem:[#allocation12 + $0x228] sm:$0xf0]  ;;  %4035 = vmatpush.bf16.msra.mxu1 %v11720_v10  ;;  %v11921_v10 = vld [vmem:[#allocation12 + $0x3f0] sm:$0xf0]  ;;  %v11887_v22 = vld [vmem:[#allocation12 + $0x390] sm:$0xf] }
 0x31c   :  { %v11692_v16 = vor.u32 %v14967_v8, %v11689_v50  ;;  %v15020_v15 = vld [vmem:[#allocation12 + $0x3ac] sm:$0xf0]  ;;  %v11633_v8 = vld [vmem:[#allocation12 + $0x1b0] sm:$0xf0] }
 0x31d   :  { %v15807_v53 = vpop.eup %15806  ;;  %4048 = vmatpush.bf16.msra.mxu2 %v11468_v37  ;;  %v11920_v37 = vor.u32 %v15028_v42, %v11919_v49  ;;  %v15016_v50 = vld [vmem:[#allocation12 + $0x394] sm:$0xf]  ;;  %v15004_v42 = vld [vmem:[#allocation12 + $0x32c] sm:$0xf0] }
 0x31e   :  { %v3165_v14 = vadd.f32 1.0, %v15807_v53  ;;  %4023 = vmatpush.bf16.msra.mxu0 %v11432_v46  ;;  %v11664_v53 = vor.u32 %v14964_v54, %v11663_v0  ;;  %v14952_v46 = vld [vmem:[#allocation12 + $0x194] sm:$0xf]  ;;  %v14940_v0 = vld [vmem:[#allocation12 + $0x12c] sm:$0xf0] }
 0x31f   :  { %4061 = vmatpush.bf16.msrb.mxu3 %v11724_v21  ;;  %4036 = vmatpush.bf16.msra.mxu1 %v11688_v57  ;;  %v11924_v21 = vor.u32 %v15024_v5, %v11921_v10  ;;  %v11889_v57 = vld [vmem:[#allocation12 + $0x3b0] sm:$0xf0] }
 0x320   :  { %15808 = vrcp.f32 %v3165_v14  ;;  %v3177_v24 = vand.u32 2147483648, %v3165_v14  ;;  %v3175_v60 = vand.u32 2147483647, %v3165_v14  ;;  %vm3171_vm9 = vweird.f32 %v3165_v14 }
 0x321   :  { %4049 = vmatpush.bf16.msra.mxu2 %v11436_v13  ;;  %15810 = vtanh.f32 %v16850_v32  ;;  %v11632_v13 = vor.u32 %v14956_v63, %v11631_v2 }
 0x322   :  { %v3178_v7 = vor.u32 1.1754944e-38, %v3177_v24  ;;  %vm3176_vm11 = vcmp.eq.f32.partialorder %v3175_v60, 8.507059e+37  ;;  %v11892_v24 = vor.u32 %v15016_v50, %v11889_v57  ;;  %v15012_v60 = vld [vmem:[#allocation12 + $0x36c] sm:$0xf0] }
 0x323   :  { %4062 = vmatpush.bf16.msrb.mxu3 %v11692_v16  ;;  %v11888_v16 = vor.u32 %v15020_v15, %v11887_v22  ;;  %v14928_v22 = vld [vmem:[#allocation12 + $0xd4] sm:$0xf] }
 0x324   :  { %v11537_v15 = vld [vmem:[#allocation12 + $0xf0] sm:$0xf0] }
 0x326   :  { %v15809_v29 = vpop.eup %15808 }
 0x327   :  { %v3167_v48 = vmul.f32 %v15809_v29, %v3165_v14  ;;  %vm3172_vm8 = vweird.f32 %v15809_v29  ;;  %v15811_v36 = vpop.eup %15810  ;;  %v11668_v14 = vor.u32 %v14960_v35, %v11665_v27  ;;  %v14936_v35 = vld [vmem:[#allocation12 + $0x114] sm:$0xf] }
 0x328   :  { %vm3173_vm10 = vmor %vm3171_vm9, %vm3172_vm8  ;;  %v11825_v27 = vld [vmem:[#allocation12 + $0x330] sm:$0xf0] }
 0x329   :  { %v3168_v11 = vsub.f32 1.0, %v3167_v48  ;;  %v14948_v48 = vld [vmem:[#allocation12 + $0x16c] sm:$0xf0] }
 0x32b   :  { %v3169_v55 = vmul.f32 %v15809_v29, %v3168_v11  ;;  %v11636_v11 = vor.u32 %v14952_v46, %v11633_v8  ;;  %v14992_v46 = vld [vmem:[#allocation12 + $0x2d4] sm:$0xf] }
 0x32c   :  { %v11793_v8 = vld [vmem:[#allocation12 + $0x2f0] sm:$0xf0] }
 0x32d   :  { %v3170_v47 = vadd.f32 %v15809_v29, %v3169_v55  ;;  %v11855_v55 = vld [vmem:[#allocation12 + $0x350] sm:$0xf] }
 0x32f   :  { %v3174_v23 = vsel %vm3173_vm10, %v15809_v29, %v3170_v47  ;;  %v11599_v29 = vld [vmem:[#allocation12 + $0x150] sm:$0xf]  ;;  %v14944_v47 = vld [vmem:[#allocation12 + $0x154] sm:$0xf] }
 0x330   :  { %v3179_v19 = vsel %vm3176_vm11, %v3178_v7, %v3174_v23  ;;  %v11601_v7 = vld [vmem:[#allocation12 + $0x170] sm:$0xf0] }
 0x331   :  { %v3185_v59 = vmul.f32 %v15811_v36, %v3179_v19  ;;  %v15008_v23 = vld [vmem:[#allocation12 + $0x354] sm:$0xf]  ;;  %v11600_v19 = vor.u32 %v14948_v48, %v11599_v29  ;;  %v11604_v54 = vor.u32 %v14944_v47, %v11601_v7  ;;  %v11540_v29 = vor.u32 %v14928_v22, %v11537_v15 }
 0x332   :  { %v11857_v36 = vld [vmem:[#allocation12 + $0x370] sm:$0xf0]  ;;  %v11796_v48 = vor.u32 %v14992_v46, %v11793_v8  ;;  %v11671_v46 = vld [vmem:[#allocation12 + $0x1d8] sm:$0xf] }
 0x333   :  { %v3186_v31 = vpack.c.bf16 %v3185_v59, %v3185_v59  ;;  %v11856_v59 = vor.u32 %v15012_v60, %v11855_v55  ;;  %v11860_v49 = vor.u32 %v15008_v23, %v11857_v36  ;;  %v14920_v55 = vld [vmem:[#allocation12 + $0x94] sm:$0xf]  ;;  %v14965_v8 = vld [vmem:[#allocation12 + $0x1f4] sm:$0xf0] }
 0x334   :  { %v11505_v60 = vld [vmem:[#allocation12 + $0xb0] sm:$0xf0] }
 0x335   :  { %3187 = vst [vmem:[#allocation3] sm:$0xf] %v3186_v31  ;;  %v11567_v31 = vld [vmem:[#allocation12 + $0x110] sm:$0xf]  ;;  %v14984_v47 = vld [vmem:[#allocation12 + $0x294] sm:$0xf] }
 0x336   :  { %v11568_v5 = vor.u32 %v14940_v0, %v11567_v31  ;;  %v11761_v7 = vld [vmem:[#allocation12 + $0x2b0] sm:$0xf0]  ;;  %v11508_v31 = vor.u32 %v14920_v55, %v11505_v60 }
 0x337   :  { %v11764_v0 = vor.u32 %v14984_v47, %v11761_v7  ;;  %v14968_v22 = vld [vmem:[#allocation12 + $0x214] sm:$0xf]  ;;  %v11672_v47 = vor.u32 %v14965_v8, %v11671_v46  ;;  %v11575_v46 = vld [vmem:[#allocation12 + $0x118] sm:$0xf] }
 0x338   :  { %v11697_v15 = vld [vmem:[#allocation12 + $0x230] sm:$0xf0]  ;;  %v14941_v8 = vld [vmem:[#allocation12 + $0x134] sm:$0xf0] }
 0x339   :  { %v11700_v60 = vor.u32 %v14968_v22, %v11697_v15 }
 0x33c   :  { %v3188_v45 = vld [vmem:[#allocation3] sm:$0xff] }
 0x33d   :  { %v3318_v3 = vunpack.c.l.b16 %v3188_v45  ;;  %v3319_v39 = vunpack.c.h.b16 %v3188_v45  ;;  %v11823_v45 = vld [vmem:[#allocation12 + $0x310] sm:$0xf] }
 0x33e   :  { %v11824_v10 = vor.u32 %v15004_v42, %v11823_v45  ;;  %v14912_v45 = vld [vmem:[#allocation12 + $0x54] sm:$0xf] }
 0x33f   :  { %v16853_v20 = vpack.c.b16 %v3318_v3, %v3318_v3  ;;  %v16855_v12 = vpack.c.b16 %v3319_v39, %v3319_v39  ;;  %v11569_v3 = vld [vmem:[#allocation12 + $0x130] sm:$0xf0] }
 0x340   :  { %v15000_v39 = vld [vmem:[#allocation12 + $0x314] sm:$0xf]  ;;  %v11572_v2 = vor.u32 %v14936_v35, %v11569_v3 }
 0x341   :  { %3972 = vmatmul.bf16.vlgmr.msrb.gmra.mxu0 %v16853_v20  ;;  %3985 = vmatmul.bf16.vlgmr.msrb.gmra.mxu1 %v16855_v12  ;;  %v11828_v63 = vor.u32 %v15000_v39, %v11825_v27  ;;  %v11473_v42 = vld [vmem:[#allocation12 + $0x70] sm:$0xf0]  ;;  %v11439_v39 = vld [vmem:[#allocation12 + $0x10] sm:$0xf] }
 0x342   :  { %3998 = vmatmul.bf16.vlgmr.msrb.gmra.mxu2 %v16853_v20  ;;  %4011 = vmatmul.bf16.vlgmr.msra.gmra.mxu3 %v16855_v12  ;;  %v14976_v35 = vld [vmem:[#allocation12 + $0x254] sm:$0xf] }
 0x343   :  { %4068 = vmatpush.bf16.msrb.mxu0 %v11664_v53  ;;  %4081 = vmatpush.bf16.msrb.mxu1 %v11920_v37  ;;  %v11535_v53 = vld [vmem:[#allocation12 + $0xd0] sm:$0xf]  ;;  %v11729_v3 = vld [vmem:[#allocation12 + $0x270] sm:$0xf0] }
 0x344   :  { %4094 = vmatpush.bf16.msrb.mxu2 %v11668_v14  ;;  %4107 = vmatpush.bf16.msra.mxu3 %v11924_v21  ;;  %v14932_v37 = vld [vmem:[#allocation12 + $0xec] sm:$0xf0] }
 0x345   :  { %v11791_v14 = vld [vmem:[#allocation12 + $0x2d0] sm:$0xf]  ;;  %v11536_v50 = vor.u32 %v14932_v37, %v11535_v53 }
 0x346   :  { %v14996_v21 = vld [vmem:[#allocation12 + $0x2ec] sm:$0xf0] }
 0x347   :  { %4069 = vmatpush.bf16.msrb.mxu0 %v11632_v13  ;;  %4082 = vmatpush.bf16.msrb.mxu1 %v11888_v16  ;;  %v11792_v57 = vor.u32 %v14996_v21, %v11791_v14  ;;  %v11503_v13 = vld [vmem:[#allocation12 + $0x90] sm:$0xf]  ;;  %v14904_v14 = vld [vmem:[#allocation12 + $0x14] sm:$0xf] }
 0x348   :  { %4095 = vmatpush.bf16.msrb.mxu2 %v11636_v11  ;;  %4108 = vmatpush.bf16.msra.mxu3 %v11892_v24  ;;  %v14924_v16 = vld [vmem:[#allocation12 + $0xac] sm:$0xf0]  ;;  %v11441_v21 = vld [vmem:[#allocation12 + $0x30] sm:$0xf0] }
 0x349   :  { %v11759_v11 = vld [vmem:[#allocation12 + $0x290] sm:$0xf]  ;;  %v11504_v23 = vor.u32 %v14924_v16, %v11503_v13  ;;  %v14961_v13 = vld [vmem:[#allocation12 + $0x1dc] sm:$0xf]  ;;  %v11444_v55 = vor.u32 %v14904_v14, %v11441_v21 }
 0x34a   :  { %v14988_v24 = vld [vmem:[#allocation12 + $0x2ac] sm:$0xf0]  ;;  %v15009_v14 = vld [vmem:[#allocation12 + $0x35c] sm:$0xf] }
 0x34b   :  { %4070 = vmatpush.bf16.msrb.mxu0 %v11600_v19  ;;  %4083 = vmatpush.bf16.msrb.mxu1 %v11856_v59  ;;  %v11760_v36 = vor.u32 %v14988_v24, %v11759_v11  ;;  %v11471_v19 = vld [vmem:[#allocation12 + $0x50] sm:$0xf]  ;;  %v15025_v11 = vld [vmem:[#allocation12 + $0x3dc] sm:$0xf] }
 0x34c   :  { %4096 = vmatpush.bf16.msrb.mxu2 %v11604_v54  ;;  %4109 = vmatpush.bf16.msra.mxu3 %v11860_v49  ;;  %v14916_v59 = vld [vmem:[#allocation12 + $0x6c] sm:$0xf0]  ;;  %v11929_v24 = vld [vmem:[#allocation12 + $0x3f8] sm:$0xf0] }
 0x34d   :  { %v11727_v54 = vld [vmem:[#allocation12 + $0x250] sm:$0xf]  ;;  %v11472_v27 = vor.u32 %v14916_v59, %v11471_v19  ;;  %v11932_v59 = vor.u32 %v15025_v11, %v11929_v24  ;;  %v11865_v21 = vld [vmem:[#allocation12 + $0x378] sm:$0xf0] }
 0x34e   :  { %v14980_v49 = vld [vmem:[#allocation12 + $0x26c] sm:$0xf0]  ;;  %v15001_v11 = vld [vmem:[#allocation12 + $0x31c] sm:$0xf] }
 0x34f   :  { %4071 = vmatpush.bf16.msrb.mxu0 %v11568_v5  ;;  %4084 = vmatpush.bf16.msrb.mxu1 %v11824_v10  ;;  %v11728_v5 = vor.u32 %v14980_v49, %v11727_v54  ;;  %v14908_v10 = vld [vmem:[#allocation12 + $0x2c] sm:$0xf0]  ;;  %v14953_v54 = vld [vmem:[#allocation12 + $0x19c] sm:$0xf] }
 0x350   :  { %4097 = vmatpush.bf16.msrb.mxu2 %v11572_v2  ;;  %4110 = vmatpush.bf16.msra.mxu3 %v11828_v63  ;;  %v11695_v53 = vld [vmem:[#allocation12 + $0x210] sm:$0xf]  ;;  %v11476_v2 = vor.u32 %v14912_v45, %v11473_v42  ;;  %v11732_v63 = vor.u32 %v14976_v35, %v11729_v3  ;;  %v11440_v16 = vor.u32 %v14908_v10, %v11439_v39  ;;  %v11641_v49 = vld [vmem:[#allocation12 + $0x1b8] sm:$0xf0]  ;;  %v11607_v39 = vld [vmem:[#allocation12 + $0x158] sm:$0xf] }
 0x351   :  { %4024 = vmatmul.bf16.vlgmr.msra.gmra.mxu0 %v16853_v20  ;;  %4037 = vmatmul.bf16.vlgmr.msra.gmra.mxu1 %v16855_v12  ;;  %v14972_v37 = vld [vmem:[#allocation12 + $0x22c] sm:$0xf0]  ;;  %v15017_v45 = vld [vmem:[#allocation12 + $0x39c] sm:$0xf] }
 0x352   :  { %4050 = vmatmul.bf16.vlgmr.msra.gmra.mxu2 %v16853_v20  ;;  %4063 = vmatmul.bf16.vlgmr.msrb.gmra.mxu3 %v16855_v12  ;;  %v11897_v42 = vld [vmem:[#allocation12 + $0x3b8] sm:$0xf0] }
 0x353   :  { %4072 = vmatpush.bf16.msrb.mxu0 %v11536_v50  ;;  %4085 = vmatpush.bf16.msrb.mxu1 %v11792_v57  ;;  %v11927_v50 = vld [vmem:[#allocation12 + $0x3d8] sm:$0xf]  ;;  %v11900_v10 = vor.u32 %v15017_v45, %v11897_v42  ;;  %v11833_v24 = vld [vmem:[#allocation12 + $0x338] sm:$0xf0] }
 0x354   :  { %4098 = vmatpush.bf16.msrb.mxu2 %v11540_v29  ;;  %4111 = vmatpush.bf16.msra.mxu3 %v11796_v48  ;;  %v15029_v57 = vld [vmem:[#allocation12 + $0x3f4] sm:$0xf0]  ;;  %v11696_v29 = vor.u32 %v14972_v37, %v11695_v53  ;;  %v11673_v48 = vld [vmem:[#allocation12 + $0x1f8] sm:$0xf0] }
 0x355   :  { %v11928_v7 = vor.u32 %v15029_v57, %v11927_v50  ;;  %v11676_v19 = vor.u32 %v14961_v13, %v11673_v48  ;;  %v11863_v53 = vld [vmem:[#allocation12 + $0x358] sm:$0xf]  ;;  %v11868_v57 = vor.u32 %v15009_v14, %v11865_v21  ;;  %v11577_v48 = vld [vmem:[#allocation12 + $0x138] sm:$0xf0] }
 0x356   :  { %v15013_v37 = vld [vmem:[#allocation12 + $0x374] sm:$0xf0] }
 0x357   :  { %4073 = vmatpush.bf16.msrb.mxu0 %v11504_v23  ;;  %4086 = vmatpush.bf16.msrb.mxu1 %v11760_v36  ;;  %v11639_v23 = vld [vmem:[#allocation12 + $0x198] sm:$0xf]  ;;  %v11864_v15 = vor.u32 %v15013_v37, %v11863_v53  ;;  %v14921_v53 = vld [vmem:[#allocation12 + $0x9c] sm:$0xf] }
 0x358   :  { %4099 = vmatpush.bf16.msrb.mxu2 %v11508_v31  ;;  %4112 = vmatpush.bf16.msra.mxu3 %v11764_v0  ;;  %v14957_v36 = vld [vmem:[#allocation12 + $0x1b4] sm:$0xf0]  ;;  %v11513_v37 = vld [vmem:[#allocation12 + $0xb8] sm:$0xf0] }
 0x359   :  { %v11895_v31 = vld [vmem:[#allocation12 + $0x398] sm:$0xf]  ;;  %v11640_v35 = vor.u32 %v14957_v36, %v11639_v23  ;;  %v11836_v36 = vor.u32 %v15001_v11, %v11833_v24 }
 0x35a   :  { %v15021_v0 = vld [vmem:[#allocation12 + $0x3b4] sm:$0xf0] }
 0x35b   :  { %4074 = vmatpush.bf16.msrb.mxu0 %v11472_v27  ;;  %4087 = vmatpush.bf16.msrb.mxu1 %v11728_v5  ;;  %v11896_v3 = vor.u32 %v15021_v0, %v11895_v31  ;;  %v14949_v27 = vld [vmem:[#allocation12 + $0x174] sm:$0xf0]  ;;  %v11644_v5 = vor.u32 %v14953_v54, %v11641_v49  ;;  %v14929_v31 = vld [vmem:[#allocation12 + $0xdc] sm:$0xf] }
 0x35c   :  { %4100 = vmatpush.bf16.msrb.mxu2 %v11476_v2  ;;  %4113 = vmatpush.bf16.msra.mxu3 %v11732_v63  ;;  %v14945_v2 = vld [vmem:[#allocation12 + $0x15c] sm:$0xf]  ;;  %v11608_v22 = vor.u32 %v14949_v27, %v11607_v39  ;;  %v11831_v13 = vld [vmem:[#allocation12 + $0x318] sm:$0xf] }
 0x35d   :  { %v11609_v63 = vld [vmem:[#allocation12 + $0x178] sm:$0xf0] }
 0x35e   :  { %v11612_v50 = vor.u32 %v14945_v2, %v11609_v63  ;;  %v11545_v0 = vld [vmem:[#allocation12 + $0xf8] sm:$0xf0] }
 0x35f   :  { %4075 = vmatpush.bf16.msrb.mxu0 %v11440_v16  ;;  %4088 = vmatpush.bf16.msrb.mxu1 %v11696_v29  ;;  %v15005_v16 = vld [vmem:[#allocation12 + $0x334] sm:$0xf0]  ;;  %v14937_v29 = vld [vmem:[#allocation12 + $0x11c] sm:$0xf]  ;;  %v11548_v39 = vor.u32 %v14929_v31, %v11545_v0 }
 0x360   :  { %4101 = vmatpush.bf16.msrb.mxu2 %v11444_v55  ;;  %4114 = vmatpush.bf16.msra.mxu3 %v11700_v60  ;;  %v11576_v55 = vor.u32 %v14941_v8, %v11575_v46  ;;  %v11832_v60 = vor.u32 %v15005_v16, %v11831_v13  ;;  %v11580_v23 = vor.u32 %v14937_v29, %v11577_v48  ;;  %v14993_v54 = vld [vmem:[#allocation12 + $0x2dc] sm:$0xf] }
 0x361   :  { %v11801_v49 = vld [vmem:[#allocation12 + $0x2f8] sm:$0xf0]  ;;  %v11516_v46 = vor.u32 %v14921_v53, %v11513_v37 }
 0x362   :  { %4076 = vmatmul.bf16.vlgmr.msrb.gmra.mxu0 %v16853_v20  ;;  %4089 = vmatmul.bf16.vlgmr.msrb.gmra.mxu1 %v16855_v12  ;;  %v11804_v27 = vor.u32 %v14993_v54, %v11801_v49  ;;  %v14985_v2 = vld [vmem:[#allocation12 + $0x29c] sm:$0xf] }
 0x363   :  { %4120 = vmatpush.bf16.msra.mxu0 %v11672_v47  ;;  %4133 = vmatpush.bf16.msra.mxu1 %v11928_v7  ;;  %v11543_v47 = vld [vmem:[#allocation12 + $0xd8] sm:$0xf]  ;;  %v11769_v63 = vld [vmem:[#allocation12 + $0x2b8] sm:$0xf0] }
 0x364   :  { %4146 = vmatpush.bf16.msra.mxu2 %v11676_v19  ;;  %4159 = vmatpush.bf16.msrb.mxu3 %v11932_v59  ;;  %v14933_v7 = vld [vmem:[#allocation12 + $0xf4] sm:$0xf0]  ;;  %v11772_v8 = vor.u32 %v14985_v2, %v11769_v63  ;;  %v14913_v13 = vld [vmem:[#allocation12 + $0x5c] sm:$0xf] }
 0x365   :  { %4102 = vmatmul.bf16.vlgmr.msrb.gmra.mxu2 %v16853_v20  ;;  %4115 = vmatmul.bf16.vlgmr.msra.gmra.mxu3 %v16855_v12  ;;  %v11799_v19 = vld [vmem:[#allocation12 + $0x2d8] sm:$0xf]  ;;  %v11544_v45 = vor.u32 %v14933_v7, %v11543_v47  ;;  %v11481_v16 = vld [vmem:[#allocation12 + $0x78] sm:$0xf0] }
 0x366   :  { %v14997_v59 = vld [vmem:[#allocation12 + $0x2f4] sm:$0xf0]  ;;  %v14977_v29 = vld [vmem:[#allocation12 + $0x25c] sm:$0xf]  ;;  %v11484_v47 = vor.u32 %v14913_v13, %v11481_v16 }
 0x367   :  { %4121 = vmatpush.bf16.msra.mxu0 %v11640_v35  ;;  %4134 = vmatpush.bf16.msra.mxu1 %v11896_v3  ;;  %v11800_v42 = vor.u32 %v14997_v59, %v11799_v19  ;;  %v11511_v35 = vld [vmem:[#allocation12 + $0x98] sm:$0xf]  ;;  %v11737_v48 = vld [vmem:[#allocation12 + $0x278] sm:$0xf0] }
 0x368   :  { %4147 = vmatpush.bf16.msra.mxu2 %v11644_v5  ;;  %4160 = vmatpush.bf16.msrb.mxu3 %v11900_v10  ;;  %v14925_v3 = vld [vmem:[#allocation12 + $0xb4] sm:$0xf0]  ;;  %v11740_v7 = vor.u32 %v14977_v29, %v11737_v48  ;;  %v14905_v19 = vld [vmem:[#allocation12 + $0x1c] sm:$0xf] }
 0x369   :  { %v11767_v5 = vld [vmem:[#allocation12 + $0x298] sm:$0xf]  ;;  %v11512_v14 = vor.u32 %v14925_v3, %v11511_v35  ;;  %v11449_v59 = vld [vmem:[#allocation12 + $0x38] sm:$0xf0] }
 0x36a   :  { %v14989_v10 = vld [vmem:[#allocation12 + $0x2b4] sm:$0xf0]  ;;  %v14969_v31 = vld [vmem:[#allocation12 + $0x21c] sm:$0xf] }
 0x36b   :  { %4122 = vmatpush.bf16.msra.mxu0 %v11608_v22  ;;  %4135 = vmatpush.bf16.msra.mxu1 %v11864_v15  ;;  %v11768_v21 = vor.u32 %v14989_v10, %v11767_v5  ;;  %v11479_v22 = vld [vmem:[#allocation12 + $0x58] sm:$0xf]  ;;  %v11705_v0 = vld [vmem:[#allocation12 + $0x238] sm:$0xf0] }
 0x36c   :  { %4148 = vmatpush.bf16.msra.mxu2 %v11612_v50  ;;  %4161 = vmatpush.bf16.msrb.mxu3 %v11868_v57  ;;  %v14917_v15 = vld [vmem:[#allocation12 + $0x74] sm:$0xf0] }
 0x36d   :  { %v11735_v50 = vld [vmem:[#allocation12 + $0x258] sm:$0xf]  ;;  %v11480_v11 = vor.u32 %v14917_v15, %v11479_v22 }
 0x36e   :  { %v14981_v57 = vld [vmem:[#allocation12 + $0x274] sm:$0xf0] }
 0x36f   :  { %4123 = vmatpush.bf16.msra.mxu0 %v11576_v55  ;;  %4136 = vmatpush.bf16.msra.mxu1 %v11832_v60  ;;  %v11736_v24 = vor.u32 %v14981_v57, %v11735_v50  ;;  %v11447_v55 = vld [vmem:[#allocation12 + $0x18] sm:$0xf] }
 0x370   :  { %4149 = vmatpush.bf16.msra.mxu2 %v11580_v23  ;;  %4162 = vmatpush.bf16.msrb.mxu3 %v11836_v36  ;;  %v14909_v60 = vld [vmem:[#allocation12 + $0x34] sm:$0xf0] }
 0x371   :  { %v11703_v23 = vld [vmem:[#allocation12 + $0x218] sm:$0xf]  ;;  %v11448_v54 = vor.u32 %v14909_v60, %v11447_v55 }
 0x372   :  { %v14973_v36 = vld [vmem:[#allocation12 + $0x234] sm:$0xf0] }
 0x373   :  { %4124 = vmatpush.bf16.msra.mxu0 %v11544_v45  ;;  %4137 = vmatpush.bf16.msra.mxu1 %v11800_v42  ;;  %v11704_v49 = vor.u32 %v14973_v36, %v11703_v23  ;;  %v11452_v45 = vor.u32 %v14905_v19, %v11449_v59  ;;  %v11708_v42 = vor.u32 %v14969_v31, %v11705_v0  ;;  %v12165_v23 = vld [vmem:[#allocation12 + $0x1c0] sm:$0xf] }
 0x374   :  { %4150 = vmatpush.bf16.msra.mxu2 %v11548_v39  ;;  %4163 = vmatpush.bf16.msrb.mxu3 %v11804_v27  ;;  %v15090_v36 = vld [vmem:[#allocation12 + $0x1dc] sm:$0xf0] }
 0x375   :  { %v12166_v59 = vor.u32 %v15090_v36, %v12165_v23  ;;  %v12421_v31 = vld [vmem:[#allocation12 + $0x3c0] sm:$0xf] }
 0x376   :  { %v15154_v0 = vld [vmem:[#allocation12 + $0x3dc] sm:$0xf0] }
 0x377   :  { %4125 = vmatpush.bf16.msra.mxu0 %v11512_v14  ;;  %4138 = vmatpush.bf16.msra.mxu1 %v11768_v21 }
 0x378   :  { %4151 = vmatpush.bf16.msra.mxu2 %v11516_v46  ;;  %4164 = vmatpush.bf16.msrb.mxu3 %v11772_v8 }
 0x37b   :  { %4126 = vmatpush.bf16.msra.mxu0 %v11480_v11  ;;  %4139 = vmatpush.bf16.msra.mxu1 %v11736_v24 }
 0x37c   :  { %4152 = vmatpush.bf16.msra.mxu2 %v11484_v47  ;;  %4165 = vmatpush.bf16.msrb.mxu3 %v11740_v7 }
 0x37f   :  { %4127 = vmatpush.bf16.msra.mxu0 %v11448_v54  ;;  %4140 = vmatpush.bf16.msra.mxu1 %v11704_v49  ;;  %v15086_v54 = vld [vmem:[#allocation12 + $0x1c4] sm:$0xf] }
 0x380   :  { %4153 = vmatpush.bf16.msra.mxu2 %v11452_v45  ;;  %4166 = vmatpush.bf16.msrb.mxu3 %v11708_v42  ;;  %v12422_v45 = vor.u32 %v15154_v0, %v12421_v31  ;;  %v12167_v42 = vld [vmem:[#allocation12 + $0x1e0] sm:$0xf0]  ;;  %v12101_v0 = vld [vmem:[#allocation12 + $0x140] sm:$0xf] }
 0x382   :  { %4128 = vmatmul.bf16.vlgmr.msra.gmra.mxu0 %v16853_v20  ;;  %4141 = vmatmul.bf16.vlgmr.msra.gmra.mxu1 %v16855_v12 }
 0x383   :  { %4154 = vmatmul.bf16.vlgmr.msra.gmra.mxu2 %v16853_v20  ;;  %4167 = vmatmul.bf16.vlgmr.msrb.gmra.mxu3 %v16855_v12 }
 0x384   :  { %5091 = vmatpush.bf16.msrb.mxu0 %v12166_v59  ;;  %5104 = vmatpush.bf16.msrb.mxu1 %v12422_v45 }
 0x3be   :  { %v3973_v35 = vpop.f32.mrf.mxu0  ;;  %v3986_v3 = vpop.f32.mrf.mxu1 }
 0x3bf   :  { %v3987_v39 = vadd.f32 %v3986_v3, %v3973_v35  ;;  %v15150_v35 = vld [vmem:[#allocation12 + $0x3c4] sm:$0xf] }
 0x3c1   :  { %v4172_v27 = vadd.f32 %v3987_v39, %v16540_v44 }
 0x3c3   :  { %v11933_v5 = vmul.f32 -1.442695, %v4172_v27 }
 0x3c5   :  { %15812 = vpow2.f32 %v11933_v5  ;;  %v3999_v10 = vpop.f32.mrf.mxu2  ;;  %v4012_v53 = vpop.f32.mrf.mxu3 }
 0x3c6   :  { %v4013_v37 = vadd.f32 %v4012_v53, %v3999_v10  ;;  %v3975_v2 = vpop.f32.mrf.mxu0  ;;  %v3988_v63 = vpop.f32.mrf.mxu1  ;;  %v12170_v10 = vor.u32 %v15086_v54, %v12167_v42  ;;  %v12423_v53 = vld [vmem:[#allocation12 + $0x3e0] sm:$0xf0]  ;;  %v15074_v54 = vld [vmem:[#allocation12 + $0x15c] sm:$0xf0] }
 0x3c7   :  { %v12426_v63 = vor.u32 %v15150_v35, %v12423_v53  ;;  %v12102_v42 = vor.u32 %v15074_v54, %v12101_v0  ;;  %v15138_v35 = vld [vmem:[#allocation12 + $0x35c] sm:$0xf0] }
 0x3c8   :  { %v4173_v14 = vadd.f32 %v4013_v37, %v16543_v4  ;;  %v597_v37 = vadd.f32 %v16364_v43, %v16350_v38  ;;  %5117 = vmatpush.bf16.msrb.mxu2 %v12170_v10 }
 0x3c9   :  { %5130 = vmatpush.bf16.msra.mxu3 %v12426_v63 }
 0x3ca   :  { %v11934_v21 = vmul.f32 -1.442695, %v4173_v14  ;;  %v12133_v14 = vld [vmem:[#allocation12 + $0x180] sm:$0xf]  ;;  %v626_v43 = vadd.f32 %v16382_v56, %v597_v37 }
 0x3cb   :  { %v15813_v22 = vpop.eup %15812 }
 0x3cc   :  { %v16875_v15 = vadd.f32 1.0, %v15813_v22  ;;  %15814 = vpow2.f32 %v11934_v21  ;;  %v15082_v21 = vld [vmem:[#allocation12 + $0x19c] sm:$0xf0] }
 0x3cd   :  { %v4001_v20 = vpop.f32.mrf.mxu2  ;;  %v4014_v12 = vpop.f32.mrf.mxu3  ;;  %v12389_v22 = vld [vmem:[#allocation12 + $0x380] sm:$0xf] }
 0x3ce   :  { %15816 = vrcp.f32 %v16875_v15  ;;  %v4025_v46 = vpop.f32.mrf.mxu0  ;;  %v4038_v8 = vpop.f32.mrf.mxu1  ;;  %v4191_v47 = vand.u32 2147483648, %v16875_v15  ;;  %v4189_v5 = vand.u32 2147483647, %v16875_v15  ;;  %vm4185_vm14 = vweird.f32 %v16875_v15 }
 0x3cf   :  { %v4039_v19 = vadd.f32 %v4038_v8, %v4025_v46 }
 0x3d0   :  { %vm4190_vm3 = vcmp.eq.f32.partialorder %v4189_v5, 8.507059e+37 }
 0x3d1   :  { %v4174_v20 = vadd.f32 %v4039_v19, %v16558_v18  ;;  %v12391_v19 = vld [vmem:[#allocation12 + $0x3a0] sm:$0xf0] }
 0x3d2   :  { %v15815_v50 = vpop.eup %15814 }
 0x3d3   :  { %v16878_v57 = vadd.f32 1.0, %v15815_v50  ;;  %v12134_v50 = vor.u32 %v15082_v21, %v12133_v14  ;;  %v15134_v21 = vld [vmem:[#allocation12 + $0x344] sm:$0xf] }
 0x3d4   :  { %v16880_v13 = vpop.eup %15816 }
 0x3d5   :  { %v4181_v16 = vmul.f32 %v16880_v13, %v16875_v15  ;;  %15818 = vrcp.f32 %v16878_v57  ;;  %v4051_v29 = vpop.f32.mrf.mxu2  ;;  %v4064_v48 = vpop.f32.mrf.mxu3  ;;  %v4210_v39 = vand.u32 2147483648, %v16878_v57  ;;  %v4208_v12 = vand.u32 2147483647, %v16878_v57  ;;  %5092 = vmatpush.bf16.msrb.mxu0 %v12134_v50 }
 0x3d6   :  { %v4065_v11 = vadd.f32 %v4064_v48, %v4051_v29  ;;  %v4027_v24 = vpop.f32.mrf.mxu0  ;;  %v4040_v55 = vpop.f32.mrf.mxu1  ;;  %v15078_v29 = vld [vmem:[#allocation12 + $0x184] sm:$0xf]  ;;  %vm4186_vm12 = vweird.f32 %v16880_v13  ;;  %vm4204_vm15 = vweird.f32 %v16878_v57  ;;  %v655_v50 = vadd.f32 %v16387_v9, %v16377_v51 }
 0x3d7   :  { %v4182_v60 = vsub.f32 1.0, %v4181_v16  ;;  %v15146_v16 = vld [vmem:[#allocation12 + $0x39c] sm:$0xf0]  ;;  %v12135_v55 = vld [vmem:[#allocation12 + $0x1a0] sm:$0xf0]  ;;  %vm16909_vm0 = vmor %vm4185_vm14, %vm4186_vm12  ;;  %vm16914_vm1 = vcmp.eq.f32.partialorder %v4208_v12, 8.507059e+37 }
 0x3d8   :  { %v4175_v7 = vadd.f32 %v4065_v11, %v16553_v61  ;;  %v4192_v11 = vor.u32 1.1754944e-38, %v4191_v47  ;;  %v12390_v24 = vor.u32 %v15146_v16, %v12389_v22  ;;  %v12138_v36 = vor.u32 %v15078_v29, %v12135_v55  ;;  %v12359_v22 = vld [vmem:[#allocation12 + $0x360] sm:$0xf0]  ;;  %v12069_v29 = vld [vmem:[#allocation12 + $0x100] sm:$0xf] }
 0x3d9   :  { %v4183_v27 = vmul.f32 %v16880_v13, %v4182_v60  ;;  %v15142_v60 = vld [vmem:[#allocation12 + $0x384] sm:$0xf]  ;;  %5093 = vmatpush.bf16.msrb.mxu0 %v12102_v42 }
 0x3da   :  { %v11935_v49 = vmul.f32 -1.442695, %v4175_v7  ;;  %v4211_v7 = vor.u32 1.1754944e-38, %v4210_v39  ;;  %5105 = vmatpush.bf16.msrb.mxu1 %v12390_v24  ;;  %v12394_v31 = vor.u32 %v15142_v60, %v12391_v19  ;;  %5118 = vmatpush.bf16.msrb.mxu2 %v12138_v36  ;;  %v15070_v39 = vld [vmem:[#allocation12 + $0x144] sm:$0xf] }
 0x3db   :  { %v16887_v3 = vpop.eup %15818  ;;  %v4184_v23 = vadd.f32 %v16880_v13, %v4183_v27  ;;  %v12103_v27 = vld [vmem:[#allocation12 + $0x160] sm:$0xf0]  ;;  %v12325_v24 = vld [vmem:[#allocation12 + $0x300] sm:$0xf] }
 0x3dc   :  { %v4200_v2 = vmul.f32 %v16887_v3, %v16878_v57  ;;  %15820 = vpow2.f32 %v11935_v49  ;;  %vm4205_vm13 = vweird.f32 %v16887_v3  ;;  %v12357_v49 = vld [vmem:[#allocation12 + $0x340] sm:$0xf]  ;;  %5131 = vmatpush.bf16.msra.mxu3 %v12394_v31  ;;  %v12106_v14 = vor.u32 %v15070_v39, %v12103_v27  ;;  %v15054_v27 = vld [vmem:[#allocation12 + $0xc4] sm:$0xf] }
 0x3dd   :  { %v4053_v46 = vpop.f32.mrf.mxu2  ;;  %v4066_v8 = vpop.f32.mrf.mxu3  ;;  %15822 = vtanh.f32 %v4174_v20  ;;  %v12358_v63 = vor.u32 %v15138_v35, %v12357_v49  ;;  %vm4206_vm2 = vmor %vm4204_vm15, %vm4205_vm13  ;;  %v4188_v20 = vsel %vm16909_vm0, %v16880_v13, %v4184_v23  ;;  %v15130_v13 = vld [vmem:[#allocation12 + $0x31c] sm:$0xf0] }
 0x3de   :  { %v4201_v48 = vsub.f32 1.0, %v4200_v2  ;;  %v12362_v8 = vor.u32 %v15134_v21, %v12359_v22  ;;  %5119 = vmatpush.bf16.msrb.mxu2 %v12106_v14  ;;  %v4193_v55 = vsel %vm4190_vm3, %v4192_v11, %v4188_v20  ;;  %v12326_v15 = vor.u32 %v15130_v13, %v12325_v24  ;;  %v12037_v11 = vld [vmem:[#allocation12 + $0xc0] sm:$0xf]  ;;  %v15118_v2 = vld [vmem:[#allocation12 + $0x2c4] sm:$0xf] }
 0x3df   :  { %v4077_v56 = vpop.f32.mrf.mxu0  ;;  %v4090_v47 = vpop.f32.mrf.mxu1  ;;  %5106 = vmatpush.bf16.msrb.mxu1 %v12358_v63  ;;  %v15058_v49 = vld [vmem:[#allocation12 + $0xdc] sm:$0xf0] }
 0x3e0   :  { %v4202_v59 = vmul.f32 %v16887_v3, %v4201_v48  ;;  %v4091_v45 = vadd.f32 %v4090_v47, %v4077_v56  ;;  %v15066_v48 = vld [vmem:[#allocation12 + $0x11c] sm:$0xf0]  ;;  %5132 = vmatpush.bf16.msra.mxu3 %v12362_v8  ;;  %v15126_v56 = vld [vmem:[#allocation12 + $0x304] sm:$0xf] }
 0x3e1   :  { %v12070_v9 = vor.u32 %v15066_v48, %v12069_v29  ;;  %v12327_v47 = vld [vmem:[#allocation12 + $0x320] sm:$0xf0]  ;;  %v12293_v35 = vld [vmem:[#allocation12 + $0x2c0] sm:$0xf] }
 0x3e2   :  { %v15821_v10 = vpop.eup %15820  ;;  %v4203_v37 = vadd.f32 %v16887_v3, %v4202_v59  ;;  %v4246_v12 = vadd.f32 %v4091_v45, %v626_v43  ;;  %v15062_v43 = vld [vmem:[#allocation12 + $0x104] sm:$0xf]  ;;  %v12330_v42 = vor.u32 %v15126_v56, %v12327_v47  ;;  %v15122_v39 = vld [vmem:[#allocation12 + $0x2dc] sm:$0xf0] }
 0x3e3   :  { %v16925_v46 = vadd.f32 1.0, %v15821_v10  ;;  %v15823_v23 = vpop.eup %15822  ;;  %5094 = vmatpush.bf16.msrb.mxu0 %v12070_v9  ;;  %5107 = vmatpush.bf16.msrb.mxu1 %v12326_v15  ;;  %v12294_v53 = vor.u32 %v15122_v39, %v12293_v35  ;;  %v12005_v8 = vld [vmem:[#allocation12 + $0x80] sm:$0xf]  ;;  %v12263_v15 = vld [vmem:[#allocation12 + $0x2a0] sm:$0xf0] }
 0x3e4   :  { %v4207_v16 = vsel %vm4206_vm2, %v16887_v3, %v4203_v37  ;;  %v11936_v60 = vmul.f32 -1.442695, %v4246_v12  ;;  %v12071_v3 = vld [vmem:[#allocation12 + $0x120] sm:$0xf0]  ;;  %v4235_v45 = vmul.f32 %v15823_v23, %v4193_v55  ;;  %5133 = vmatpush.bf16.msra.mxu3 %v12330_v42  ;;  %v12261_v48 = vld [vmem:[#allocation12 + $0x280] sm:$0xf] }
 0x3e5   :  { %v4212_v57 = vsel %vm16914_vm1, %v4211_v7, %v4207_v16  ;;  %15824 = vrcp.f32 %v16925_v46  ;;  %v12074_v5 = vor.u32 %v15062_v43, %v12071_v3  ;;  %v684_v7 = vadd.f32 %v16379_v52, %v655_v50  ;;  %v12039_v37 = vld [vmem:[#allocation12 + $0xe0] sm:$0xf0]  ;;  %v15050_v50 = vld [vmem:[#allocation12 + $0x9c] sm:$0xf0] }
 0x3e6   :  { %v4234_v36 = vmul.f32 %v4212_v57, %v16776_v30  ;;  %15826 = vpow2.f32 %v11936_v60  ;;  %v12038_v30 = vor.u32 %v15058_v49, %v12037_v11  ;;  %v12295_v52 = vld [vmem:[#allocation12 + $0x2e0] sm:$0xf0]  ;;  %v12042_v21 = vor.u32 %v15054_v27, %v12039_v37  ;;  %v15114_v24 = vld [vmem:[#allocation12 + $0x29c] sm:$0xf0] }
 0x3e7   :  { %v4079_v0 = vpop.f32.mrf.mxu0  ;;  %v4092_v54 = vpop.f32.mrf.mxu1  ;;  %5120 = vmatpush.bf16.msrb.mxu2 %v12074_v5  ;;  %v12298_v22 = vor.u32 %v15118_v2, %v12295_v52  ;;  %v4228_v16 = vand.u32 2147483647, %v16925_v46  ;;  %5108 = vmatpush.bf16.msrb.mxu1 %v12294_v53  ;;  %v12006_v29 = vor.u32 %v15050_v50, %v12005_v8  ;;  %v12262_v43 = vor.u32 %v15114_v24, %v12261_v48  ;;  %v15046_v55 = vld [vmem:[#allocation12 + $0x84] sm:$0xf]  ;;  %v11973_v47 = vld [vmem:[#allocation12 + $0x40] sm:$0xf] }
 0x3e8   :  { %v4103_v19 = vpop.f32.mrf.mxu2  ;;  %v4116_v59 = vpop.f32.mrf.mxu3  ;;  %v16939_v14 = vadd.f32 %v4235_v45, %v4234_v36  ;;  %5095 = vmatpush.bf16.msrb.mxu0 %v12038_v30  ;;  %v12007_v60 = vld [vmem:[#allocation12 + $0xa0] sm:$0xf0]  ;;  %v4230_v9 = vand.u32 2147483648, %v16925_v46  ;;  %v15106_v0 = vld [vmem:[#allocation12 + $0x25c] sm:$0xf0]  ;;  %vm4224_vm5 = vweird.f32 %v16925_v46 }
 0x3e9   :  { %v4117_v31 = vadd.f32 %v4116_v59, %v4103_v19  ;;  %5134 = vmatpush.bf16.msra.mxu3 %v12298_v22  ;;  %v12010_v19 = vor.u32 %v15046_v55, %v12007_v60  ;;  %v15110_v59 = vld [vmem:[#allocation12 + $0x284] sm:$0xf]  ;;  %vm4229_vm7 = vcmp.eq.f32.partialorder %v4228_v16, 8.507059e+37  ;;  %v11941_v2 = vld [vmem:[#allocation12] sm:$0xf] }
 0x3ea   :  { %v12266_v56 = vor.u32 %v15110_v59, %v12263_v15  ;;  %v15038_v45 = vld [vmem:[#allocation12 + $0x44] sm:$0xf]  ;;  %v4231_v35 = vor.u32 1.1754944e-38, %v4230_v9  ;;  %v12197_v52 = vld [vmem:[#allocation12 + $0x200] sm:$0xf]  ;;  %v713_v59 = vadd.f32 %v16504_v26, %v16428_v33 }
 0x3eb   :  { %v4247_v10 = vadd.f32 %v4117_v31, %v684_v7  ;;  %v16937_v63 = vpop.eup %15824  ;;  %5121 = vmatpush.bf16.msrb.mxu2 %v12042_v21  ;;  %v15042_v7 = vld [vmem:[#allocation12 + $0x5c] sm:$0xf0]  ;;  %5109 = vmatpush.bf16.msrb.mxu1 %v12262_v43  ;;  %v11975_v42 = vld [vmem:[#allocation12 + $0x60] sm:$0xf0]  ;;  %v12173_v43 = vld [vmem:[#allocation12 + $0x1c8] sm:$0xf] }
 0x3ec   :  { %v4220_v20 = vmul.f32 %v16937_v63, %v16925_v46  ;;  %v15827_v57 = vpop.eup %15826  ;;  %vm4225_vm4 = vweird.f32 %v16937_v63  ;;  %5096 = vmatpush.bf16.msrb.mxu0 %v12006_v29  ;;  %v12229_v31 = vld [vmem:[#allocation12 + $0x240] sm:$0xf]  ;;  %v11974_v11 = vor.u32 %v15042_v7, %v11973_v47  ;;  %v15102_v30 = vld [vmem:[#allocation12 + $0x244] sm:$0xf]  ;;  %v11978_v39 = vor.u32 %v15038_v45, %v11975_v42  ;;  %v15087_v47 = vld [vmem:[#allocation12 + $0x1cc] sm:$0xf] }
 0x3ed   :  { %v11937_v12 = vmul.f32 -1.442695, %v4247_v10  ;;  %v16946_v3 = vadd.f32 1.0, %v15827_v57  ;;  %v12230_v49 = vor.u32 %v15106_v0, %v12229_v31  ;;  %vm4226_vm6 = vmor %vm4224_vm5, %vm4225_vm4  ;;  %5135 = vmatpush.bf16.msra.mxu3 %v12266_v56  ;;  %v12231_v27 = vld [vmem:[#allocation12 + $0x260] sm:$0xf0] }
 0x3ee   :  { %v4221_v13 = vsub.f32 1.0, %v4220_v20  ;;  %v12234_v37 = vor.u32 %v15102_v30, %v12231_v27  ;;  %v15034_v46 = vld [vmem:[#allocation12 + $0x1c] sm:$0xf0]  ;;  %v15030_v16 = vld [vmem:[#allocation12 + $0x4] sm:$0xf] }
 0x3ef   :  { %15828 = vpow2.f32 %v11937_v12  ;;  %5122 = vmatpush.bf16.msrb.mxu2 %v12010_v19  ;;  %v4265_v12 = vand.u32 2147483648, %v16946_v3  ;;  %5110 = vmatpush.bf16.msrb.mxu1 %v12230_v49  ;;  %v11942_v8 = vor.u32 %v15034_v46, %v11941_v2  ;;  %v15098_v50 = vld [vmem:[#allocation12 + $0x21c] sm:$0xf0]  ;;  %v11943_v24 = vld [vmem:[#allocation12 + $0x20] sm:$0xf0]  ;;  %vm4259_vm9 = vweird.f32 %v16946_v3 }
 0x3f0   :  { %15830 = vtanh.f32 %v16939_v14  ;;  %v4105_v23 = vpop.f32.mrf.mxu2  ;;  %v4118_v36 = vpop.f32.mrf.mxu3  ;;  %v4222_v5 = vmul.f32 %v16937_v63, %v4221_v13  ;;  %5097 = vmatpush.bf16.msrb.mxu0 %v11974_v11  ;;  %v12198_v48 = vor.u32 %v15098_v50, %v12197_v52  ;;  %v12199_v57 = vld [vmem:[#allocation12 + $0x220] sm:$0xf0]  ;;  %v11946_v9 = vor.u32 %v15030_v16, %v11943_v24  ;;  %v15155_v19 = vld [vmem:[#allocation12 + $0x3e4] sm:$0xf0]  ;;  %v12175_v7 = vld [vmem:[#allocation12 + $0x1e8] sm:$0xf0] }
 0x3f1   :  { %15832 = vrcp.f32 %v16946_v3  ;;  %5136 = vmatpush.bf16.msra.mxu3 %v12234_v37  ;;  %v15091_v23 = vld [vmem:[#allocation12 + $0x1e4] sm:$0xf0]  ;;  %v4263_v15 = vand.u32 2147483647, %v16946_v3  ;;  %v16967_v0 = vor.u32 1.1754944e-38, %v4265_v12  ;;  %v12178_v11 = vor.u32 %v15087_v47, %v12175_v7 }
 0x3f2   :  { %v4223_v54 = vadd.f32 %v16937_v63, %v4222_v5  ;;  %v12429_v36 = vld [vmem:[#allocation12 + $0x3c8] sm:$0xf]  ;;  %v12174_v56 = vor.u32 %v15091_v23, %v12173_v43  ;;  %v15151_v49 = vld [vmem:[#allocation12 + $0x3cc] sm:$0xf]  ;;  %v742_v12 = vadd.f32 %v16506_v28, %v713_v59 }
 0x3f3   :  { %5123 = vmatpush.bf16.msrb.mxu2 %v11978_v39  ;;  %5111 = vmatpush.bf16.msrb.mxu1 %v12198_v48  ;;  %v12431_v45 = vld [vmem:[#allocation12 + $0x3e8] sm:$0xf0]  ;;  %v12141_v26 = vld [vmem:[#allocation12 + $0x188] sm:$0xf]  ;;  %vm4264_vm15 = vcmp.eq.f32.partialorder %v4263_v15, 8.507059e+37 }
 0x3f4   :  { %v4227_v53 = vsel %vm4226_vm6, %v16937_v63, %v4223_v54  ;;  %v15094_v63 = vld [vmem:[#allocation12 + $0x204] sm:$0xf]  ;;  %5098 = vmatpush.bf16.msrb.mxu0 %v11942_v8  ;;  %v12430_v54 = vor.u32 %v15155_v19, %v12429_v36  ;;  %v12434_v42 = vor.u32 %v15151_v49, %v12431_v45  ;;  %v15083_v30 = vld [vmem:[#allocation12 + $0x1a4] sm:$0xf0]  ;;  %v15079_v52 = vld [vmem:[#allocation12 + $0x18c] sm:$0xf] }
 0x3f5   :  { %v15829_v10 = vpop.eup %15828  ;;  %v4232_v22 = vsel %vm4229_vm7, %v4231_v35, %v4227_v53  ;;  %v12202_v5 = vor.u32 %v15094_v63, %v12199_v57  ;;  %v12397_v35 = vld [vmem:[#allocation12 + $0x388] sm:$0xf]  ;;  %v12142_v2 = vor.u32 %v15083_v30, %v12141_v26  ;;  %v12399_v16 = vld [vmem:[#allocation12 + $0x3a8] sm:$0xf0] }
 0x3f6   :  { %v15831_v21 = vpop.eup %15830  ;;  %v16956_v20 = vadd.f32 1.0, %v15829_v10  ;;  %v15147_v39 = vld [vmem:[#allocation12 + $0x3a4] sm:$0xf0]  ;;  %v15071_v59 = vld [vmem:[#allocation12 + $0x14c] sm:$0xf] }
 0x3f7   :  { %v4238_v29 = vmul.f32 %v15831_v21, %v4232_v22  ;;  %v16959_v13 = vpop.eup %15832  ;;  %5124 = vmatpush.bf16.msrb.mxu2 %v11946_v9  ;;  %5137 = vmatpush.bf16.msra.mxu3 %v12202_v5  ;;  %v12398_v46 = vor.u32 %v15147_v39, %v12397_v35  ;;  %v12143_v21 = vld [vmem:[#allocation12 + $0x1a8] sm:$0xf0]  ;;  %v15075_v48 = vld [vmem:[#allocation12 + $0x164] sm:$0xf0] }
 0x3f8   :  { %15834 = vrcp.f32 %v16956_v20  ;;  %v4255_v60 = vmul.f32 %v16959_v13, %v16946_v3  ;;  %5143 = vmatpush.bf16.msra.mxu0 %v12174_v56  ;;  %5156 = vmatpush.bf16.msra.mxu1 %v12430_v54  ;;  %vm4260_vm8 = vweird.f32 %v16959_v13  ;;  %v15143_v22 = vld [vmem:[#allocation12 + $0x38c] sm:$0xf]  ;;  %v4282_v24 = vand.u32 2147483647, %v16956_v20  ;;  %v15067_v26 = vld [vmem:[#allocation12 + $0x124] sm:$0xf0] }
 0x3f9   :  { %v4239_v55 = vpack.c.bf16 %v4238_v29, %v4238_v29  ;;  %v12109_v29 = vld [vmem:[#allocation12 + $0x148] sm:$0xf]  ;;  %v12146_v63 = vor.u32 %v15079_v52, %v12143_v21  ;;  %v12402_v57 = vor.u32 %v15143_v22, %v12399_v16  ;;  %v4284_v28 = vand.u32 2147483648, %v16956_v20  ;;  %vm16983_vm10 = vmor %vm4259_vm9, %vm4260_vm8  ;;  %v12111_v5 = vld [vmem:[#allocation12 + $0x168] sm:$0xf0] }
 0x3fa   :  { %v4256_v31 = vsub.f32 1.0, %v4255_v60  ;;  %v12110_v43 = vor.u32 %v15075_v48, %v12109_v29  ;;  %v15139_v60 = vld [vmem:[#allocation12 + $0x364] sm:$0xf0]  ;;  %v771_v56 = vadd.f32 %v16500_v62, %v16431_v34  ;;  %v12114_v7 = vor.u32 %v15071_v59, %v12111_v5  ;;  %v12367_v54 = vld [vmem:[#allocation12 + $0x368] sm:$0xf0] }
 0x3fb   :  { %4240 = vst [vmem:[#allocation3 + $0x4] sm:$0xf] %v4239_v55  ;;  %5169 = vmatpush.bf16.msra.mxu2 %v12178_v11  ;;  %5182 = vmatpush.bf16.msrb.mxu3 %v12434_v42  ;;  %v12077_v11 = vld [vmem:[#allocation12 + $0x108] sm:$0xf]  ;;  %vm4278_vm12 = vweird.f32 %v16956_v20  ;;  %v15063_v35 = vld [vmem:[#allocation12 + $0x10c] sm:$0xf] }
 0x3fc   :  { %4241 = vst [vmem:[#allocation6 + $0x8] sm:$0xf] %v4239_v55  ;;  %v4257_v37 = vmul.f32 %v16959_v13, %v4256_v31  ;;  %5144 = vmatpush.bf16.msra.mxu0 %v12142_v2  ;;  %v12365_v55 = vld [vmem:[#allocation12 + $0x348] sm:$0xf]  ;;  %5157 = vmatpush.bf16.msra.mxu1 %v12398_v46  ;;  %v15135_v31 = vld [vmem:[#allocation12 + $0x34c] sm:$0xf]  ;;  %v12078_v62 = vor.u32 %v15067_v26, %v12077_v11 }
 0x3fd   :  { %v12366_v19 = vor.u32 %v15139_v60, %v12365_v55  ;;  %v12370_v45 = vor.u32 %v15135_v31, %v12367_v54  ;;  %v12333_v42 = vld [vmem:[#allocation12 + $0x308] sm:$0xf]  ;;  %v12079_v39 = vld [vmem:[#allocation12 + $0x128] sm:$0xf0]  ;;  %vm17000_vm14 = vcmp.eq.f32.partialorder %v4282_v24, 8.507059e+37 }
 0x3fe   :  { %v16969_v27 = vpop.eup %15834  ;;  %v4258_v47 = vadd.f32 %v16959_v13, %v4257_v37  ;;  %v15131_v30 = vld [vmem:[#allocation12 + $0x324] sm:$0xf0]  ;;  %v4285_v37 = vor.u32 1.1754944e-38, %v4284_v28  ;;  %v12335_v22 = vld [vmem:[#allocation12 + $0x328] sm:$0xf0]  ;;  %v12082_v48 = vor.u32 %v15063_v35, %v12079_v39 }
 0x3ff   :  { %v4129_v10 = vpop.f32.mrf.mxu0  ;;  %v4142_v53 = vpop.f32.mrf.mxu1  ;;  %v4274_v8 = vmul.f32 %v16969_v27, %v16956_v20  ;;  %vm4279_vm11 = vweird.f32 %v16969_v27  ;;  %5170 = vmatpush.bf16.msra.mxu2 %v12146_v63  ;;  %5183 = vmatpush.bf16.msrb.mxu3 %v12402_v57  ;;  %v12334_v21 = vor.u32 %v15131_v30, %v12333_v42  ;;  %v12045_v24 = vld [vmem:[#allocation12 + $0xc8] sm:$0xf]  ;;  %v15119_v36 = vld [vmem:[#allocation12 + $0x2cc] sm:$0xf] }
 0x400   :  { %v4143_v50 = vadd.f32 %v4142_v53, %v4129_v10  ;;  %5145 = vmatpush.bf16.msra.mxu0 %v12110_v43  ;;  %v15127_v10 = vld [vmem:[#allocation12 + $0x30c] sm:$0xf]  ;;  %vm16995_vm13 = vmor %vm4278_vm12, %vm4279_vm11  ;;  %5158 = vmatpush.bf16.msra.mxu1 %v12366_v19  ;;  %v15059_v63 = vld [vmem:[#allocation12 + $0xe4] sm:$0xf0] }
 0x401   :  { %v4275_v9 = vsub.f32 1.0, %v4274_v8  ;;  %v4262_v8 = vsel %vm16983_vm10, %v16959_v13, %v4258_v47  ;;  %v12301_v57 = vld [vmem:[#allocation12 + $0x2c8] sm:$0xf]  ;;  %v12338_v55 = vor.u32 %v15127_v10, %v12335_v22  ;;  %v12303_v19 = vld [vmem:[#allocation12 + $0x2e8] sm:$0xf0] }
 0x402   :  { %v4248_v23 = vadd.f32 %v4143_v50, %v742_v12  ;;  %v800_v12 = vadd.f32 %v16502_v17, %v771_v56  ;;  %v15123_v60 = vld [vmem:[#allocation12 + $0x2e4] sm:$0xf0]  ;;  %v15055_v17 = vld [vmem:[#allocation12 + $0xcc] sm:$0xf]  ;;  %v4267_v5 = vsel %vm4264_vm15, %v16967_v0, %v4262_v8  ;;  %v12306_v54 = vor.u32 %v15119_v36, %v12303_v19 }
 0x403   :  { %v4276_v49 = vmul.f32 %v16969_v27, %v4275_v9  ;;  %5171 = vmatpush.bf16.msra.mxu2 %v12114_v7  ;;  %5184 = vmatpush.bf16.msrb.mxu3 %v12370_v45  ;;  %v12047_v9 = vld [vmem:[#allocation12 + $0xe8] sm:$0xf0]  ;;  %v12302_v56 = vor.u32 %v15123_v60, %v12301_v57  ;;  %v12013_v15 = vld [vmem:[#allocation12 + $0x88] sm:$0xf] }
 0x404   :  { %15836 = vtanh.f32 %v4248_v23  ;;  %5146 = vmatpush.bf16.msra.mxu0 %v12078_v62  ;;  %v12046_v23 = vor.u32 %v15059_v63, %v12045_v24  ;;  %5159 = vmatpush.bf16.msra.mxu1 %v12334_v21  ;;  %v12050_v3 = vor.u32 %v15055_v17, %v12047_v9  ;;  %v15051_v31 = vld [vmem:[#allocation12 + $0xa4] sm:$0xf0]  ;;  %v15047_v45 = vld [vmem:[#allocation12 + $0x8c] sm:$0xf] }
 0x405   :  { %v4277_v2 = vadd.f32 %v16969_v27, %v4276_v49  ;;  %v12269_v11 = vld [vmem:[#allocation12 + $0x288] sm:$0xf]  ;;  %v12014_v0 = vor.u32 %v15051_v31, %v12013_v15  ;;  %v12015_v42 = vld [vmem:[#allocation12 + $0xa8] sm:$0xf0] }
 0x406   :  { %v4155_v52 = vpop.f32.mrf.mxu2  ;;  %v4168_v20 = vpop.f32.mrf.mxu3  ;;  %v15115_v49 = vld [vmem:[#allocation12 + $0x2a4] sm:$0xf0]  ;;  %v12271_v30 = vld [vmem:[#allocation12 + $0x2a8] sm:$0xf0] }
 0x407   :  { %v4169_v50 = vadd.f32 %v4168_v20, %v4155_v52  ;;  %v4131_v16 = vpop.f32.mrf.mxu0  ;;  %v4144_v29 = vpop.f32.mrf.mxu1  ;;  %v4281_v43 = vsel %vm16995_vm13, %v16969_v27, %v4277_v2  ;;  %5172 = vmatpush.bf16.msra.mxu2 %v12082_v48  ;;  %5185 = vmatpush.bf16.msrb.mxu3 %v12338_v55  ;;  %v12270_v39 = vor.u32 %v15115_v49, %v12269_v11  ;;  %v11981_v10 = vld [vmem:[#allocation12 + $0x48] sm:$0xf]  ;;  %v15039_v20 = vld [vmem:[#allocation12 + $0x4c] sm:$0xf] }
 0x408   :  { %v4286_v13 = vsel %vm17000_vm14, %v4285_v37, %v4281_v43  ;;  %5147 = vmatpush.bf16.msra.mxu0 %v12046_v23  ;;  %5160 = vmatpush.bf16.msra.mxu1 %v12302_v56  ;;  %v15043_v53 = vld [vmem:[#allocation12 + $0x64] sm:$0xf0]  ;;  %v12018_v37 = vor.u32 %v15047_v45, %v12015_v42  ;;  %v11983_v21 = vld [vmem:[#allocation12 + $0x68] sm:$0xf0]  ;;  %v15092_v42 = vld [vmem:[#allocation12 + $0x1ec] sm:$0xf0] }
 0x409   :  { %v4249_v28 = vadd.f32 %v4169_v50, %v800_v12  ;;  %v4308_v27 = vmul.f32 %v4286_v13, %v16850_v32  ;;  %v15111_v32 = vld [vmem:[#allocation12 + $0x28c] sm:$0xf]  ;;  %v12237_v2 = vld [vmem:[#allocation12 + $0x248] sm:$0xf]  ;;  %v11982_v22 = vor.u32 %v15043_v53, %v11981_v10  ;;  %v11986_v24 = vor.u32 %v15039_v20, %v11983_v21  ;;  %v12183_v53 = vld [vmem:[#allocation12 + $0x1f0] sm:$0xf0] }
 0x40a   :  { %v15837_v59 = vpop.eup %15836  ;;  %v15107_v46 = vld [vmem:[#allocation12 + $0x264] sm:$0xf0]  ;;  %v12274_v52 = vor.u32 %v15111_v32, %v12271_v30  ;;  %v15103_v12 = vld [vmem:[#allocation12 + $0x24c] sm:$0xf]  ;;  %v12437_v32 = vld [vmem:[#allocation12 + $0x3d0] sm:$0xf] }
 0x40b   :  { %v4309_v47 = vmul.f32 %v15837_v59, %v4267_v5  ;;  %v11938_v7 = vmul.f32 -1.442695, %v4249_v28  ;;  %5173 = vmatpush.bf16.msra.mxu2 %v12050_v3  ;;  %5186 = vmatpush.bf16.msrb.mxu3 %v12306_v54  ;;  %v12239_v8 = vld [vmem:[#allocation12 + $0x268] sm:$0xf0]  ;;  %v12238_v50 = vor.u32 %v15107_v46, %v12237_v2  ;;  %v11949_v16 = vld [vmem:[#allocation12 + $0x8] sm:$0xf] }
 0x40c   :  { %5148 = vmatpush.bf16.msra.mxu0 %v12014_v0  ;;  %5161 = vmatpush.bf16.msra.mxu1 %v12270_v39  ;;  %v15035_v29 = vld [vmem:[#allocation12 + $0x24] sm:$0xf0]  ;;  %v12242_v55 = vor.u32 %v15103_v12, %v12239_v8  ;;  %v15031_v60 = vld [vmem:[#allocation12 + $0xc] sm:$0xf]  ;;  %v12181_v0 = vld [vmem:[#allocation12 + $0x1d0] sm:$0xf] }
 0x40d   :  { %v17017_v26 = vadd.f32 %v4309_v47, %v4308_v27  ;;  %15838 = vpow2.f32 %v11938_v7  ;;  %v12205_v63 = vld [vmem:[#allocation12 + $0x208] sm:$0xf]  ;;  %v11951_v17 = vld [vmem:[#allocation12 + $0x28] sm:$0xf0]  ;;  %v11950_v9 = vor.u32 %v15035_v29, %v11949_v16  ;;  %v12439_v2 = vld [vmem:[#allocation12 + $0x3f0] sm:$0xf0]  ;;  %v12182_v20 = vor.u32 %v15092_v42, %v12181_v0 }
 0x40e   :  { %v4157_v62 = vpop.f32.mrf.mxu2  ;;  %v4170_v35 = vpop.f32.mrf.mxu3  ;;  %v15099_v57 = vld [vmem:[#allocation12 + $0x224] sm:$0xf0]  ;;  %v15095_v13 = vld [vmem:[#allocation12 + $0x20c] sm:$0xf]  ;;  %v11954_v36 = vor.u32 %v15031_v60, %v11951_v17  ;;  %v15084_v12 = vld [vmem:[#allocation12 + $0x1ac] sm:$0xf0] }
 0x40f   :  { %5174 = vmatpush.bf16.msra.mxu2 %v12018_v37  ;;  %5187 = vmatpush.bf16.msrb.mxu3 %v12274_v52  ;;  %v12207_v28 = vld [vmem:[#allocation12 + $0x228] sm:$0xf0]  ;;  %v12206_v23 = vor.u32 %v15099_v57, %v12205_v63  ;;  %v15156_v62 = vld [vmem:[#allocation12 + $0x3ec] sm:$0xf0]  ;;  %v15088_v35 = vld [vmem:[#allocation12 + $0x1d4] sm:$0xf] }
 0x410   :  { %5149 = vmatpush.bf16.msra.mxu0 %v11982_v22  ;;  %5162 = vmatpush.bf16.msra.mxu1 %v12238_v50  ;;  %v12210_v19 = vor.u32 %v15095_v13, %v12207_v28  ;;  %v15152_v37 = vld [vmem:[#allocation12 + $0x3d4] sm:$0xf]  ;;  %v12438_v21 = vor.u32 %v15156_v62, %v12437_v32  ;;  %v12149_v22 = vld [vmem:[#allocation12 + $0x190] sm:$0xf]  ;;  %v12186_v8 = vor.u32 %v15088_v35, %v12183_v53 }
 0x411   :  { %v12442_v50 = vor.u32 %v15152_v37, %v12439_v2  ;;  %v12405_v16 = vld [vmem:[#allocation12 + $0x390] sm:$0xf]  ;;  %v15144_v63 = vld [vmem:[#allocation12 + $0x394] sm:$0xf] }
 0x412   :  { %v15148_v29 = vld [vmem:[#allocation12 + $0x3ac] sm:$0xf0]  ;;  %v12407_v57 = vld [vmem:[#allocation12 + $0x3b0] sm:$0xf0] }
 0x413   :  { %v15839_v48 = vpop.eup %15838  ;;  %5175 = vmatpush.bf16.msra.mxu2 %v11986_v24  ;;  %5188 = vmatpush.bf16.msrb.mxu3 %v12242_v55  ;;  %v12151_v24 = vld [vmem:[#allocation12 + $0x1b0] sm:$0xf0]  ;;  %v12406_v55 = vor.u32 %v15148_v29, %v12405_v16  ;;  %v12117_v60 = vld [vmem:[#allocation12 + $0x150] sm:$0xf]  ;;  %v12410_v13 = vor.u32 %v15144_v63, %v12407_v57 }
 0x414   :  { %v4292_v43 = vadd.f32 1.0, %v15839_v48  ;;  %5150 = vmatpush.bf16.msra.mxu0 %v11950_v9  ;;  %5163 = vmatpush.bf16.msra.mxu1 %v12206_v23  ;;  %v15080_v48 = vld [vmem:[#allocation12 + $0x194] sm:$0xf]  ;;  %v15076_v17 = vld [vmem:[#allocation12 + $0x16c] sm:$0xf0] }
 0x415   :  { %v12154_v9 = vor.u32 %v15080_v48, %v12151_v24  ;;  %v12373_v28 = vld [vmem:[#allocation12 + $0x350] sm:$0xf]  ;;  %v12343_v0 = vld [vmem:[#allocation12 + $0x330] sm:$0xf0] }
 0x416   :  { %15840 = vrcp.f32 %v4292_v43  ;;  %v4304_v56 = vand.u32 2147483648, %v4292_v43  ;;  %v4302_v7 = vand.u32 2147483647, %v4292_v43  ;;  %vm4298_vm1 = vweird.f32 %v4292_v43  ;;  %v15140_v23 = vld [vmem:[#allocation12 + $0x36c] sm:$0xf0] }
 0x417   :  { %5176 = vmatpush.bf16.msra.mxu2 %v11954_v36  ;;  %5189 = vmatpush.bf16.msrb.mxu3 %v12210_v19  ;;  %15842 = vtanh.f32 %v17017_v26  ;;  %v15072_v36 = vld [vmem:[#allocation12 + $0x154] sm:$0xf]  ;;  %v15060_v62 = vld [vmem:[#allocation12 + $0xec] sm:$0xf0] }
 0x418   :  { %v4305_v15 = vor.u32 1.1754944e-38, %v4304_v56  ;;  %vm4303_vm3 = vcmp.eq.f32.partialorder %v4302_v7, 8.507059e+37  ;;  %v12119_v19 = vld [vmem:[#allocation12 + $0x170] sm:$0xf0]  ;;  %v12374_v56 = vor.u32 %v15140_v23, %v12373_v28  ;;  %v15068_v7 = vld [vmem:[#allocation12 + $0x12c] sm:$0xf0] }
 0x419   :  { %v15124_v53 = vld [vmem:[#allocation12 + $0x2ec] sm:$0xf0]  ;;  %v15056_v37 = vld [vmem:[#allocation12 + $0xd4] sm:$0xf] }
 0x41a   :  { %v12055_v2 = vld [vmem:[#allocation12 + $0xf0] sm:$0xf0]  ;;  %v12277_v48 = vld [vmem:[#allocation12 + $0x290] sm:$0xf] }
 0x41b   :  { %v12058_v16 = vor.u32 %v15056_v37, %v12055_v2  ;;  %v15116_v24 = vld [vmem:[#allocation12 + $0x2ac] sm:$0xf0]  ;;  %v15048_v63 = vld [vmem:[#allocation12 + $0x94] sm:$0xf]  ;;  %v12191_v2 = vld [vmem:[#allocation12 + $0x1f8] sm:$0xf0] }
 0x41c   :  { %v15841_v59 = vpop.eup %15840  ;;  %v12023_v57 = vld [vmem:[#allocation12 + $0xb0] sm:$0xf0] }
 0x41d   :  { %v4294_v5 = vmul.f32 %v15841_v59, %v4292_v43  ;;  %vm4299_vm0 = vweird.f32 %v15841_v59  ;;  %v15843_v54 = vpop.eup %15842  ;;  %v12150_v43 = vor.u32 %v15084_v12, %v12149_v22  ;;  %v12026_v28 = vor.u32 %v15048_v63, %v12023_v57  ;;  %v12413_v63 = vld [vmem:[#allocation12 + $0x398] sm:$0xf] }
 0x41e   :  { %vm4300_vm2 = vmor %vm4298_vm1, %vm4299_vm0  ;;  %v15149_v57 = vld [vmem:[#allocation12 + $0x3b4] sm:$0xf0] }
 0x41f   :  { %v4295_v27 = vsub.f32 1.0, %v4294_v5  ;;  %v12375_v5 = vld [vmem:[#allocation12 + $0x370] sm:$0xf0] }
 0x421   :  { %v4296_v47 = vmul.f32 %v15841_v59, %v4295_v27  ;;  %v12118_v27 = vor.u32 %v15076_v17, %v12117_v60  ;;  %v12278_v17 = vor.u32 %v15116_v24, %v12277_v48 }
 0x423   :  { %v4297_v3 = vadd.f32 %v15841_v59, %v4296_v47  ;;  %v12085_v47 = vld [vmem:[#allocation12 + $0x110] sm:$0xf] }
 0x424   :  { %v12086_v42 = vor.u32 %v15068_v7, %v12085_v47  ;;  %v11957_v47 = vld [vmem:[#allocation12 + $0x10] sm:$0xf] }
 0x425   :  { %v4301_v31 = vsel %vm4300_vm2, %v15841_v59, %v4297_v3  ;;  %v15136_v59 = vld [vmem:[#allocation12 + $0x354] sm:$0xf]  ;;  %v12122_v3 = vor.u32 %v15072_v36, %v12119_v19  ;;  %v12245_v36 = vld [vmem:[#allocation12 + $0x250] sm:$0xf] }
 0x426   :  { %v4306_v11 = vsel %vm4303_vm3, %v4305_v15, %v4301_v31  ;;  %v12378_v15 = vor.u32 %v15136_v59, %v12375_v5  ;;  %v12341_v31 = vld [vmem:[#allocation12 + $0x310] sm:$0xf]  ;;  %v15040_v59 = vld [vmem:[#allocation12 + $0x54] sm:$0xf] }
 0x427   :  { %v4312_v49 = vmul.f32 %v15843_v54, %v4306_v11  ;;  %v15132_v54 = vld [vmem:[#allocation12 + $0x32c] sm:$0xf0]  ;;  %v15064_v11 = vld [vmem:[#allocation12 + $0x114] sm:$0xf] }
 0x428   :  { %v12342_v32 = vor.u32 %v15132_v54, %v12341_v31  ;;  %v15108_v19 = vld [vmem:[#allocation12 + $0x26c] sm:$0xf0]  ;;  %v11991_v5 = vld [vmem:[#allocation12 + $0x70] sm:$0xf0] }
 0x429   :  { %v4313_v45 = vpack.c.bf16 %v4312_v49, %v4312_v49  ;;  %v12087_v49 = vld [vmem:[#allocation12 + $0x130] sm:$0xf0]  ;;  %v12213_v31 = vld [vmem:[#allocation12 + $0x210] sm:$0xf] }
 0x42a   :  { %v12090_v35 = vor.u32 %v15064_v11, %v12087_v49  ;;  %v15100_v54 = vld [vmem:[#allocation12 + $0x22c] sm:$0xf0]  ;;  %v11994_v11 = vor.u32 %v15040_v59, %v11991_v5  ;;  %v12381_v59 = vld [vmem:[#allocation12 + $0x358] sm:$0xf] }
 0x42b   :  { %4314 = vst [vmem:[#allocation3] sm:$0xf] %v4313_v45  ;;  %v15128_v45 = vld [vmem:[#allocation12 + $0x314] sm:$0xf]  ;;  %v12214_v37 = vor.u32 %v15100_v54, %v12213_v31  ;;  %v15141_v5 = vld [vmem:[#allocation12 + $0x374] sm:$0xf0] }
 0x42c   :  { %v12093_v31 = vld [vmem:[#allocation12 + $0x118] sm:$0xf] }
 0x42d   :  { %v15069_v54 = vld [vmem:[#allocation12 + $0x134] sm:$0xf0] }
 0x432   :  { %v4315_v30 = vld [vmem:[#allocation3] sm:$0xff] }
 0x433   :  { %v4445_v39 = vunpack.c.l.b16 %v4315_v30  ;;  %v4446_v10 = vunpack.c.h.b16 %v4315_v30  ;;  %v12053_v30 = vld [vmem:[#allocation12 + $0xd0] sm:$0xf] }
 0x434   :  { %v12054_v22 = vor.u32 %v15060_v62, %v12053_v30  ;;  %v12189_v30 = vld [vmem:[#allocation12 + $0x1d8] sm:$0xf] }
 0x435   :  { %v17020_v46 = vpack.c.b16 %v4445_v39, %v4445_v39  ;;  %v17022_v52 = vpack.c.b16 %v4446_v10, %v4446_v10  ;;  %v12346_v39 = vor.u32 %v15128_v45, %v12343_v0  ;;  %v12309_v10 = vld [vmem:[#allocation12 + $0x2d0] sm:$0xf]  ;;  %v15032_v45 = vld [vmem:[#allocation12 + $0x14] sm:$0xf]  ;;  %v15093_v62 = vld [vmem:[#allocation12 + $0x1f4] sm:$0xf0] }
 0x436   :  { %v12310_v12 = vor.u32 %v15124_v53, %v12309_v10  ;;  %v11959_v0 = vld [vmem:[#allocation12 + $0x30] sm:$0xf0]  ;;  %v15089_v10 = vld [vmem:[#allocation12 + $0x1dc] sm:$0xf] }
 0x437   :  { %5099 = vmatmul.bf16.vlgmr.msrb.gmra.mxu0 %v17020_v46  ;;  %5112 = vmatmul.bf16.vlgmr.msrb.gmra.mxu1 %v17022_v52  ;;  %v12194_v48 = vor.u32 %v15089_v10, %v12191_v2  ;;  %v12061_v10 = vld [vmem:[#allocation12 + $0xd8] sm:$0xf] }
 0x438   :  { %5125 = vmatmul.bf16.vlgmr.msrb.gmra.mxu2 %v17020_v46  ;;  %5138 = vmatmul.bf16.vlgmr.msra.gmra.mxu3 %v17022_v52 }
 0x439   :  { %5195 = vmatpush.bf16.msrb.mxu0 %v12182_v20  ;;  %5208 = vmatpush.bf16.msrb.mxu1 %v12438_v21  ;;  %v15120_v20 = vld [vmem:[#allocation12 + $0x2d4] sm:$0xf] }
 0x43a   :  { %5221 = vmatpush.bf16.msrb.mxu2 %v12186_v8  ;;  %5234 = vmatpush.bf16.msra.mxu3 %v12442_v50  ;;  %v12311_v21 = vld [vmem:[#allocation12 + $0x2f0] sm:$0xf0]  ;;  %v12021_v8 = vld [vmem:[#allocation12 + $0x90] sm:$0xf] }
 0x43b   :  { %v15052_v50 = vld [vmem:[#allocation12 + $0xac] sm:$0xf0]  ;;  %v12314_v29 = vor.u32 %v15120_v20, %v12311_v21  ;;  %v15153_v20 = vld [vmem:[#allocation12 + $0x3dc] sm:$0xf] }
 0x43c   :  { %v12022_v60 = vor.u32 %v15052_v50, %v12021_v8  ;;  %v12447_v21 = vld [vmem:[#allocation12 + $0x3f8] sm:$0xf0]  ;;  %v12190_v8 = vor.u32 %v15093_v62, %v12189_v30 }
 0x43d   :  { %5196 = vmatpush.bf16.msrb.mxu0 %v12150_v43  ;;  %5209 = vmatpush.bf16.msrb.mxu1 %v12406_v55  ;;  %v15112_v43 = vld [vmem:[#allocation12 + $0x294] sm:$0xf]  ;;  %v12450_v24 = vor.u32 %v15153_v20, %v12447_v21  ;;  %v15129_v30 = vld [vmem:[#allocation12 + $0x31c] sm:$0xf]  ;;  %v12317_v20 = vld [vmem:[#allocation12 + $0x2d8] sm:$0xf] }
 0x43e   :  { %5222 = vmatpush.bf16.msrb.mxu2 %v12154_v9  ;;  %5235 = vmatpush.bf16.msra.mxu3 %v12410_v13  ;;  %v12279_v55 = vld [vmem:[#allocation12 + $0x2b0] sm:$0xf0]  ;;  %v11989_v9 = vld [vmem:[#allocation12 + $0x50] sm:$0xf]  ;;  %v12351_v62 = vld [vmem:[#allocation12 + $0x338] sm:$0xf0] }
 0x43f   :  { %v15044_v13 = vld [vmem:[#allocation12 + $0x6c] sm:$0xf0]  ;;  %v12282_v23 = vor.u32 %v15112_v43, %v12279_v55  ;;  %v15081_v43 = vld [vmem:[#allocation12 + $0x19c] sm:$0xf]  ;;  %v12354_v2 = vor.u32 %v15129_v30, %v12351_v62  ;;  %v15125_v21 = vld [vmem:[#allocation12 + $0x2f4] sm:$0xf0] }
 0x440   :  { %v11990_v7 = vor.u32 %v15044_v13, %v11989_v9  ;;  %v12159_v55 = vld [vmem:[#allocation12 + $0x1b8] sm:$0xf0]  ;;  %v12414_v13 = vor.u32 %v15149_v57, %v12413_v63 }
 0x441   :  { %5197 = vmatpush.bf16.msrb.mxu0 %v12118_v27  ;;  %5210 = vmatpush.bf16.msrb.mxu1 %v12374_v56  ;;  %v15104_v27 = vld [vmem:[#allocation12 + $0x254] sm:$0xf]  ;;  %v15033_v30 = vld [vmem:[#allocation12 + $0x1c] sm:$0xf] }
 0x442   :  { %5223 = vmatpush.bf16.msrb.mxu2 %v12122_v3  ;;  %5236 = vmatpush.bf16.msra.mxu3 %v12378_v15  ;;  %v12247_v56 = vld [vmem:[#allocation12 + $0x270] sm:$0xf0]  ;;  %v12246_v3 = vor.u32 %v15108_v19, %v12245_v36  ;;  %v15036_v15 = vld [vmem:[#allocation12 + $0x2c] sm:$0xf0]  ;;  %v12162_v36 = vor.u32 %v15081_v43, %v12159_v55  ;;  %v12285_v43 = vld [vmem:[#allocation12 + $0x298] sm:$0xf] }
 0x443   :  { %v12250_v49 = vor.u32 %v15104_v27, %v12247_v56  ;;  %v11958_v53 = vor.u32 %v15036_v15, %v11957_v47  ;;  %v15073_v27 = vld [vmem:[#allocation12 + $0x15c] sm:$0xf]  ;;  %v12382_v15 = vor.u32 %v15141_v5, %v12381_v59  ;;  %v15117_v55 = vld [vmem:[#allocation12 + $0x2b4] sm:$0xf0] }
 0x444   :  { %v12127_v56 = vld [vmem:[#allocation12 + $0x178] sm:$0xf0] }
 0x445   :  { %5198 = vmatpush.bf16.msrb.mxu0 %v12086_v42  ;;  %5211 = vmatpush.bf16.msrb.mxu1 %v12342_v32  ;;  %v15096_v42 = vld [vmem:[#allocation12 + $0x214] sm:$0xf]  ;;  %v15137_v47 = vld [vmem:[#allocation12 + $0x35c] sm:$0xf] }
 0x446   :  { %5224 = vmatpush.bf16.msrb.mxu2 %v12090_v35  ;;  %5237 = vmatpush.bf16.msra.mxu3 %v12346_v39  ;;  %v12215_v32 = vld [vmem:[#allocation12 + $0x230] sm:$0xf0]  ;;  %v12445_v35 = vld [vmem:[#allocation12 + $0x3d8] sm:$0xf]  ;;  %v11967_v62 = vld [vmem:[#allocation12 + $0x38] sm:$0xf0] }
 0x447   :  { %5151 = vmatmul.bf16.vlgmr.msra.gmra.mxu0 %v17020_v46  ;;  %5164 = vmatmul.bf16.vlgmr.msra.gmra.mxu1 %v17022_v52  ;;  %v15157_v39 = vld [vmem:[#allocation12 + $0x3f4] sm:$0xf0] }
 0x448   :  { %5177 = vmatmul.bf16.vlgmr.msra.gmra.mxu2 %v17020_v46  ;;  %5190 = vmatmul.bf16.vlgmr.msrb.gmra.mxu3 %v17022_v52  ;;  %v12446_v50 = vor.u32 %v15157_v39, %v12445_v35  ;;  %v12094_v35 = vor.u32 %v15069_v54, %v12093_v31 }
 0x449   :  { %5199 = vmatpush.bf16.msrb.mxu0 %v12054_v22  ;;  %5212 = vmatpush.bf16.msrb.mxu1 %v12310_v12  ;;  %v11962_v22 = vor.u32 %v15032_v45, %v11959_v0  ;;  %v12218_v12 = vor.u32 %v15096_v42, %v12215_v32  ;;  %v12349_v45 = vld [vmem:[#allocation12 + $0x318] sm:$0xf]  ;;  %v15065_v42 = vld [vmem:[#allocation12 + $0x11c] sm:$0xf] }
 0x44a   :  { %5225 = vmatpush.bf16.msrb.mxu2 %v12058_v16  ;;  %5238 = vmatpush.bf16.msra.mxu3 %v12314_v29  ;;  %v12157_v16 = vld [vmem:[#allocation12 + $0x198] sm:$0xf]  ;;  %v12095_v32 = vld [vmem:[#allocation12 + $0x138] sm:$0xf0] }
 0x44b   :  { %v15085_v29 = vld [vmem:[#allocation12 + $0x1b4] sm:$0xf0] }
 0x44c   :  { %v12158_v9 = vor.u32 %v15085_v29, %v12157_v16  ;;  %v15133_v0 = vld [vmem:[#allocation12 + $0x334] sm:$0xf0]  ;;  %v12318_v29 = vor.u32 %v15125_v21, %v12317_v20 }
 0x44d   :  { %5200 = vmatpush.bf16.msrb.mxu0 %v12022_v60  ;;  %5213 = vmatpush.bf16.msrb.mxu1 %v12278_v17  ;;  %v15145_v60 = vld [vmem:[#allocation12 + $0x39c] sm:$0xf]  ;;  %v12350_v39 = vor.u32 %v15133_v0, %v12349_v45 }
 0x44e   :  { %5226 = vmatpush.bf16.msrb.mxu2 %v12026_v28  ;;  %5239 = vmatpush.bf16.msra.mxu3 %v12282_v23  ;;  %v12415_v17 = vld [vmem:[#allocation12 + $0x3b8] sm:$0xf0]  ;;  %v12125_v28 = vld [vmem:[#allocation12 + $0x158] sm:$0xf] }
 0x44f   :  { %v15077_v23 = vld [vmem:[#allocation12 + $0x174] sm:$0xf0]  ;;  %v12418_v19 = vor.u32 %v15145_v60, %v12415_v17  ;;  %v15049_v60 = vld [vmem:[#allocation12 + $0x9c] sm:$0xf] }
 0x450   :  { %v12031_v17 = vld [vmem:[#allocation12 + $0xb8] sm:$0xf0] }
 0x451   :  { %5201 = vmatpush.bf16.msrb.mxu0 %v11990_v7  ;;  %5214 = vmatpush.bf16.msrb.mxu1 %v12246_v3  ;;  %v12383_v7 = vld [vmem:[#allocation12 + $0x378] sm:$0xf0]  ;;  %v12126_v3 = vor.u32 %v15077_v23, %v12125_v28  ;;  %v12286_v23 = vor.u32 %v15117_v55, %v12285_v43  ;;  %v12034_v59 = vor.u32 %v15049_v60, %v12031_v17 }
 0x452   :  { %5227 = vmatpush.bf16.msrb.mxu2 %v11994_v11  ;;  %5240 = vmatpush.bf16.msra.mxu3 %v12250_v49  ;;  %v12130_v11 = vor.u32 %v15073_v27, %v12127_v56  ;;  %v12386_v49 = vor.u32 %v15137_v47, %v12383_v7  ;;  %v12253_v27 = vld [vmem:[#allocation12 + $0x258] sm:$0xf]  ;;  %v15041_v47 = vld [vmem:[#allocation12 + $0x5c] sm:$0xf] }
 0x453   :  { %v15109_v56 = vld [vmem:[#allocation12 + $0x274] sm:$0xf0]  ;;  %v11999_v7 = vld [vmem:[#allocation12 + $0x78] sm:$0xf0] }
 0x454   :  { %v12254_v54 = vor.u32 %v15109_v56, %v12253_v27  ;;  %v12002_v45 = vor.u32 %v15041_v47, %v11999_v7 }
 0x455   :  { %5202 = vmatpush.bf16.msrb.mxu0 %v11958_v53  ;;  %5215 = vmatpush.bf16.msrb.mxu1 %v12214_v37  ;;  %v15061_v53 = vld [vmem:[#allocation12 + $0xf4] sm:$0xf0]  ;;  %v12098_v37 = vor.u32 %v15065_v42, %v12095_v32 }
 0x456   :  { %5228 = vmatpush.bf16.msrb.mxu2 %v11962_v22  ;;  %5241 = vmatpush.bf16.msra.mxu3 %v12218_v12  ;;  %v15057_v22 = vld [vmem:[#allocation12 + $0xdc] sm:$0xf]  ;;  %v12062_v16 = vor.u32 %v15061_v53, %v12061_v10  ;;  %v12221_v42 = vld [vmem:[#allocation12 + $0x218] sm:$0xf] }
 0x457   :  { %v12063_v12 = vld [vmem:[#allocation12 + $0xf8] sm:$0xf0]  ;;  %v15101_v32 = vld [vmem:[#allocation12 + $0x234] sm:$0xf0] }
 0x458   :  { %5203 = vmatmul.bf16.vlgmr.msrb.gmra.mxu0 %v17020_v46  ;;  %5216 = vmatmul.bf16.vlgmr.msrb.gmra.mxu1 %v17022_v52  ;;  %v12066_v63 = vor.u32 %v15057_v22, %v12063_v12  ;;  %v12222_v53 = vor.u32 %v15101_v32, %v12221_v42  ;;  %v12685_v32 = vld [vmem:[#allocation12 + $0x1e0] sm:$0xf0] }
 0x459   :  { %5247 = vmatpush.bf16.msra.mxu0 %v12190_v8  ;;  %5260 = vmatpush.bf16.msra.mxu1 %v12446_v50  ;;  %v15121_v8 = vld [vmem:[#allocation12 + $0x2dc] sm:$0xf] }
 0x45a   :  { %5273 = vmatpush.bf16.msra.mxu2 %v12194_v48  ;;  %5286 = vmatpush.bf16.msrb.mxu3 %v12450_v24  ;;  %v12319_v50 = vld [vmem:[#allocation12 + $0x2f8] sm:$0xf0]  ;;  %v12029_v48 = vld [vmem:[#allocation12 + $0x98] sm:$0xf] }
 0x45b   :  { %5229 = vmatmul.bf16.vlgmr.msrb.gmra.mxu2 %v17020_v46  ;;  %5242 = vmatmul.bf16.vlgmr.msra.gmra.mxu3 %v17022_v52  ;;  %v15053_v24 = vld [vmem:[#allocation12 + $0xb4] sm:$0xf0]  ;;  %v12322_v57 = vor.u32 %v15121_v8, %v12319_v50 }
 0x45c   :  { %v12030_v28 = vor.u32 %v15053_v24, %v12029_v48 }
 0x45d   :  { %5248 = vmatpush.bf16.msra.mxu0 %v12158_v9  ;;  %5261 = vmatpush.bf16.msra.mxu1 %v12414_v13  ;;  %v15113_v9 = vld [vmem:[#allocation12 + $0x29c] sm:$0xf] }
 0x45e   :  { %5274 = vmatpush.bf16.msra.mxu2 %v12162_v36  ;;  %5287 = vmatpush.bf16.msrb.mxu3 %v12418_v19  ;;  %v12287_v13 = vld [vmem:[#allocation12 + $0x2b8] sm:$0xf0]  ;;  %v11997_v36 = vld [vmem:[#allocation12 + $0x58] sm:$0xf] }
 0x45f   :  { %v15045_v19 = vld [vmem:[#allocation12 + $0x74] sm:$0xf0]  ;;  %v12290_v5 = vor.u32 %v15113_v9, %v12287_v13 }
 0x460   :  { %v11998_v31 = vor.u32 %v15045_v19, %v11997_v36 }
 0x461   :  { %5249 = vmatpush.bf16.msra.mxu0 %v12126_v3  ;;  %5262 = vmatpush.bf16.msra.mxu1 %v12382_v15  ;;  %v15105_v3 = vld [vmem:[#allocation12 + $0x25c] sm:$0xf] }
 0x462   :  { %5275 = vmatpush.bf16.msra.mxu2 %v12130_v11  ;;  %5288 = vmatpush.bf16.msrb.mxu3 %v12386_v49  ;;  %v12255_v15 = vld [vmem:[#allocation12 + $0x278] sm:$0xf0]  ;;  %v11965_v11 = vld [vmem:[#allocation12 + $0x18] sm:$0xf] }
 0x463   :  { %v15037_v49 = vld [vmem:[#allocation12 + $0x34] sm:$0xf0]  ;;  %v12258_v0 = vor.u32 %v15105_v3, %v12255_v15  ;;  %v12683_v3 = vld [vmem:[#allocation12 + $0x1c0] sm:$0xf] }
 0x464   :  { %v11966_v10 = vor.u32 %v15037_v49, %v11965_v11  ;;  %v15218_v15 = vld [vmem:[#allocation12 + $0x1dc] sm:$0xf0] }
 0x465   :  { %5250 = vmatpush.bf16.msra.mxu0 %v12094_v35  ;;  %5263 = vmatpush.bf16.msra.mxu1 %v12350_v39  ;;  %v15097_v35 = vld [vmem:[#allocation12 + $0x21c] sm:$0xf]  ;;  %v12939_v11 = vld [vmem:[#allocation12 + $0x3c0] sm:$0xf] }
 0x466   :  { %5276 = vmatpush.bf16.msra.mxu2 %v12098_v37  ;;  %5289 = vmatpush.bf16.msrb.mxu3 %v12354_v2  ;;  %v12223_v39 = vld [vmem:[#allocation12 + $0x238] sm:$0xf0]  ;;  %v11970_v37 = vor.u32 %v15033_v30, %v11967_v62  ;;  %v15282_v49 = vld [vmem:[#allocation12 + $0x3dc] sm:$0xf0]  ;;  %v15278_v30 = vld [vmem:[#allocation12 + $0x3c4] sm:$0xf] }
 0x467   :  { %v12226_v2 = vor.u32 %v15097_v35, %v12223_v39  ;;  %v12940_v42 = vor.u32 %v15282_v49, %v12939_v11  ;;  %v12621_v11 = vld [vmem:[#allocation12 + $0x160] sm:$0xf0] }
 0x469   :  { %5251 = vmatpush.bf16.msra.mxu0 %v12062_v16  ;;  %5264 = vmatpush.bf16.msra.mxu1 %v12318_v29 }
 0x46a   :  { %5277 = vmatpush.bf16.msra.mxu2 %v12066_v63  ;;  %5290 = vmatpush.bf16.msrb.mxu3 %v12322_v57 }
 0x46d   :  { %5252 = vmatpush.bf16.msra.mxu0 %v12030_v28  ;;  %5265 = vmatpush.bf16.msra.mxu1 %v12286_v23 }
 0x46e   :  { %5278 = vmatpush.bf16.msra.mxu2 %v12034_v59  ;;  %5291 = vmatpush.bf16.msrb.mxu3 %v12290_v5 }
 0x471   :  { %5253 = vmatpush.bf16.msra.mxu0 %v11998_v31  ;;  %5266 = vmatpush.bf16.msra.mxu1 %v12254_v54  ;;  %v12684_v54 = vor.u32 %v15218_v15, %v12683_v3 }
 0x472   :  { %5279 = vmatpush.bf16.msra.mxu2 %v12002_v45  ;;  %5292 = vmatpush.bf16.msrb.mxu3 %v12258_v0  ;;  %v15214_v45 = vld [vmem:[#allocation12 + $0x1c4] sm:$0xf] }
 0x475   :  { %5254 = vmatpush.bf16.msra.mxu0 %v11966_v10  ;;  %5267 = vmatpush.bf16.msra.mxu1 %v12222_v53  ;;  %v12688_v53 = vor.u32 %v15214_v45, %v12685_v32 }
 0x476   :  { %5280 = vmatpush.bf16.msra.mxu2 %v11970_v37  ;;  %5293 = vmatpush.bf16.msrb.mxu3 %v12226_v2  ;;  %v12941_v37 = vld [vmem:[#allocation12 + $0x3e0] sm:$0xf0] }
 0x478   :  { %5255 = vmatmul.bf16.vlgmr.msra.gmra.mxu0 %v17020_v46  ;;  %5268 = vmatmul.bf16.vlgmr.msra.gmra.mxu1 %v17022_v52 }
 0x479   :  { %5281 = vmatmul.bf16.vlgmr.msra.gmra.mxu2 %v17020_v46  ;;  %5294 = vmatmul.bf16.vlgmr.msrb.gmra.mxu3 %v17022_v52 }
 0x47a   :  { %6218 = vmatpush.bf16.msrb.mxu0 %v12684_v54  ;;  %6231 = vmatpush.bf16.msrb.mxu1 %v12940_v42  ;;  %v15198_v54 = vld [vmem:[#allocation12 + $0x144] sm:$0xf]  ;;  %v12523_v42 = vld [vmem:[#allocation12 + $0x80] sm:$0xf] }
 0x47b   :  { %6244 = vmatpush.bf16.msrb.mxu2 %v12688_v53 }
 0x4b4   :  { %v5100_v20 = vpop.f32.mrf.mxu0  ;;  %v5113_v21 = vpop.f32.mrf.mxu1 }
 0x4b5   :  { %v5114_v22 = vadd.f32 %v5113_v21, %v5100_v20  ;;  %v12944_v20 = vor.u32 %v15278_v30, %v12941_v37  ;;  %v12651_v21 = vld [vmem:[#allocation12 + $0x180] sm:$0xf]  ;;  %v12624_v30 = vor.u32 %v15198_v54, %v12621_v11 }
 0x4b7   :  { %v5299_v12 = vadd.f32 %v5114_v22, %v16540_v44  ;;  %v15210_v22 = vld [vmem:[#allocation12 + $0x19c] sm:$0xf0]  ;;  %6257 = vmatpush.bf16.msra.mxu3 %v12944_v20 }
 0x4b9   :  { %v12451_v8 = vmul.f32 -1.442695, %v5299_v12  ;;  %v12907_v12 = vld [vmem:[#allocation12 + $0x380] sm:$0xf] }
 0x4bb   :  { %15844 = vpow2.f32 %v12451_v8  ;;  %v5126_v50 = vpop.f32.mrf.mxu2  ;;  %v5139_v16 = vpop.f32.mrf.mxu3 }
 0x4bc   :  { %v5140_v29 = vadd.f32 %v5139_v16, %v5126_v50  ;;  %v5102_v48 = vpop.f32.mrf.mxu0  ;;  %v5115_v24 = vpop.f32.mrf.mxu1 }
 0x4bd   :  { %v12652_v48 = vor.u32 %v15210_v22, %v12651_v21  ;;  %v15274_v24 = vld [vmem:[#allocation12 + $0x39c] sm:$0xf0] }
 0x4be   :  { %v5300_v63 = vadd.f32 %v5140_v29, %v16543_v4  ;;  %v12587_v22 = vld [vmem:[#allocation12 + $0x100] sm:$0xf] }
 0x4bf   :  { %6219 = vmatpush.bf16.msrb.mxu0 %v12652_v48 }
 0x4c0   :  { %v12452_v57 = vmul.f32 -1.442695, %v5300_v63  ;;  %v15206_v63 = vld [vmem:[#allocation12 + $0x184] sm:$0xf] }
 0x4c1   :  { %v15845_v43 = vpop.eup %15844 }
 0x4c2   :  { %v17042_v55 = vadd.f32 1.0, %v15845_v43  ;;  %15846 = vpow2.f32 %v12452_v57 }
 0x4c3   :  { %v5128_v46 = vpop.f32.mrf.mxu2  ;;  %v5141_v52 = vpop.f32.mrf.mxu3 }
 0x4c4   :  { %15848 = vrcp.f32 %v17042_v55  ;;  %v5152_v60 = vpop.f32.mrf.mxu0  ;;  %v5165_v17 = vpop.f32.mrf.mxu1  ;;  %v5318_v47 = vand.u32 2147483648, %v17042_v55  ;;  %v5316_v10 = vand.u32 2147483647, %v17042_v55  ;;  %v12908_v46 = vor.u32 %v15274_v24, %v12907_v12  ;;  %v12653_v52 = vld [vmem:[#allocation12 + $0x1a0] sm:$0xf0] }
 0x4c5   :  { %v5166_v31 = vadd.f32 %v5165_v17, %v5152_v60  ;;  %v15270_v60 = vld [vmem:[#allocation12 + $0x384] sm:$0xf]  ;;  %vm5312_vm6 = vweird.f32 %v17042_v55  ;;  %v15194_v12 = vld [vmem:[#allocation12 + $0x11c] sm:$0xf0] }
 0x4c6   :  { %v5319_v43 = vor.u32 1.1754944e-38, %v5318_v47  ;;  %6232 = vmatpush.bf16.msrb.mxu1 %v12908_v46  ;;  %v15202_v47 = vld [vmem:[#allocation12 + $0x15c] sm:$0xf0]  ;;  %vm5317_vm11 = vcmp.eq.f32.partialorder %v5316_v10, 8.507059e+37  ;;  %v15254_v46 = vld [vmem:[#allocation12 + $0x304] sm:$0xf] }
 0x4c7   :  { %v5301_v8 = vadd.f32 %v5166_v31, %v16558_v18  ;;  %v15266_v31 = vld [vmem:[#allocation12 + $0x35c] sm:$0xf0] }
 0x4c8   :  { %v15847_v9 = vpop.eup %15846 }
 0x4c9   :  { %v17045_v13 = vadd.f32 1.0, %v15847_v9 }
 0x4ca   :  { %v17047_v28 = vpop.eup %15848 }
 0x4cb   :  { %v5308_v23 = vmul.f32 %v17047_v28, %v17042_v55  ;;  %15850 = vrcp.f32 %v17045_v13  ;;  %v5178_v36 = vpop.f32.mrf.mxu2  ;;  %v5191_v19 = vpop.f32.mrf.mxu3  ;;  %v5337_v35 = vand.u32 2147483648, %v17045_v13  ;;  %v5335_v50 = vand.u32 2147483647, %v17045_v13 }
 0x4cc   :  { %v5192_v59 = vadd.f32 %v5191_v19, %v5178_v36  ;;  %v5154_v5 = vpop.f32.mrf.mxu0  ;;  %v5167_v27 = vpop.f32.mrf.mxu1  ;;  %vm5313_vm4 = vweird.f32 %v17047_v28  ;;  %v12909_v36 = vld [vmem:[#allocation12 + $0x3a0] sm:$0xf0]  ;;  %vm5331_vm7 = vweird.f32 %v17045_v13 }
 0x4cd   :  { %v5309_v56 = vsub.f32 1.0, %v5308_v23  ;;  %v5338_v17 = vor.u32 1.1754944e-38, %v5337_v35  ;;  %v12656_v23 = vor.u32 %v15206_v63, %v12653_v52  ;;  %v12912_v27 = vor.u32 %v15270_v60, %v12909_v36  ;;  %vm17073_vm8 = vmor %vm5312_vm6, %vm5313_vm4  ;;  %v15262_v35 = vld [vmem:[#allocation12 + $0x344] sm:$0xf] }
 0x4ce   :  { %v5302_v7 = vadd.f32 %v5192_v59, %v16553_v61  ;;  %vm17078_vm9 = vcmp.eq.f32.partialorder %v5335_v50, 8.507059e+37  ;;  %v15190_v50 = vld [vmem:[#allocation12 + $0x104] sm:$0xf] }
 0x4cf   :  { %v5310_v39 = vmul.f32 %v17047_v28, %v5309_v56  ;;  %v12619_v56 = vld [vmem:[#allocation12 + $0x140] sm:$0xf]  ;;  %6245 = vmatpush.bf16.msrb.mxu2 %v12656_v23  ;;  %6258 = vmatpush.bf16.msra.mxu3 %v12912_v27  ;;  %v12845_v52 = vld [vmem:[#allocation12 + $0x320] sm:$0xf0] }
 0x4d0   :  { %v12453_v0 = vmul.f32 -1.442695, %v5302_v7  ;;  %v12875_v7 = vld [vmem:[#allocation12 + $0x340] sm:$0xf]  ;;  %v12620_v15 = vor.u32 %v15202_v47, %v12619_v56  ;;  %v15182_v27 = vld [vmem:[#allocation12 + $0xc4] sm:$0xf] }
 0x4d1   :  { %v17054_v62 = vpop.eup %15850  ;;  %v5311_v9 = vadd.f32 %v17047_v28, %v5310_v39  ;;  %v12876_v32 = vor.u32 %v15266_v31, %v12875_v7  ;;  %v12877_v39 = vld [vmem:[#allocation12 + $0x360] sm:$0xf0]  ;;  %v12555_v23 = vld [vmem:[#allocation12 + $0xc0] sm:$0xf] }
 0x4d2   :  { %v5327_v2 = vmul.f32 %v17054_v62, %v17045_v13  ;;  %15852 = vpow2.f32 %v12453_v0  ;;  %vm5332_vm5 = vweird.f32 %v17054_v62  ;;  %6220 = vmatpush.bf16.msrb.mxu0 %v12620_v15  ;;  %v12880_v20 = vor.u32 %v15262_v35, %v12877_v39  ;;  %v12557_v7 = vld [vmem:[#allocation12 + $0xe0] sm:$0xf0]  ;;  %v12779_v35 = vld [vmem:[#allocation12 + $0x280] sm:$0xf] }
 0x4d3   :  { %v5180_v16 = vpop.f32.mrf.mxu2  ;;  %v5193_v29 = vpop.f32.mrf.mxu3  ;;  %15854 = vtanh.f32 %v5301_v8  ;;  %vm5333_vm10 = vmor %vm5331_vm7, %vm5332_vm5  ;;  %v5315_v53 = vsel %vm17073_vm8, %v17047_v28, %v5311_v9  ;;  %6233 = vmatpush.bf16.msrb.mxu1 %v12876_v32  ;;  %v12843_v8 = vld [vmem:[#allocation12 + $0x300] sm:$0xf]  ;;  %6246 = vmatpush.bf16.msrb.mxu2 %v12624_v30  ;;  %v12813_v15 = vld [vmem:[#allocation12 + $0x2e0] sm:$0xf0]  ;;  %v12560_v11 = vor.u32 %v15182_v27, %v12557_v7 }
 0x4d4   :  { %v5328_v57 = vsub.f32 1.0, %v5327_v2  ;;  %v15258_v28 = vld [vmem:[#allocation12 + $0x31c] sm:$0xf0]  ;;  %6259 = vmatpush.bf16.msra.mxu3 %v12880_v20  ;;  %v12588_v29 = vor.u32 %v15194_v12, %v12587_v22  ;;  %v12525_v22 = vld [vmem:[#allocation12 + $0xa0] sm:$0xf0] }
 0x4d5   :  { %v5204_v59 = vpop.f32.mrf.mxu0  ;;  %v5217_v5 = vpop.f32.mrf.mxu1  ;;  %v12844_v55 = vor.u32 %v15258_v28, %v12843_v8  ;;  %v15178_v32 = vld [vmem:[#allocation12 + $0x9c] sm:$0xf0] }
 0x4d6   :  { %v5329_v19 = vmul.f32 %v17054_v62, %v5328_v57  ;;  %v5218_v3 = vadd.f32 %v5217_v5, %v5204_v59  ;;  %6221 = vmatpush.bf16.msrb.mxu0 %v12588_v29  ;;  %v12811_v5 = vld [vmem:[#allocation12 + $0x2c0] sm:$0xf]  ;;  %v12524_v30 = vor.u32 %v15178_v32, %v12523_v42  ;;  %v12717_v42 = vld [vmem:[#allocation12 + $0x220] sm:$0xf0] }
 0x4d7   :  { %6234 = vmatpush.bf16.msrb.mxu1 %v12844_v55  ;;  %v15242_v39 = vld [vmem:[#allocation12 + $0x29c] sm:$0xf0] }
 0x4d8   :  { %v15853_v49 = vpop.eup %15852  ;;  %v5330_v0 = vadd.f32 %v17054_v62, %v5329_v19  ;;  %v5373_v2 = vadd.f32 %v5218_v3, %v16390_v25  ;;  %v5320_v25 = vsel %vm5317_vm11, %v5319_v43, %v5315_v53  ;;  %v15186_v43 = vld [vmem:[#allocation12 + $0xdc] sm:$0xf0]  ;;  %v12848_v19 = vor.u32 %v15254_v46, %v12845_v52  ;;  %v15246_v3 = vld [vmem:[#allocation12 + $0x2c4] sm:$0xf] }
 0x4d9   :  { %v17089_v37 = vadd.f32 1.0, %v15853_v49  ;;  %v15855_v48 = vpop.eup %15854  ;;  %v12556_v59 = vor.u32 %v15186_v43, %v12555_v23  ;;  %v12816_v49 = vor.u32 %v15246_v3, %v12813_v15  ;;  %v12780_v20 = vor.u32 %v15242_v39, %v12779_v35  ;;  %v15166_v52 = vld [vmem:[#allocation12 + $0x44] sm:$0xf]  ;;  %v15226_v15 = vld [vmem:[#allocation12 + $0x21c] sm:$0xf0] }
 0x4da   :  { %v5334_v21 = vsel %vm5333_vm10, %v17054_v62, %v5330_v0  ;;  %v12454_v16 = vmul.f32 -1.442695, %v5373_v2  ;;  %v12589_v62 = vld [vmem:[#allocation12 + $0x120] sm:$0xf0]  ;;  %v5362_v36 = vmul.f32 %v15855_v48, %v5320_v25  ;;  %6260 = vmatpush.bf16.msra.mxu3 %v12848_v19  ;;  %v12491_v48 = vld [vmem:[#allocation12 + $0x40] sm:$0xf] }
 0x4db   :  { %v5339_v13 = vsel %vm17078_vm9, %v5338_v17, %v5334_v21  ;;  %15856 = vrcp.f32 %v17089_v37  ;;  %v12592_v10 = vor.u32 %v15190_v50, %v12589_v62  ;;  %6222 = vmatpush.bf16.msrb.mxu0 %v12556_v59  ;;  %v15174_v21 = vld [vmem:[#allocation12 + $0x84] sm:$0xf]  ;;  %v5357_v12 = vand.u32 2147483648, %v17089_v37 }
 0x4dc   :  { %v5361_v24 = vmul.f32 %v5339_v13, %v16939_v14  ;;  %15858 = vpow2.f32 %v12454_v16  ;;  %v15250_v14 = vld [vmem:[#allocation12 + $0x2dc] sm:$0xf0]  ;;  %v12528_v50 = vor.u32 %v15174_v21, %v12525_v22  ;;  %v15238_v25 = vld [vmem:[#allocation12 + $0x284] sm:$0xf]  ;;  %vm5351_vm13 = vweird.f32 %v17089_v37 }
 0x4dd   :  { %v5206_v17 = vpop.f32.mrf.mxu0  ;;  %v5219_v9 = vpop.f32.mrf.mxu1  ;;  %6247 = vmatpush.bf16.msrb.mxu2 %v12592_v10  ;;  %v12812_v47 = vor.u32 %v15250_v14, %v12811_v5  ;;  %v12781_v16 = vld [vmem:[#allocation12 + $0x2a0] sm:$0xf0]  ;;  %v12459_v5 = vld [vmem:[#allocation12] sm:$0xf] }
 0x4de   :  { %v5230_v63 = vpop.f32.mrf.mxu2  ;;  %v5243_v57 = vpop.f32.mrf.mxu3  ;;  %v17102_v54 = vadd.f32 %v5362_v36, %v5361_v24  ;;  %6261 = vmatpush.bf16.msra.mxu3 %v12816_v49  ;;  %v12784_v62 = vor.u32 %v15238_v25, %v12781_v16  ;;  %v15170_v24 = vld [vmem:[#allocation12 + $0x5c] sm:$0xf0]  ;;  %v15230_v17 = vld [vmem:[#allocation12 + $0x244] sm:$0xf]  ;;  %v5358_v9 = vor.u32 1.1754944e-38, %v5357_v12 }
 0x4df   :  { %v5244_v60 = vadd.f32 %v5243_v57, %v5230_v63  ;;  %6235 = vmatpush.bf16.msrb.mxu1 %v12812_v47  ;;  %6223 = vmatpush.bf16.msrb.mxu0 %v12524_v30  ;;  %v12747_v63 = vld [vmem:[#allocation12 + $0x240] sm:$0xf]  ;;  %v12492_v10 = vor.u32 %v15170_v24, %v12491_v48  ;;  %v12749_v43 = vld [vmem:[#allocation12 + $0x260] sm:$0xf0]  ;;  %v12949_v48 = vld [vmem:[#allocation12 + $0x3e8] sm:$0xf0] }
 0x4e0   :  { %v15234_v57 = vld [vmem:[#allocation12 + $0x25c] sm:$0xf0]  ;;  %v12752_v59 = vor.u32 %v15230_v17, %v12749_v43  ;;  %v12659_v24 = vld [vmem:[#allocation12 + $0x188] sm:$0xf]  ;;  %v15207_v43 = vld [vmem:[#allocation12 + $0x18c] sm:$0xf] }
 0x4e1   :  { %v5374_v56 = vadd.f32 %v5244_v60, %v16395_v6  ;;  %v17100_v31 = vpop.eup %15856  ;;  %v5355_v6 = vand.u32 2147483647, %v17089_v37  ;;  %6248 = vmatpush.bf16.msrb.mxu2 %v12560_v11  ;;  %v12748_v46 = vor.u32 %v15234_v57, %v12747_v63  ;;  %v12493_v60 = vld [vmem:[#allocation12 + $0x60] sm:$0xf0]  ;;  %v12715_v14 = vld [vmem:[#allocation12 + $0x200] sm:$0xf] }
 0x4e2   :  { %v5347_v45 = vmul.f32 %v17100_v31, %v17089_v37  ;;  %v15859_v53 = vpop.eup %15858  ;;  %vm5352_vm12 = vweird.f32 %v17100_v31  ;;  %6262 = vmatpush.bf16.msra.mxu3 %v12784_v62  ;;  %v12496_v23 = vor.u32 %v15166_v52, %v12493_v60  ;;  %v15162_v37 = vld [vmem:[#allocation12 + $0x1c] sm:$0xf0]  ;;  %v15158_v11 = vld [vmem:[#allocation12 + $0x4] sm:$0xf]  ;;  %v15279_v62 = vld [vmem:[#allocation12 + $0x3cc] sm:$0xf] }
 0x4e3   :  { %v12455_v0 = vmul.f32 -1.442695, %v5374_v56  ;;  %v17109_v8 = vadd.f32 1.0, %v15859_v53  ;;  %6236 = vmatpush.bf16.msrb.mxu1 %v12780_v20  ;;  %vm5353_vm14 = vmor %vm5351_vm13, %vm5352_vm12  ;;  %vm5356_vm15 = vcmp.eq.f32.partialorder %v5355_v6, 8.507059e+37  ;;  %6224 = vmatpush.bf16.msrb.mxu0 %v12492_v10  ;;  %v12460_v3 = vor.u32 %v15162_v37, %v12459_v5  ;;  %v12691_v6 = vld [vmem:[#allocation12 + $0x1c8] sm:$0xf] }
 0x4e4   :  { %v5348_v2 = vsub.f32 1.0, %v5347_v45  ;;  %v12716_v45 = vor.u32 %v15226_v15, %v12715_v14  ;;  %v15219_v53 = vld [vmem:[#allocation12 + $0x1e4] sm:$0xf0]  ;;  %v12952_v63 = vor.u32 %v15279_v62, %v12949_v48  ;;  %v12917_v37 = vld [vmem:[#allocation12 + $0x3a8] sm:$0xf0] }
 0x4e5   :  { %15860 = vpow2.f32 %v12455_v0  ;;  %6249 = vmatpush.bf16.msrb.mxu2 %v12528_v50  ;;  %v5392_v7 = vand.u32 2147483648, %v17109_v8  ;;  %v12461_v0 = vld [vmem:[#allocation12 + $0x20] sm:$0xf0]  ;;  %v15283_v20 = vld [vmem:[#allocation12 + $0x3e4] sm:$0xf0]  ;;  %v12692_v12 = vor.u32 %v15219_v53, %v12691_v6  ;;  %vm5386_vm1 = vweird.f32 %v17109_v8 }
 0x4e6   :  { %15862 = vtanh.f32 %v17102_v54  ;;  %v5232_v13 = vpop.f32.mrf.mxu2  ;;  %v5245_v28 = vpop.f32.mrf.mxu3  ;;  %v5349_v29 = vmul.f32 %v17100_v31, %v5348_v2  ;;  %6263 = vmatpush.bf16.msra.mxu3 %v12752_v59  ;;  %v12464_v39 = vor.u32 %v15158_v11, %v12461_v0  ;;  %v12947_v2 = vld [vmem:[#allocation12 + $0x3c8] sm:$0xf]  ;;  %v5390_v21 = vand.u32 2147483647, %v17109_v8  ;;  %v12597_v62 = vld [vmem:[#allocation12 + $0x128] sm:$0xf0] }
 0x4e7   :  { %15864 = vrcp.f32 %v17109_v8  ;;  %6237 = vmatpush.bf16.msrb.mxu1 %v12748_v46  ;;  %6225 = vmatpush.bf16.msrb.mxu0 %v12460_v3  ;;  %v15215_v13 = vld [vmem:[#allocation12 + $0x1cc] sm:$0xf]  ;;  %v17128_v25 = vor.u32 1.1754944e-38, %v5392_v7  ;;  %v12948_v16 = vor.u32 %v15283_v20, %v12947_v2  ;;  %v15211_v57 = vld [vmem:[#allocation12 + $0x1a4] sm:$0xf0] }
 0x4e8   :  { %v5350_v55 = vadd.f32 %v17100_v31, %v5349_v29  ;;  %v12693_v28 = vld [vmem:[#allocation12 + $0x1e8] sm:$0xf0]  ;;  %v15275_v10 = vld [vmem:[#allocation12 + $0x3a4] sm:$0xf0]  ;;  %vm5391_vm7 = vcmp.eq.f32.partialorder %v5390_v21, 8.507059e+37 }
 0x4e9   :  { %6250 = vmatpush.bf16.msrb.mxu2 %v12496_v23  ;;  %v12696_v29 = vor.u32 %v15215_v13, %v12693_v28  ;;  %v12627_v14 = vld [vmem:[#allocation12 + $0x148] sm:$0xf]  ;;  %v15263_v2 = vld [vmem:[#allocation12 + $0x34c] sm:$0xf] }
 0x4ea   :  { %v5354_v19 = vsel %vm5353_vm14, %v17100_v31, %v5350_v55  ;;  %v15222_v31 = vld [vmem:[#allocation12 + $0x204] sm:$0xf]  ;;  %v12915_v55 = vld [vmem:[#allocation12 + $0x388] sm:$0xf]  ;;  %v15255_v48 = vld [vmem:[#allocation12 + $0x30c] sm:$0xf] }
 0x4eb   :  { %v15861_v36 = vpop.eup %15860  ;;  %v5359_v56 = vsel %vm5356_vm15, %v5358_v9, %v5354_v19  ;;  %6238 = vmatpush.bf16.msrb.mxu1 %v12716_v45  ;;  %v12720_v22 = vor.u32 %v15222_v31, %v12717_v42  ;;  %6270 = vmatpush.bf16.msra.mxu0 %v12692_v12  ;;  %v12660_v9 = vor.u32 %v15211_v57, %v12659_v24  ;;  %v15271_v19 = vld [vmem:[#allocation12 + $0x38c] sm:$0xf]  ;;  %v12883_v11 = vld [vmem:[#allocation12 + $0x348] sm:$0xf] }
 0x4ec   :  { %v15863_v27 = vpop.eup %15862  ;;  %v17119_v47 = vadd.f32 1.0, %v15861_v36  ;;  %v12916_v23 = vor.u32 %v15275_v10, %v12915_v55  ;;  %v12661_v36 = vld [vmem:[#allocation12 + $0x1a8] sm:$0xf0]  ;;  %v12920_v3 = vor.u32 %v15271_v19, %v12917_v37  ;;  %v12595_v20 = vld [vmem:[#allocation12 + $0x108] sm:$0xf] }
 0x4ed   :  { %v5365_v49 = vmul.f32 %v15863_v27, %v5359_v56  ;;  %v17122_v32 = vpop.eup %15864  ;;  %6251 = vmatpush.bf16.msrb.mxu2 %v12464_v39  ;;  %6264 = vmatpush.bf16.msra.mxu3 %v12720_v22  ;;  %v15203_v27 = vld [vmem:[#allocation12 + $0x164] sm:$0xf0]  ;;  %v12664_v7 = vor.u32 %v15207_v43, %v12661_v36  ;;  %v15167_v24 = vld [vmem:[#allocation12 + $0x4c] sm:$0xf] }
 0x4ee   :  { %15866 = vrcp.f32 %v17119_v47  ;;  %v5382_v35 = vmul.f32 %v17122_v32, %v17109_v8  ;;  %vm5387_vm0 = vweird.f32 %v17122_v32  ;;  %v5409_v56 = vand.u32 2147483647, %v17119_v47  ;;  %v15195_v13 = vld [vmem:[#allocation12 + $0x124] sm:$0xf0]  ;;  %v15231_v55 = vld [vmem:[#allocation12 + $0x24c] sm:$0xf] }
 0x4ef   :  { %v5366_v30 = vpack.c.bf16 %v5365_v49, %v5365_v49  ;;  %6283 = vmatpush.bf16.msra.mxu1 %v12948_v16  ;;  %6271 = vmatpush.bf16.msra.mxu0 %v12660_v9  ;;  %v12628_v15 = vor.u32 %v15203_v27, %v12627_v14  ;;  %v15267_v49 = vld [vmem:[#allocation12 + $0x364] sm:$0xf0]  ;;  %v5411_v0 = vand.u32 2147483648, %v17119_v47  ;;  %vm17144_vm2 = vmor %vm5386_vm1, %vm5387_vm0  ;;  %vm5405_vm4 = vweird.f32 %v17119_v47 }
 0x4f0   :  { %v5383_v50 = vsub.f32 1.0, %v5382_v35  ;;  %v12884_v6 = vor.u32 %v15267_v49, %v12883_v11  ;;  %v12629_v35 = vld [vmem:[#allocation12 + $0x168] sm:$0xf0]  ;;  %v12851_v28 = vld [vmem:[#allocation12 + $0x308] sm:$0xf]  ;;  %v12596_v16 = vor.u32 %v15195_v13, %v12595_v20  ;;  %vm17159_vm6 = vcmp.eq.f32.partialorder %v5409_v56, 8.507059e+37 }
 0x4f1   :  { %5367 = vst [vmem:[#allocation3 + $0x4] sm:$0xf] %v5366_v30  ;;  %6296 = vmatpush.bf16.msra.mxu2 %v12696_v29  ;;  %6309 = vmatpush.bf16.msrb.mxu3 %v12952_v63  ;;  %v15191_v29 = vld [vmem:[#allocation12 + $0x10c] sm:$0xf]  ;;  %v5412_v63 = vor.u32 1.1754944e-38, %v5411_v0 }
 0x4f2   :  { %5368 = vst [vmem:[#allocation6 + $0xc] sm:$0xf] %v5366_v30  ;;  %v5384_v17 = vmul.f32 %v17122_v32, %v5383_v50  ;;  %v15199_v30 = vld [vmem:[#allocation12 + $0x14c] sm:$0xf]  ;;  %v15259_v50 = vld [vmem:[#allocation12 + $0x324] sm:$0xf0]  ;;  %v12600_v36 = vor.u32 %v15191_v29, %v12597_v62 }
 0x4f3   :  { %6284 = vmatpush.bf16.msra.mxu1 %v12916_v23  ;;  %v12632_v53 = vor.u32 %v15199_v30, %v12629_v35  ;;  %6272 = vmatpush.bf16.msra.mxu0 %v12628_v15  ;;  %v12563_v19 = vld [vmem:[#allocation12 + $0xc8] sm:$0xf]  ;;  %v15183_v56 = vld [vmem:[#allocation12 + $0xcc] sm:$0xf] }
 0x4f4   :  { %v17130_v46 = vpop.eup %15866  ;;  %v5385_v39 = vadd.f32 %v17122_v32, %v5384_v17  ;;  %v15251_v27 = vld [vmem:[#allocation12 + $0x2e4] sm:$0xf0]  ;;  %v15247_v11 = vld [vmem:[#allocation12 + $0x2cc] sm:$0xf] }
 0x4f5   :  { %v5256_v52 = vpop.f32.mrf.mxu0  ;;  %v5269_v60 = vpop.f32.mrf.mxu1  ;;  %v5401_v59 = vmul.f32 %v17130_v46, %v17119_v47  ;;  %vm5406_vm3 = vweird.f32 %v17130_v46  ;;  %6297 = vmatpush.bf16.msra.mxu2 %v12664_v7  ;;  %6310 = vmatpush.bf16.msrb.mxu3 %v12920_v3  ;;  %v12565_v7 = vld [vmem:[#allocation12 + $0xe8] sm:$0xf0]  ;;  %v12531_v21 = vld [vmem:[#allocation12 + $0x88] sm:$0xf] }
 0x4f6   :  { %v5270_v5 = vadd.f32 %v5269_v60, %v5256_v52  ;;  %vm17154_vm5 = vmor %vm5405_vm4, %vm5406_vm3  ;;  %v12852_v52 = vor.u32 %v15259_v50, %v12851_v28  ;;  %v12853_v60 = vld [vmem:[#allocation12 + $0x328] sm:$0xf0]  ;;  %v5389_v17 = vsel %vm17144_vm2, %v17122_v32, %v5385_v39  ;;  %v12568_v8 = vor.u32 %v15183_v56, %v12565_v7  ;;  %v15179_v30 = vld [vmem:[#allocation12 + $0xa4] sm:$0xf0] }
 0x4f7   :  { %v5402_v45 = vsub.f32 1.0, %v5401_v59  ;;  %6285 = vmatpush.bf16.msra.mxu1 %v12884_v6  ;;  %v15187_v59 = vld [vmem:[#allocation12 + $0xe4] sm:$0xf0]  ;;  %v12856_v14 = vor.u32 %v15255_v48, %v12853_v60  ;;  %6273 = vmatpush.bf16.msra.mxu0 %v12596_v16  ;;  %v12821_v49 = vld [vmem:[#allocation12 + $0x2e8] sm:$0xf0] }
 0x4f8   :  { %v5375_v31 = vadd.f32 %v5270_v5, %v16512_v58  ;;  %v12885_v58 = vld [vmem:[#allocation12 + $0x368] sm:$0xf0]  ;;  %v12819_v5 = vld [vmem:[#allocation12 + $0x2c8] sm:$0xf]  ;;  %v12564_v15 = vor.u32 %v15187_v59, %v12563_v19  ;;  %v12824_v35 = vor.u32 %v15247_v11, %v12821_v49 }
 0x4f9   :  { %v5403_v22 = vmul.f32 %v17130_v46, %v5402_v45  ;;  %v12888_v12 = vor.u32 %v15263_v2, %v12885_v58  ;;  %6298 = vmatpush.bf16.msra.mxu2 %v12632_v53  ;;  %v15243_v39 = vld [vmem:[#allocation12 + $0x2a4] sm:$0xf0]  ;;  %v15175_v53 = vld [vmem:[#allocation12 + $0x8c] sm:$0xf] }
 0x4fa   :  { %15868 = vtanh.f32 %v5375_v31  ;;  %v12820_v31 = vor.u32 %v15251_v27, %v12819_v5  ;;  %v12533_v58 = vld [vmem:[#allocation12 + $0xa8] sm:$0xf0]  ;;  %v12499_v28 = vld [vmem:[#allocation12 + $0x48] sm:$0xf] }
 0x4fb   :  { %v5404_v57 = vadd.f32 %v17130_v46, %v5403_v22  ;;  %6311 = vmatpush.bf16.msrb.mxu3 %v12888_v12  ;;  %6286 = vmatpush.bf16.msra.mxu1 %v12852_v52  ;;  %v12789_v20 = vld [vmem:[#allocation12 + $0x2a8] sm:$0xf0]  ;;  %v15171_v50 = vld [vmem:[#allocation12 + $0x64] sm:$0xf0]  ;;  %v12536_v16 = vor.u32 %v15175_v53, %v12533_v58  ;;  %v15216_v58 = vld [vmem:[#allocation12 + $0x1d4] sm:$0xf] }
 0x4fc   :  { %v5282_v10 = vpop.f32.mrf.mxu2  ;;  %v5295_v47 = vpop.f32.mrf.mxu3  ;;  %6274 = vmatpush.bf16.msra.mxu0 %v12564_v15  ;;  %v12755_v29 = vld [vmem:[#allocation12 + $0x248] sm:$0xf]  ;;  %v15159_v59 = vld [vmem:[#allocation12 + $0xc] sm:$0xf] }
 0x4fd   :  { %v5296_v9 = vadd.f32 %v5295_v47, %v5282_v10  ;;  %v5258_v23 = vpop.f32.mrf.mxu0  ;;  %v5271_v43 = vpop.f32.mrf.mxu1  ;;  %v5408_v37 = vsel %vm17154_vm5, %v17130_v46, %v5404_v57  ;;  %v5394_v46 = vsel %vm5391_vm7, %v17128_v25, %v5389_v17  ;;  %6299 = vmatpush.bf16.msra.mxu2 %v12600_v36  ;;  %v12532_v25 = vor.u32 %v15179_v30, %v12531_v21  ;;  %v15235_v62 = vld [vmem:[#allocation12 + $0x264] sm:$0xf0]  ;;  %v12757_v10 = vld [vmem:[#allocation12 + $0x268] sm:$0xf0] }
 0x4fe   :  { %v5413_v32 = vsel %vm17159_vm6, %v5412_v63, %v5408_v37  ;;  %v12501_v63 = vld [vmem:[#allocation12 + $0x68] sm:$0xf0]  ;;  %v12500_v57 = vor.u32 %v15171_v50, %v12499_v28  ;;  %v12756_v47 = vor.u32 %v15235_v62, %v12755_v29  ;;  %v12467_v52 = vld [vmem:[#allocation12 + $0x8] sm:$0xf]  ;;  %v12760_v19 = vor.u32 %v15231_v55, %v12757_v10  ;;  %v12667_v62 = vld [vmem:[#allocation12 + $0x190] sm:$0xf] }
 0x4ff   :  { %v5376_v3 = vadd.f32 %v5296_v9, %v16510_v41  ;;  %v5435_v0 = vmul.f32 %v5413_v32, %v17017_v26  ;;  %6312 = vmatpush.bf16.msrb.mxu3 %v12856_v14  ;;  %v12787_v41 = vld [vmem:[#allocation12 + $0x288] sm:$0xf]  ;;  %v15239_v26 = vld [vmem:[#allocation12 + $0x28c] sm:$0xf]  ;;  %6287 = vmatpush.bf16.msra.mxu1 %v12820_v31  ;;  %v12504_v9 = vor.u32 %v15167_v24, %v12501_v63  ;;  %v15276_v55 = vld [vmem:[#allocation12 + $0x3ac] sm:$0xf0] }
 0x500   :  { %v15869_v45 = vpop.eup %15868  ;;  %v12788_v13 = vor.u32 %v15243_v39, %v12787_v41  ;;  %v12792_v48 = vor.u32 %v15239_v26, %v12789_v20  ;;  %6275 = vmatpush.bf16.msra.mxu0 %v12532_v25  ;;  %v15163_v60 = vld [vmem:[#allocation12 + $0x24] sm:$0xf0]  ;;  %v12469_v5 = vld [vmem:[#allocation12 + $0x28] sm:$0xf0]  ;;  %v15220_v41 = vld [vmem:[#allocation12 + $0x1ec] sm:$0xf0] }
 0x501   :  { %v5436_v42 = vmul.f32 %v15869_v45, %v5394_v46  ;;  %v12456_v6 = vmul.f32 -1.442695, %v5376_v3  ;;  %6300 = vmatpush.bf16.msra.mxu2 %v12568_v8  ;;  %v12723_v23 = vld [vmem:[#allocation12 + $0x208] sm:$0xf]  ;;  %v12468_v37 = vor.u32 %v15163_v60, %v12467_v52  ;;  %v15223_v14 = vld [vmem:[#allocation12 + $0x20c] sm:$0xf]  ;;  %v12472_v7 = vor.u32 %v15159_v59, %v12469_v5 }
 0x502   :  { %v15227_v43 = vld [vmem:[#allocation12 + $0x224] sm:$0xf0]  ;;  %v12725_v27 = vld [vmem:[#allocation12 + $0x228] sm:$0xf0]  ;;  %v12955_v39 = vld [vmem:[#allocation12 + $0x3d0] sm:$0xf] }
 0x503   :  { %v17176_v2 = vadd.f32 %v5436_v42, %v5435_v0  ;;  %15870 = vpow2.f32 %v12456_v6  ;;  %6313 = vmatpush.bf16.msrb.mxu3 %v12824_v35  ;;  %6288 = vmatpush.bf16.msra.mxu1 %v12788_v13  ;;  %v12724_v56 = vor.u32 %v15227_v43, %v12723_v23  ;;  %v12728_v32 = vor.u32 %v15223_v14, %v12725_v27  ;;  %v12699_v35 = vld [vmem:[#allocation12 + $0x1d0] sm:$0xf]  ;;  %v12957_v13 = vld [vmem:[#allocation12 + $0x3f0] sm:$0xf0] }
 0x504   :  { %v5284_v22 = vpop.f32.mrf.mxu2  ;;  %v5297_v12 = vpop.f32.mrf.mxu3  ;;  %6276 = vmatpush.bf16.msra.mxu0 %v12500_v57  ;;  %v15284_v25 = vld [vmem:[#allocation12 + $0x3ec] sm:$0xf0]  ;;  %v15208_v10 = vld [vmem:[#allocation12 + $0x194] sm:$0xf] }
 0x505   :  { %6301 = vmatpush.bf16.msra.mxu2 %v12536_v16  ;;  %v12701_v22 = vld [vmem:[#allocation12 + $0x1f0] sm:$0xf0]  ;;  %v12700_v16 = vor.u32 %v15220_v41, %v12699_v35  ;;  %v12956_v29 = vor.u32 %v15284_v25, %v12955_v39  ;;  %v12923_v57 = vld [vmem:[#allocation12 + $0x390] sm:$0xf] }
 0x506   :  { %v15280_v12 = vld [vmem:[#allocation12 + $0x3d4] sm:$0xf]  ;;  %v12704_v24 = vor.u32 %v15216_v58, %v12701_v22  ;;  %v12635_v23 = vld [vmem:[#allocation12 + $0x150] sm:$0xf] }
 0x507   :  { %6314 = vmatpush.bf16.msrb.mxu3 %v12792_v48  ;;  %6289 = vmatpush.bf16.msra.mxu1 %v12756_v47  ;;  %v15212_v48 = vld [vmem:[#allocation12 + $0x1ac] sm:$0xf0]  ;;  %v12960_v63 = vor.u32 %v15280_v12, %v12957_v13  ;;  %v12669_v47 = vld [vmem:[#allocation12 + $0x1b0] sm:$0xf0] }
 0x508   :  { %6277 = vmatpush.bf16.msra.mxu0 %v12468_v37  ;;  %v15272_v52 = vld [vmem:[#allocation12 + $0x394] sm:$0xf]  ;;  %v15204_v43 = vld [vmem:[#allocation12 + $0x16c] sm:$0xf0] }
 0x509   :  { %v15871_v17 = vpop.eup %15870  ;;  %6302 = vmatpush.bf16.msra.mxu2 %v12504_v9  ;;  %v12925_v60 = vld [vmem:[#allocation12 + $0x3b0] sm:$0xf0]  ;;  %v12924_v9 = vor.u32 %v15276_v55, %v12923_v57  ;;  %v12891_v59 = vld [vmem:[#allocation12 + $0x350] sm:$0xf] }
 0x50a   :  { %v5419_v36 = vadd.f32 1.0, %v15871_v17  ;;  %v12668_v17 = vor.u32 %v15212_v48, %v12667_v62  ;;  %v15268_v5 = vld [vmem:[#allocation12 + $0x36c] sm:$0xf0]  ;;  %v15200_v37 = vld [vmem:[#allocation12 + $0x154] sm:$0xf] }
 0x50b   :  { %6315 = vmatpush.bf16.msrb.mxu3 %v12760_v19  ;;  %6290 = vmatpush.bf16.msra.mxu1 %v12724_v56  ;;  %v12928_v19 = vor.u32 %v15272_v52, %v12925_v60  ;;  %v12637_v14 = vld [vmem:[#allocation12 + $0x170] sm:$0xf0]  ;;  %v15188_v35 = vld [vmem:[#allocation12 + $0xec] sm:$0xf0] }
 0x50c   :  { %15872 = vrcp.f32 %v5419_v36  ;;  %v5431_v49 = vand.u32 2147483648, %v5419_v36  ;;  %v5429_v46 = vand.u32 2147483647, %v5419_v36  ;;  %vm5425_vm9 = vweird.f32 %v5419_v36  ;;  %v15264_v27 = vld [vmem:[#allocation12 + $0x354] sm:$0xf] }
 0x50d   :  { %6303 = vmatpush.bf16.msra.mxu2 %v12472_v7  ;;  %15874 = vtanh.f32 %v17176_v2  ;;  %v12893_v56 = vld [vmem:[#allocation12 + $0x370] sm:$0xf0]  ;;  %v12636_v7 = vor.u32 %v15204_v43, %v12635_v23  ;;  %v15252_v25 = vld [vmem:[#allocation12 + $0x2ec] sm:$0xf0] }
 0x50e   :  { %v5432_v31 = vor.u32 1.1754944e-38, %v5431_v49  ;;  %vm5430_vm11 = vcmp.eq.f32.partialorder %v5429_v46, 8.507059e+37  ;;  %v12896_v49 = vor.u32 %v15264_v27, %v12893_v56  ;;  %v15260_v46 = vld [vmem:[#allocation12 + $0x32c] sm:$0xf0]  ;;  %v15184_v58 = vld [vmem:[#allocation12 + $0xd4] sm:$0xf] }
 0x50f   :  { %6316 = vmatpush.bf16.msrb.mxu3 %v12728_v32  ;;  %v12892_v32 = vor.u32 %v15268_v5, %v12891_v59  ;;  %v12829_v22 = vld [vmem:[#allocation12 + $0x2f0] sm:$0xf0]  ;;  %v12475_v27 = vld [vmem:[#allocation12 + $0x10] sm:$0xf] }
 0x510   :  { %v15176_v57 = vld [vmem:[#allocation12 + $0x94] sm:$0xf] }
 0x511   :  { %v12541_v55 = vld [vmem:[#allocation12 + $0xb0] sm:$0xf0] }
 0x512   :  { %v15873_v3 = vpop.eup %15872  ;;  %v12544_v23 = vor.u32 %v15176_v57, %v12541_v55  ;;  %v15168_v59 = vld [vmem:[#allocation12 + $0x54] sm:$0xf]  ;;  %v15273_v57 = vld [vmem:[#allocation12 + $0x39c] sm:$0xf] }
 0x513   :  { %v5421_v15 = vmul.f32 %v15873_v3, %v5419_v36  ;;  %vm5426_vm8 = vweird.f32 %v15873_v3  ;;  %v15875_v6 = vpop.eup %15874  ;;  %v12672_v36 = vor.u32 %v15208_v10, %v12669_v47  ;;  %v15240_v10 = vld [vmem:[#allocation12 + $0x294] sm:$0xf]  ;;  %v12933_v55 = vld [vmem:[#allocation12 + $0x3b8] sm:$0xf0] }
 0x514   :  { %vm5427_vm10 = vmor %vm5425_vm9, %vm5426_vm8  ;;  %v12797_v47 = vld [vmem:[#allocation12 + $0x2b0] sm:$0xf0] }
 0x515   :  { %v5422_v11 = vsub.f32 1.0, %v5421_v15  ;;  %v15196_v15 = vld [vmem:[#allocation12 + $0x12c] sm:$0xf0]  ;;  %v12800_v43 = vor.u32 %v15240_v10, %v12797_v47  ;;  %v12509_v5 = vld [vmem:[#allocation12 + $0x70] sm:$0xf0] }
 0x517   :  { %v5423_v45 = vmul.f32 %v15873_v3, %v5422_v11  ;;  %v12640_v11 = vor.u32 %v15200_v37, %v12637_v14  ;;  %v15232_v37 = vld [vmem:[#allocation12 + $0x254] sm:$0xf] }
 0x518   :  { %v12765_v14 = vld [vmem:[#allocation12 + $0x270] sm:$0xf0] }
 0x519   :  { %v5424_v0 = vadd.f32 %v15873_v3, %v5423_v45  ;;  %v12859_v45 = vld [vmem:[#allocation12 + $0x310] sm:$0xf] }
 0x51b   :  { %v5428_v42 = vsel %vm5427_vm10, %v15873_v3, %v5424_v0  ;;  %v12603_v3 = vld [vmem:[#allocation12 + $0x110] sm:$0xf]  ;;  %v15192_v0 = vld [vmem:[#allocation12 + $0x114] sm:$0xf] }
 0x51c   :  { %v5433_v8 = vsel %vm5430_vm11, %v5432_v31, %v5428_v42  ;;  %v12605_v31 = vld [vmem:[#allocation12 + $0x130] sm:$0xf0] }
 0x51d   :  { %v5439_v21 = vmul.f32 %v15875_v6, %v5433_v8  ;;  %v15256_v42 = vld [vmem:[#allocation12 + $0x314] sm:$0xf]  ;;  %v12604_v8 = vor.u32 %v15196_v15, %v12603_v3  ;;  %v12608_v41 = vor.u32 %v15192_v0, %v12605_v31  ;;  %v12731_v3 = vld [vmem:[#allocation12 + $0x210] sm:$0xf] }
 0x51e   :  { %v12861_v6 = vld [vmem:[#allocation12 + $0x330] sm:$0xf0]  ;;  %v15228_v15 = vld [vmem:[#allocation12 + $0x22c] sm:$0xf0] }
 0x51f   :  { %v5440_v30 = vpack.c.bf16 %v5439_v21, %v5439_v21  ;;  %v12860_v21 = vor.u32 %v15260_v46, %v12859_v45  ;;  %v12864_v39 = vor.u32 %v15256_v42, %v12861_v6  ;;  %v15160_v45 = vld [vmem:[#allocation12 + $0x14] sm:$0xf]  ;;  %v12707_v42 = vld [vmem:[#allocation12 + $0x1d8] sm:$0xf] }
 0x520   :  { %v12477_v46 = vld [vmem:[#allocation12 + $0x30] sm:$0xf0]  ;;  %v15221_v6 = vld [vmem:[#allocation12 + $0x1f4] sm:$0xf0] }
 0x521   :  { %5441 = vst [vmem:[#allocation3] sm:$0xf] %v5440_v30  ;;  %v12571_v30 = vld [vmem:[#allocation12 + $0xd0] sm:$0xf]  ;;  %v15224_v0 = vld [vmem:[#allocation12 + $0x214] sm:$0xf] }
 0x522   :  { %v12572_v12 = vor.u32 %v15188_v35, %v12571_v30  ;;  %v12733_v31 = vld [vmem:[#allocation12 + $0x230] sm:$0xf0]  ;;  %v15217_v30 = vld [vmem:[#allocation12 + $0x1dc] sm:$0xf] }
 0x528   :  { %v5442_v53 = vld [vmem:[#allocation3] sm:$0xff] }
 0x529   :  { %v5572_v26 = vunpack.c.l.b16 %v5442_v53  ;;  %v5573_v20 = vunpack.c.h.b16 %v5442_v53  ;;  %v12827_v53 = vld [vmem:[#allocation12 + $0x2d0] sm:$0xf] }
 0x52a   :  { %v12828_v13 = vor.u32 %v15252_v25, %v12827_v53  ;;  %v15281_v53 = vld [vmem:[#allocation12 + $0x3dc] sm:$0xf] }
 0x52b   :  { %v17179_v28 = vpack.c.b16 %v5572_v26, %v5572_v26  ;;  %v17181_v50 = vpack.c.b16 %v5573_v20, %v5573_v20  ;;  %v12573_v26 = vld [vmem:[#allocation12 + $0xf0] sm:$0xf0]  ;;  %v12965_v25 = vld [vmem:[#allocation12 + $0x3f8] sm:$0xf0] }
 0x52c   :  { %v15248_v20 = vld [vmem:[#allocation12 + $0x2d4] sm:$0xf]  ;;  %v12576_v62 = vor.u32 %v15184_v58, %v12573_v26  ;;  %v12480_v58 = vor.u32 %v15160_v45, %v12477_v46  ;;  %v12736_v26 = vor.u32 %v15224_v0, %v12733_v31  ;;  %v15257_v45 = vld [vmem:[#allocation12 + $0x31c] sm:$0xf] }
 0x52d   :  { %6226 = vmatmul.bf16.vlgmr.msrb.gmra.mxu0 %v17179_v28  ;;  %6239 = vmatmul.bf16.vlgmr.msrb.gmra.mxu1 %v17181_v50  ;;  %v12832_v48 = vor.u32 %v15248_v20, %v12829_v22  ;;  %v12708_v20 = vor.u32 %v15221_v6, %v12707_v42  ;;  %v12869_v46 = vld [vmem:[#allocation12 + $0x338] sm:$0xf0]  ;;  %v12579_v42 = vld [vmem:[#allocation12 + $0xd8] sm:$0xf] }
 0x52e   :  { %6252 = vmatmul.bf16.vlgmr.msrb.gmra.mxu2 %v17179_v28  ;;  %6265 = vmatmul.bf16.vlgmr.msra.gmra.mxu3 %v17181_v50  ;;  %v15189_v6 = vld [vmem:[#allocation12 + $0xf4] sm:$0xf0] }
 0x52f   :  { %6322 = vmatpush.bf16.msrb.mxu0 %v12700_v16  ;;  %6335 = vmatpush.bf16.msrb.mxu1 %v12956_v29  ;;  %v12539_v16 = vld [vmem:[#allocation12 + $0x90] sm:$0xf] }
 0x530   :  { %6348 = vmatpush.bf16.msrb.mxu2 %v12704_v24  ;;  %6361 = vmatpush.bf16.msra.mxu3 %v12960_v63  ;;  %v15180_v29 = vld [vmem:[#allocation12 + $0xac] sm:$0xf0] }
 0x531   :  { %v12795_v24 = vld [vmem:[#allocation12 + $0x290] sm:$0xf]  ;;  %v12540_v52 = vor.u32 %v15180_v29, %v12539_v16  ;;  %v12968_v29 = vor.u32 %v15281_v53, %v12965_v25  ;;  %v15249_v53 = vld [vmem:[#allocation12 + $0x2dc] sm:$0xf] }
 0x532   :  { %v15244_v63 = vld [vmem:[#allocation12 + $0x2ac] sm:$0xf0]  ;;  %v12837_v25 = vld [vmem:[#allocation12 + $0x2f8] sm:$0xf0] }
 0x533   :  { %6323 = vmatpush.bf16.msrb.mxu0 %v12668_v17  ;;  %6336 = vmatpush.bf16.msrb.mxu1 %v12924_v9  ;;  %v12796_v60 = vor.u32 %v15244_v63, %v12795_v24  ;;  %v12507_v17 = vld [vmem:[#allocation12 + $0x50] sm:$0xf]  ;;  %v15209_v24 = vld [vmem:[#allocation12 + $0x19c] sm:$0xf] }
 0x534   :  { %6349 = vmatpush.bf16.msrb.mxu2 %v12672_v36  ;;  %6362 = vmatpush.bf16.msra.mxu3 %v12928_v19  ;;  %v15172_v9 = vld [vmem:[#allocation12 + $0x6c] sm:$0xf0]  ;;  %v12677_v63 = vld [vmem:[#allocation12 + $0x1b8] sm:$0xf0] }
 0x535   :  { %v12763_v36 = vld [vmem:[#allocation12 + $0x250] sm:$0xf]  ;;  %v12508_v56 = vor.u32 %v15172_v9, %v12507_v17  ;;  %v12680_v17 = vor.u32 %v15209_v24, %v12677_v63  ;;  %v12936_v9 = vor.u32 %v15273_v57, %v12933_v55  ;;  %v15241_v24 = vld [vmem:[#allocation12 + $0x29c] sm:$0xf] }
 0x536   :  { %v15236_v19 = vld [vmem:[#allocation12 + $0x26c] sm:$0xf0]  ;;  %v12805_v63 = vld [vmem:[#allocation12 + $0x2b8] sm:$0xf0] }
 0x537   :  { %6324 = vmatpush.bf16.msrb.mxu0 %v12636_v7  ;;  %6337 = vmatpush.bf16.msrb.mxu1 %v12892_v32  ;;  %v12764_v7 = vor.u32 %v15236_v19, %v12763_v36  ;;  %v15164_v32 = vld [vmem:[#allocation12 + $0x2c] sm:$0xf0]  ;;  %v15201_v36 = vld [vmem:[#allocation12 + $0x15c] sm:$0xf] }
 0x538   :  { %6350 = vmatpush.bf16.msrb.mxu2 %v12640_v11  ;;  %6363 = vmatpush.bf16.msra.mxu3 %v12896_v49  ;;  %v12512_v11 = vor.u32 %v15168_v59, %v12509_v5  ;;  %v12768_v49 = vor.u32 %v15232_v37, %v12765_v14  ;;  %v12476_v35 = vor.u32 %v15164_v32, %v12475_v27  ;;  %v12645_v19 = vld [vmem:[#allocation12 + $0x178] sm:$0xf0]  ;;  %v12611_v27 = vld [vmem:[#allocation12 + $0x118] sm:$0xf] }
 0x539   :  { %v15265_v59 = vld [vmem:[#allocation12 + $0x35c] sm:$0xf] }
 0x53a   :  { %v12901_v5 = vld [vmem:[#allocation12 + $0x378] sm:$0xf0] }
 0x53b   :  { %6325 = vmatpush.bf16.msrb.mxu0 %v12604_v8  ;;  %6338 = vmatpush.bf16.msrb.mxu1 %v12860_v21  ;;  %v12963_v8 = vld [vmem:[#allocation12 + $0x3d8] sm:$0xf]  ;;  %v12904_v32 = vor.u32 %v15265_v59, %v12901_v5 }
 0x53c   :  { %6351 = vmatpush.bf16.msrb.mxu2 %v12608_v41  ;;  %6364 = vmatpush.bf16.msra.mxu3 %v12864_v39  ;;  %v15285_v21 = vld [vmem:[#allocation12 + $0x3f4] sm:$0xf0]  ;;  %v12732_v41 = vor.u32 %v15228_v15, %v12731_v3  ;;  %v12709_v39 = vld [vmem:[#allocation12 + $0x1f8] sm:$0xf0] }
 0x53d   :  { %6278 = vmatmul.bf16.vlgmr.msra.gmra.mxu0 %v17179_v28  ;;  %6291 = vmatmul.bf16.vlgmr.msra.gmra.mxu1 %v17181_v50  ;;  %v12964_v22 = vor.u32 %v15285_v21, %v12963_v8  ;;  %v12712_v16 = vor.u32 %v15217_v30, %v12709_v39  ;;  %v12867_v3 = vld [vmem:[#allocation12 + $0x318] sm:$0xf]  ;;  %v12872_v21 = vor.u32 %v15257_v45, %v12869_v46  ;;  %v12581_v39 = vld [vmem:[#allocation12 + $0xf8] sm:$0xf0] }
 0x53e   :  { %6304 = vmatmul.bf16.vlgmr.msra.gmra.mxu2 %v17179_v28  ;;  %6317 = vmatmul.bf16.vlgmr.msrb.gmra.mxu3 %v17181_v50  ;;  %v15261_v15 = vld [vmem:[#allocation12 + $0x334] sm:$0xf0] }
 0x53f   :  { %6326 = vmatpush.bf16.msrb.mxu0 %v12572_v12  ;;  %6339 = vmatpush.bf16.msrb.mxu1 %v12828_v13  ;;  %v12675_v12 = vld [vmem:[#allocation12 + $0x198] sm:$0xf]  ;;  %v12868_v31 = vor.u32 %v15261_v15, %v12867_v3  ;;  %v15161_v3 = vld [vmem:[#allocation12 + $0x1c] sm:$0xf] }
 0x540   :  { %6352 = vmatpush.bf16.msrb.mxu2 %v12576_v62  ;;  %6365 = vmatpush.bf16.msra.mxu3 %v12832_v48  ;;  %v15213_v13 = vld [vmem:[#allocation12 + $0x1b4] sm:$0xf0]  ;;  %v12485_v15 = vld [vmem:[#allocation12 + $0x38] sm:$0xf0] }
 0x541   :  { %v12931_v62 = vld [vmem:[#allocation12 + $0x398] sm:$0xf]  ;;  %v12676_v10 = vor.u32 %v15213_v13, %v12675_v12  ;;  %v12840_v13 = vor.u32 %v15249_v53, %v12837_v25 }
 0x542   :  { %v15277_v48 = vld [vmem:[#allocation12 + $0x3b4] sm:$0xf0] }
 0x543   :  { %6327 = vmatpush.bf16.msrb.mxu0 %v12540_v52  ;;  %6340 = vmatpush.bf16.msrb.mxu1 %v12796_v60  ;;  %v12932_v47 = vor.u32 %v15277_v48, %v12931_v62  ;;  %v12643_v52 = vld [vmem:[#allocation12 + $0x158] sm:$0xf]  ;;  %v15177_v62 = vld [vmem:[#allocation12 + $0x9c] sm:$0xf] }
 0x544   :  { %6353 = vmatpush.bf16.msrb.mxu2 %v12544_v23  ;;  %6366 = vmatpush.bf16.msra.mxu3 %v12800_v43  ;;  %v15205_v60 = vld [vmem:[#allocation12 + $0x174] sm:$0xf0]  ;;  %v12549_v48 = vld [vmem:[#allocation12 + $0xb8] sm:$0xf0] }
 0x545   :  { %v12899_v23 = vld [vmem:[#allocation12 + $0x358] sm:$0xf]  ;;  %v12644_v37 = vor.u32 %v15205_v60, %v12643_v52  ;;  %v12552_v52 = vor.u32 %v15177_v62, %v12549_v48  ;;  %v12808_v60 = vor.u32 %v15241_v24, %v12805_v63 }
 0x546   :  { %v15269_v43 = vld [vmem:[#allocation12 + $0x374] sm:$0xf0] }
 0x547   :  { %6328 = vmatpush.bf16.msrb.mxu0 %v12508_v56  ;;  %6341 = vmatpush.bf16.msrb.mxu1 %v12764_v7  ;;  %v12900_v14 = vor.u32 %v15269_v43, %v12899_v23  ;;  %v15197_v56 = vld [vmem:[#allocation12 + $0x134] sm:$0xf0]  ;;  %v12648_v7 = vor.u32 %v15201_v36, %v12645_v19  ;;  %v15169_v23 = vld [vmem:[#allocation12 + $0x5c] sm:$0xf] }
 0x548   :  { %6354 = vmatpush.bf16.msrb.mxu2 %v12512_v11  ;;  %6367 = vmatpush.bf16.msra.mxu3 %v12768_v49  ;;  %v15193_v11 = vld [vmem:[#allocation12 + $0x11c] sm:$0xf]  ;;  %v12612_v0 = vor.u32 %v15197_v56, %v12611_v27  ;;  %v12835_v30 = vld [vmem:[#allocation12 + $0x2d8] sm:$0xf] }
 0x549   :  { %v12613_v49 = vld [vmem:[#allocation12 + $0x138] sm:$0xf0] }
 0x54a   :  { %v12616_v8 = vor.u32 %v15193_v11, %v12613_v49  ;;  %v12517_v43 = vld [vmem:[#allocation12 + $0x78] sm:$0xf0] }
 0x54b   :  { %6329 = vmatpush.bf16.msrb.mxu0 %v12476_v35  ;;  %6342 = vmatpush.bf16.msrb.mxu1 %v12732_v41  ;;  %v15253_v35 = vld [vmem:[#allocation12 + $0x2f4] sm:$0xf0]  ;;  %v15185_v41 = vld [vmem:[#allocation12 + $0xdc] sm:$0xf]  ;;  %v12520_v27 = vor.u32 %v15169_v23, %v12517_v43 }
 0x54c   :  { %6355 = vmatpush.bf16.msrb.mxu2 %v12480_v58  ;;  %6368 = vmatpush.bf16.msra.mxu3 %v12736_v26  ;;  %v12580_v58 = vor.u32 %v15189_v6, %v12579_v42  ;;  %v12836_v26 = vor.u32 %v15253_v35, %v12835_v30  ;;  %v12584_v12 = vor.u32 %v15185_v41, %v12581_v39  ;;  %v15233_v36 = vld [vmem:[#allocation12 + $0x25c] sm:$0xf] }
 0x54d   :  { %v12773_v19 = vld [vmem:[#allocation12 + $0x278] sm:$0xf0] }
 0x54e   :  { %6330 = vmatmul.bf16.vlgmr.msrb.gmra.mxu0 %v17179_v28  ;;  %6343 = vmatmul.bf16.vlgmr.msrb.gmra.mxu1 %v17181_v50  ;;  %v12776_v56 = vor.u32 %v15233_v36, %v12773_v19  ;;  %v15225_v11 = vld [vmem:[#allocation12 + $0x21c] sm:$0xf]  ;;  %v13457_v36 = vld [vmem:[#allocation12 + $0x3c0] sm:$0xf] }
 0x54f   :  { %6374 = vmatpush.bf16.msra.mxu0 %v12708_v20  ;;  %6387 = vmatpush.bf16.msra.mxu1 %v12964_v22  ;;  %v12547_v20 = vld [vmem:[#allocation12 + $0x98] sm:$0xf]  ;;  %v12741_v49 = vld [vmem:[#allocation12 + $0x238] sm:$0xf0]  ;;  %v15410_v19 = vld [vmem:[#allocation12 + $0x3dc] sm:$0xf0] }
 0x550   :  { %6400 = vmatpush.bf16.msra.mxu2 %v12712_v16  ;;  %6413 = vmatpush.bf16.msrb.mxu3 %v12968_v29  ;;  %v15181_v22 = vld [vmem:[#allocation12 + $0xb4] sm:$0xf0] }
 0x551   :  { %6356 = vmatmul.bf16.vlgmr.msrb.gmra.mxu2 %v17179_v28  ;;  %6369 = vmatmul.bf16.vlgmr.msra.gmra.mxu3 %v17181_v50  ;;  %v12803_v16 = vld [vmem:[#allocation12 + $0x298] sm:$0xf]  ;;  %v12548_v57 = vor.u32 %v15181_v22, %v12547_v20 }
 0x552   :  { %v15245_v29 = vld [vmem:[#allocation12 + $0x2b4] sm:$0xf0] }
 0x553   :  { %6375 = vmatpush.bf16.msra.mxu0 %v12676_v10  ;;  %6388 = vmatpush.bf16.msra.mxu1 %v12932_v47  ;;  %v12804_v55 = vor.u32 %v15245_v29, %v12803_v16  ;;  %v12515_v10 = vld [vmem:[#allocation12 + $0x58] sm:$0xf] }
 0x554   :  { %6401 = vmatpush.bf16.msra.mxu2 %v12680_v17  ;;  %6414 = vmatpush.bf16.msrb.mxu3 %v12936_v9  ;;  %v15173_v47 = vld [vmem:[#allocation12 + $0x74] sm:$0xf0] }
 0x555   :  { %v12771_v17 = vld [vmem:[#allocation12 + $0x258] sm:$0xf]  ;;  %v12516_v59 = vor.u32 %v15173_v47, %v12515_v10 }
 0x556   :  { %v15237_v9 = vld [vmem:[#allocation12 + $0x274] sm:$0xf0] }
 0x557   :  { %6376 = vmatpush.bf16.msra.mxu0 %v12644_v37  ;;  %6389 = vmatpush.bf16.msra.mxu1 %v12900_v14  ;;  %v12772_v5 = vor.u32 %v15237_v9, %v12771_v17  ;;  %v12483_v37 = vld [vmem:[#allocation12 + $0x18] sm:$0xf]  ;;  %v13201_v17 = vld [vmem:[#allocation12 + $0x1c0] sm:$0xf] }
 0x558   :  { %6402 = vmatpush.bf16.msra.mxu2 %v12648_v7  ;;  %6415 = vmatpush.bf16.msrb.mxu3 %v12904_v32  ;;  %v15165_v14 = vld [vmem:[#allocation12 + $0x34] sm:$0xf0]  ;;  %v15346_v9 = vld [vmem:[#allocation12 + $0x1dc] sm:$0xf0] }
 0x559   :  { %v12739_v7 = vld [vmem:[#allocation12 + $0x218] sm:$0xf]  ;;  %v12484_v45 = vor.u32 %v15165_v14, %v12483_v37  ;;  %v13202_v43 = vor.u32 %v15346_v9, %v13201_v17  ;;  %v13458_v37 = vor.u32 %v15410_v19, %v13457_v36  ;;  %v13203_v14 = vld [vmem:[#allocation12 + $0x1e0] sm:$0xf0]  ;;  %v15306_v36 = vld [vmem:[#allocation12 + $0x9c] sm:$0xf0] }
 0x55a   :  { %v15229_v32 = vld [vmem:[#allocation12 + $0x234] sm:$0xf0]  ;;  %v13139_v17 = vld [vmem:[#allocation12 + $0x160] sm:$0xf0] }
 0x55b   :  { %6377 = vmatpush.bf16.msra.mxu0 %v12612_v0  ;;  %6390 = vmatpush.bf16.msra.mxu1 %v12868_v31  ;;  %v12740_v46 = vor.u32 %v15229_v32, %v12739_v7  ;;  %v12488_v0 = vor.u32 %v15161_v3, %v12485_v15  ;;  %v12744_v31 = vor.u32 %v15225_v11, %v12741_v49  ;;  %v13459_v11 = vld [vmem:[#allocation12 + $0x3e0] sm:$0xf0] }
 0x55c   :  { %6403 = vmatpush.bf16.msra.mxu2 %v12616_v8  ;;  %6416 = vmatpush.bf16.msrb.mxu3 %v12872_v21  ;;  %v602_v49 = vadd.f32 %v16357_v40, %v16350_v38 }
 0x55e   :  { %v631_v40 = vadd.f32 %v16393_v1, %v602_v49 }
 0x55f   :  { %6378 = vmatpush.bf16.msra.mxu0 %v12580_v58  ;;  %6391 = vmatpush.bf16.msra.mxu1 %v12836_v26 }
 0x560   :  { %6404 = vmatpush.bf16.msra.mxu2 %v12584_v12  ;;  %6417 = vmatpush.bf16.msrb.mxu3 %v12840_v13 }
 0x563   :  { %6379 = vmatpush.bf16.msra.mxu0 %v12548_v57  ;;  %6392 = vmatpush.bf16.msra.mxu1 %v12804_v55 }
 0x564   :  { %6405 = vmatpush.bf16.msra.mxu2 %v12552_v52  ;;  %6418 = vmatpush.bf16.msrb.mxu3 %v12808_v60 }
 0x567   :  { %6380 = vmatpush.bf16.msra.mxu0 %v12516_v59  ;;  %6393 = vmatpush.bf16.msra.mxu1 %v12772_v5  ;;  %v15342_v59 = vld [vmem:[#allocation12 + $0x1c4] sm:$0xf] }
 0x568   :  { %6406 = vmatpush.bf16.msra.mxu2 %v12520_v27  ;;  %6419 = vmatpush.bf16.msrb.mxu3 %v12776_v56  ;;  %v15406_v27 = vld [vmem:[#allocation12 + $0x3c4] sm:$0xf]  ;;  %v13206_v15 = vor.u32 %v15342_v59, %v13203_v14 }
 0x56b   :  { %6381 = vmatpush.bf16.msra.mxu0 %v12484_v45  ;;  %6394 = vmatpush.bf16.msra.mxu1 %v12740_v46  ;;  %v13462_v46 = vor.u32 %v15406_v27, %v13459_v11 }
 0x56c   :  { %6407 = vmatpush.bf16.msra.mxu2 %v12488_v0  ;;  %6420 = vmatpush.bf16.msrb.mxu3 %v12744_v31  ;;  %v13169_v0 = vld [vmem:[#allocation12 + $0x180] sm:$0xf] }
 0x56d   :  { %v15338_v31 = vld [vmem:[#allocation12 + $0x19c] sm:$0xf0] }
 0x56e   :  { %6382 = vmatmul.bf16.vlgmr.msra.gmra.mxu0 %v17179_v28  ;;  %6395 = vmatmul.bf16.vlgmr.msra.gmra.mxu1 %v17181_v50 }
 0x56f   :  { %6408 = vmatmul.bf16.vlgmr.msra.gmra.mxu2 %v17179_v28  ;;  %6421 = vmatmul.bf16.vlgmr.msrb.gmra.mxu3 %v17181_v50 }
 0x570   :  { %7345 = vmatpush.bf16.msrb.mxu0 %v13202_v43  ;;  %7358 = vmatpush.bf16.msrb.mxu1 %v13458_v37  ;;  %v13395_v37 = vld [vmem:[#allocation12 + $0x360] sm:$0xf0] }
 0x571   :  { %7371 = vmatpush.bf16.msrb.mxu2 %v13206_v15  ;;  %7384 = vmatpush.bf16.msra.mxu3 %v13462_v46  ;;  %v17798_v15 = vld [vmem:[#allocation30_spill] sm:$0xff]  ;;  %v15322_v46 = vld [vmem:[#allocation12 + $0x11c] sm:$0xf0] }
 0x572   :  { %v660_v11 = vadd.f32 %v17798_v15, %v16377_v51  ;;  %v15302_v15 = vld [vmem:[#allocation12 + $0x84] sm:$0xf] }
 0x5aa   :  { %v6227_v42 = vpop.f32.mrf.mxu0  ;;  %v6240_v6 = vpop.f32.mrf.mxu1 }
 0x5ab   :  { %v6241_v8 = vadd.f32 %v6240_v6, %v6227_v42  ;;  %v13425_v42 = vld [vmem:[#allocation12 + $0x380] sm:$0xf] }
 0x5ad   :  { %v6426_v21 = vadd.f32 %v6241_v8, %v16540_v44 }
 0x5af   :  { %v12969_v30 = vmul.f32 -1.442695, %v6426_v21 }
 0x5b1   :  { %15876 = vpow2.f32 %v12969_v30  ;;  %v6253_v35 = vpop.f32.mrf.mxu2  ;;  %v6266_v41 = vpop.f32.mrf.mxu3 }
 0x5b2   :  { %v6267_v39 = vadd.f32 %v6266_v41, %v6253_v35  ;;  %v6229_v53 = vpop.f32.mrf.mxu0  ;;  %v6242_v25 = vpop.f32.mrf.mxu1  ;;  %v13170_v35 = vor.u32 %v15338_v31, %v13169_v0  ;;  %v15402_v41 = vld [vmem:[#allocation12 + $0x39c] sm:$0xf0]  ;;  %v15318_v31 = vld [vmem:[#allocation12 + $0x104] sm:$0xf] }
 0x5b3   :  { %v13361_v0 = vld [vmem:[#allocation12 + $0x300] sm:$0xf] }
 0x5b4   :  { %v6427_v58 = vadd.f32 %v6267_v39, %v16543_v4  ;;  %v15334_v39 = vld [vmem:[#allocation12 + $0x184] sm:$0xf]  ;;  %7346 = vmatpush.bf16.msrb.mxu0 %v13170_v35 }
 0x5b6   :  { %v12970_v26 = vmul.f32 -1.442695, %v6427_v58  ;;  %v13426_v58 = vor.u32 %v15402_v41, %v13425_v42 }
 0x5b7   :  { %v15877_v20 = vpop.eup %15876 }
 0x5b8   :  { %v17201_v22 = vadd.f32 1.0, %v15877_v20  ;;  %15878 = vpow2.f32 %v12970_v26  ;;  %v13171_v26 = vld [vmem:[#allocation12 + $0x1a0] sm:$0xf0]  ;;  %7359 = vmatpush.bf16.msrb.mxu1 %v13426_v58 }
 0x5b9   :  { %v6255_v28 = vpop.f32.mrf.mxu2  ;;  %v6268_v50 = vpop.f32.mrf.mxu3  ;;  %v15398_v20 = vld [vmem:[#allocation12 + $0x384] sm:$0xf] }
 0x5ba   :  { %15880 = vrcp.f32 %v17201_v22  ;;  %v6279_v12 = vpop.f32.mrf.mxu0  ;;  %v6292_v13 = vpop.f32.mrf.mxu1  ;;  %v6445_v52 = vand.u32 2147483648, %v17201_v22  ;;  %v6443_v3 = vand.u32 2147483647, %v17201_v22  ;;  %vm6439_vm14 = vweird.f32 %v17201_v22 }
 0x5bb   :  { %v6293_v23 = vadd.f32 %v6292_v13, %v6279_v12  ;;  %v13174_v12 = vor.u32 %v15334_v39, %v13171_v26  ;;  %v13427_v13 = vld [vmem:[#allocation12 + $0x3a0] sm:$0xf0] }
 0x5bc   :  { %v6446_v25 = vor.u32 1.1754944e-38, %v6445_v52  ;;  %v15394_v52 = vld [vmem:[#allocation12 + $0x35c] sm:$0xf0]  ;;  %vm6444_vm3 = vcmp.eq.f32.partialorder %v6443_v3, 8.507059e+37  ;;  %v15382_v39 = vld [vmem:[#allocation12 + $0x304] sm:$0xf] }
 0x5bd   :  { %v6428_v6 = vadd.f32 %v6293_v23, %v16558_v18  ;;  %7372 = vmatpush.bf16.msrb.mxu2 %v13174_v12 }
 0x5be   :  { %v15879_v16 = vpop.eup %15878 }
 0x5bf   :  { %v17204_v29 = vadd.f32 1.0, %v15879_v16 }
 0x5c0   :  { %v17206_v62 = vpop.eup %15880 }
 0x5c1   :  { %v6435_v48 = vmul.f32 %v17206_v62, %v17201_v22  ;;  %15882 = vrcp.f32 %v17204_v29  ;;  %v6305_v24 = vpop.f32.mrf.mxu2  ;;  %v6318_v63 = vpop.f32.mrf.mxu3  ;;  %v6464_v7 = vand.u32 2147483648, %v17204_v29  ;;  %v6462_v8 = vand.u32 2147483647, %v17204_v29 }
 0x5c2   :  { %v6319_v57 = vadd.f32 %v6318_v63, %v6305_v24  ;;  %v6281_v55 = vpop.f32.mrf.mxu0  ;;  %v6294_v10 = vpop.f32.mrf.mxu1  ;;  %vm6440_vm12 = vweird.f32 %v17206_v62  ;;  %v13430_v24 = vor.u32 %v15398_v20, %v13427_v13  ;;  %v13137_v63 = vld [vmem:[#allocation12 + $0x140] sm:$0xf]  ;;  %vm6458_vm15 = vweird.f32 %v17204_v29 }
 0x5c3   :  { %v6436_v47 = vsub.f32 1.0, %v6435_v48  ;;  %v6465_v28 = vor.u32 1.1754944e-38, %v6464_v7  ;;  %v13393_v55 = vld [vmem:[#allocation12 + $0x340] sm:$0xf]  ;;  %vm17235_vm0 = vmor %vm6439_vm14, %vm6440_vm12  ;;  %vm17240_vm1 = vcmp.eq.f32.partialorder %v6462_v8, 8.507059e+37 }
 0x5c4   :  { %v6429_v60 = vadd.f32 %v6319_v57, %v16553_v61  ;;  %v15330_v57 = vld [vmem:[#allocation12 + $0x15c] sm:$0xf0]  ;;  %7385 = vmatpush.bf16.msra.mxu3 %v13430_v24  ;;  %v13394_v19 = vor.u32 %v15394_v52, %v13393_v55  ;;  %v15374_v55 = vld [vmem:[#allocation12 + $0x2c4] sm:$0xf] }
 0x5c5   :  { %v6437_v32 = vmul.f32 %v17206_v62, %v6436_v47  ;;  %v13138_v47 = vor.u32 %v15330_v57, %v13137_v63  ;;  %v13075_v57 = vld [vmem:[#allocation12 + $0xe0] sm:$0xf0] }
 0x5c6   :  { %v12971_v5 = vmul.f32 -1.442695, %v6429_v60  ;;  %v15326_v60 = vld [vmem:[#allocation12 + $0x144] sm:$0xf]  ;;  %7360 = vmatpush.bf16.msrb.mxu1 %v13394_v19 }
 0x5c7   :  { %v17213_v56 = vpop.eup %15882  ;;  %v6438_v50 = vadd.f32 %v17206_v62, %v6437_v32  ;;  %v13142_v59 = vor.u32 %v15326_v60, %v13139_v17  ;;  %7347 = vmatpush.bf16.msrb.mxu0 %v13138_v47 }
 0x5c8   :  { %v6454_v45 = vmul.f32 %v17213_v56, %v17204_v29  ;;  %15884 = vpow2.f32 %v12971_v5  ;;  %vm6459_vm13 = vweird.f32 %v17213_v56  ;;  %v15390_v5 = vld [vmem:[#allocation12 + $0x344] sm:$0xf] }
 0x5c9   :  { %v6307_v21 = vpop.f32.mrf.mxu2  ;;  %v6320_v30 = vpop.f32.mrf.mxu3  ;;  %15886 = vtanh.f32 %v6428_v6  ;;  %vm6460_vm2 = vmor %vm6458_vm15, %vm6459_vm13  ;;  %v6442_v14 = vsel %vm17235_vm0, %v17206_v62, %v6438_v50  ;;  %v13398_v32 = vor.u32 %v15390_v5, %v13395_v37  ;;  %7373 = vmatpush.bf16.msrb.mxu2 %v13142_v59  ;;  %v15386_v62 = vld [vmem:[#allocation12 + $0x31c] sm:$0xf0] }
 0x5ca   :  { %v6455_v53 = vsub.f32 1.0, %v6454_v45  ;;  %v13105_v45 = vld [vmem:[#allocation12 + $0x100] sm:$0xf]  ;;  %v6447_v42 = vsel %vm6444_vm3, %v6446_v25, %v6442_v14  ;;  %v13362_v22 = vor.u32 %v15386_v62, %v13361_v0  ;;  %v15366_v62 = vld [vmem:[#allocation12 + $0x284] sm:$0xf] }
 0x5cb   :  { %v6331_v1 = vpop.f32.mrf.mxu0  ;;  %v6344_v48 = vpop.f32.mrf.mxu1  ;;  %7386 = vmatpush.bf16.msra.mxu3 %v13398_v32  ;;  %v13106_v8 = vor.u32 %v15322_v46, %v13105_v45  ;;  %v13073_v25 = vld [vmem:[#allocation12 + $0xc0] sm:$0xf] }
 0x5cc   :  { %v6456_v16 = vmul.f32 %v17213_v56, %v6455_v53  ;;  %v6345_v10 = vadd.f32 %v6344_v48, %v6331_v1  ;;  %v17799_v53 = vld [vmem:[#allocation29_spill] sm:$0xff]  ;;  %v15314_v50 = vld [vmem:[#allocation12 + $0xdc] sm:$0xf0]  ;;  %7361 = vmatpush.bf16.msrb.mxu1 %v13362_v22  ;;  %v15310_v48 = vld [vmem:[#allocation12 + $0xc4] sm:$0xf] }
 0x5cd   :  { %v689_v58 = vadd.f32 %v17799_v53, %v660_v11  ;;  %7348 = vmatpush.bf16.msrb.mxu0 %v13106_v8  ;;  %v15378_v1 = vld [vmem:[#allocation12 + $0x2dc] sm:$0xf0]  ;;  %v13078_v60 = vor.u32 %v15310_v48, %v13075_v57  ;;  %v13043_v11 = vld [vmem:[#allocation12 + $0xa0] sm:$0xf0] }
 0x5ce   :  { %v15885_v9 = vpop.eup %15884  ;;  %v6457_v43 = vadd.f32 %v17213_v56, %v6456_v16  ;;  %v6500_v7 = vadd.f32 %v6345_v10, %v631_v40  ;;  %v13363_v40 = vld [vmem:[#allocation12 + $0x320] sm:$0xf0]  ;;  %v13329_v16 = vld [vmem:[#allocation12 + $0x2c0] sm:$0xf] }
 0x5cf   :  { %v17251_v27 = vadd.f32 1.0, %v15885_v9  ;;  %v15887_v21 = vpop.eup %15886  ;;  %v13366_v13 = vor.u32 %v15382_v39, %v13363_v40  ;;  %v13330_v63 = vor.u32 %v15378_v1, %v13329_v16  ;;  %v13331_v10 = vld [vmem:[#allocation12 + $0x2e0] sm:$0xf0]  ;;  %v13297_v5 = vld [vmem:[#allocation12 + $0x280] sm:$0xf] }
 0x5d0   :  { %v6461_v49 = vsel %vm6460_vm2, %v17213_v56, %v6457_v43  ;;  %v12972_v6 = vmul.f32 -1.442695, %v6500_v7  ;;  %v13107_v56 = vld [vmem:[#allocation12 + $0x120] sm:$0xf0]  ;;  %v6489_v12 = vmul.f32 %v15887_v21, %v6447_v42  ;;  %v13334_v17 = vor.u32 %v15374_v55, %v13331_v10  ;;  %v13041_v43 = vld [vmem:[#allocation12 + $0x80] sm:$0xf] }
 0x5d1   :  { %v6466_v29 = vsel %vm17240_vm1, %v6465_v28, %v6461_v49  ;;  %15888 = vrcp.f32 %v17251_v27  ;;  %v13110_v3 = vor.u32 %v15318_v31, %v13107_v56  ;;  %7387 = vmatpush.bf16.msra.mxu3 %v13366_v13  ;;  %v6482_v19 = vand.u32 2147483647, %v17251_v27  ;;  %7362 = vmatpush.bf16.msrb.mxu1 %v13330_v63  ;;  %v15370_v37 = vld [vmem:[#allocation12 + $0x29c] sm:$0xf0]  ;;  %v13299_v31 = vld [vmem:[#allocation12 + $0x2a0] sm:$0xf0] }
 0x5d2   :  { %v6488_v30 = vmul.f32 %v6466_v29, %v17102_v54  ;;  %15890 = vpow2.f32 %v12972_v6  ;;  %v13074_v54 = vor.u32 %v15314_v50, %v13073_v25  ;;  %v13042_v59 = vor.u32 %v15306_v36, %v13041_v43  ;;  %v13009_v8 = vld [vmem:[#allocation12 + $0x40] sm:$0xf]  ;;  %v13011_v39 = vld [vmem:[#allocation12 + $0x60] sm:$0xf0] }
 0x5d3   :  { %v6333_v20 = vpop.f32.mrf.mxu0  ;;  %v6346_v28 = vpop.f32.mrf.mxu1  ;;  %7374 = vmatpush.bf16.msrb.mxu2 %v13110_v3  ;;  %v13298_v32 = vor.u32 %v15370_v37, %v13297_v5  ;;  %v6484_v49 = vand.u32 2147483648, %v17251_v27  ;;  %v13046_v29 = vor.u32 %v15302_v15, %v13043_v11  ;;  %v13302_v6 = vor.u32 %v15366_v62, %v13299_v31  ;;  %v15298_v56 = vld [vmem:[#allocation12 + $0x5c] sm:$0xf0]  ;;  %v15294_v3 = vld [vmem:[#allocation12 + $0x44] sm:$0xf]  ;;  %v17800_v37 = vld [vmem:[#allocation38_spill] sm:$0xff] }
 0x5d4   :  { %v6357_v35 = vpop.f32.mrf.mxu2  ;;  %v6370_v41 = vpop.f32.mrf.mxu3  ;;  %v17265_v52 = vadd.f32 %v6489_v12, %v6488_v30  ;;  %7349 = vmatpush.bf16.msrb.mxu0 %v13074_v54  ;;  %v13265_v21 = vld [vmem:[#allocation12 + $0x240] sm:$0xf]  ;;  %vm6478_vm5 = vweird.f32 %v17251_v27  ;;  %v15358_v40 = vld [vmem:[#allocation12 + $0x244] sm:$0xf]  ;;  %vm6483_vm7 = vcmp.eq.f32.partialorder %v6482_v19, 8.507059e+37 }
 0x5d5   :  { %v6371_v26 = vadd.f32 %v6370_v41, %v6357_v35  ;;  %7388 = vmatpush.bf16.msra.mxu3 %v13334_v17  ;;  %7363 = vmatpush.bf16.msrb.mxu1 %v13298_v32  ;;  %v15362_v30 = vld [vmem:[#allocation12 + $0x25c] sm:$0xf0]  ;;  %v13010_v41 = vor.u32 %v15298_v56, %v13009_v8  ;;  %v6485_v53 = vor.u32 1.1754944e-38, %v6484_v49  ;;  %v15286_v63 = vld [vmem:[#allocation12 + $0x4] sm:$0xf] }
 0x5d6   :  { %v13266_v22 = vor.u32 %v15362_v30, %v13265_v21  ;;  %v12977_v50 = vld [vmem:[#allocation12] sm:$0xf]  ;;  %v12979_v10 = vld [vmem:[#allocation12 + $0x20] sm:$0xf0]  ;;  %v15347_v19 = vld [vmem:[#allocation12 + $0x1e4] sm:$0xf0] }
 0x5d7   :  { %v6501_v24 = vadd.f32 %v6371_v26, %v689_v58  ;;  %v17263_v47 = vpop.eup %15888  ;;  %7375 = vmatpush.bf16.msrb.mxu2 %v13078_v60  ;;  %v13014_v58 = vor.u32 %v15294_v3, %v13011_v39  ;;  %v13267_v26 = vld [vmem:[#allocation12 + $0x260] sm:$0xf0]  ;;  %v13233_v12 = vld [vmem:[#allocation12 + $0x200] sm:$0xf]  ;;  %v12982_v36 = vor.u32 %v15286_v63, %v12979_v10  ;;  %v15411_v5 = vld [vmem:[#allocation12 + $0x3e4] sm:$0xf0] }
 0x5d8   :  { %v6474_v9 = vmul.f32 %v17263_v47, %v17251_v27  ;;  %v15891_v14 = vpop.eup %15890  ;;  %vm6479_vm4 = vweird.f32 %v17263_v47  ;;  %7350 = vmatpush.bf16.msrb.mxu0 %v13042_v59  ;;  %v13270_v25 = vor.u32 %v15358_v40, %v13267_v26  ;;  %v15290_v27 = vld [vmem:[#allocation12 + $0x1c] sm:$0xf0]  ;;  %v13235_v60 = vld [vmem:[#allocation12 + $0x220] sm:$0xf0]  ;;  %v13465_v59 = vld [vmem:[#allocation12 + $0x3c8] sm:$0xf] }
 0x5d9   :  { %v12973_v23 = vmul.f32 -1.442695, %v6501_v24  ;;  %v17272_v45 = vadd.f32 1.0, %v15891_v14  ;;  %vm6480_vm6 = vmor %vm6478_vm5, %vm6479_vm4  ;;  %7389 = vmatpush.bf16.msra.mxu3 %v13302_v6  ;;  %7364 = vmatpush.bf16.msrb.mxu1 %v13266_v22  ;;  %v12978_v48 = vor.u32 %v15290_v27, %v12977_v50  ;;  %v15354_v24 = vld [vmem:[#allocation12 + $0x21c] sm:$0xf0]  ;;  %v718_v14 = vadd.f32 %v17800_v37, %v16428_v33 }
 0x5da   :  { %v6475_v7 = vsub.f32 1.0, %v6474_v9  ;;  %v13234_v55 = vor.u32 %v15354_v24, %v13233_v12  ;;  %v13209_v9 = vld [vmem:[#allocation12 + $0x1c8] sm:$0xf]  ;;  %v15343_v11 = vld [vmem:[#allocation12 + $0x1cc] sm:$0xf] }
 0x5db   :  { %15892 = vpow2.f32 %v12973_v23  ;;  %7376 = vmatpush.bf16.msrb.mxu2 %v13046_v29  ;;  %v6519_v1 = vand.u32 2147483648, %v17272_v45  ;;  %v13210_v15 = vor.u32 %v15347_v19, %v13209_v9  ;;  %v13211_v49 = vld [vmem:[#allocation12 + $0x1e8] sm:$0xf0]  ;;  %v13466_v29 = vor.u32 %v15411_v5, %v13465_v59  ;;  %v13177_v6 = vld [vmem:[#allocation12 + $0x188] sm:$0xf] }
 0x5dc   :  { %15894 = vtanh.f32 %v17265_v52  ;;  %v6359_v46 = vpop.f32.mrf.mxu2  ;;  %v6372_v0 = vpop.f32.mrf.mxu3  ;;  %v6476_v42 = vmul.f32 %v17263_v47, %v6475_v7  ;;  %7351 = vmatpush.bf16.msrb.mxu0 %v13010_v41  ;;  %v6517_v7 = vand.u32 2147483647, %v17272_v45  ;;  %v13214_v62 = vor.u32 %v15343_v11, %v13211_v49  ;;  %v15407_v31 = vld [vmem:[#allocation12 + $0x3cc] sm:$0xf]  ;;  %v15339_v56 = vld [vmem:[#allocation12 + $0x1a4] sm:$0xf0] }
 0x5dd   :  { %15896 = vrcp.f32 %v17272_v45  ;;  %7390 = vmatpush.bf16.msra.mxu3 %v13270_v25  ;;  %7365 = vmatpush.bf16.msrb.mxu1 %v13234_v55  ;;  %v17293_v0 = vor.u32 1.1754944e-38, %v6519_v1  ;;  %v13433_v21 = vld [vmem:[#allocation12 + $0x388] sm:$0xf]  ;;  %v13178_v39 = vor.u32 %v15339_v56, %v13177_v6  ;;  %v15399_v26 = vld [vmem:[#allocation12 + $0x38c] sm:$0xf]  ;;  %vm6513_vm9 = vweird.f32 %v17272_v45 }
 0x5de   :  { %v6477_v35 = vadd.f32 %v17263_v47, %v6476_v42  ;;  %v13467_v42 = vld [vmem:[#allocation12 + $0x3e8] sm:$0xf0]  ;;  %v15403_v30 = vld [vmem:[#allocation12 + $0x3a4] sm:$0xf0]  ;;  %vm6518_vm15 = vcmp.eq.f32.partialorder %v6517_v7, 8.507059e+37 }
 0x5df   :  { %7377 = vmatpush.bf16.msrb.mxu2 %v13014_v58  ;;  %v13470_v8 = vor.u32 %v15407_v31, %v13467_v42  ;;  %v13434_v40 = vor.u32 %v15403_v30, %v13433_v21  ;;  %v13179_v58 = vld [vmem:[#allocation12 + $0x1a8] sm:$0xf0]  ;;  %v13145_v12 = vld [vmem:[#allocation12 + $0x148] sm:$0xf] }
 0x5e0   :  { %v6481_v28 = vsel %vm6480_vm6, %v17263_v47, %v6477_v35  ;;  %v15350_v47 = vld [vmem:[#allocation12 + $0x204] sm:$0xf]  ;;  %7352 = vmatpush.bf16.msrb.mxu0 %v12978_v48  ;;  %v13435_v27 = vld [vmem:[#allocation12 + $0x3a8] sm:$0xf0]  ;;  %v13401_v63 = vld [vmem:[#allocation12 + $0x348] sm:$0xf] }
 0x5e1   :  { %v15893_v20 = vpop.eup %15892  ;;  %v6486_v54 = vsel %vm6483_vm7, %v6485_v53, %v6481_v28  ;;  %v13238_v32 = vor.u32 %v15350_v47, %v13235_v60  ;;  %7410 = vmatpush.bf16.msra.mxu1 %v13466_v29  ;;  %v15335_v53 = vld [vmem:[#allocation12 + $0x18c] sm:$0xf]  ;;  %v13438_v48 = vor.u32 %v15399_v26, %v13435_v27  ;;  %v15323_v49 = vld [vmem:[#allocation12 + $0x124] sm:$0xf0] }
 0x5e2   :  { %v15895_v13 = vpop.eup %15894  ;;  %v17282_v16 = vadd.f32 1.0, %v15893_v20  ;;  %v17801_v20 = vld [vmem:[#allocation39_spill] sm:$0xff]  ;;  %v13182_v1 = vor.u32 %v15335_v53, %v13179_v58  ;;  %v15391_v37 = vld [vmem:[#allocation12 + $0x34c] sm:$0xf]  ;;  %v15387_v29 = vld [vmem:[#allocation12 + $0x324] sm:$0xf0] }
 0x5e3   :  { %v6492_v57 = vmul.f32 %v15895_v13, %v6486_v54  ;;  %v17285_v17 = vpop.eup %15896  ;;  %7378 = vmatpush.bf16.msrb.mxu2 %v12982_v36  ;;  %7391 = vmatpush.bf16.msra.mxu3 %v13238_v32  ;;  %v747_v28 = vadd.f32 %v17801_v20, %v718_v14  ;;  %v15331_v13 = vld [vmem:[#allocation12 + $0x164] sm:$0xf0]  ;;  %v13403_v14 = vld [vmem:[#allocation12 + $0x368] sm:$0xf0] }
 0x5e4   :  { %15898 = vrcp.f32 %v17282_v16  ;;  %v6509_v43 = vmul.f32 %v17285_v17, %v17272_v45  ;;  %7397 = vmatpush.bf16.msra.mxu0 %v13210_v15  ;;  %vm6514_vm8 = vweird.f32 %v17285_v17  ;;  %v6536_v54 = vand.u32 2147483647, %v17282_v16  ;;  %v17804_v36 = vld [vmem:[#allocation36_spill] sm:$0xff] }
 0x5e5   :  { %v6493_v23 = vpack.c.bf16 %v6492_v57, %v6492_v57  ;;  %v13146_v24 = vor.u32 %v15331_v13, %v13145_v12  ;;  %v15395_v57 = vld [vmem:[#allocation12 + $0x364] sm:$0xf0]  ;;  %v6538_v10 = vand.u32 2147483648, %v17282_v16  ;;  %vm17309_vm10 = vmor %vm6513_vm9, %vm6514_vm8  ;;  %7411 = vmatpush.bf16.msra.mxu1 %v13434_v40  ;;  %v776_v19 = vadd.f32 %v17804_v36, %v16431_v34  ;;  %v15319_v31 = vld [vmem:[#allocation12 + $0x10c] sm:$0xf] }
 0x5e6   :  { %v6510_v46 = vsub.f32 1.0, %v6509_v43  ;;  %v13402_v9 = vor.u32 %v15395_v57, %v13401_v63  ;;  %v13147_v43 = vld [vmem:[#allocation12 + $0x168] sm:$0xf0]  ;;  %v13113_v32 = vld [vmem:[#allocation12 + $0x108] sm:$0xf]  ;;  %v13406_v11 = vor.u32 %v15391_v37, %v13403_v14  ;;  %vm6532_vm12 = vweird.f32 %v17282_v16 }
 0x5e7   :  { %6494 = vst [vmem:[#allocation3 + $0x4] sm:$0xf] %v6493_v23  ;;  %7423 = vmatpush.bf16.msra.mxu2 %v13214_v62  ;;  %7436 = vmatpush.bf16.msrb.mxu3 %v13470_v8  ;;  %v13114_v62 = vor.u32 %v15323_v49, %v13113_v32  ;;  %v13115_v42 = vld [vmem:[#allocation12 + $0x128] sm:$0xf0]  ;;  %v6539_v56 = vor.u32 1.1754944e-38, %v6538_v10  ;;  %vm17326_vm14 = vcmp.eq.f32.partialorder %v6536_v54, 8.507059e+37 }
 0x5e8   :  { %6495 = vst [vmem:[#allocation6 + $0x10] sm:$0xf] %v6493_v23  ;;  %v6511_v3 = vmul.f32 %v17285_v17, %v6510_v46  ;;  %7398 = vmatpush.bf16.msra.mxu0 %v13178_v39  ;;  %v15327_v23 = vld [vmem:[#allocation12 + $0x14c] sm:$0xf]  ;;  %v13369_v46 = vld [vmem:[#allocation12 + $0x308] sm:$0xf] }
 0x5e9   :  { %v13150_v5 = vor.u32 %v15327_v23, %v13147_v43  ;;  %v15383_v6 = vld [vmem:[#allocation12 + $0x30c] sm:$0xf]  ;;  %7412 = vmatpush.bf16.msra.mxu1 %v13402_v9  ;;  %v17809_v39 = vld [vmem:[#allocation37_spill] sm:$0xff]  ;;  %v13337_v27 = vld [vmem:[#allocation12 + $0x2c8] sm:$0xf] }
 0x5ea   :  { %v17295_v35 = vpop.eup %15898  ;;  %v6512_v59 = vadd.f32 %v17285_v17, %v6511_v3  ;;  %v13371_v3 = vld [vmem:[#allocation12 + $0x328] sm:$0xf0]  ;;  %v805_v40 = vadd.f32 %v17809_v39, %v776_v19  ;;  %v15379_v54 = vld [vmem:[#allocation12 + $0x2e4] sm:$0xf0] }
 0x5eb   :  { %v6383_v41 = vpop.f32.mrf.mxu0  ;;  %v6396_v22 = vpop.f32.mrf.mxu1  ;;  %v6528_v25 = vmul.f32 %v17295_v35, %v17282_v16  ;;  %vm6533_vm11 = vweird.f32 %v17295_v35  ;;  %7424 = vmatpush.bf16.msra.mxu2 %v13182_v1  ;;  %7437 = vmatpush.bf16.msrb.mxu3 %v13438_v48  ;;  %v13374_v13 = vor.u32 %v15383_v6, %v13371_v3  ;;  %v15311_v1 = vld [vmem:[#allocation12 + $0xcc] sm:$0xf]  ;;  %v13338_v60 = vor.u32 %v15379_v54, %v13337_v27  ;;  %v13049_v7 = vld [vmem:[#allocation12 + $0x88] sm:$0xf] }
 0x5ec   :  { %v6397_v50 = vadd.f32 %v6396_v22, %v6383_v41  ;;  %7399 = vmatpush.bf16.msra.mxu0 %v13146_v24  ;;  %vm17321_vm13 = vmor %vm6532_vm12, %vm6533_vm11  ;;  %v13370_v22 = vor.u32 %v15387_v29, %v13369_v46  ;;  %v6516_v53 = vsel %vm17309_vm10, %v17285_v17, %v6512_v59  ;;  %v13083_v48 = vld [vmem:[#allocation12 + $0xe8] sm:$0xf0]  ;;  %v15307_v43 = vld [vmem:[#allocation12 + $0xa4] sm:$0xf0] }
 0x5ed   :  { %v6529_v55 = vsub.f32 1.0, %v6528_v25  ;;  %v13081_v25 = vld [vmem:[#allocation12 + $0xc8] sm:$0xf]  ;;  %v15375_v57 = vld [vmem:[#allocation12 + $0x2cc] sm:$0xf]  ;;  %v13086_v45 = vor.u32 %v15311_v1, %v13083_v48 }
 0x5ee   :  { %v6502_v47 = vadd.f32 %v6397_v50, %v747_v28  ;;  %v13118_v28 = vor.u32 %v15319_v31, %v13115_v42  ;;  %v15315_v50 = vld [vmem:[#allocation12 + $0xe4] sm:$0xf0]  ;;  %7413 = vmatpush.bf16.msra.mxu1 %v13370_v22  ;;  %v13051_v14 = vld [vmem:[#allocation12 + $0xa8] sm:$0xf0] }
 0x5ef   :  { %v6530_v15 = vmul.f32 %v17295_v35, %v6529_v55  ;;  %7425 = vmatpush.bf16.msra.mxu2 %v13150_v5  ;;  %7438 = vmatpush.bf16.msrb.mxu3 %v13406_v11  ;;  %v13082_v63 = vor.u32 %v15315_v50, %v13081_v25  ;;  %v13339_v55 = vld [vmem:[#allocation12 + $0x2e8] sm:$0xf0]  ;;  %v13305_v19 = vld [vmem:[#allocation12 + $0x288] sm:$0xf] }
 0x5f0   :  { %15900 = vtanh.f32 %v6502_v47  ;;  %7400 = vmatpush.bf16.msra.mxu0 %v13114_v62  ;;  %v6521_v47 = vsel %vm6518_vm15, %v17293_v0, %v6516_v53  ;;  %v13342_v36 = vor.u32 %v15375_v57, %v13339_v55  ;;  %v15371_v59 = vld [vmem:[#allocation12 + $0x2a4] sm:$0xf0]  ;;  %v15303_v5 = vld [vmem:[#allocation12 + $0x8c] sm:$0xf]  ;;  %v13050_v0 = vor.u32 %v15307_v43, %v13049_v7  ;;  %v13217_v7 = vld [vmem:[#allocation12 + $0x1d0] sm:$0xf] }
 0x5f1   :  { %v6531_v21 = vadd.f32 %v17295_v35, %v6530_v15  ;;  %v13307_v32 = vld [vmem:[#allocation12 + $0x2a8] sm:$0xf0]  ;;  %v13306_v49 = vor.u32 %v15371_v59, %v13305_v19  ;;  %v13017_v46 = vld [vmem:[#allocation12 + $0x48] sm:$0xf]  ;;  %v13054_v62 = vor.u32 %v15303_v5, %v13051_v14  ;;  %v15348_v43 = vld [vmem:[#allocation12 + $0x1ec] sm:$0xf0] }
 0x5f2   :  { %v6409_v41 = vpop.f32.mrf.mxu2  ;;  %v6422_v16 = vpop.f32.mrf.mxu3  ;;  %7414 = vmatpush.bf16.msra.mxu1 %v13338_v60  ;;  %v15299_v29 = vld [vmem:[#allocation12 + $0x64] sm:$0xf0]  ;;  %v15295_v8 = vld [vmem:[#allocation12 + $0x4c] sm:$0xf]  ;;  %v15412_v59 = vld [vmem:[#allocation12 + $0x3ec] sm:$0xf0] }
 0x5f3   :  { %v6423_v58 = vadd.f32 %v6422_v16, %v6409_v41  ;;  %v6385_v26 = vpop.f32.mrf.mxu0  ;;  %v6398_v20 = vpop.f32.mrf.mxu1  ;;  %v6535_v12 = vsel %vm17321_vm13, %v17295_v35, %v6531_v21  ;;  %7426 = vmatpush.bf16.msra.mxu2 %v13118_v28  ;;  %7439 = vmatpush.bf16.msrb.mxu3 %v13374_v13  ;;  %v13273_v31 = vld [vmem:[#allocation12 + $0x248] sm:$0xf]  ;;  %v13018_v21 = vor.u32 %v15299_v29, %v13017_v46  ;;  %v15359_v30 = vld [vmem:[#allocation12 + $0x24c] sm:$0xf]  ;;  %v15344_v5 = vld [vmem:[#allocation12 + $0x1d4] sm:$0xf] }
 0x5f4   :  { %v6540_v17 = vsel %vm17326_vm14, %v6539_v56, %v6535_v12  ;;  %7401 = vmatpush.bf16.msra.mxu0 %v13082_v63  ;;  %v15363_v42 = vld [vmem:[#allocation12 + $0x264] sm:$0xf0]  ;;  %v13019_v56 = vld [vmem:[#allocation12 + $0x68] sm:$0xf0]  ;;  %v13218_v46 = vor.u32 %v15348_v43, %v13217_v7  ;;  %v13345_v43 = vld [vmem:[#allocation12 + $0x2d0] sm:$0xf] }
 0x5f5   :  { %v6503_v24 = vadd.f32 %v6423_v58, %v805_v40  ;;  %v6562_v35 = vmul.f32 %v6540_v17, %v17176_v2  ;;  %v15367_v2 = vld [vmem:[#allocation12 + $0x28c] sm:$0xf]  ;;  %v13274_v16 = vor.u32 %v15363_v42, %v13273_v31  ;;  %v12985_v22 = vld [vmem:[#allocation12 + $0x8] sm:$0xf]  ;;  %v13022_v40 = vor.u32 %v15295_v8, %v13019_v56  ;;  %v15340_v31 = vld [vmem:[#allocation12 + $0x1ac] sm:$0xf0] }
 0x5f6   :  { %v15901_v10 = vpop.eup %15900  ;;  %v13310_v6 = vor.u32 %v15367_v2, %v13307_v32  ;;  %v13275_v41 = vld [vmem:[#allocation12 + $0x268] sm:$0xf0]  ;;  %7415 = vmatpush.bf16.msra.mxu1 %v13306_v49  ;;  %v15291_v3 = vld [vmem:[#allocation12 + $0x24] sm:$0xf0]  ;;  %v13219_v2 = vld [vmem:[#allocation12 + $0x1f0] sm:$0xf0] }
 0x5f7   :  { %v6563_v9 = vmul.f32 %v15901_v10, %v6521_v47  ;;  %v12974_v23 = vmul.f32 -1.442695, %v6503_v24  ;;  %7427 = vmatpush.bf16.msra.mxu2 %v13086_v45  ;;  %7440 = vmatpush.bf16.msrb.mxu3 %v13342_v36  ;;  %v13241_v53 = vld [vmem:[#allocation12 + $0x208] sm:$0xf]  ;;  %v13278_v20 = vor.u32 %v15359_v30, %v13275_v41  ;;  %v15287_v28 = vld [vmem:[#allocation12 + $0xc] sm:$0xf]  ;;  %v12986_v50 = vor.u32 %v15291_v3, %v12985_v22 }
 0x5f8   :  { %7402 = vmatpush.bf16.msra.mxu0 %v13050_v0  ;;  %v15355_v58 = vld [vmem:[#allocation12 + $0x224] sm:$0xf0]  ;;  %v12987_v25 = vld [vmem:[#allocation12 + $0x28] sm:$0xf0]  ;;  %v13473_v36 = vld [vmem:[#allocation12 + $0x3d0] sm:$0xf]  ;;  %v13222_v42 = vor.u32 %v15344_v5, %v13219_v2 }
 0x5f9   :  { %v17343_v37 = vadd.f32 %v6563_v9, %v6562_v35  ;;  %15902 = vpow2.f32 %v12974_v23  ;;  %v15351_v27 = vld [vmem:[#allocation12 + $0x20c] sm:$0xf]  ;;  %v13242_v13 = vor.u32 %v15355_v58, %v13241_v53  ;;  %v12990_v54 = vor.u32 %v15287_v28, %v12987_v25  ;;  %v15408_v32 = vld [vmem:[#allocation12 + $0x3d4] sm:$0xf]  ;;  %v13441_v8 = vld [vmem:[#allocation12 + $0x390] sm:$0xf] }
 0x5fa   :  { %v6411_v15 = vpop.f32.mrf.mxu2  ;;  %v6424_v11 = vpop.f32.mrf.mxu3  ;;  %v13243_v12 = vld [vmem:[#allocation12 + $0x228] sm:$0xf0]  ;;  %7416 = vmatpush.bf16.msra.mxu1 %v13274_v16  ;;  %v13474_v29 = vor.u32 %v15412_v59, %v13473_v36  ;;  %v15404_v56 = vld [vmem:[#allocation12 + $0x3ac] sm:$0xf0]  ;;  %v13187_v30 = vld [vmem:[#allocation12 + $0x1b0] sm:$0xf0] }
 0x5fb   :  { %7428 = vmatpush.bf16.msra.mxu2 %v13054_v62  ;;  %7441 = vmatpush.bf16.msrb.mxu3 %v13310_v6  ;;  %v13246_v1 = vor.u32 %v15351_v27, %v13243_v12  ;;  %v13475_v15 = vld [vmem:[#allocation12 + $0x3f0] sm:$0xf0]  ;;  %v13185_v62 = vld [vmem:[#allocation12 + $0x190] sm:$0xf]  ;;  %v13442_v3 = vor.u32 %v15404_v56, %v13441_v8 }
 0x5fc   :  { %7403 = vmatpush.bf16.msra.mxu0 %v13018_v21  ;;  %v13478_v6 = vor.u32 %v15408_v32, %v13475_v15  ;;  %v15336_v21 = vld [vmem:[#allocation12 + $0x194] sm:$0xf]  ;;  %v13186_v22 = vor.u32 %v15340_v31, %v13185_v62  ;;  %v15380_v36 = vld [vmem:[#allocation12 + $0x2ec] sm:$0xf0] }
 0x5fd   :  { %v15400_v41 = vld [vmem:[#allocation12 + $0x394] sm:$0xf]  ;;  %v13190_v53 = vor.u32 %v15336_v21, %v13187_v30  ;;  %v13346_v2 = vor.u32 %v15380_v36, %v13345_v43  ;;  %v13057_v32 = vld [vmem:[#allocation12 + $0x90] sm:$0xf] }
 0x5fe   :  { %7417 = vmatpush.bf16.msra.mxu1 %v13242_v13  ;;  %v13443_v16 = vld [vmem:[#allocation12 + $0x3b0] sm:$0xf0]  ;;  %v15308_v15 = vld [vmem:[#allocation12 + $0xac] sm:$0xf0] }
 0x5ff   :  { %v15903_v39 = vpop.eup %15902  ;;  %7429 = vmatpush.bf16.msra.mxu2 %v13022_v40  ;;  %7442 = vmatpush.bf16.msrb.mxu3 %v13278_v20  ;;  %v15332_v40 = vld [vmem:[#allocation12 + $0x16c] sm:$0xf0]  ;;  %v13446_v58 = vor.u32 %v15400_v41, %v13443_v16  ;;  %v15328_v28 = vld [vmem:[#allocation12 + $0x154] sm:$0xf]  ;;  %v13058_v21 = vor.u32 %v15308_v15, %v13057_v32  ;;  %v13449_v32 = vld [vmem:[#allocation12 + $0x398] sm:$0xf] }
 0x600   :  { %v6546_v26 = vadd.f32 1.0, %v15903_v39  ;;  %7404 = vmatpush.bf16.msra.mxu0 %v12986_v50  ;;  %v13153_v39 = vld [vmem:[#allocation12 + $0x150] sm:$0xf]  ;;  %v13155_v25 = vld [vmem:[#allocation12 + $0x170] sm:$0xf0] }
 0x601   :  { %v15396_v20 = vld [vmem:[#allocation12 + $0x36c] sm:$0xf0]  ;;  %v15392_v50 = vld [vmem:[#allocation12 + $0x354] sm:$0xf]  ;;  %v13154_v12 = vor.u32 %v15332_v40, %v13153_v39  ;;  %v15405_v15 = vld [vmem:[#allocation12 + $0x3b4] sm:$0xf0] }
 0x602   :  { %15904 = vrcp.f32 %v6546_v26  ;;  %v6558_v63 = vand.u32 2147483648, %v6546_v26  ;;  %v6556_v55 = vand.u32 2147483647, %v6546_v26  ;;  %vm6552_vm1 = vweird.f32 %v6546_v26  ;;  %v13411_v27 = vld [vmem:[#allocation12 + $0x370] sm:$0xf0] }
 0x603   :  { %7430 = vmatpush.bf16.msra.mxu2 %v12990_v54  ;;  %7443 = vmatpush.bf16.msrb.mxu3 %v13246_v1  ;;  %15906 = vtanh.f32 %v17343_v37  ;;  %v13121_v54 = vld [vmem:[#allocation12 + $0x110] sm:$0xf]  ;;  %v13091_v59 = vld [vmem:[#allocation12 + $0xf0] sm:$0xf0] }
 0x604   :  { %v6559_v47 = vor.u32 1.1754944e-38, %v6558_v63  ;;  %vm6557_vm3 = vcmp.eq.f32.partialorder %v6556_v55, 8.507059e+37  ;;  %v15324_v1 = vld [vmem:[#allocation12 + $0x12c] sm:$0xf0]  ;;  %v13123_v55 = vld [vmem:[#allocation12 + $0x130] sm:$0xf0] }
 0x605   :  { %v15388_v63 = vld [vmem:[#allocation12 + $0x32c] sm:$0xf0]  ;;  %v15376_v5 = vld [vmem:[#allocation12 + $0x2d4] sm:$0xf] }
 0x606   :  { %v13313_v62 = vld [vmem:[#allocation12 + $0x290] sm:$0xf]  ;;  %v15368_v8 = vld [vmem:[#allocation12 + $0x294] sm:$0xf] }
 0x607   :  { %v15372_v31 = vld [vmem:[#allocation12 + $0x2ac] sm:$0xf0]  ;;  %v13315_v56 = vld [vmem:[#allocation12 + $0x2b0] sm:$0xf0] }
 0x608   :  { %v15905_v48 = vpop.eup %15904  ;;  %v13314_v30 = vor.u32 %v15372_v31, %v13313_v62  ;;  %v13025_v41 = vld [vmem:[#allocation12 + $0x50] sm:$0xf]  ;;  %v15401_v62 = vld [vmem:[#allocation12 + $0x39c] sm:$0xf] }
 0x609   :  { %v6548_v17 = vmul.f32 %v15905_v48, %v6546_v26  ;;  %vm6553_vm0 = vweird.f32 %v15905_v48  ;;  %v15907_v60 = vpop.eup %15906  ;;  %v13409_v26 = vld [vmem:[#allocation12 + $0x350] sm:$0xf]  ;;  %v13451_v31 = vld [vmem:[#allocation12 + $0x3b8] sm:$0xf0] }
 0x60a   :  { %vm6554_vm2 = vmor %vm6552_vm1, %vm6553_vm0  ;;  %v13410_v13 = vor.u32 %v15396_v20, %v13409_v26  ;;  %v15300_v16 = vld [vmem:[#allocation12 + $0x6c] sm:$0xf0]  ;;  %v15360_v26 = vld [vmem:[#allocation12 + $0x254] sm:$0xf] }
 0x60b   :  { %v6549_v24 = vsub.f32 1.0, %v6548_v17  ;;  %v13414_v17 = vor.u32 %v15392_v50, %v13411_v27  ;;  %v13281_v39 = vld [vmem:[#allocation12 + $0x250] sm:$0xf]  ;;  %v13283_v20 = vld [vmem:[#allocation12 + $0x270] sm:$0xf0] }
 0x60c   :  { %v15364_v40 = vld [vmem:[#allocation12 + $0x26c] sm:$0xf0] }
 0x60d   :  { %v6550_v57 = vmul.f32 %v15905_v48, %v6549_v24  ;;  %v13377_v24 = vld [vmem:[#allocation12 + $0x310] sm:$0xf]  ;;  %v13282_v50 = vor.u32 %v15364_v40, %v13281_v39  ;;  %v15393_v39 = vld [vmem:[#allocation12 + $0x35c] sm:$0xf] }
 0x60e   :  { %v15292_v27 = vld [vmem:[#allocation12 + $0x2c] sm:$0xf0]  ;;  %v13419_v40 = vld [vmem:[#allocation12 + $0x378] sm:$0xf0] }
 0x60f   :  { %v6551_v10 = vadd.f32 %v15905_v48, %v6550_v57  ;;  %v15320_v57 = vld [vmem:[#allocation12 + $0x114] sm:$0xf] }
 0x611   :  { %v6555_v35 = vsel %vm6554_vm2, %v15905_v48, %v6551_v10  ;;  %v13158_v48 = vor.u32 %v15328_v28, %v13155_v25  ;;  %v15384_v10 = vld [vmem:[#allocation12 + $0x314] sm:$0xf]  ;;  %v12993_v28 = vld [vmem:[#allocation12 + $0x10] sm:$0xf]  ;;  %v13026_v25 = vor.u32 %v15300_v16, %v13025_v41  ;;  %v13417_v41 = vld [vmem:[#allocation12 + $0x358] sm:$0xf] }
 0x612   :  { %v6560_v9 = vsel %vm6557_vm3, %v6559_v47, %v6555_v35  ;;  %v13379_v47 = vld [vmem:[#allocation12 + $0x330] sm:$0xf0]  ;;  %v13122_v35 = vor.u32 %v15324_v1, %v13121_v54  ;;  %v13286_v1 = vor.u32 %v15360_v26, %v13283_v20  ;;  %v15397_v16 = vld [vmem:[#allocation12 + $0x374] sm:$0xf0] }
 0x613   :  { %v6566_v23 = vmul.f32 %v15907_v60, %v6560_v9  ;;  %v13378_v60 = vor.u32 %v15388_v63, %v13377_v24  ;;  %v13089_v9 = vld [vmem:[#allocation12 + $0xd0] sm:$0xf]  ;;  %v13382_v7 = vor.u32 %v15384_v10, %v13379_v47  ;;  %v15352_v24 = vld [vmem:[#allocation12 + $0x214] sm:$0xf]  ;;  %v13481_v10 = vld [vmem:[#allocation12 + $0x3d8] sm:$0xf] }
 0x614   :  { %v13251_v63 = vld [vmem:[#allocation12 + $0x230] sm:$0xf0]  ;;  %v15413_v47 = vld [vmem:[#allocation12 + $0x3f4] sm:$0xf0] }
 0x615   :  { %v6567_v45 = vpack.c.bf16 %v6566_v23, %v6566_v23  ;;  %v15316_v23 = vld [vmem:[#allocation12 + $0xec] sm:$0xf0]  ;;  %v13254_v36 = vor.u32 %v15352_v24, %v13251_v63  ;;  %v13129_v26 = vld [vmem:[#allocation12 + $0x118] sm:$0xf] }
 0x616   :  { %v15325_v20 = vld [vmem:[#allocation12 + $0x134] sm:$0xf0] }
 0x617   :  { %6568 = vst [vmem:[#allocation3] sm:$0xf] %v6567_v45  ;;  %v13126_v45 = vor.u32 %v15320_v57, %v13123_v55  ;;  %v13225_v57 = vld [vmem:[#allocation12 + $0x1d8] sm:$0xf] }
 0x618   :  { %v15349_v55 = vld [vmem:[#allocation12 + $0x1f4] sm:$0xf0] }
 0x619   :  { %v13097_v24 = vld [vmem:[#allocation12 + $0xd8] sm:$0xf] }
 0x61a   :  { %v15317_v63 = vld [vmem:[#allocation12 + $0xf4] sm:$0xf0] }
 0x61e   :  { %v6569_v19 = vld [vmem:[#allocation3] sm:$0xff] }
 0x61f   :  { %v6699_v0 = vunpack.c.l.b16 %v6569_v19  ;;  %v6700_v14 = vunpack.c.h.b16 %v6569_v19  ;;  %v15312_v19 = vld [vmem:[#allocation12 + $0xd4] sm:$0xf] }
 0x621   :  { %v17346_v11 = vpack.c.b16 %v6699_v0, %v6699_v0  ;;  %v17348_v49 = vpack.c.b16 %v6700_v14, %v6700_v14  ;;  %v13347_v0 = vld [vmem:[#allocation12 + $0x2f0] sm:$0xf0]  ;;  %v13090_v14 = vor.u32 %v15316_v23, %v13089_v9  ;;  %v13227_v23 = vld [vmem:[#allocation12 + $0x1f8] sm:$0xf0] }
 0x623   :  { %7353 = vmatmul.bf16.vlgmr.msrb.gmra.mxu0 %v17346_v11  ;;  %7366 = vmatmul.bf16.vlgmr.msrb.gmra.mxu1 %v17348_v49 }
 0x624   :  { %7379 = vmatmul.bf16.vlgmr.msrb.gmra.mxu2 %v17346_v11  ;;  %7392 = vmatmul.bf16.vlgmr.msra.gmra.mxu3 %v17348_v49 }
 0x625   :  { %7449 = vmatpush.bf16.msrb.mxu0 %v13218_v46  ;;  %7462 = vmatpush.bf16.msrb.mxu1 %v13474_v29  ;;  %v13094_v46 = vor.u32 %v15312_v19, %v13091_v59  ;;  %v13350_v29 = vor.u32 %v15376_v5, %v13347_v0  ;;  %v13226_v19 = vor.u32 %v15349_v55, %v13225_v57  ;;  %v13193_v5 = vld [vmem:[#allocation12 + $0x198] sm:$0xf] }
 0x626   :  { %7475 = vmatpush.bf16.msrb.mxu2 %v13222_v42  ;;  %7488 = vmatpush.bf16.msra.mxu3 %v13478_v6  ;;  %v15304_v42 = vld [vmem:[#allocation12 + $0x94] sm:$0xf]  ;;  %v13482_v59 = vor.u32 %v15413_v47, %v13481_v10  ;;  %v15341_v0 = vld [vmem:[#allocation12 + $0x1b4] sm:$0xf0] }
 0x627   :  { %v13059_v6 = vld [vmem:[#allocation12 + $0xb0] sm:$0xf0]  ;;  %v13353_v10 = vld [vmem:[#allocation12 + $0x2d8] sm:$0xf] }
 0x628   :  { %v15381_v47 = vld [vmem:[#allocation12 + $0x2f4] sm:$0xf0] }
 0x629   :  { %7450 = vmatpush.bf16.msrb.mxu0 %v13186_v22  ;;  %7463 = vmatpush.bf16.msrb.mxu1 %v13442_v3  ;;  %v13062_v22 = vor.u32 %v15304_v42, %v13059_v6  ;;  %v13318_v3 = vor.u32 %v15368_v8, %v13315_v56  ;;  %v13194_v42 = vor.u32 %v15341_v0, %v13193_v5  ;;  %v13161_v8 = vld [vmem:[#allocation12 + $0x158] sm:$0xf] }
 0x62a   :  { %7476 = vmatpush.bf16.msrb.mxu2 %v13190_v53  ;;  %7489 = vmatpush.bf16.msra.mxu3 %v13446_v58  ;;  %v15296_v53 = vld [vmem:[#allocation12 + $0x54] sm:$0xf]  ;;  %v13450_v6 = vor.u32 %v15405_v15, %v13449_v32  ;;  %v15333_v56 = vld [vmem:[#allocation12 + $0x174] sm:$0xf0]  ;;  %v15369_v32 = vld [vmem:[#allocation12 + $0x29c] sm:$0xf] }
 0x62b   :  { %v13027_v58 = vld [vmem:[#allocation12 + $0x70] sm:$0xf0]  ;;  %v13321_v5 = vld [vmem:[#allocation12 + $0x298] sm:$0xf]  ;;  %v13323_v15 = vld [vmem:[#allocation12 + $0x2b8] sm:$0xf0] }
 0x62c   :  { %v13030_v54 = vor.u32 %v15296_v53, %v13027_v58  ;;  %v13162_v53 = vor.u32 %v15333_v56, %v13161_v8  ;;  %v13418_v58 = vor.u32 %v15397_v16, %v13417_v41  ;;  %v15373_v0 = vld [vmem:[#allocation12 + $0x2b4] sm:$0xf0]  ;;  %v15361_v41 = vld [vmem:[#allocation12 + $0x25c] sm:$0xf] }
 0x62d   :  { %7451 = vmatpush.bf16.msrb.mxu0 %v13154_v12  ;;  %7464 = vmatpush.bf16.msrb.mxu1 %v13410_v13  ;;  %v13249_v12 = vld [vmem:[#allocation12 + $0x210] sm:$0xf]  ;;  %v13289_v8 = vld [vmem:[#allocation12 + $0x258] sm:$0xf]  ;;  %v13291_v16 = vld [vmem:[#allocation12 + $0x278] sm:$0xf0] }
 0x62e   :  { %7477 = vmatpush.bf16.msrb.mxu2 %v13158_v48  ;;  %7490 = vmatpush.bf16.msra.mxu3 %v13414_v17  ;;  %v15356_v13 = vld [vmem:[#allocation12 + $0x22c] sm:$0xf0]  ;;  %v15288_v48 = vld [vmem:[#allocation12 + $0x14] sm:$0xf]  ;;  %v15365_v56 = vld [vmem:[#allocation12 + $0x274] sm:$0xf0] }
 0x62f   :  { %v12995_v17 = vld [vmem:[#allocation12 + $0x30] sm:$0xf0]  ;;  %v13250_v9 = vor.u32 %v15356_v13, %v13249_v12  ;;  %v15321_v12 = vld [vmem:[#allocation12 + $0x11c] sm:$0xf] }
 0x630   :  { %v12998_v43 = vor.u32 %v15288_v48, %v12995_v17  ;;  %v13131_v13 = vld [vmem:[#allocation12 + $0x138] sm:$0xf0]  ;;  %v13130_v48 = vor.u32 %v15325_v20, %v13129_v26  ;;  %v13257_v26 = vld [vmem:[#allocation12 + $0x218] sm:$0xf] }
 0x631   :  { %7452 = vmatpush.bf16.msrb.mxu0 %v13122_v35  ;;  %7465 = vmatpush.bf16.msrb.mxu1 %v13378_v60  ;;  %v15345_v35 = vld [vmem:[#allocation12 + $0x1dc] sm:$0xf]  ;;  %v12994_v60 = vor.u32 %v15292_v27, %v12993_v28  ;;  %v15389_v27 = vld [vmem:[#allocation12 + $0x334] sm:$0xf0]  ;;  %v13134_v57 = vor.u32 %v15321_v12, %v13131_v13 }
 0x632   :  { %7478 = vmatpush.bf16.msrb.mxu2 %v13126_v45  ;;  %7491 = vmatpush.bf16.msra.mxu3 %v13382_v7  ;;  %v15409_v45 = vld [vmem:[#allocation12 + $0x3dc] sm:$0xf]  ;;  %v15357_v20 = vld [vmem:[#allocation12 + $0x234] sm:$0xf0] }
 0x633   :  { %7405 = vmatmul.bf16.vlgmr.msra.gmra.mxu0 %v17346_v11  ;;  %7418 = vmatmul.bf16.vlgmr.msra.gmra.mxu1 %v17348_v49  ;;  %v13483_v7 = vld [vmem:[#allocation12 + $0x3f8] sm:$0xf0]  ;;  %v13258_v13 = vor.u32 %v15357_v20, %v13257_v26 }
 0x634   :  { %7431 = vmatmul.bf16.vlgmr.msra.gmra.mxu2 %v17346_v11  ;;  %7444 = vmatmul.bf16.vlgmr.msrb.gmra.mxu3 %v17348_v49 }
 0x635   :  { %7453 = vmatpush.bf16.msrb.mxu0 %v13090_v14  ;;  %7466 = vmatpush.bf16.msrb.mxu1 %v13346_v2  ;;  %v13230_v14 = vor.u32 %v15345_v35, %v13227_v23  ;;  %v13486_v2 = vor.u32 %v15409_v45, %v13483_v7  ;;  %v15313_v35 = vld [vmem:[#allocation12 + $0xdc] sm:$0xf]  ;;  %v13098_v45 = vor.u32 %v15317_v63, %v13097_v24 }
 0x636   :  { %7479 = vmatpush.bf16.msrb.mxu2 %v13094_v46  ;;  %7492 = vmatpush.bf16.msra.mxu3 %v13350_v29  ;;  %v15337_v46 = vld [vmem:[#allocation12 + $0x19c] sm:$0xf]  ;;  %v13354_v7 = vor.u32 %v15381_v47, %v13353_v10 }
 0x637   :  { %v13195_v29 = vld [vmem:[#allocation12 + $0x1b8] sm:$0xf0] }
 0x638   :  { %v13355_v23 = vld [vmem:[#allocation12 + $0x2f8] sm:$0xf0] }
 0x639   :  { %7454 = vmatpush.bf16.msrb.mxu0 %v13058_v21  ;;  %7467 = vmatpush.bf16.msrb.mxu1 %v13314_v30  ;;  %v13198_v21 = vor.u32 %v15337_v46, %v13195_v29  ;;  %v13454_v30 = vor.u32 %v15401_v62, %v13451_v31  ;;  %v13322_v29 = vor.u32 %v15373_v0, %v13321_v5  ;;  %v13033_v62 = vld [vmem:[#allocation12 + $0x58] sm:$0xf] }
 0x63a   :  { %7480 = vmatpush.bf16.msrb.mxu2 %v13062_v22  ;;  %7493 = vmatpush.bf16.msra.mxu3 %v13318_v3  ;;  %v15329_v22 = vld [vmem:[#allocation12 + $0x15c] sm:$0xf]  ;;  %v15301_v31 = vld [vmem:[#allocation12 + $0x74] sm:$0xf0] }
 0x63b   :  { %v13163_v3 = vld [vmem:[#allocation12 + $0x178] sm:$0xf0] }
 0x63c   :  { %v13166_v28 = vor.u32 %v15329_v22, %v13163_v3  ;;  %v13034_v22 = vor.u32 %v15301_v31, %v13033_v62  ;;  %v13290_v3 = vor.u32 %v15365_v56, %v13289_v8 }
 0x63d   :  { %7455 = vmatpush.bf16.msrb.mxu0 %v13026_v25  ;;  %7468 = vmatpush.bf16.msrb.mxu1 %v13282_v50  ;;  %v13422_v25 = vor.u32 %v15393_v39, %v13419_v40  ;;  %v13385_v50 = vld [vmem:[#allocation12 + $0x318] sm:$0xf] }
 0x63e   :  { %7481 = vmatpush.bf16.msrb.mxu2 %v13030_v54  ;;  %7494 = vmatpush.bf16.msra.mxu3 %v13286_v1  ;;  %v15385_v54 = vld [vmem:[#allocation12 + $0x31c] sm:$0xf]  ;;  %v13386_v17 = vor.u32 %v15389_v27, %v13385_v50  ;;  %v13001_v39 = vld [vmem:[#allocation12 + $0x18] sm:$0xf] }
 0x63f   :  { %v13387_v1 = vld [vmem:[#allocation12 + $0x338] sm:$0xf0]  ;;  %v15293_v40 = vld [vmem:[#allocation12 + $0x34] sm:$0xf0] }
 0x640   :  { %v13390_v55 = vor.u32 %v15385_v54, %v13387_v1  ;;  %v15353_v50 = vld [vmem:[#allocation12 + $0x21c] sm:$0xf]  ;;  %v13002_v12 = vor.u32 %v15293_v40, %v13001_v39  ;;  %v15534_v39 = vld [vmem:[#allocation12 + $0x3c4] sm:$0xf] }
 0x641   :  { %7456 = vmatpush.bf16.msrb.mxu0 %v12994_v60  ;;  %7469 = vmatpush.bf16.msrb.mxu1 %v13250_v9  ;;  %v13099_v60 = vld [vmem:[#allocation12 + $0xf8] sm:$0xf0] }
 0x642   :  { %7482 = vmatpush.bf16.msrb.mxu2 %v12998_v43  ;;  %7495 = vmatpush.bf16.msra.mxu3 %v13254_v36  ;;  %v15377_v9 = vld [vmem:[#allocation12 + $0x2dc] sm:$0xf]  ;;  %v13065_v43 = vld [vmem:[#allocation12 + $0x98] sm:$0xf] }
 0x643   :  { %v15309_v36 = vld [vmem:[#allocation12 + $0xb4] sm:$0xf0]  ;;  %v13259_v27 = vld [vmem:[#allocation12 + $0x238] sm:$0xf0] }
 0x644   :  { %7457 = vmatmul.bf16.vlgmr.msrb.gmra.mxu0 %v17346_v11  ;;  %7470 = vmatmul.bf16.vlgmr.msrb.gmra.mxu1 %v17348_v49  ;;  %v13066_v46 = vor.u32 %v15309_v36, %v13065_v43  ;;  %v13262_v1 = vor.u32 %v15353_v50, %v13259_v27  ;;  %v13687_v27 = vld [vmem:[#allocation12 + $0x180] sm:$0xf] }
 0x645   :  { %7501 = vmatpush.bf16.msra.mxu0 %v13226_v19  ;;  %7514 = vmatpush.bf16.msra.mxu1 %v13482_v59  ;;  %v13102_v19 = vor.u32 %v15313_v35, %v13099_v60  ;;  %v13358_v59 = vor.u32 %v15377_v9, %v13355_v23 }
 0x646   :  { %7527 = vmatpush.bf16.msra.mxu2 %v13230_v14  ;;  %7540 = vmatpush.bf16.msrb.mxu3 %v13486_v2  ;;  %v15305_v14 = vld [vmem:[#allocation12 + $0x9c] sm:$0xf] }
 0x647   :  { %7483 = vmatmul.bf16.vlgmr.msrb.gmra.mxu2 %v17346_v11  ;;  %7496 = vmatmul.bf16.vlgmr.msra.gmra.mxu3 %v17348_v49  ;;  %v13067_v2 = vld [vmem:[#allocation12 + $0xb8] sm:$0xf0] }
 0x649   :  { %7502 = vmatpush.bf16.msra.mxu0 %v13194_v42  ;;  %7515 = vmatpush.bf16.msra.mxu1 %v13450_v6  ;;  %v13070_v42 = vor.u32 %v15305_v14, %v13067_v2  ;;  %v13326_v6 = vor.u32 %v15369_v32, %v13323_v15 }
 0x64a   :  { %7528 = vmatpush.bf16.msra.mxu2 %v13198_v21  ;;  %7541 = vmatpush.bf16.msrb.mxu3 %v13454_v30  ;;  %v15297_v21 = vld [vmem:[#allocation12 + $0x5c] sm:$0xf] }
 0x64b   :  { %v13035_v30 = vld [vmem:[#allocation12 + $0x78] sm:$0xf0] }
 0x64d   :  { %7503 = vmatpush.bf16.msra.mxu0 %v13162_v53  ;;  %7516 = vmatpush.bf16.msra.mxu1 %v13418_v58  ;;  %v13038_v53 = vor.u32 %v15297_v21, %v13035_v30  ;;  %v13294_v58 = vor.u32 %v15361_v41, %v13291_v16  ;;  %v13975_v21 = vld [vmem:[#allocation12 + $0x3c0] sm:$0xf]  ;;  %v15470_v41 = vld [vmem:[#allocation12 + $0x1c4] sm:$0xf] }
 0x64e   :  { %7529 = vmatpush.bf16.msra.mxu2 %v13166_v28  ;;  %7542 = vmatpush.bf16.msrb.mxu3 %v13422_v25  ;;  %v15289_v28 = vld [vmem:[#allocation12 + $0x1c] sm:$0xf]  ;;  %v15538_v30 = vld [vmem:[#allocation12 + $0x3dc] sm:$0xf0] }
 0x64f   :  { %v13003_v25 = vld [vmem:[#allocation12 + $0x38] sm:$0xf0] }
 0x650   :  { %v13006_v54 = vor.u32 %v15289_v28, %v13003_v25  ;;  %v13977_v28 = vld [vmem:[#allocation12 + $0x3e0] sm:$0xf0] }
 0x651   :  { %7504 = vmatpush.bf16.msra.mxu0 %v13130_v48  ;;  %7517 = vmatpush.bf16.msra.mxu1 %v13386_v17  ;;  %v13980_v50 = vor.u32 %v15534_v39, %v13977_v28  ;;  %v15450_v28 = vld [vmem:[#allocation12 + $0x11c] sm:$0xf0] }
 0x652   :  { %7530 = vmatpush.bf16.msra.mxu2 %v13134_v57  ;;  %7543 = vmatpush.bf16.msrb.mxu3 %v13390_v55 }
 0x655   :  { %7505 = vmatpush.bf16.msra.mxu0 %v13098_v45  ;;  %7518 = vmatpush.bf16.msra.mxu1 %v13354_v7 }
 0x656   :  { %7531 = vmatpush.bf16.msra.mxu2 %v13102_v19  ;;  %7544 = vmatpush.bf16.msrb.mxu3 %v13358_v59 }
 0x659   :  { %7506 = vmatpush.bf16.msra.mxu0 %v13066_v46  ;;  %7519 = vmatpush.bf16.msra.mxu1 %v13322_v29 }
 0x65a   :  { %7532 = vmatpush.bf16.msra.mxu2 %v13070_v42  ;;  %7545 = vmatpush.bf16.msrb.mxu3 %v13326_v6  ;;  %v13719_v42 = vld [vmem:[#allocation12 + $0x1c0] sm:$0xf] }
 0x65b   :  { %v15474_v6 = vld [vmem:[#allocation12 + $0x1dc] sm:$0xf0] }
 0x65c   :  { %v13720_v56 = vor.u32 %v15474_v6, %v13719_v42  ;;  %v15434_v42 = vld [vmem:[#allocation12 + $0x9c] sm:$0xf0] }
 0x65d   :  { %7507 = vmatpush.bf16.msra.mxu0 %v13034_v22  ;;  %7520 = vmatpush.bf16.msra.mxu1 %v13290_v3  ;;  %v13976_v22 = vor.u32 %v15538_v30, %v13975_v21  ;;  %v13721_v3 = vld [vmem:[#allocation12 + $0x1e0] sm:$0xf0] }
 0x65e   :  { %7533 = vmatpush.bf16.msra.mxu2 %v13038_v53  ;;  %7546 = vmatpush.bf16.msrb.mxu3 %v13294_v58  ;;  %v13724_v20 = vor.u32 %v15470_v41, %v13721_v3  ;;  %v15518_v30 = vld [vmem:[#allocation12 + $0x344] sm:$0xf] }
 0x65f   :  { %v13913_v41 = vld [vmem:[#allocation12 + $0x360] sm:$0xf0] }
 0x660   :  { %v17814_v3 = vld [vmem:[#allocation31_spill] sm:$0xff] }
 0x661   :  { %7508 = vmatpush.bf16.msra.mxu0 %v13002_v12  ;;  %7521 = vmatpush.bf16.msra.mxu1 %v13258_v13  ;;  %v15466_v12 = vld [vmem:[#allocation12 + $0x19c] sm:$0xf0] }
 0x662   :  { %7534 = vmatpush.bf16.msra.mxu2 %v13006_v54  ;;  %7547 = vmatpush.bf16.msrb.mxu3 %v13262_v1  ;;  %v13943_v13 = vld [vmem:[#allocation12 + $0x380] sm:$0xf] }
 0x664   :  { %7509 = vmatmul.bf16.vlgmr.msra.gmra.mxu0 %v17346_v11  ;;  %7522 = vmatmul.bf16.vlgmr.msra.gmra.mxu1 %v17348_v49 }
 0x665   :  { %7535 = vmatmul.bf16.vlgmr.msra.gmra.mxu2 %v17346_v11  ;;  %7548 = vmatmul.bf16.vlgmr.msrb.gmra.mxu3 %v17348_v49 }
 0x666   :  { %8472 = vmatpush.bf16.msrb.mxu0 %v13720_v56  ;;  %8485 = vmatpush.bf16.msrb.mxu1 %v13976_v22 }
 0x667   :  { %8498 = vmatpush.bf16.msrb.mxu2 %v13724_v20  ;;  %8511 = vmatpush.bf16.msra.mxu3 %v13980_v50  ;;  %v13623_v20 = vld [vmem:[#allocation12 + $0x100] sm:$0xf]  ;;  %v15446_v50 = vld [vmem:[#allocation12 + $0x104] sm:$0xf] }
 0x6a0   :  { %v7354_v48 = vpop.f32.mrf.mxu0  ;;  %v7367_v17 = vpop.f32.mrf.mxu1 }
 0x6a1   :  { %v7368_v24 = vadd.f32 %v7367_v17, %v7354_v48 }
 0x6a3   :  { %v7553_v63 = vadd.f32 %v7368_v24, %v16540_v44  ;;  %v13688_v24 = vor.u32 %v15466_v12, %v13687_v27 }
 0x6a5   :  { %v13487_v57 = vmul.f32 -1.442695, %v7553_v63  ;;  %v15530_v63 = vld [vmem:[#allocation12 + $0x39c] sm:$0xf0]  ;;  %8473 = vmatpush.bf16.msrb.mxu0 %v13688_v24  ;;  %v15510_v24 = vld [vmem:[#allocation12 + $0x304] sm:$0xf] }
 0x6a7   :  { %15908 = vpow2.f32 %v13487_v57  ;;  %v7380_v55 = vpop.f32.mrf.mxu2  ;;  %v7393_v10 = vpop.f32.mrf.mxu3  ;;  %v15462_v57 = vld [vmem:[#allocation12 + $0x184] sm:$0xf] }
 0x6a8   :  { %v7394_v47 = vadd.f32 %v7393_v10, %v7380_v55  ;;  %v7356_v35 = vpop.f32.mrf.mxu0  ;;  %v7369_v60 = vpop.f32.mrf.mxu1 }
 0x6a9   :  { %v13689_v35 = vld [vmem:[#allocation12 + $0x1a0] sm:$0xf0] }
 0x6aa   :  { %v7554_v9 = vadd.f32 %v7394_v47, %v16543_v4  ;;  %v13944_v47 = vor.u32 %v15530_v63, %v13943_v13  ;;  %v15526_v60 = vld [vmem:[#allocation12 + $0x384] sm:$0xf]  ;;  %v13624_v13 = vor.u32 %v15450_v28, %v13623_v20 }
 0x6ab   :  { %v13881_v63 = vld [vmem:[#allocation12 + $0x320] sm:$0xf0] }
 0x6ac   :  { %v13488_v23 = vmul.f32 -1.442695, %v7554_v9  ;;  %8486 = vmatpush.bf16.msrb.mxu1 %v13944_v47 }
 0x6ad   :  { %v15909_v45 = vpop.eup %15908 }
 0x6ae   :  { %v17368_v7 = vadd.f32 1.0, %v15909_v45  ;;  %15910 = vpow2.f32 %v13488_v23  ;;  %v13692_v45 = vor.u32 %v15462_v57, %v13689_v35  ;;  %v13591_v35 = vld [vmem:[#allocation12 + $0xc0] sm:$0xf] }
 0x6af   :  { %v7382_v11 = vpop.f32.mrf.mxu2  ;;  %v7395_v49 = vpop.f32.mrf.mxu3 }
 0x6b0   :  { %15912 = vrcp.f32 %v17368_v7  ;;  %v7406_v43 = vpop.f32.mrf.mxu0  ;;  %v7419_v36 = vpop.f32.mrf.mxu1  ;;  %v7572_v62 = vand.u32 2147483648, %v17368_v7  ;;  %v7570_v26 = vand.u32 2147483647, %v17368_v7  ;;  %v13945_v11 = vld [vmem:[#allocation12 + $0x3a0] sm:$0xf0]  ;;  %vm7566_vm6 = vweird.f32 %v17368_v7  ;;  %8499 = vmatpush.bf16.msrb.mxu2 %v13692_v45 }
 0x6b1   :  { %v7420_v8 = vadd.f32 %v7419_v36, %v7406_v43  ;;  %v13847_v45 = vld [vmem:[#allocation12 + $0x2c0] sm:$0xf] }
 0x6b2   :  { %v7573_v10 = vor.u32 1.1754944e-38, %v7572_v62  ;;  %v13657_v62 = vld [vmem:[#allocation12 + $0x160] sm:$0xf0]  ;;  %vm7571_vm11 = vcmp.eq.f32.partialorder %v7570_v26, 8.507059e+37 }
 0x6b3   :  { %v7555_v54 = vadd.f32 %v7420_v8, %v16558_v18 }
 0x6b4   :  { %v15911_v19 = vpop.eup %15910 }
 0x6b5   :  { %v17371_v59 = vadd.f32 1.0, %v15911_v19  ;;  %v13948_v19 = vor.u32 %v15526_v60, %v13945_v11  ;;  %v15438_v11 = vld [vmem:[#allocation12 + $0xc4] sm:$0xf] }
 0x6b6   :  { %v17373_v5 = vpop.eup %15912 }
 0x6b7   :  { %v7562_v0 = vmul.f32 %v17373_v5, %v17368_v7  ;;  %15914 = vrcp.f32 %v17371_v59  ;;  %v7432_v14 = vpop.f32.mrf.mxu2  ;;  %v7445_v2 = vpop.f32.mrf.mxu3  ;;  %v7591_v53 = vand.u32 2147483648, %v17371_v59  ;;  %v7589_v1 = vand.u32 2147483647, %v17371_v59  ;;  %8512 = vmatpush.bf16.msra.mxu3 %v13948_v19  ;;  %v13593_v19 = vld [vmem:[#allocation12 + $0xe0] sm:$0xf0] }
 0x6b8   :  { %v7446_v32 = vadd.f32 %v7445_v2, %v7432_v14  ;;  %v7408_v15 = vpop.f32.mrf.mxu0  ;;  %v7421_v46 = vpop.f32.mrf.mxu1  ;;  %vm7567_vm4 = vweird.f32 %v17373_v5  ;;  %v15458_v14 = vld [vmem:[#allocation12 + $0x15c] sm:$0xf0]  ;;  %vm7585_vm7 = vweird.f32 %v17371_v59 }
 0x6b9   :  { %v7563_v29 = vsub.f32 1.0, %v7562_v0  ;;  %v7592_v9 = vor.u32 1.1754944e-38, %v7591_v53  ;;  %v13655_v0 = vld [vmem:[#allocation12 + $0x140] sm:$0xf]  ;;  %vm17399_vm8 = vmor %vm7566_vm6, %vm7567_vm4  ;;  %vm17404_vm9 = vcmp.eq.f32.partialorder %v7589_v1, 8.507059e+37  ;;  %v13916_v53 = vor.u32 %v15518_v30, %v13913_v41 }
 0x6ba   :  { %v7556_v31 = vadd.f32 %v7446_v32, %v16553_v61  ;;  %v13911_v2 = vld [vmem:[#allocation12 + $0x340] sm:$0xf]  ;;  %v13656_v15 = vor.u32 %v15458_v14, %v13655_v0  ;;  %v15502_v0 = vld [vmem:[#allocation12 + $0x2c4] sm:$0xf] }
 0x6bb   :  { %v7564_v58 = vmul.f32 %v17373_v5, %v7563_v29  ;;  %v15522_v46 = vld [vmem:[#allocation12 + $0x35c] sm:$0xf0]  ;;  %v15454_v29 = vld [vmem:[#allocation12 + $0x144] sm:$0xf]  ;;  %8513 = vmatpush.bf16.msra.mxu3 %v13916_v53 }
 0x6bc   :  { %v13489_v16 = vmul.f32 -1.442695, %v7556_v31  ;;  %v13912_v56 = vor.u32 %v15522_v46, %v13911_v2  ;;  %v13660_v21 = vor.u32 %v15454_v29, %v13657_v62  ;;  %8474 = vmatpush.bf16.msrb.mxu0 %v13656_v15  ;;  %v13849_v14 = vld [vmem:[#allocation12 + $0x2e0] sm:$0xf0]  ;;  %v13596_v15 = vor.u32 %v15438_v11, %v13593_v19 }
 0x6bd   :  { %v17380_v40 = vpop.eup %15914  ;;  %v7565_v23 = vadd.f32 %v17373_v5, %v7564_v58  ;;  %v13852_v46 = vor.u32 %v15502_v0, %v13849_v14  ;;  %v13497_v14 = vld [vmem:[#allocation12 + $0x20] sm:$0xf0] }
 0x6be   :  { %v7581_v25 = vmul.f32 %v17380_v40, %v17371_v59  ;;  %15916 = vpow2.f32 %v13489_v16  ;;  %vm7586_vm5 = vweird.f32 %v17380_v40  ;;  %8487 = vmatpush.bf16.msrb.mxu1 %v13912_v56  ;;  %8500 = vmatpush.bf16.msrb.mxu2 %v13660_v21  ;;  %v13815_v56 = vld [vmem:[#allocation12 + $0x280] sm:$0xf] }
 0x6bf   :  { %v7434_v48 = vpop.f32.mrf.mxu2  ;;  %v7447_v17 = vpop.f32.mrf.mxu3  ;;  %15918 = vtanh.f32 %v7555_v54  ;;  %vm7587_vm10 = vmor %vm7585_vm7, %vm7586_vm5  ;;  %v7569_v16 = vsel %vm17399_vm8, %v17373_v5, %v7565_v23  ;;  %v15514_v5 = vld [vmem:[#allocation12 + $0x31c] sm:$0xf0] }
 0x6c0   :  { %v7582_v55 = vsub.f32 1.0, %v7581_v25  ;;  %v13879_v25 = vld [vmem:[#allocation12 + $0x300] sm:$0xf]  ;;  %v7574_v27 = vsel %vm7571_vm11, %v7573_v10, %v7569_v16  ;;  %8475 = vmatpush.bf16.msrb.mxu0 %v13624_v13 }
 0x6c1   :  { %v7458_v43 = vpop.f32.mrf.mxu0  ;;  %v7471_v36 = vpop.f32.mrf.mxu1  ;;  %v13880_v7 = vor.u32 %v15514_v5, %v13879_v25  ;;  %v15442_v10 = vld [vmem:[#allocation12 + $0xdc] sm:$0xf0]  ;;  %v13817_v5 = vld [vmem:[#allocation12 + $0x2a0] sm:$0xf0] }
 0x6c2   :  { %v7583_v49 = vmul.f32 %v17380_v40, %v7582_v55  ;;  %v7472_v32 = vadd.f32 %v7471_v36, %v7458_v43  ;;  %v13592_v23 = vor.u32 %v15442_v10, %v13591_v35  ;;  %v15498_v21 = vld [vmem:[#allocation12 + $0x29c] sm:$0xf0] }
 0x6c3   :  { %8488 = vmatpush.bf16.msrb.mxu1 %v13880_v7  ;;  %v13816_v16 = vor.u32 %v15498_v21, %v13815_v56  ;;  %v15426_v13 = vld [vmem:[#allocation12 + $0x5c] sm:$0xf0]  ;;  %v15422_v7 = vld [vmem:[#allocation12 + $0x44] sm:$0xf]  ;;  %v15539_v56 = vld [vmem:[#allocation12 + $0x3e4] sm:$0xf0] }
 0x6c4   :  { %v15917_v31 = vpop.eup %15916  ;;  %v7584_v6 = vadd.f32 %v17380_v40, %v7583_v49  ;;  %v7627_v39 = vadd.f32 %v7472_v32, %v17814_v3  ;;  %v17815_v49 = vld [vmem:[#allocation32_spill] sm:$0xff]  ;;  %8476 = vmatpush.bf16.msrb.mxu0 %v13592_v23  ;;  %v15430_v3 = vld [vmem:[#allocation12 + $0x84] sm:$0xf] }
 0x6c5   :  { %v17415_v22 = vadd.f32 1.0, %v15917_v31  ;;  %v15919_v54 = vpop.eup %15918  ;;  %v13559_v31 = vld [vmem:[#allocation12 + $0x80] sm:$0xf] }
 0x6c6   :  { %v7588_v58 = vsel %vm7587_vm10, %v17380_v40, %v7584_v6  ;;  %v13490_v12 = vmul.f32 -1.442695, %v7627_v39  ;;  %v13625_v40 = vld [vmem:[#allocation12 + $0x120] sm:$0xf0]  ;;  %v7616_v60 = vmul.f32 %v15919_v54, %v7574_v27  ;;  %v13560_v8 = vor.u32 %v15434_v42, %v13559_v31  ;;  %v15490_v54 = vld [vmem:[#allocation12 + $0x25c] sm:$0xf0] }
 0x6c7   :  { %v7593_v59 = vsel %vm17404_vm9, %v7592_v9, %v7588_v58  ;;  %15920 = vrcp.f32 %v17415_v22  ;;  %v13628_v26 = vor.u32 %v15446_v50, %v13625_v40  ;;  %v13884_v9 = vor.u32 %v15510_v24, %v13881_v63  ;;  %v13561_v39 = vld [vmem:[#allocation12 + $0xa0] sm:$0xf0]  ;;  %v13783_v40 = vld [vmem:[#allocation12 + $0x240] sm:$0xf] }
 0x6c8   :  { %v7615_v1 = vmul.f32 %v7593_v59, %v17265_v52  ;;  %15922 = vpow2.f32 %v13490_v12  ;;  %v15506_v52 = vld [vmem:[#allocation12 + $0x2dc] sm:$0xf0]  ;;  %v7609_v6 = vand.u32 2147483647, %v17415_v22  ;;  %v7611_v53 = vand.u32 2147483648, %v17415_v22  ;;  %8477 = vmatpush.bf16.msrb.mxu0 %v13560_v8 }
 0x6c9   :  { %v7460_v55 = vpop.f32.mrf.mxu0  ;;  %v7473_v47 = vpop.f32.mrf.mxu1  ;;  %8501 = vmatpush.bf16.msrb.mxu2 %v13628_v26  ;;  %v13848_v36 = vor.u32 %v15506_v52, %v13847_v45  ;;  %8514 = vmatpush.bf16.msra.mxu3 %v13884_v9  ;;  %v13564_v25 = vor.u32 %v15430_v3, %v13561_v39  ;;  %v15494_v59 = vld [vmem:[#allocation12 + $0x284] sm:$0xf]  ;;  %v13527_v12 = vld [vmem:[#allocation12 + $0x40] sm:$0xf]  ;;  %vm7605_vm13 = vweird.f32 %v17415_v22  ;;  %v13983_v8 = vld [vmem:[#allocation12 + $0x3c8] sm:$0xf] }
 0x6ca   :  { %v7484_v48 = vpop.f32.mrf.mxu2  ;;  %v7497_v17 = vpop.f32.mrf.mxu3  ;;  %v17428_v32 = vadd.f32 %v7616_v60, %v7615_v1  ;;  %v13820_v27 = vor.u32 %v15494_v59, %v13817_v5  ;;  %v13529_v26 = vld [vmem:[#allocation12 + $0x60] sm:$0xf0]  ;;  %vm7610_vm15 = vcmp.eq.f32.partialorder %v7609_v6, 8.507059e+37  ;;  %v7612_v63 = vor.u32 1.1754944e-38, %v7611_v53  ;;  %v13495_v60 = vld [vmem:[#allocation12] sm:$0xf] }
 0x6cb   :  { %v7498_v57 = vadd.f32 %v7497_v17, %v7484_v48  ;;  %8489 = vmatpush.bf16.msrb.mxu1 %v13848_v36  ;;  %v13528_v48 = vor.u32 %v15426_v13, %v13527_v12  ;;  %v13784_v17 = vor.u32 %v15490_v54, %v13783_v40  ;;  %v15486_v24 = vld [vmem:[#allocation12 + $0x244] sm:$0xf]  ;;  %v13751_v9 = vld [vmem:[#allocation12 + $0x200] sm:$0xf]  ;;  %v15475_v6 = vld [vmem:[#allocation12 + $0x1e4] sm:$0xf0] }
 0x6cc   :  { %v13785_v55 = vld [vmem:[#allocation12 + $0x260] sm:$0xf0]  ;;  %v13729_v3 = vld [vmem:[#allocation12 + $0x1e8] sm:$0xf0]  ;;  %v13695_v5 = vld [vmem:[#allocation12 + $0x188] sm:$0xf] }
 0x6cd   :  { %v7628_v43 = vadd.f32 %v7498_v57, %v17815_v49  ;;  %v17426_v2 = vpop.eup %15920  ;;  %8502 = vmatpush.bf16.msrb.mxu2 %v13596_v15  ;;  %8515 = vmatpush.bf16.msra.mxu3 %v13852_v46  ;;  %v13532_v57 = vor.u32 %v15422_v7, %v13529_v26  ;;  %v13788_v10 = vor.u32 %v15486_v24, %v13785_v55  ;;  %v15414_v36 = vld [vmem:[#allocation12 + $0x4] sm:$0xf]  ;;  %v13985_v59 = vld [vmem:[#allocation12 + $0x3e8] sm:$0xf0]  ;;  %v13951_v12 = vld [vmem:[#allocation12 + $0x388] sm:$0xf] }
 0x6ce   :  { %v7601_v29 = vmul.f32 %v17426_v2, %v17415_v22  ;;  %v15923_v30 = vpop.eup %15922  ;;  %vm7606_vm12 = vweird.f32 %v17426_v2  ;;  %8478 = vmatpush.bf16.msrb.mxu0 %v13528_v48  ;;  %v15418_v22 = vld [vmem:[#allocation12 + $0x1c] sm:$0xf0]  ;;  %v13753_v15 = vld [vmem:[#allocation12 + $0x220] sm:$0xf0]  ;;  %v13500_v42 = vor.u32 %v15414_v36, %v13497_v14  ;;  %v15531_v13 = vld [vmem:[#allocation12 + $0x3a4] sm:$0xf0] }
 0x6cf   :  { %v13491_v62 = vmul.f32 -1.442695, %v7628_v43  ;;  %v17435_v58 = vadd.f32 1.0, %v15923_v30  ;;  %8490 = vmatpush.bf16.msrb.mxu1 %v13816_v16  ;;  %vm7607_vm14 = vmor %vm7605_vm13, %vm7606_vm12  ;;  %v13496_v49 = vor.u32 %v15418_v22, %v13495_v60  ;;  %v15482_v43 = vld [vmem:[#allocation12 + $0x21c] sm:$0xf0]  ;;  %v13952_v7 = vor.u32 %v15531_v13, %v13951_v12  ;;  %v17816_v36 = vld [vmem:[#allocation41_spill] sm:$0xff] }
 0x6d0   :  { %v7602_v41 = vsub.f32 1.0, %v7601_v29  ;;  %v13752_v0 = vor.u32 %v15482_v43, %v13751_v9  ;;  %v13727_v29 = vld [vmem:[#allocation12 + $0x1c8] sm:$0xf]  ;;  %v15471_v16 = vld [vmem:[#allocation12 + $0x1cc] sm:$0xf] }
 0x6d1   :  { %15924 = vpow2.f32 %v13491_v62  ;;  %8503 = vmatpush.bf16.msrb.mxu2 %v13564_v25  ;;  %8516 = vmatpush.bf16.msra.mxu3 %v13820_v27  ;;  %v7646_v11 = vand.u32 2147483648, %v17435_v58  ;;  %v7644_v21 = vand.u32 2147483647, %v17435_v58  ;;  %v15535_v25 = vld [vmem:[#allocation12 + $0x3cc] sm:$0xf]  ;;  %vm7640_vm1 = vweird.f32 %v17435_v58 }
 0x6d2   :  { %15926 = vtanh.f32 %v17428_v32  ;;  %v7486_v20 = vpop.f32.mrf.mxu2  ;;  %v7499_v28 = vpop.f32.mrf.mxu3  ;;  %v7603_v50 = vmul.f32 %v17426_v2, %v7602_v41  ;;  %8479 = vmatpush.bf16.msrb.mxu0 %v13496_v49  ;;  %v13728_v41 = vor.u32 %v15475_v6, %v13727_v29  ;;  %v15467_v27 = vld [vmem:[#allocation12 + $0x1a4] sm:$0xf0]  ;;  %v15463_v26 = vld [vmem:[#allocation12 + $0x18c] sm:$0xf] }
 0x6d3   :  { %15928 = vrcp.f32 %v17435_v58  ;;  %8491 = vmatpush.bf16.msrb.mxu1 %v13784_v17  ;;  %v17454_v53 = vor.u32 1.1754944e-38, %v7646_v11  ;;  %v13984_v20 = vor.u32 %v15539_v56, %v13983_v8  ;;  %v13732_v28 = vor.u32 %v15471_v16, %v13729_v3  ;;  %v13697_v24 = vld [vmem:[#allocation12 + $0x1a8] sm:$0xf0]  ;;  %v15523_v11 = vld [vmem:[#allocation12 + $0x364] sm:$0xf0] }
 0x6d4   :  { %v7604_v1 = vadd.f32 %v17426_v2, %v7603_v50  ;;  %v13988_v50 = vor.u32 %v15535_v25, %v13985_v59  ;;  %v13696_v17 = vor.u32 %v15467_v27, %v13695_v5  ;;  %v13700_v22 = vor.u32 %v15463_v26, %v13697_v24  ;;  %v13631_v6 = vld [vmem:[#allocation12 + $0x108] sm:$0xf]  ;;  %v13889_v13 = vld [vmem:[#allocation12 + $0x328] sm:$0xf0] }
 0x6d5   :  { %8504 = vmatpush.bf16.msrb.mxu2 %v13532_v57  ;;  %8517 = vmatpush.bf16.msra.mxu3 %v13788_v10  ;;  %v15459_v10 = vld [vmem:[#allocation12 + $0x164] sm:$0xf0]  ;;  %vm7645_vm7 = vcmp.eq.f32.partialorder %v7644_v21, 8.507059e+37  ;;  %v13537_v25 = vld [vmem:[#allocation12 + $0x68] sm:$0xf0] }
 0x6d6   :  { %v7608_v35 = vsel %vm7607_vm14, %v17426_v2, %v7604_v1  ;;  %v15478_v2 = vld [vmem:[#allocation12 + $0x204] sm:$0xf]  ;;  %8524 = vmatpush.bf16.msra.mxu0 %v13728_v41  ;;  %v13887_v41 = vld [vmem:[#allocation12 + $0x308] sm:$0xf] }
 0x6d7   :  { %v15925_v47 = vpop.eup %15924  ;;  %v7613_v45 = vsel %vm7610_vm15, %v7612_v63, %v7608_v35  ;;  %8492 = vmatpush.bf16.msrb.mxu1 %v13752_v0  ;;  %v13756_v30 = vor.u32 %v15478_v2, %v13753_v15  ;;  %v15527_v63 = vld [vmem:[#allocation12 + $0x38c] sm:$0xf]  ;;  %v13663_v35 = vld [vmem:[#allocation12 + $0x148] sm:$0xf] }
 0x6d8   :  { %v15927_v23 = vpop.eup %15926  ;;  %v17445_v52 = vadd.f32 1.0, %v15925_v47  ;;  %v13953_v47 = vld [vmem:[#allocation12 + $0x3a8] sm:$0xf0]  ;;  %v15515_v16 = vld [vmem:[#allocation12 + $0x324] sm:$0xf0] }
 0x6d9   :  { %v7619_v19 = vmul.f32 %v15927_v23, %v7613_v45  ;;  %v17448_v46 = vpop.eup %15928  ;;  %8505 = vmatpush.bf16.msrb.mxu2 %v13500_v42  ;;  %8518 = vmatpush.bf16.msra.mxu3 %v13756_v30  ;;  %v13956_v9 = vor.u32 %v15527_v63, %v13953_v47  ;;  %v13664_v23 = vor.u32 %v15459_v10, %v13663_v35  ;;  %v13919_v45 = vld [vmem:[#allocation12 + $0x348] sm:$0xf]  ;;  %v15455_v2 = vld [vmem:[#allocation12 + $0x14c] sm:$0xf] }
 0x6da   :  { %15930 = vrcp.f32 %v17445_v52  ;;  %v7636_v31 = vmul.f32 %v17448_v46, %v17435_v58  ;;  %vm7641_vm0 = vweird.f32 %v17448_v46  ;;  %v7663_v60 = vand.u32 2147483647, %v17445_v52  ;;  %8525 = vmatpush.bf16.msra.mxu0 %v13696_v17  ;;  %v13665_v15 = vld [vmem:[#allocation12 + $0x168] sm:$0xf0]  ;;  %v15451_v30 = vld [vmem:[#allocation12 + $0x124] sm:$0xf0] }
 0x6db   :  { %v7620_v62 = vpack.c.bf16 %v7619_v19, %v7619_v19  ;;  %8537 = vmatpush.bf16.msra.mxu1 %v13984_v20  ;;  %v7665_v43 = vand.u32 2147483648, %v17445_v52  ;;  %vm17470_vm2 = vmor %vm7640_vm1, %vm7641_vm0  ;;  %v13920_v14 = vor.u32 %v15523_v11, %v13919_v45  ;;  %v13921_v42 = vld [vmem:[#allocation12 + $0x368] sm:$0xf0]  ;;  %vm7659_vm4 = vweird.f32 %v17445_v52  ;;  %v13599_v26 = vld [vmem:[#allocation12 + $0xc8] sm:$0xf] }
 0x6dc   :  { %v7637_v39 = vsub.f32 1.0, %v7636_v31  ;;  %v15519_v31 = vld [vmem:[#allocation12 + $0x34c] sm:$0xf]  ;;  %v13632_v3 = vor.u32 %v15451_v30, %v13631_v6  ;;  %vm17485_vm6 = vcmp.eq.f32.partialorder %v7663_v60, 8.507059e+37  ;;  %v13888_v12 = vor.u32 %v15515_v16, %v13887_v41  ;;  %v15443_v24 = vld [vmem:[#allocation12 + $0xe4] sm:$0xf0] }
 0x6dd   :  { %7621 = vst [vmem:[#allocation3 + $0x4] sm:$0xf] %v7620_v62  ;;  %8550 = vmatpush.bf16.msra.mxu2 %v13732_v28  ;;  %8563 = vmatpush.bf16.msrb.mxu3 %v13988_v50  ;;  %v13924_v56 = vor.u32 %v15519_v31, %v13921_v42  ;;  %v13633_v20 = vld [vmem:[#allocation12 + $0x128] sm:$0xf0]  ;;  %v7666_v59 = vor.u32 1.1754944e-38, %v7665_v43 }
 0x6de   :  { %7622 = vst [vmem:[#allocation6 + $0x14] sm:$0xf] %v7620_v62  ;;  %v7638_v48 = vmul.f32 %v17448_v46, %v7637_v39  ;;  %v13668_v62 = vor.u32 %v15455_v2, %v13665_v15  ;;  %8526 = vmatpush.bf16.msra.mxu0 %v13664_v23  ;;  %v15447_v39 = vld [vmem:[#allocation12 + $0x10c] sm:$0xf]  ;;  %v13855_v63 = vld [vmem:[#allocation12 + $0x2c8] sm:$0xf] }
 0x6df   :  { %8538 = vmatpush.bf16.msra.mxu1 %v13952_v7  ;;  %v15511_v28 = vld [vmem:[#allocation12 + $0x30c] sm:$0xf]  ;;  %v13636_v7 = vor.u32 %v15447_v39, %v13633_v20  ;;  %v15507_v47 = vld [vmem:[#allocation12 + $0x2e4] sm:$0xf0] }
 0x6e0   :  { %v17456_v40 = vpop.eup %15930  ;;  %v7639_v29 = vadd.f32 %v17448_v46, %v7638_v48  ;;  %v15439_v35 = vld [vmem:[#allocation12 + $0xcc] sm:$0xf]  ;;  %v13856_v43 = vor.u32 %v15507_v47, %v13855_v63  ;;  %v13567_v21 = vld [vmem:[#allocation12 + $0x88] sm:$0xf] }
 0x6e1   :  { %v7510_v54 = vpop.f32.mrf.mxu0  ;;  %v7523_v1 = vpop.f32.mrf.mxu1  ;;  %v7655_v57 = vmul.f32 %v17456_v40, %v17445_v52  ;;  %vm7660_vm3 = vweird.f32 %v17456_v40  ;;  %8551 = vmatpush.bf16.msra.mxu2 %v13700_v22  ;;  %8564 = vmatpush.bf16.msrb.mxu3 %v13956_v9  ;;  %v13601_v10 = vld [vmem:[#allocation12 + $0xe8] sm:$0xf0]  ;;  %v13600_v9 = vor.u32 %v15443_v24, %v13599_v26  ;;  %v15435_v0 = vld [vmem:[#allocation12 + $0xa4] sm:$0xf0] }
 0x6e2   :  { %v7524_v55 = vadd.f32 %v7523_v1, %v7510_v54  ;;  %vm17480_vm5 = vmor %vm7659_vm4, %vm7660_vm3  ;;  %v7643_v54 = vsel %vm17470_vm2, %v17448_v46, %v7639_v29  ;;  %v17823_v60 = vld [vmem:[#allocation40_spill] sm:$0xff]  ;;  %8527 = vmatpush.bf16.msra.mxu0 %v13632_v3  ;;  %v13604_v58 = vor.u32 %v15439_v35, %v13601_v10 }
 0x6e3   :  { %v7656_v49 = vsub.f32 1.0, %v7655_v57  ;;  %8539 = vmatpush.bf16.msra.mxu1 %v13920_v14  ;;  %v15503_v23 = vld [vmem:[#allocation12 + $0x2cc] sm:$0xf]  ;;  %v13823_v2 = vld [vmem:[#allocation12 + $0x288] sm:$0xf] }
 0x6e4   :  { %v7629_v19 = vadd.f32 %v7524_v55, %v17816_v36  ;;  %v13892_v55 = vor.u32 %v15511_v28, %v13889_v13  ;;  %v13857_v45 = vld [vmem:[#allocation12 + $0x2e8] sm:$0xf0]  ;;  %v15499_v15 = vld [vmem:[#allocation12 + $0x2a4] sm:$0xf0] }
 0x6e5   :  { %v7657_v8 = vmul.f32 %v17456_v40, %v7656_v49  ;;  %8552 = vmatpush.bf16.msra.mxu2 %v13668_v62  ;;  %8565 = vmatpush.bf16.msrb.mxu3 %v13924_v56  ;;  %v13860_v14 = vor.u32 %v15503_v23, %v13857_v45  ;;  %v15431_v29 = vld [vmem:[#allocation12 + $0x8c] sm:$0xf]  ;;  %v13824_v56 = vor.u32 %v15499_v15, %v13823_v2  ;;  %v13535_v30 = vld [vmem:[#allocation12 + $0x48] sm:$0xf]  ;;  %v15540_v15 = vld [vmem:[#allocation12 + $0x3ec] sm:$0xf0] }
 0x6e6   :  { %15932 = vtanh.f32 %v7629_v19  ;;  %8528 = vmatpush.bf16.msra.mxu0 %v13600_v9  ;;  %v13569_v31 = vld [vmem:[#allocation12 + $0xa8] sm:$0xf0]  ;;  %v15427_v41 = vld [vmem:[#allocation12 + $0x64] sm:$0xf0] }
 0x6e7   :  { %v7658_v5 = vadd.f32 %v17456_v40, %v7657_v8  ;;  %8540 = vmatpush.bf16.msra.mxu1 %v13888_v12  ;;  %v13825_v42 = vld [vmem:[#allocation12 + $0x2a8] sm:$0xf0]  ;;  %v13572_v16 = vor.u32 %v15431_v29, %v13569_v31  ;;  %v13791_v3 = vld [vmem:[#allocation12 + $0x248] sm:$0xf]  ;;  %v15472_v29 = vld [vmem:[#allocation12 + $0x1d4] sm:$0xf] }
 0x6e8   :  { %v7536_v27 = vpop.f32.mrf.mxu2  ;;  %v7549_v52 = vpop.f32.mrf.mxu3  ;;  %v15491_v39 = vld [vmem:[#allocation12 + $0x264] sm:$0xf0]  ;;  %v15423_v28 = vld [vmem:[#allocation12 + $0x4c] sm:$0xf] }
 0x6e9   :  { %v7550_v1 = vadd.f32 %v7549_v52, %v7536_v27  ;;  %v7512_v48 = vpop.f32.mrf.mxu0  ;;  %v7525_v17 = vpop.f32.mrf.mxu1  ;;  %v7662_v57 = vsel %vm17480_vm5, %v17456_v40, %v7658_v5  ;;  %v7648_v40 = vsel %vm7645_vm7, %v17454_v53, %v7643_v54  ;;  %8553 = vmatpush.bf16.msra.mxu2 %v13636_v7  ;;  %8566 = vmatpush.bf16.msrb.mxu3 %v13892_v55  ;;  %v15487_v5 = vld [vmem:[#allocation12 + $0x24c] sm:$0xf]  ;;  %v13503_v52 = vld [vmem:[#allocation12 + $0x8] sm:$0xf] }
 0x6ea   :  { %v7667_v46 = vsel %vm17485_vm6, %v7666_v59, %v7662_v57  ;;  %v13568_v53 = vor.u32 %v15435_v0, %v13567_v21  ;;  %v13536_v59 = vor.u32 %v15427_v41, %v13535_v30  ;;  %v13793_v50 = vld [vmem:[#allocation12 + $0x268] sm:$0xf0]  ;;  %v13792_v27 = vor.u32 %v15491_v39, %v13791_v3  ;;  %v15419_v12 = vld [vmem:[#allocation12 + $0x24] sm:$0xf0]  ;;  %v13735_v21 = vld [vmem:[#allocation12 + $0x1d0] sm:$0xf] }
 0x6eb   :  { %v7630_v22 = vadd.f32 %v7550_v1, %v17823_v60  ;;  %v7689_v49 = vmul.f32 %v7667_v46, %v17343_v37  ;;  %v15495_v37 = vld [vmem:[#allocation12 + $0x28c] sm:$0xf]  ;;  %8541 = vmatpush.bf16.msra.mxu1 %v13856_v43  ;;  %v13540_v54 = vor.u32 %v15423_v28, %v13537_v25  ;;  %v13759_v1 = vld [vmem:[#allocation12 + $0x208] sm:$0xf]  ;;  %v13796_v7 = vor.u32 %v15487_v5, %v13793_v50  ;;  %v15476_v0 = vld [vmem:[#allocation12 + $0x1ec] sm:$0xf0] }
 0x6ec   :  { %v15933_v11 = vpop.eup %15932  ;;  %v13828_v20 = vor.u32 %v15495_v37, %v13825_v42  ;;  %8529 = vmatpush.bf16.msra.mxu0 %v13568_v53  ;;  %v15483_v48 = vld [vmem:[#allocation12 + $0x224] sm:$0xf0]  ;;  %v15415_v26 = vld [vmem:[#allocation12 + $0xc] sm:$0xf]  ;;  %v13504_v63 = vor.u32 %v15419_v12, %v13503_v52  ;;  %v13737_v37 = vld [vmem:[#allocation12 + $0x1f0] sm:$0xf0]  ;;  %v13736_v30 = vor.u32 %v15476_v0, %v13735_v21 }
 0x6ed   :  { %v7690_v36 = vmul.f32 %v15933_v11, %v7648_v40  ;;  %v13492_v19 = vmul.f32 -1.442695, %v7630_v22  ;;  %8554 = vmatpush.bf16.msra.mxu2 %v13604_v58  ;;  %8567 = vmatpush.bf16.msrb.mxu3 %v13860_v14  ;;  %v13505_v24 = vld [vmem:[#allocation12 + $0x28] sm:$0xf0]  ;;  %v13760_v47 = vor.u32 %v15483_v48, %v13759_v1  ;;  %v13991_v14 = vld [vmem:[#allocation12 + $0x3d0] sm:$0xf]  ;;  %v13740_v39 = vor.u32 %v15472_v29, %v13737_v37 }
 0x6ee   :  { %v15479_v57 = vld [vmem:[#allocation12 + $0x20c] sm:$0xf]  ;;  %v13508_v35 = vor.u32 %v15415_v26, %v13505_v24  ;;  %v15536_v42 = vld [vmem:[#allocation12 + $0x3d4] sm:$0xf]  ;;  %v13992_v41 = vor.u32 %v15540_v15, %v13991_v14  ;;  %v15468_v3 = vld [vmem:[#allocation12 + $0x1ac] sm:$0xf0] }
 0x6ef   :  { %v17502_v62 = vadd.f32 %v7690_v36, %v7689_v49  ;;  %15934 = vpow2.f32 %v13492_v19  ;;  %8542 = vmatpush.bf16.msra.mxu1 %v13824_v56  ;;  %v13761_v55 = vld [vmem:[#allocation12 + $0x228] sm:$0xf0]  ;;  %v13959_v28 = vld [vmem:[#allocation12 + $0x390] sm:$0xf]  ;;  %v13705_v5 = vld [vmem:[#allocation12 + $0x1b0] sm:$0xf0] }
 0x6f0   :  { %v7538_v6 = vpop.f32.mrf.mxu2  ;;  %v7551_v8 = vpop.f32.mrf.mxu3  ;;  %8530 = vmatpush.bf16.msra.mxu0 %v13536_v59  ;;  %v13764_v10 = vor.u32 %v15479_v57, %v13761_v55  ;;  %v15532_v25 = vld [vmem:[#allocation12 + $0x3ac] sm:$0xf0]  ;;  %v15464_v59 = vld [vmem:[#allocation12 + $0x194] sm:$0xf] }
 0x6f1   :  { %8555 = vmatpush.bf16.msra.mxu2 %v13572_v16  ;;  %8568 = vmatpush.bf16.msrb.mxu3 %v13828_v20  ;;  %v13993_v6 = vld [vmem:[#allocation12 + $0x3f0] sm:$0xf0]  ;;  %v13703_v16 = vld [vmem:[#allocation12 + $0x190] sm:$0xf]  ;;  %v13960_v12 = vor.u32 %v15532_v25, %v13959_v28  ;;  %v13708_v1 = vor.u32 %v15464_v59, %v13705_v5 }
 0x6f2   :  { %v13996_v20 = vor.u32 %v15536_v42, %v13993_v6  ;;  %v15528_v50 = vld [vmem:[#allocation12 + $0x394] sm:$0xf]  ;;  %v13704_v52 = vor.u32 %v15468_v3, %v13703_v16  ;;  %v13863_v0 = vld [vmem:[#allocation12 + $0x2d0] sm:$0xf] }
 0x6f3   :  { %8543 = vmatpush.bf16.msra.mxu1 %v13792_v27  ;;  %v13961_v27 = vld [vmem:[#allocation12 + $0x3b0] sm:$0xf0]  ;;  %v15508_v14 = vld [vmem:[#allocation12 + $0x2ec] sm:$0xf0] }
 0x6f4   :  { %8531 = vmatpush.bf16.msra.mxu0 %v13504_v63  ;;  %v13964_v48 = vor.u32 %v15528_v50, %v13961_v27  ;;  %v15456_v26 = vld [vmem:[#allocation12 + $0x154] sm:$0xf]  ;;  %v13864_v37 = vor.u32 %v15508_v14, %v13863_v0  ;;  %v13575_v42 = vld [vmem:[#allocation12 + $0x90] sm:$0xf] }
 0x6f5   :  { %v15935_v13 = vpop.eup %15934  ;;  %8556 = vmatpush.bf16.msra.mxu2 %v13540_v54  ;;  %8569 = vmatpush.bf16.msrb.mxu3 %v13796_v7  ;;  %v15460_v54 = vld [vmem:[#allocation12 + $0x16c] sm:$0xf0]  ;;  %v13673_v24 = vld [vmem:[#allocation12 + $0x170] sm:$0xf0] }
 0x6f6   :  { %v7673_v17 = vadd.f32 1.0, %v15935_v13  ;;  %v13671_v13 = vld [vmem:[#allocation12 + $0x150] sm:$0xf]  ;;  %v15520_v63 = vld [vmem:[#allocation12 + $0x354] sm:$0xf] }
 0x6f7   :  { %8544 = vmatpush.bf16.msra.mxu1 %v13760_v47  ;;  %v15524_v7 = vld [vmem:[#allocation12 + $0x36c] sm:$0xf0]  ;;  %v13929_v57 = vld [vmem:[#allocation12 + $0x370] sm:$0xf0]  ;;  %v13672_v55 = vor.u32 %v15460_v54, %v13671_v13 }
 0x6f8   :  { %15936 = vrcp.f32 %v7673_v17  ;;  %v7685_v9 = vand.u32 2147483648, %v7673_v17  ;;  %v7683_v45 = vand.u32 2147483647, %v7673_v17  ;;  %vm7679_vm9 = vweird.f32 %v7673_v17  ;;  %v13609_v15 = vld [vmem:[#allocation12 + $0xf0] sm:$0xf0] }
 0x6f9   :  { %8557 = vmatpush.bf16.msra.mxu2 %v13508_v35  ;;  %8570 = vmatpush.bf16.msrb.mxu3 %v13764_v10  ;;  %15938 = vtanh.f32 %v17502_v62  ;;  %v13639_v35 = vld [vmem:[#allocation12 + $0x110] sm:$0xf]  ;;  %v15504_v29 = vld [vmem:[#allocation12 + $0x2d4] sm:$0xf] }
 0x6fa   :  { %v7686_v40 = vor.u32 1.1754944e-38, %v7685_v9  ;;  %vm7684_vm11 = vcmp.eq.f32.partialorder %v7683_v45, 8.507059e+37  ;;  %v15452_v10 = vld [vmem:[#allocation12 + $0x12c] sm:$0xf0]  ;;  %v13641_v45 = vld [vmem:[#allocation12 + $0x130] sm:$0xf0] }
 0x6fb   :  { %v15516_v9 = vld [vmem:[#allocation12 + $0x32c] sm:$0xf0]  ;;  %v15496_v28 = vld [vmem:[#allocation12 + $0x294] sm:$0xf] }
 0x6fc   :  { %v15436_v6 = vld [vmem:[#allocation12 + $0xac] sm:$0xf0]  ;;  %v13833_v25 = vld [vmem:[#allocation12 + $0x2b0] sm:$0xf0] }
 0x6fd   :  { %v13831_v16 = vld [vmem:[#allocation12 + $0x290] sm:$0xf]  ;;  %v13576_v59 = vor.u32 %v15436_v6, %v13575_v42  ;;  %v13967_v42 = vld [vmem:[#allocation12 + $0x398] sm:$0xf] }
 0x6fe   :  { %v15937_v46 = vpop.eup %15936  ;;  %v15500_v3 = vld [vmem:[#allocation12 + $0x2ac] sm:$0xf0]  ;;  %v15533_v6 = vld [vmem:[#allocation12 + $0x3b4] sm:$0xf0] }
 0x6ff   :  { %v7675_v60 = vmul.f32 %v15937_v46, %v7673_v17  ;;  %vm7680_vm8 = vweird.f32 %v15937_v46  ;;  %v15939_v43 = vpop.eup %15938  ;;  %v13927_v17 = vld [vmem:[#allocation12 + $0x350] sm:$0xf]  ;;  %v13832_v5 = vor.u32 %v15500_v3, %v13831_v16  ;;  %v15529_v16 = vld [vmem:[#allocation12 + $0x39c] sm:$0xf] }
 0x700   :  { %vm7681_vm10 = vmor %vm7679_vm9, %vm7680_vm8  ;;  %v13928_v47 = vor.u32 %v15524_v7, %v13927_v17  ;;  %v13543_v50 = vld [vmem:[#allocation12 + $0x50] sm:$0xf]  ;;  %v15488_v17 = vld [vmem:[#allocation12 + $0x254] sm:$0xf] }
 0x701   :  { %v7676_v22 = vsub.f32 1.0, %v7675_v60  ;;  %v13932_v60 = vor.u32 %v15520_v63, %v13929_v57  ;;  %v15428_v27 = vld [vmem:[#allocation12 + $0x6c] sm:$0xf0]  ;;  %v13801_v7 = vld [vmem:[#allocation12 + $0x270] sm:$0xf0] }
 0x702   :  { %v13799_v13 = vld [vmem:[#allocation12 + $0x250] sm:$0xf]  ;;  %v13969_v3 = vld [vmem:[#allocation12 + $0x3b8] sm:$0xf0] }
 0x703   :  { %v7677_v23 = vmul.f32 %v15937_v46, %v7676_v22  ;;  %v13895_v22 = vld [vmem:[#allocation12 + $0x310] sm:$0xf] }
 0x704   :  { %v15492_v54 = vld [vmem:[#allocation12 + $0x26c] sm:$0xf0] }
 0x705   :  { %v7678_v11 = vadd.f32 %v15937_v46, %v7677_v23  ;;  %v15448_v23 = vld [vmem:[#allocation12 + $0x114] sm:$0xf]  ;;  %v13800_v63 = vor.u32 %v15492_v54, %v13799_v13  ;;  %v15420_v57 = vld [vmem:[#allocation12 + $0x2c] sm:$0xf0]  ;;  %v15521_v13 = vld [vmem:[#allocation12 + $0x35c] sm:$0xf] }
 0x706   :  { %v13937_v54 = vld [vmem:[#allocation12 + $0x378] sm:$0xf0] }
 0x707   :  { %v7682_v49 = vsel %vm7681_vm10, %v15937_v46, %v7678_v11  ;;  %v13676_v46 = vor.u32 %v15456_v26, %v13673_v24  ;;  %v15512_v11 = vld [vmem:[#allocation12 + $0x314] sm:$0xf]  ;;  %v13511_v26 = vld [vmem:[#allocation12 + $0x10] sm:$0xf]  ;;  %v13544_v24 = vor.u32 %v15428_v27, %v13543_v50  ;;  %v13935_v50 = vld [vmem:[#allocation12 + $0x358] sm:$0xf] }
 0x708   :  { %v7687_v36 = vsel %vm7684_vm11, %v7686_v40, %v7682_v49  ;;  %v13897_v40 = vld [vmem:[#allocation12 + $0x330] sm:$0xf0]  ;;  %v13640_v49 = vor.u32 %v15452_v10, %v13639_v35  ;;  %v13804_v10 = vor.u32 %v15488_v17, %v13801_v7  ;;  %v15525_v27 = vld [vmem:[#allocation12 + $0x374] sm:$0xf0] }
 0x709   :  { %v7693_v19 = vmul.f32 %v15939_v43, %v7687_v36  ;;  %v13896_v43 = vor.u32 %v15516_v9, %v13895_v22  ;;  %v13607_v36 = vld [vmem:[#allocation12 + $0xd0] sm:$0xf]  ;;  %v13900_v21 = vor.u32 %v15512_v11, %v13897_v40  ;;  %v15480_v22 = vld [vmem:[#allocation12 + $0x214] sm:$0xf]  ;;  %v13999_v11 = vld [vmem:[#allocation12 + $0x3d8] sm:$0xf] }
 0x70a   :  { %v13769_v9 = vld [vmem:[#allocation12 + $0x230] sm:$0xf0]  ;;  %v15541_v40 = vld [vmem:[#allocation12 + $0x3f4] sm:$0xf0] }
 0x70b   :  { %v7694_v58 = vpack.c.bf16 %v7693_v19, %v7693_v19  ;;  %v15444_v19 = vld [vmem:[#allocation12 + $0xec] sm:$0xf0]  ;;  %v13772_v14 = vor.u32 %v15480_v22, %v13769_v9  ;;  %v13647_v17 = vld [vmem:[#allocation12 + $0x118] sm:$0xf] }
 0x70c   :  { %v15453_v7 = vld [vmem:[#allocation12 + $0x134] sm:$0xf0] }
 0x70d   :  { %7695 = vst [vmem:[#allocation3] sm:$0xf] %v7694_v58  ;;  %v13644_v58 = vor.u32 %v15448_v23, %v13641_v45  ;;  %v13743_v23 = vld [vmem:[#allocation12 + $0x1d8] sm:$0xf] }
 0x70e   :  { %v15477_v45 = vld [vmem:[#allocation12 + $0x1f4] sm:$0xf0] }
 0x70f   :  { %v13615_v22 = vld [vmem:[#allocation12 + $0xd8] sm:$0xf] }
 0x710   :  { %v15445_v9 = vld [vmem:[#allocation12 + $0xf4] sm:$0xf0] }
 0x714   :  { %v7696_v2 = vld [vmem:[#allocation3] sm:$0xff] }
 0x715   :  { %v7826_v53 = vunpack.c.l.b16 %v7696_v2  ;;  %v7827_v31 = vunpack.c.h.b16 %v7696_v2  ;;  %v15440_v2 = vld [vmem:[#allocation12 + $0xd4] sm:$0xf] }
 0x717   :  { %v17505_v8 = vpack.c.b16 %v7826_v53, %v7826_v53  ;;  %v17507_v56 = vpack.c.b16 %v7827_v31, %v7827_v31  ;;  %v13865_v53 = vld [vmem:[#allocation12 + $0x2f0] sm:$0xf0]  ;;  %v13608_v31 = vor.u32 %v15444_v19, %v13607_v36  ;;  %v13745_v19 = vld [vmem:[#allocation12 + $0x1f8] sm:$0xf0] }
 0x719   :  { %8480 = vmatmul.bf16.vlgmr.msrb.gmra.mxu0 %v17505_v8  ;;  %8493 = vmatmul.bf16.vlgmr.msrb.gmra.mxu1 %v17507_v56 }
 0x71a   :  { %8506 = vmatmul.bf16.vlgmr.msrb.gmra.mxu2 %v17505_v8  ;;  %8519 = vmatmul.bf16.vlgmr.msra.gmra.mxu3 %v17507_v56 }
 0x71b   :  { %8576 = vmatpush.bf16.msrb.mxu0 %v13736_v30  ;;  %8589 = vmatpush.bf16.msrb.mxu1 %v13992_v41  ;;  %v13612_v30 = vor.u32 %v15440_v2, %v13609_v15  ;;  %v13868_v41 = vor.u32 %v15504_v29, %v13865_v53  ;;  %v13744_v2 = vor.u32 %v15477_v45, %v13743_v23  ;;  %v13711_v29 = vld [vmem:[#allocation12 + $0x198] sm:$0xf] }
 0x71c   :  { %8602 = vmatpush.bf16.msrb.mxu2 %v13740_v39  ;;  %8615 = vmatpush.bf16.msra.mxu3 %v13996_v20  ;;  %v15432_v39 = vld [vmem:[#allocation12 + $0x94] sm:$0xf]  ;;  %v14000_v15 = vor.u32 %v15541_v40, %v13999_v11  ;;  %v15469_v53 = vld [vmem:[#allocation12 + $0x1b4] sm:$0xf0] }
 0x71d   :  { %v13577_v20 = vld [vmem:[#allocation12 + $0xb0] sm:$0xf0]  ;;  %v13871_v11 = vld [vmem:[#allocation12 + $0x2d8] sm:$0xf] }
 0x71e   :  { %v15509_v40 = vld [vmem:[#allocation12 + $0x2f4] sm:$0xf0] }
 0x71f   :  { %8577 = vmatpush.bf16.msrb.mxu0 %v13704_v52  ;;  %8590 = vmatpush.bf16.msrb.mxu1 %v13960_v12  ;;  %v13580_v52 = vor.u32 %v15432_v39, %v13577_v20  ;;  %v13836_v12 = vor.u32 %v15496_v28, %v13833_v25  ;;  %v13712_v39 = vor.u32 %v15469_v53, %v13711_v29  ;;  %v13679_v28 = vld [vmem:[#allocation12 + $0x158] sm:$0xf] }
 0x720   :  { %8603 = vmatpush.bf16.msrb.mxu2 %v13708_v1  ;;  %8616 = vmatpush.bf16.msra.mxu3 %v13964_v48  ;;  %v15424_v1 = vld [vmem:[#allocation12 + $0x54] sm:$0xf]  ;;  %v13968_v20 = vor.u32 %v15533_v6, %v13967_v42  ;;  %v15461_v25 = vld [vmem:[#allocation12 + $0x174] sm:$0xf0]  ;;  %v15497_v42 = vld [vmem:[#allocation12 + $0x29c] sm:$0xf] }
 0x721   :  { %v13545_v48 = vld [vmem:[#allocation12 + $0x70] sm:$0xf0]  ;;  %v13839_v29 = vld [vmem:[#allocation12 + $0x298] sm:$0xf]  ;;  %v13841_v6 = vld [vmem:[#allocation12 + $0x2b8] sm:$0xf0] }
 0x722   :  { %v13548_v35 = vor.u32 %v15424_v1, %v13545_v48  ;;  %v13680_v1 = vor.u32 %v15461_v25, %v13679_v28  ;;  %v13936_v48 = vor.u32 %v15525_v27, %v13935_v50  ;;  %v15501_v53 = vld [vmem:[#allocation12 + $0x2b4] sm:$0xf0]  ;;  %v15489_v50 = vld [vmem:[#allocation12 + $0x25c] sm:$0xf] }
 0x723   :  { %8578 = vmatpush.bf16.msrb.mxu0 %v13672_v55  ;;  %8591 = vmatpush.bf16.msrb.mxu1 %v13928_v47  ;;  %v13767_v55 = vld [vmem:[#allocation12 + $0x210] sm:$0xf]  ;;  %v13807_v28 = vld [vmem:[#allocation12 + $0x258] sm:$0xf]  ;;  %v13809_v27 = vld [vmem:[#allocation12 + $0x278] sm:$0xf0] }
 0x724   :  { %8604 = vmatpush.bf16.msrb.mxu2 %v13676_v46  ;;  %8617 = vmatpush.bf16.msra.mxu3 %v13932_v60  ;;  %v15484_v47 = vld [vmem:[#allocation12 + $0x22c] sm:$0xf0]  ;;  %v15416_v46 = vld [vmem:[#allocation12 + $0x14] sm:$0xf]  ;;  %v15493_v25 = vld [vmem:[#allocation12 + $0x274] sm:$0xf0] }
 0x725   :  { %v13513_v60 = vld [vmem:[#allocation12 + $0x30] sm:$0xf0]  ;;  %v13768_v36 = vor.u32 %v15484_v47, %v13767_v55  ;;  %v15449_v55 = vld [vmem:[#allocation12 + $0x11c] sm:$0xf] }
 0x726   :  { %v13516_v0 = vor.u32 %v15416_v46, %v13513_v60  ;;  %v13649_v47 = vld [vmem:[#allocation12 + $0x138] sm:$0xf0]  ;;  %v13648_v46 = vor.u32 %v15453_v7, %v13647_v17  ;;  %v13775_v17 = vld [vmem:[#allocation12 + $0x218] sm:$0xf] }
 0x727   :  { %8579 = vmatpush.bf16.msrb.mxu0 %v13640_v49  ;;  %8592 = vmatpush.bf16.msrb.mxu1 %v13896_v43  ;;  %v15473_v49 = vld [vmem:[#allocation12 + $0x1dc] sm:$0xf]  ;;  %v13512_v43 = vor.u32 %v15420_v57, %v13511_v26  ;;  %v15517_v57 = vld [vmem:[#allocation12 + $0x334] sm:$0xf0]  ;;  %v13652_v23 = vor.u32 %v15449_v55, %v13649_v47 }
 0x728   :  { %8605 = vmatpush.bf16.msrb.mxu2 %v13644_v58  ;;  %8618 = vmatpush.bf16.msra.mxu3 %v13900_v21  ;;  %v15537_v58 = vld [vmem:[#allocation12 + $0x3dc] sm:$0xf]  ;;  %v15485_v7 = vld [vmem:[#allocation12 + $0x234] sm:$0xf0] }
 0x729   :  { %8532 = vmatmul.bf16.vlgmr.msra.gmra.mxu0 %v17505_v8  ;;  %8545 = vmatmul.bf16.vlgmr.msra.gmra.mxu1 %v17507_v56  ;;  %v14001_v21 = vld [vmem:[#allocation12 + $0x3f8] sm:$0xf0]  ;;  %v13776_v47 = vor.u32 %v15485_v7, %v13775_v17 }
 0x72a   :  { %8558 = vmatmul.bf16.vlgmr.msra.gmra.mxu2 %v17505_v8  ;;  %8571 = vmatmul.bf16.vlgmr.msrb.gmra.mxu3 %v17507_v56 }
 0x72b   :  { %8580 = vmatpush.bf16.msrb.mxu0 %v13608_v31  ;;  %8593 = vmatpush.bf16.msrb.mxu1 %v13864_v37  ;;  %v13748_v31 = vor.u32 %v15473_v49, %v13745_v19  ;;  %v14004_v37 = vor.u32 %v15537_v58, %v14001_v21  ;;  %v15441_v49 = vld [vmem:[#allocation12 + $0xdc] sm:$0xf]  ;;  %v13616_v58 = vor.u32 %v15445_v9, %v13615_v22 }
 0x72c   :  { %8606 = vmatpush.bf16.msrb.mxu2 %v13612_v30  ;;  %8619 = vmatpush.bf16.msra.mxu3 %v13868_v41  ;;  %v15465_v30 = vld [vmem:[#allocation12 + $0x19c] sm:$0xf]  ;;  %v13872_v21 = vor.u32 %v15509_v40, %v13871_v11 }
 0x72d   :  { %v13713_v41 = vld [vmem:[#allocation12 + $0x1b8] sm:$0xf0] }
 0x72e   :  { %v13873_v19 = vld [vmem:[#allocation12 + $0x2f8] sm:$0xf0] }
 0x72f   :  { %8581 = vmatpush.bf16.msrb.mxu0 %v13576_v59  ;;  %8594 = vmatpush.bf16.msrb.mxu1 %v13832_v5  ;;  %v13716_v59 = vor.u32 %v15465_v30, %v13713_v41  ;;  %v13972_v5 = vor.u32 %v15529_v16, %v13969_v3  ;;  %v13840_v41 = vor.u32 %v15501_v53, %v13839_v29  ;;  %v13551_v16 = vld [vmem:[#allocation12 + $0x58] sm:$0xf] }
 0x730   :  { %8607 = vmatpush.bf16.msrb.mxu2 %v13580_v52  ;;  %8620 = vmatpush.bf16.msra.mxu3 %v13836_v12  ;;  %v15457_v52 = vld [vmem:[#allocation12 + $0x15c] sm:$0xf]  ;;  %v15429_v3 = vld [vmem:[#allocation12 + $0x74] sm:$0xf0] }
 0x731   :  { %v13681_v12 = vld [vmem:[#allocation12 + $0x178] sm:$0xf0] }
 0x732   :  { %v13684_v26 = vor.u32 %v15457_v52, %v13681_v12  ;;  %v13552_v52 = vor.u32 %v15429_v3, %v13551_v16  ;;  %v13808_v12 = vor.u32 %v15493_v25, %v13807_v28 }
 0x733   :  { %8582 = vmatpush.bf16.msrb.mxu0 %v13544_v24  ;;  %8595 = vmatpush.bf16.msrb.mxu1 %v13800_v63  ;;  %v13940_v24 = vor.u32 %v15521_v13, %v13937_v54  ;;  %v13903_v63 = vld [vmem:[#allocation12 + $0x318] sm:$0xf] }
 0x734   :  { %8608 = vmatpush.bf16.msrb.mxu2 %v13548_v35  ;;  %8621 = vmatpush.bf16.msra.mxu3 %v13804_v10  ;;  %v15513_v35 = vld [vmem:[#allocation12 + $0x31c] sm:$0xf]  ;;  %v13904_v60 = vor.u32 %v15517_v57, %v13903_v63  ;;  %v13519_v13 = vld [vmem:[#allocation12 + $0x18] sm:$0xf] }
 0x735   :  { %v13905_v10 = vld [vmem:[#allocation12 + $0x338] sm:$0xf0]  ;;  %v15421_v54 = vld [vmem:[#allocation12 + $0x34] sm:$0xf0] }
 0x736   :  { %v13908_v45 = vor.u32 %v15513_v35, %v13905_v10  ;;  %v15481_v63 = vld [vmem:[#allocation12 + $0x21c] sm:$0xf]  ;;  %v13520_v55 = vor.u32 %v15421_v54, %v13519_v13  ;;  %v15662_v13 = vld [vmem:[#allocation12 + $0x3c4] sm:$0xf] }
 0x737   :  { %8583 = vmatpush.bf16.msrb.mxu0 %v13512_v43  ;;  %8596 = vmatpush.bf16.msrb.mxu1 %v13768_v36  ;;  %v13617_v43 = vld [vmem:[#allocation12 + $0xf8] sm:$0xf0] }
 0x738   :  { %8609 = vmatpush.bf16.msrb.mxu2 %v13516_v0  ;;  %8622 = vmatpush.bf16.msra.mxu3 %v13772_v14  ;;  %v15505_v36 = vld [vmem:[#allocation12 + $0x2dc] sm:$0xf]  ;;  %v13583_v0 = vld [vmem:[#allocation12 + $0x98] sm:$0xf] }
 0x739   :  { %v15437_v14 = vld [vmem:[#allocation12 + $0xb4] sm:$0xf0]  ;;  %v13777_v57 = vld [vmem:[#allocation12 + $0x238] sm:$0xf0] }
 0x73a   :  { %8584 = vmatmul.bf16.vlgmr.msrb.gmra.mxu0 %v17505_v8  ;;  %8597 = vmatmul.bf16.vlgmr.msrb.gmra.mxu1 %v17507_v56  ;;  %v13584_v30 = vor.u32 %v15437_v14, %v13583_v0  ;;  %v13780_v10 = vor.u32 %v15481_v63, %v13777_v57 }
 0x73b   :  { %8628 = vmatpush.bf16.msra.mxu0 %v13744_v2  ;;  %8641 = vmatpush.bf16.msra.mxu1 %v14000_v15  ;;  %v13620_v2 = vor.u32 %v15441_v49, %v13617_v43  ;;  %v13876_v15 = vor.u32 %v15505_v36, %v13873_v19 }
 0x73c   :  { %8654 = vmatpush.bf16.msra.mxu2 %v13748_v31  ;;  %8667 = vmatpush.bf16.msrb.mxu3 %v14004_v37  ;;  %v15433_v31 = vld [vmem:[#allocation12 + $0x9c] sm:$0xf] }
 0x73d   :  { %8610 = vmatmul.bf16.vlgmr.msrb.gmra.mxu2 %v17505_v8  ;;  %8623 = vmatmul.bf16.vlgmr.msra.gmra.mxu3 %v17507_v56  ;;  %v13585_v37 = vld [vmem:[#allocation12 + $0xb8] sm:$0xf0] }
 0x73f   :  { %8629 = vmatpush.bf16.msra.mxu0 %v13712_v39  ;;  %8642 = vmatpush.bf16.msra.mxu1 %v13968_v20  ;;  %v13588_v39 = vor.u32 %v15433_v31, %v13585_v37  ;;  %v13844_v20 = vor.u32 %v15497_v42, %v13841_v6 }
 0x740   :  { %8655 = vmatpush.bf16.msra.mxu2 %v13716_v59  ;;  %8668 = vmatpush.bf16.msrb.mxu3 %v13972_v5  ;;  %v15425_v59 = vld [vmem:[#allocation12 + $0x5c] sm:$0xf] }
 0x741   :  { %v13553_v5 = vld [vmem:[#allocation12 + $0x78] sm:$0xf0] }
 0x743   :  { %8630 = vmatpush.bf16.msra.mxu0 %v13680_v1  ;;  %8643 = vmatpush.bf16.msra.mxu1 %v13936_v48  ;;  %v13556_v1 = vor.u32 %v15425_v59, %v13553_v5  ;;  %v13812_v48 = vor.u32 %v15489_v50, %v13809_v27  ;;  %v14493_v59 = vld [vmem:[#allocation12 + $0x3c0] sm:$0xf]  ;;  %v15598_v50 = vld [vmem:[#allocation12 + $0x1c4] sm:$0xf] }
 0x744   :  { %8656 = vmatpush.bf16.msra.mxu2 %v13684_v26  ;;  %8669 = vmatpush.bf16.msrb.mxu3 %v13940_v24  ;;  %v15417_v26 = vld [vmem:[#allocation12 + $0x1c] sm:$0xf]  ;;  %v15666_v5 = vld [vmem:[#allocation12 + $0x3dc] sm:$0xf0] }
 0x745   :  { %v13521_v24 = vld [vmem:[#allocation12 + $0x38] sm:$0xf0] }
 0x746   :  { %v13524_v35 = vor.u32 %v15417_v26, %v13521_v24  ;;  %v14495_v26 = vld [vmem:[#allocation12 + $0x3e0] sm:$0xf0]  ;;  %v17824_v24 = vld [vmem:[#allocation28_spill] sm:$0xff] }
 0x747   :  { %8631 = vmatpush.bf16.msra.mxu0 %v13648_v46  ;;  %8644 = vmatpush.bf16.msra.mxu1 %v13904_v60  ;;  %v607_v63 = vadd.f32 %v17824_v24, %v16350_v38  ;;  %v17825_v38 = vld [vmem:[#allocation34_spill] sm:$0xff] }
 0x748   :  { %8657 = vmatpush.bf16.msra.mxu2 %v13652_v23  ;;  %8670 = vmatpush.bf16.msrb.mxu3 %v13908_v45 }
 0x74b   :  { %8632 = vmatpush.bf16.msra.mxu0 %v13616_v58  ;;  %8645 = vmatpush.bf16.msra.mxu1 %v13872_v21 }
 0x74c   :  { %8658 = vmatpush.bf16.msra.mxu2 %v13620_v2  ;;  %8671 = vmatpush.bf16.msrb.mxu3 %v13876_v15 }
 0x74f   :  { %8633 = vmatpush.bf16.msra.mxu0 %v13584_v30  ;;  %8646 = vmatpush.bf16.msra.mxu1 %v13840_v41 }
 0x750   :  { %8659 = vmatpush.bf16.msra.mxu2 %v13588_v39  ;;  %8672 = vmatpush.bf16.msrb.mxu3 %v13844_v20  ;;  %v14237_v39 = vld [vmem:[#allocation12 + $0x1c0] sm:$0xf] }
 0x751   :  { %v15602_v20 = vld [vmem:[#allocation12 + $0x1dc] sm:$0xf0] }
 0x752   :  { %v14238_v25 = vor.u32 %v15602_v20, %v14237_v39  ;;  %v15582_v39 = vld [vmem:[#allocation12 + $0x144] sm:$0xf] }
 0x753   :  { %8634 = vmatpush.bf16.msra.mxu0 %v13552_v52  ;;  %8647 = vmatpush.bf16.msra.mxu1 %v13808_v12  ;;  %v14494_v52 = vor.u32 %v15666_v5, %v14493_v59  ;;  %v14239_v12 = vld [vmem:[#allocation12 + $0x1e0] sm:$0xf0] }
 0x754   :  { %8660 = vmatpush.bf16.msra.mxu2 %v13556_v1  ;;  %8673 = vmatpush.bf16.msrb.mxu3 %v13812_v48  ;;  %v14242_v7 = vor.u32 %v15598_v50, %v14239_v12  ;;  %v14175_v20 = vld [vmem:[#allocation12 + $0x160] sm:$0xf0] }
 0x755   :  { %v14431_v12 = vld [vmem:[#allocation12 + $0x360] sm:$0xf0] }
 0x757   :  { %8635 = vmatpush.bf16.msra.mxu0 %v13520_v55  ;;  %8648 = vmatpush.bf16.msra.mxu1 %v13776_v47  ;;  %v14498_v55 = vor.u32 %v15662_v13, %v14495_v26  ;;  %v14205_v47 = vld [vmem:[#allocation12 + $0x180] sm:$0xf] }
 0x758   :  { %8661 = vmatpush.bf16.msra.mxu2 %v13524_v35  ;;  %8674 = vmatpush.bf16.msrb.mxu3 %v13780_v10  ;;  %v15594_v35 = vld [vmem:[#allocation12 + $0x19c] sm:$0xf0] }
 0x759   :  { %v14461_v10 = vld [vmem:[#allocation12 + $0x380] sm:$0xf] }
 0x75a   :  { %8636 = vmatmul.bf16.vlgmr.msra.gmra.mxu0 %v17505_v8  ;;  %8649 = vmatmul.bf16.vlgmr.msra.gmra.mxu1 %v17507_v56  ;;  %v17830_v26 = vld [vmem:[#allocation35_spill] sm:$0xff] }
 0x75b   :  { %8662 = vmatmul.bf16.vlgmr.msra.gmra.mxu2 %v17505_v8  ;;  %8675 = vmatmul.bf16.vlgmr.msrb.gmra.mxu3 %v17507_v56  ;;  %v665_v24 = vadd.f32 %v17830_v26, %v16377_v51 }
 0x75c   :  { %9599 = vmatpush.bf16.msrb.mxu0 %v14238_v25  ;;  %9612 = vmatpush.bf16.msrb.mxu1 %v14494_v52  ;;  %v15646_v52 = vld [vmem:[#allocation12 + $0x344] sm:$0xf]  ;;  %v15562_v25 = vld [vmem:[#allocation12 + $0x9c] sm:$0xf0] }
 0x75d   :  { %9625 = vmatpush.bf16.msrb.mxu2 %v14242_v7  ;;  %9638 = vmatpush.bf16.msra.mxu3 %v14498_v55  ;;  %v14434_v7 = vor.u32 %v15646_v52, %v14431_v12  ;;  %v15578_v55 = vld [vmem:[#allocation12 + $0x11c] sm:$0xf0] }
 0x796   :  { %v8481_v46 = vpop.f32.mrf.mxu0  ;;  %v8494_v60 = vpop.f32.mrf.mxu1 }
 0x797   :  { %v8495_v22 = vadd.f32 %v8494_v60, %v8481_v46 }
 0x799   :  { %v8680_v9 = vadd.f32 %v8495_v22, %v16540_v44 }
 0x79b   :  { %v14005_v23 = vmul.f32 -1.442695, %v8680_v9 }
 0x79d   :  { %15940 = vpow2.f32 %v14005_v23  ;;  %v8507_v45 = vpop.f32.mrf.mxu2  ;;  %v8520_v11 = vpop.f32.mrf.mxu3  ;;  %v14206_v23 = vor.u32 %v15594_v35, %v14205_v47  ;;  %v14397_v47 = vld [vmem:[#allocation12 + $0x300] sm:$0xf]  ;;  %v15574_v35 = vld [vmem:[#allocation12 + $0x104] sm:$0xf] }
 0x79e   :  { %v8521_v40 = vadd.f32 %v8520_v11, %v8507_v45  ;;  %v8483_v49 = vpop.f32.mrf.mxu0  ;;  %v8496_v43 = vpop.f32.mrf.mxu1  ;;  %v15658_v45 = vld [vmem:[#allocation12 + $0x39c] sm:$0xf0]  ;;  %v15590_v11 = vld [vmem:[#allocation12 + $0x184] sm:$0xf] }
 0x79f   :  { %9600 = vmatpush.bf16.msrb.mxu0 %v14206_v23 }
 0x7a0   :  { %v8681_v36 = vadd.f32 %v8521_v40, %v16543_v4  ;;  %v636_v40 = vadd.f32 %v17825_v38, %v607_v63  ;;  %v17831_v38 = vld [vmem:[#allocation33_spill] sm:$0xff] }
 0x7a2   :  { %v14006_v19 = vmul.f32 -1.442695, %v8681_v36  ;;  %v14462_v36 = vor.u32 %v15658_v45, %v14461_v10  ;;  %v15638_v45 = vld [vmem:[#allocation12 + $0x304] sm:$0xf] }
 0x7a3   :  { %v15941_v58 = vpop.eup %15940 }
 0x7a4   :  { %v17527_v21 = vadd.f32 1.0, %v15941_v58  ;;  %15942 = vpow2.f32 %v14006_v19  ;;  %v14207_v19 = vld [vmem:[#allocation12 + $0x1a0] sm:$0xf0]  ;;  %9613 = vmatpush.bf16.msrb.mxu1 %v14462_v36 }
 0x7a5   :  { %v8509_v8 = vpop.f32.mrf.mxu2  ;;  %v8522_v56 = vpop.f32.mrf.mxu3  ;;  %v15654_v58 = vld [vmem:[#allocation12 + $0x384] sm:$0xf] }
 0x7a6   :  { %15944 = vrcp.f32 %v17527_v21  ;;  %v8533_v0 = vpop.f32.mrf.mxu0  ;;  %v8546_v14 = vpop.f32.mrf.mxu1  ;;  %v8699_v16 = vand.u32 2147483648, %v17527_v21  ;;  %v8697_v17 = vand.u32 2147483647, %v17527_v21  ;;  %vm8693_vm14 = vweird.f32 %v17527_v21 }
 0x7a7   :  { %v8547_v28 = vadd.f32 %v8546_v14, %v8533_v0  ;;  %v14210_v0 = vor.u32 %v15590_v11, %v14207_v19  ;;  %v14463_v14 = vld [vmem:[#allocation12 + $0x3a0] sm:$0xf0] }
 0x7a8   :  { %v8700_v43 = vor.u32 1.1754944e-38, %v8699_v16  ;;  %vm8698_vm3 = vcmp.eq.f32.partialorder %v8697_v17, 8.507059e+37  ;;  %v14399_v11 = vld [vmem:[#allocation12 + $0x320] sm:$0xf0] }
 0x7a9   :  { %v8682_v46 = vadd.f32 %v8547_v28, %v16558_v18  ;;  %9626 = vmatpush.bf16.msrb.mxu2 %v14210_v0  ;;  %v14365_v0 = vld [vmem:[#allocation12 + $0x2c0] sm:$0xf] }
 0x7aa   :  { %v15943_v2 = vpop.eup %15942 }
 0x7ab   :  { %v17530_v15 = vadd.f32 1.0, %v15943_v2 }
 0x7ac   :  { %v17532_v29 = vpop.eup %15944 }
 0x7ad   :  { %v8689_v53 = vmul.f32 %v17532_v29, %v17527_v21  ;;  %15946 = vrcp.f32 %v17530_v15  ;;  %v8559_v31 = vpop.f32.mrf.mxu2  ;;  %v8572_v37 = vpop.f32.mrf.mxu3  ;;  %v8718_v1 = vand.u32 2147483648, %v17530_v15  ;;  %v8716_v60 = vand.u32 2147483647, %v17530_v15 }
 0x7ae   :  { %v8573_v42 = vadd.f32 %v8572_v37, %v8559_v31  ;;  %v8535_v6 = vpop.f32.mrf.mxu0  ;;  %v8548_v30 = vpop.f32.mrf.mxu1  ;;  %vm8694_vm12 = vweird.f32 %v17532_v29  ;;  %v14466_v37 = vor.u32 %v15654_v58, %v14463_v14  ;;  %vm8712_vm15 = vweird.f32 %v17530_v15  ;;  %v15570_v58 = vld [vmem:[#allocation12 + $0xdc] sm:$0xf0] }
 0x7af   :  { %v8690_v41 = vsub.f32 1.0, %v8689_v53  ;;  %v8719_v8 = vor.u32 1.1754944e-38, %v8718_v1  ;;  %v15586_v6 = vld [vmem:[#allocation12 + $0x15c] sm:$0xf0]  ;;  %vm17561_vm0 = vmor %vm8693_vm14, %vm8694_vm12  ;;  %vm17566_vm1 = vcmp.eq.f32.partialorder %v8716_v60, 8.507059e+37 }
 0x7b0   :  { %v8683_v3 = vadd.f32 %v8573_v42, %v16553_v61  ;;  %v14173_v42 = vld [vmem:[#allocation12 + $0x140] sm:$0xf]  ;;  %9639 = vmatpush.bf16.msra.mxu3 %v14466_v37  ;;  %v14111_v37 = vld [vmem:[#allocation12 + $0xe0] sm:$0xf0] }
 0x7b1   :  { %v8691_v48 = vmul.f32 %v17532_v29, %v8690_v41  ;;  %v14429_v30 = vld [vmem:[#allocation12 + $0x340] sm:$0xf]  ;;  %v14174_v16 = vor.u32 %v15586_v6, %v14173_v42  ;;  %v15630_v42 = vld [vmem:[#allocation12 + $0x2c4] sm:$0xf] }
 0x7b2   :  { %v14007_v27 = vmul.f32 -1.442695, %v8683_v3  ;;  %v15650_v3 = vld [vmem:[#allocation12 + $0x35c] sm:$0xf0]  ;;  %v14367_v6 = vld [vmem:[#allocation12 + $0x2e0] sm:$0xf0] }
 0x7b3   :  { %v17539_v54 = vpop.eup %15946  ;;  %v8692_v56 = vadd.f32 %v17532_v29, %v8691_v48  ;;  %v14430_v50 = vor.u32 %v15650_v3, %v14429_v30  ;;  %9601 = vmatpush.bf16.msrb.mxu0 %v14174_v16  ;;  %v15634_v14 = vld [vmem:[#allocation12 + $0x2dc] sm:$0xf0]  ;;  %v14370_v3 = vor.u32 %v15630_v42, %v14367_v6  ;;  %v15606_v42 = vld [vmem:[#allocation12 + $0x204] sm:$0xf] }
 0x7b4   :  { %v8708_v57 = vmul.f32 %v17539_v54, %v17530_v15  ;;  %15948 = vpow2.f32 %v14007_v27  ;;  %vm8713_vm13 = vweird.f32 %v17539_v54  ;;  %v14178_v27 = vor.u32 %v15582_v39, %v14175_v20  ;;  %9640 = vmatpush.bf16.msra.mxu3 %v14434_v7  ;;  %v14079_v7 = vld [vmem:[#allocation12 + $0xa0] sm:$0xf0] }
 0x7b5   :  { %v8561_v22 = vpop.f32.mrf.mxu2  ;;  %v8574_v9 = vpop.f32.mrf.mxu3  ;;  %15950 = vtanh.f32 %v8682_v46  ;;  %vm8714_vm2 = vmor %vm8712_vm15, %vm8713_vm13  ;;  %v8696_v13 = vsel %vm17561_vm0, %v17532_v29, %v8692_v56  ;;  %9614 = vmatpush.bf16.msrb.mxu1 %v14430_v50  ;;  %v15642_v29 = vld [vmem:[#allocation12 + $0x31c] sm:$0xf0]  ;;  %v14402_v56 = vor.u32 %v15638_v45, %v14399_v11  ;;  %v14271_v6 = vld [vmem:[#allocation12 + $0x220] sm:$0xf0] }
 0x7b6   :  { %v8709_v49 = vsub.f32 1.0, %v8708_v57  ;;  %v14141_v57 = vld [vmem:[#allocation12 + $0x100] sm:$0xf]  ;;  %9627 = vmatpush.bf16.msrb.mxu2 %v14178_v27  ;;  %v8701_v10 = vsel %vm8698_vm3, %v8700_v43, %v8696_v13  ;;  %v14398_v21 = vor.u32 %v15642_v29, %v14397_v47  ;;  %v15622_v47 = vld [vmem:[#allocation12 + $0x284] sm:$0xf] }
 0x7b7   :  { %v8585_v53 = vpop.f32.mrf.mxu0  ;;  %v8598_v31 = vpop.f32.mrf.mxu1  ;;  %v14142_v51 = vor.u32 %v15578_v55, %v14141_v57  ;;  %v14109_v43 = vld [vmem:[#allocation12 + $0xc0] sm:$0xf] }
 0x7b8   :  { %v8710_v2 = vmul.f32 %v17539_v54, %v8709_v49  ;;  %v8599_v41 = vadd.f32 %v8598_v31, %v8585_v53  ;;  %v14366_v31 = vor.u32 %v15634_v14, %v14365_v0  ;;  %9641 = vmatpush.bf16.msra.mxu3 %v14402_v56  ;;  %v14333_v50 = vld [vmem:[#allocation12 + $0x280] sm:$0xf] }
 0x7b9   :  { %9602 = vmatpush.bf16.msrb.mxu0 %v14142_v51  ;;  %9615 = vmatpush.bf16.msrb.mxu1 %v14398_v21  ;;  %v15626_v27 = vld [vmem:[#allocation12 + $0x29c] sm:$0xf0]  ;;  %v14047_v21 = vld [vmem:[#allocation12 + $0x60] sm:$0xf0] }
 0x7ba   :  { %v15949_v28 = vpop.eup %15948  ;;  %v8711_v59 = vadd.f32 %v17539_v54, %v8710_v2  ;;  %v8754_v48 = vadd.f32 %v8599_v41, %v636_v40  ;;  %v694_v40 = vadd.f32 %v17831_v38, %v665_v24  ;;  %v15566_v2 = vld [vmem:[#allocation12 + $0xc4] sm:$0xf]  ;;  %v14334_v13 = vor.u32 %v15626_v27, %v14333_v50  ;;  %v14301_v51 = vld [vmem:[#allocation12 + $0x240] sm:$0xf] }
 0x7bb   :  { %v17577_v1 = vadd.f32 1.0, %v15949_v28  ;;  %v15951_v60 = vpop.eup %15950  ;;  %v14114_v16 = vor.u32 %v15566_v2, %v14111_v37  ;;  %v14077_v28 = vld [vmem:[#allocation12 + $0x80] sm:$0xf]  ;;  %v14303_v38 = vld [vmem:[#allocation12 + $0x260] sm:$0xf0] }
 0x7bc   :  { %v8715_v63 = vsel %vm8714_vm2, %v17539_v54, %v8711_v59  ;;  %v14008_v46 = vmul.f32 -1.442695, %v8754_v48  ;;  %v14143_v54 = vld [vmem:[#allocation12 + $0x120] sm:$0xf0]  ;;  %v14078_v5 = vor.u32 %v15562_v25, %v14077_v28  ;;  %9642 = vmatpush.bf16.msra.mxu3 %v14370_v3  ;;  %v15610_v14 = vld [vmem:[#allocation12 + $0x21c] sm:$0xf0] }
 0x7bd   :  { %v8720_v15 = vsel %vm17566_vm1, %v8719_v8, %v8715_v63  ;;  %15952 = vrcp.f32 %v17577_v1  ;;  %v14146_v17 = vor.u32 %v15574_v35, %v14143_v54  ;;  %v8743_v8 = vmul.f32 %v15951_v60, %v8701_v10  ;;  %9616 = vmatpush.bf16.msrb.mxu1 %v14366_v31  ;;  %v15558_v48 = vld [vmem:[#allocation12 + $0x84] sm:$0xf]  ;;  %v14045_v10 = vld [vmem:[#allocation12 + $0x40] sm:$0xf]  ;;  %v15603_v28 = vld [vmem:[#allocation12 + $0x1e4] sm:$0xf0] }
 0x7be   :  { %v8742_v22 = vmul.f32 %v8720_v15, %v17428_v32  ;;  %15954 = vpow2.f32 %v14008_v46  ;;  %v14110_v32 = vor.u32 %v15570_v58, %v14109_v43  ;;  %v8736_v59 = vand.u32 2147483647, %v17577_v1  ;;  %v14335_v15 = vld [vmem:[#allocation12 + $0x2a0] sm:$0xf0]  ;;  %v15554_v46 = vld [vmem:[#allocation12 + $0x5c] sm:$0xf0] }
 0x7bf   :  { %v8587_v36 = vpop.f32.mrf.mxu0  ;;  %v8600_v19 = vpop.f32.mrf.mxu1  ;;  %9628 = vmatpush.bf16.msrb.mxu2 %v14146_v17  ;;  %v8738_v26 = vand.u32 2147483648, %v17577_v1  ;;  %v14082_v55 = vor.u32 %v15558_v48, %v14079_v7  ;;  %v14338_v35 = vor.u32 %v15622_v47, %v14335_v15  ;;  %v15618_v54 = vld [vmem:[#allocation12 + $0x25c] sm:$0xf0]  ;;  %vm8732_vm5 = vweird.f32 %v17577_v1  ;;  %v15614_v17 = vld [vmem:[#allocation12 + $0x244] sm:$0xf] }
 0x7c0   :  { %v8611_v9 = vpop.f32.mrf.mxu2  ;;  %v8624_v23 = vpop.f32.mrf.mxu3  ;;  %v17591_v41 = vadd.f32 %v8743_v8, %v8742_v22  ;;  %9603 = vmatpush.bf16.msrb.mxu0 %v14110_v32  ;;  %v14046_v22 = vor.u32 %v15554_v46, %v14045_v10  ;;  %vm8737_vm7 = vcmp.eq.f32.partialorder %v8736_v59, 8.507059e+37  ;;  %v14306_v36 = vor.u32 %v15614_v17, %v14303_v38  ;;  %v14013_v19 = vld [vmem:[#allocation12] sm:$0xf]  ;;  %v15542_v2 = vld [vmem:[#allocation12 + $0x4] sm:$0xf] }
 0x7c1   :  { %v8625_v49 = vadd.f32 %v8624_v23, %v8611_v9  ;;  %9617 = vmatpush.bf16.msrb.mxu1 %v14334_v13  ;;  %v14302_v9 = vor.u32 %v15618_v54, %v14301_v51  ;;  %v15550_v23 = vld [vmem:[#allocation12 + $0x44] sm:$0xf]  ;;  %v8739_v45 = vor.u32 1.1754944e-38, %v8738_v26  ;;  %9643 = vmatpush.bf16.msra.mxu3 %v14338_v35  ;;  %v14269_v43 = vld [vmem:[#allocation12 + $0x200] sm:$0xf] }
 0x7c2   :  { %v14050_v11 = vor.u32 %v15550_v23, %v14047_v21  ;;  %v14270_v31 = vor.u32 %v15610_v14, %v14269_v43  ;;  %v14015_v37 = vld [vmem:[#allocation12 + $0x20] sm:$0xf0]  ;;  %v14501_v25 = vld [vmem:[#allocation12 + $0x3c8] sm:$0xf]  ;;  %v15599_v13 = vld [vmem:[#allocation12 + $0x1cc] sm:$0xf] }
 0x7c3   :  { %v8755_v53 = vadd.f32 %v8625_v49, %v694_v40  ;;  %v17589_v30 = vpop.eup %15952  ;;  %9629 = vmatpush.bf16.msrb.mxu2 %v14114_v16  ;;  %v14245_v16 = vld [vmem:[#allocation12 + $0x1c8] sm:$0xf]  ;;  %v14247_v48 = vld [vmem:[#allocation12 + $0x1e8] sm:$0xf0] }
 0x7c4   :  { %v8728_v39 = vmul.f32 %v17589_v30, %v17577_v1  ;;  %v15955_v52 = vpop.eup %15954  ;;  %vm8733_vm4 = vweird.f32 %v17589_v30  ;;  %9604 = vmatpush.bf16.msrb.mxu0 %v14078_v5  ;;  %v15546_v1 = vld [vmem:[#allocation12 + $0x1c] sm:$0xf0]  ;;  %v15667_v59 = vld [vmem:[#allocation12 + $0x3e4] sm:$0xf0]  ;;  %v17832_v5 = vld [vmem:[#allocation42_spill] sm:$0xff] }
 0x7c5   :  { %v14009_v20 = vmul.f32 -1.442695, %v8755_v53  ;;  %v17598_v24 = vadd.f32 1.0, %v15955_v52  ;;  %vm8734_vm6 = vmor %vm8732_vm5, %vm8733_vm4  ;;  %9618 = vmatpush.bf16.msrb.mxu1 %v14302_v9  ;;  %v14014_v0 = vor.u32 %v15546_v1, %v14013_v19  ;;  %9644 = vmatpush.bf16.msra.mxu3 %v14306_v36  ;;  %v723_v50 = vadd.f32 %v17832_v5, %v16428_v33  ;;  %v14503_v47 = vld [vmem:[#allocation12 + $0x3e8] sm:$0xf0] }
 0x7c6   :  { %v8729_v12 = vsub.f32 1.0, %v8728_v39  ;;  %v14274_v52 = vor.u32 %v15606_v42, %v14271_v6  ;;  %v14213_v33 = vld [vmem:[#allocation12 + $0x188] sm:$0xf]  ;;  %v15591_v23 = vld [vmem:[#allocation12 + $0x18c] sm:$0xf] }
 0x7c7   :  { %15956 = vpow2.f32 %v14009_v20  ;;  %9630 = vmatpush.bf16.msrb.mxu2 %v14082_v55  ;;  %v8773_v32 = vand.u32 2147483648, %v17598_v24  ;;  %v14018_v20 = vor.u32 %v15542_v2, %v14015_v37  ;;  %v8771_v27 = vand.u32 2147483647, %v17598_v24  ;;  %v15663_v55 = vld [vmem:[#allocation12 + $0x3cc] sm:$0xf] }
 0x7c8   :  { %15958 = vtanh.f32 %v17591_v41  ;;  %v8613_v63 = vpop.f32.mrf.mxu2  ;;  %v8626_v57 = vpop.f32.mrf.mxu3  ;;  %v8730_v29 = vmul.f32 %v17589_v30, %v8729_v12  ;;  %9605 = vmatpush.bf16.msrb.mxu0 %v14046_v22  ;;  %v14246_v12 = vor.u32 %v15603_v28, %v14245_v16  ;;  %v14506_v15 = vor.u32 %v15663_v55, %v14503_v47  ;;  %v14469_v35 = vld [vmem:[#allocation12 + $0x388] sm:$0xf]  ;;  %v14215_v21 = vld [vmem:[#allocation12 + $0x1a8] sm:$0xf0] }
 0x7c9   :  { %15960 = vrcp.f32 %v17598_v24  ;;  %9619 = vmatpush.bf16.msrb.mxu1 %v14270_v31  ;;  %v17619_v26 = vor.u32 1.1754944e-38, %v8773_v32  ;;  %v14502_v63 = vor.u32 %v15667_v59, %v14501_v25  ;;  %v14250_v57 = vor.u32 %v15599_v13, %v14247_v48  ;;  %9645 = vmatpush.bf16.msra.mxu3 %v14274_v52  ;;  %v15659_v10 = vld [vmem:[#allocation12 + $0x3a4] sm:$0xf0]  ;;  %v15655_v17 = vld [vmem:[#allocation12 + $0x38c] sm:$0xf] }
 0x7ca   :  { %v8731_v60 = vadd.f32 %v17589_v30, %v8730_v29  ;;  %v15595_v29 = vld [vmem:[#allocation12 + $0x1a4] sm:$0xf0]  ;;  %v14470_v9 = vor.u32 %v15659_v10, %v14469_v35  ;;  %vm8767_vm9 = vweird.f32 %v17598_v24  ;;  %v14218_v43 = vor.u32 %v15591_v23, %v14215_v21  ;;  %v15583_v42 = vld [vmem:[#allocation12 + $0x14c] sm:$0xf]  ;;  %v17841_v10 = vld [vmem:[#allocation45_spill] sm:$0xff] }
 0x7cb   :  { %9631 = vmatpush.bf16.msrb.mxu2 %v14050_v11  ;;  %v14214_v22 = vor.u32 %v15595_v29, %v14213_v33  ;;  %v14181_v36 = vld [vmem:[#allocation12 + $0x148] sm:$0xf]  ;;  %v14183_v6 = vld [vmem:[#allocation12 + $0x168] sm:$0xf0]  ;;  %vm8772_vm15 = vcmp.eq.f32.partialorder %v8771_v27, 8.507059e+37 }
 0x7cc   :  { %v8735_v49 = vsel %vm8734_vm6, %v17589_v30, %v8731_v60  ;;  %9606 = vmatpush.bf16.msrb.mxu0 %v14014_v0  ;;  %v15587_v19 = vld [vmem:[#allocation12 + $0x164] sm:$0xf0]  ;;  %v15647_v28 = vld [vmem:[#allocation12 + $0x34c] sm:$0xf] }
 0x7cd   :  { %v15957_v40 = vpop.eup %15956  ;;  %v8740_v8 = vsel %vm8737_vm7, %v8739_v45, %v8735_v49  ;;  %9664 = vmatpush.bf16.msra.mxu1 %v14502_v63  ;;  %v17833_v45 = vld [vmem:[#allocation43_spill] sm:$0xff]  ;;  %9690 = vmatpush.bf16.msrb.mxu3 %v14506_v15  ;;  %v14471_v49 = vld [vmem:[#allocation12 + $0x3a8] sm:$0xf0]  ;;  %v14437_v32 = vld [vmem:[#allocation12 + $0x348] sm:$0xf] }
 0x7ce   :  { %v15959_v58 = vpop.eup %15958  ;;  %v17608_v56 = vadd.f32 1.0, %v15957_v40  ;;  %v752_v11 = vadd.f32 %v17833_v45, %v723_v50  ;;  %v15651_v0 = vld [vmem:[#allocation12 + $0x364] sm:$0xf0]  ;;  %v14439_v25 = vld [vmem:[#allocation12 + $0x368] sm:$0xf0] }
 0x7cf   :  { %v8746_v53 = vmul.f32 %v15959_v58, %v8740_v8  ;;  %v17611_v30 = vpop.eup %15960  ;;  %9632 = vmatpush.bf16.msrb.mxu2 %v14018_v20  ;;  %v14474_v58 = vor.u32 %v15655_v17, %v14471_v49  ;;  %v14182_v8 = vor.u32 %v15587_v19, %v14181_v36  ;;  %v14438_v37 = vor.u32 %v15651_v0, %v14437_v32  ;;  %v17836_v16 = vld [vmem:[#allocation44_spill] sm:$0xff] }
 0x7d0   :  { %15962 = vrcp.f32 %v17608_v56  ;;  %v8763_v39 = vmul.f32 %v17611_v30, %v17598_v24  ;;  %9651 = vmatpush.bf16.msra.mxu0 %v14246_v12  ;;  %vm8768_vm8 = vweird.f32 %v17611_v30  ;;  %v8790_v1 = vand.u32 2147483647, %v17608_v56  ;;  %v14149_v59 = vld [vmem:[#allocation12 + $0x108] sm:$0xf]  ;;  %v15575_v48 = vld [vmem:[#allocation12 + $0x10c] sm:$0xf] }
 0x7d1   :  { %v8747_v3 = vpack.c.bf16 %v8746_v53, %v8746_v53  ;;  %v8792_v2 = vand.u32 2147483648, %v17608_v56  ;;  %vm17635_vm10 = vmor %vm8767_vm9, %vm8768_vm8  ;;  %9665 = vmatpush.bf16.msra.mxu1 %v14470_v9  ;;  %v14186_v20 = vor.u32 %v15583_v42, %v14183_v6  ;;  %9691 = vmatpush.bf16.msrb.mxu3 %v14474_v58  ;;  %v14442_v50 = vor.u32 %v15647_v28, %v14439_v25  ;;  %v15579_v52 = vld [vmem:[#allocation12 + $0x124] sm:$0xf0]  ;;  %v15639_v63 = vld [vmem:[#allocation12 + $0x30c] sm:$0xf] }
 0x7d2   :  { %v8764_v7 = vsub.f32 1.0, %v8763_v39  ;;  %v14405_v12 = vld [vmem:[#allocation12 + $0x308] sm:$0xf]  ;;  %vm8786_vm12 = vweird.f32 %v17608_v56  ;;  %vm17652_vm14 = vcmp.eq.f32.partialorder %v8790_v1, 8.507059e+37  ;;  %v14407_v35 = vld [vmem:[#allocation12 + $0x328] sm:$0xf0] }
 0x7d3   :  { %8749 = vst [vmem:[#allocation6 + $0x18] sm:$0xf] %v8747_v3  ;;  %9677 = vmatpush.bf16.msra.mxu2 %v14250_v57  ;;  %v15643_v13 = vld [vmem:[#allocation12 + $0x324] sm:$0xf0]  ;;  %v8793_v55 = vor.u32 1.1754944e-38, %v8792_v2 }
 0x7d4   :  { %8748 = vst [vmem:[#allocation3 + $0x4] sm:$0xf] %v8747_v3  ;;  %v8765_v60 = vmul.f32 %v17611_v30, %v8764_v7  ;;  %9652 = vmatpush.bf16.msra.mxu0 %v14214_v22  ;;  %v781_v3 = vadd.f32 %v17836_v16, %v16431_v34  ;;  %v14150_v34 = vor.u32 %v15579_v52, %v14149_v59  ;;  %v14151_v7 = vld [vmem:[#allocation12 + $0x128] sm:$0xf0]  ;;  %v14117_v21 = vld [vmem:[#allocation12 + $0xc8] sm:$0xf] }
 0x7d5   :  { %9666 = vmatpush.bf16.msra.mxu1 %v14438_v37  ;;  %v14406_v29 = vor.u32 %v15643_v13, %v14405_v12  ;;  %v14154_v23 = vor.u32 %v15575_v48, %v14151_v7  ;;  %v15571_v17 = vld [vmem:[#allocation12 + $0xe4] sm:$0xf0]  ;;  %9692 = vmatpush.bf16.msrb.mxu3 %v14442_v50  ;;  %v15567_v49 = vld [vmem:[#allocation12 + $0xcc] sm:$0xf] }
 0x7d6   :  { %v17621_v46 = vpop.eup %15962  ;;  %v8766_v39 = vadd.f32 %v17611_v30, %v8765_v60  ;;  %v14373_v45 = vld [vmem:[#allocation12 + $0x2c8] sm:$0xf]  ;;  %v14119_v36 = vld [vmem:[#allocation12 + $0xe8] sm:$0xf0]  ;;  %v14118_v1 = vor.u32 %v15571_v17, %v14117_v21 }
 0x7d7   :  { %v8637_v51 = vpop.f32.mrf.mxu0  ;;  %v8650_v54 = vpop.f32.mrf.mxu1  ;;  %v8782_v38 = vmul.f32 %v17621_v46, %v17608_v56  ;;  %vm8787_vm11 = vweird.f32 %v17621_v46  ;;  %9678 = vmatpush.bf16.msra.mxu2 %v14218_v43  ;;  %v15631_v43 = vld [vmem:[#allocation12 + $0x2cc] sm:$0xf]  ;;  %v14122_v24 = vor.u32 %v15567_v49, %v14119_v36  ;;  %v14085_v27 = vld [vmem:[#allocation12 + $0x88] sm:$0xf] }
 0x7d8   :  { %v8651_v40 = vadd.f32 %v8650_v54, %v8637_v51  ;;  %9653 = vmatpush.bf16.msra.mxu0 %v14182_v8  ;;  %vm17647_vm13 = vmor %vm8786_vm12, %vm8787_vm11  ;;  %v810_v51 = vadd.f32 %v17841_v10, %v781_v3  ;;  %v8770_v54 = vsel %vm17635_vm10, %v17611_v30, %v8766_v39  ;;  %v14375_v58 = vld [vmem:[#allocation12 + $0x2e8] sm:$0xf0]  ;;  %v14341_v37 = vld [vmem:[#allocation12 + $0x288] sm:$0xf] }
 0x7d9   :  { %v8783_v14 = vsub.f32 1.0, %v8782_v38  ;;  %v14410_v38 = vor.u32 %v15639_v63, %v14407_v35  ;;  %v8775_v32 = vsel %vm8772_vm15, %v17619_v26, %v8770_v54  ;;  %9667 = vmatpush.bf16.msra.mxu1 %v14406_v29  ;;  %v14378_v31 = vor.u32 %v15631_v43, %v14375_v58  ;;  %v15627_v42 = vld [vmem:[#allocation12 + $0x2a4] sm:$0xf0]  ;;  %v15559_v6 = vld [vmem:[#allocation12 + $0x8c] sm:$0xf] }
 0x7da   :  { %v8756_v53 = vadd.f32 %v8651_v40, %v752_v11  ;;  %v15635_v40 = vld [vmem:[#allocation12 + $0x2e4] sm:$0xf0]  ;;  %v14087_v26 = vld [vmem:[#allocation12 + $0xa8] sm:$0xf0]  ;;  %v14342_v25 = vor.u32 %v15627_v42, %v14341_v37  ;;  %v14255_v42 = vld [vmem:[#allocation12 + $0x1f0] sm:$0xf0] }
 0x7db   :  { %v8784_v5 = vmul.f32 %v17621_v46, %v8783_v14  ;;  %9679 = vmatpush.bf16.msra.mxu2 %v14186_v20  ;;  %v14374_v0 = vor.u32 %v15635_v40, %v14373_v45  ;;  %9693 = vmatpush.bf16.msrb.mxu3 %v14410_v38  ;;  %v15623_v39 = vld [vmem:[#allocation12 + $0x28c] sm:$0xf]  ;;  %v14053_v59 = vld [vmem:[#allocation12 + $0x48] sm:$0xf]  ;;  %v14090_v50 = vor.u32 %v15559_v6, %v14087_v26  ;;  %v15664_v6 = vld [vmem:[#allocation12 + $0x3d4] sm:$0xf] }
 0x7dc   :  { %15964 = vtanh.f32 %v8756_v53  ;;  %9654 = vmatpush.bf16.msra.mxu0 %v14150_v34  ;;  %v15563_v53 = vld [vmem:[#allocation12 + $0xa4] sm:$0xf0]  ;;  %v15551_v34 = vld [vmem:[#allocation12 + $0x4c] sm:$0xf] }
 0x7dd   :  { %v8785_v47 = vadd.f32 %v17621_v46, %v8784_v5  ;;  %v14086_v3 = vor.u32 %v15563_v53, %v14085_v27  ;;  %9668 = vmatpush.bf16.msra.mxu1 %v14374_v0  ;;  %v15555_v5 = vld [vmem:[#allocation12 + $0x64] sm:$0xf0]  ;;  %v14055_v48 = vld [vmem:[#allocation12 + $0x68] sm:$0xf0]  ;;  %v14253_v0 = vld [vmem:[#allocation12 + $0x1d0] sm:$0xf] }
 0x7de   :  { %v8663_v15 = vpop.f32.mrf.mxu2  ;;  %v8676_v56 = vpop.f32.mrf.mxu3  ;;  %v14309_v52 = vld [vmem:[#allocation12 + $0x248] sm:$0xf]  ;;  %v14054_v7 = vor.u32 %v15555_v5, %v14053_v59  ;;  %v15615_v63 = vld [vmem:[#allocation12 + $0x24c] sm:$0xf]  ;;  %v15668_v27 = vld [vmem:[#allocation12 + $0x3ec] sm:$0xf0] }
 0x7df   :  { %v8677_v60 = vadd.f32 %v8676_v56, %v8663_v15  ;;  %v8639_v22 = vpop.f32.mrf.mxu0  ;;  %v8652_v9 = vpop.f32.mrf.mxu1  ;;  %v8789_v11 = vsel %vm17647_vm13, %v17621_v46, %v8785_v47  ;;  %9680 = vmatpush.bf16.msra.mxu2 %v14154_v23  ;;  %v15619_v12 = vld [vmem:[#allocation12 + $0x264] sm:$0xf0]  ;;  %9694 = vmatpush.bf16.msrb.mxu3 %v14378_v31  ;;  %v14311_v57 = vld [vmem:[#allocation12 + $0x268] sm:$0xf0]  ;;  %v14058_v56 = vor.u32 %v15551_v34, %v14055_v48  ;;  %v15600_v53 = vld [vmem:[#allocation12 + $0x1d4] sm:$0xf] }
 0x7e0   :  { %v8794_v30 = vsel %vm17652_vm14, %v8793_v55, %v8789_v11  ;;  %9655 = vmatpush.bf16.msra.mxu0 %v14118_v1  ;;  %v14310_v55 = vor.u32 %v15619_v12, %v14309_v52  ;;  %v14021_v47 = vld [vmem:[#allocation12 + $0x8] sm:$0xf]  ;;  %v15543_v54 = vld [vmem:[#allocation12 + $0xc] sm:$0xf]  ;;  %v14477_v5 = vld [vmem:[#allocation12 + $0x390] sm:$0xf] }
 0x7e1   :  { %v8757_v19 = vadd.f32 %v8677_v60, %v810_v51  ;;  %v8816_v46 = vmul.f32 %v8794_v30, %v17502_v62  ;;  %v14343_v62 = vld [vmem:[#allocation12 + $0x2a8] sm:$0xf0]  ;;  %9669 = vmatpush.bf16.msra.mxu1 %v14342_v25  ;;  %v15547_v33 = vld [vmem:[#allocation12 + $0x24] sm:$0xf0]  ;;  %v14314_v51 = vor.u32 %v15615_v63, %v14311_v57  ;;  %v14258_v25 = vor.u32 %v15600_v53, %v14255_v42  ;;  %v15592_v52 = vld [vmem:[#allocation12 + $0x194] sm:$0xf] }
 0x7e2   :  { %v15965_v8 = vpop.eup %15964  ;;  %v14346_v13 = vor.u32 %v15623_v39, %v14343_v62  ;;  %v14277_v29 = vld [vmem:[#allocation12 + $0x208] sm:$0xf]  ;;  %v14023_v60 = vld [vmem:[#allocation12 + $0x28] sm:$0xf0]  ;;  %v14022_v22 = vor.u32 %v15547_v33, %v14021_v47  ;;  %v14223_v12 = vld [vmem:[#allocation12 + $0x1b0] sm:$0xf0] }
 0x7e3   :  { %v8817_v14 = vmul.f32 %v15965_v8, %v8775_v32  ;;  %v14010_v2 = vmul.f32 -1.442695, %v8757_v19  ;;  %9681 = vmatpush.bf16.msra.mxu2 %v14122_v24  ;;  %v15611_v35 = vld [vmem:[#allocation12 + $0x224] sm:$0xf0]  ;;  %v15607_v9 = vld [vmem:[#allocation12 + $0x20c] sm:$0xf]  ;;  %v14026_v17 = vor.u32 %v15543_v54, %v14023_v60 }
 0x7e4   :  { %9656 = vmatpush.bf16.msra.mxu0 %v14086_v3  ;;  %9695 = vmatpush.bf16.msrb.mxu3 %v14346_v13  ;;  %v14279_v23 = vld [vmem:[#allocation12 + $0x228] sm:$0xf0]  ;;  %v14278_v21 = vor.u32 %v15611_v35, %v14277_v29  ;;  %v15656_v13 = vld [vmem:[#allocation12 + $0x394] sm:$0xf]  ;;  %v14189_v63 = vld [vmem:[#allocation12 + $0x150] sm:$0xf] }
 0x7e5   :  { %v8818_v16 = vadd.f32 %v8817_v14, %v8816_v46  ;;  %15966 = vpow2.f32 %v14010_v2  ;;  %9670 = vmatpush.bf16.msra.mxu1 %v14310_v55  ;;  %v14282_v45 = vor.u32 %v15607_v9, %v14279_v23  ;;  %v15604_v14 = vld [vmem:[#allocation12 + $0x1ec] sm:$0xf0]  ;;  %v14479_v34 = vld [vmem:[#allocation12 + $0x3b0] sm:$0xf0]  ;;  %v14226_v55 = vor.u32 %v15592_v52, %v14223_v12 }
 0x7e6   :  { %v8665_v20 = vpop.f32.mrf.mxu2  ;;  %v8678_v28 = vpop.f32.mrf.mxu3  ;;  %v14509_v2 = vld [vmem:[#allocation12 + $0x3d0] sm:$0xf]  ;;  %v14254_v39 = vor.u32 %v15604_v14, %v14253_v0  ;;  %v14482_v47 = vor.u32 %v15656_v13, %v14479_v34  ;;  %v14191_v29 = vld [vmem:[#allocation12 + $0x170] sm:$0xf0] }
 0x7e7   :  { %9889 = vst [vmem:[#allocation21] sm:$0xff] %v8818_v16  ;;  %9682 = vmatpush.bf16.msra.mxu2 %v14090_v50  ;;  %v14510_v62 = vor.u32 %v15668_v27, %v14509_v2  ;;  %v14221_v20 = vld [vmem:[#allocation12 + $0x190] sm:$0xf]  ;;  %v15648_v35 = vld [vmem:[#allocation12 + $0x354] sm:$0xf] }
 0x7e8   :  { %9657 = vmatpush.bf16.msra.mxu0 %v14054_v7  ;;  %9696 = vmatpush.bf16.msrb.mxu3 %v14314_v51  ;;  %v15596_v28 = vld [vmem:[#allocation12 + $0x1ac] sm:$0xf0]  ;;  %v15632_v0 = vld [vmem:[#allocation12 + $0x2d4] sm:$0xf] }
 0x7e9   :  { %9671 = vmatpush.bf16.msra.mxu1 %v14278_v21  ;;  %v15660_v50 = vld [vmem:[#allocation12 + $0x3ac] sm:$0xf0]  ;;  %v14222_v48 = vor.u32 %v15596_v28, %v14221_v20  ;;  %v14383_v14 = vld [vmem:[#allocation12 + $0x2f0] sm:$0xf0] }
 0x7ea   :  { %v14478_v7 = vor.u32 %v15660_v50, %v14477_v5  ;;  %v15588_v57 = vld [vmem:[#allocation12 + $0x16c] sm:$0xf0]  ;;  %v14351_v20 = vld [vmem:[#allocation12 + $0x2b0] sm:$0xf0] }
 0x7eb   :  { %v15967_v15 = vpop.eup %15966  ;;  %9683 = vmatpush.bf16.msra.mxu2 %v14058_v56  ;;  %v14445_v33 = vld [vmem:[#allocation12 + $0x350] sm:$0xf]  ;;  %v15584_v56 = vld [vmem:[#allocation12 + $0x154] sm:$0xf]  ;;  %v14190_v51 = vor.u32 %v15588_v57, %v14189_v63 }
 0x7ec   :  { %v8800_v10 = vadd.f32 1.0, %v15967_v15  ;;  %9658 = vmatpush.bf16.msra.mxu0 %v14022_v22  ;;  %9697 = vmatpush.bf16.msrb.mxu3 %v14282_v45  ;;  %v15652_v15 = vld [vmem:[#allocation12 + $0x36c] sm:$0xf0]  ;;  %v14194_v9 = vor.u32 %v15584_v56, %v14191_v29  ;;  %v15576_v45 = vld [vmem:[#allocation12 + $0x114] sm:$0xf] }
 0x7ed   :  { %v14446_v54 = vor.u32 %v15652_v15, %v14445_v33  ;;  %v14157_v60 = vld [vmem:[#allocation12 + $0x110] sm:$0xf]  ;;  %v15552_v34 = vld [vmem:[#allocation12 + $0x54] sm:$0xf] }
 0x7ee   :  { %15968 = vrcp.f32 %v8800_v10  ;;  %v8812_v49 = vand.u32 2147483648, %v8800_v10  ;;  %v8810_v30 = vand.u32 2147483647, %v8800_v10  ;;  %vm8806_vm1 = vweird.f32 %v8800_v10  ;;  %v15580_v22 = vld [vmem:[#allocation12 + $0x12c] sm:$0xf0] }
 0x7ef   :  { %9684 = vmatpush.bf16.msra.mxu2 %v14026_v17  ;;  %15970 = vtanh.f32 %v8818_v16  ;;  %v14511_v16 = vld [vmem:[#allocation12 + $0x3f0] sm:$0xf0]  ;;  %v14413_v21 = vld [vmem:[#allocation12 + $0x310] sm:$0xf] }
 0x7f0   :  { %v8813_v1 = vor.u32 1.1754944e-38, %v8812_v49  ;;  %vm8811_vm3 = vcmp.eq.f32.partialorder %v8810_v30, 8.507059e+37  ;;  %v14514_v59 = vor.u32 %v15664_v6, %v14511_v16  ;;  %v15644_v17 = vld [vmem:[#allocation12 + $0x32c] sm:$0xf0]  ;;  %v14158_v49 = vor.u32 %v15580_v22, %v14157_v60  ;;  %v15560_v16 = vld [vmem:[#allocation12 + $0x94] sm:$0xf] }
 0x7f1   :  { %v14125_v30 = vld [vmem:[#allocation12 + $0xd0] sm:$0xf]  ;;  %v14319_v63 = vld [vmem:[#allocation12 + $0x270] sm:$0xf0]  ;;  %v14261_v22 = vld [vmem:[#allocation12 + $0x1d8] sm:$0xf] }
 0x7f2   :  { %v14093_v27 = vld [vmem:[#allocation12 + $0x90] sm:$0xf]  ;;  %v14287_v60 = vld [vmem:[#allocation12 + $0x230] sm:$0xf0] }
 0x7f3   :  { %v15564_v53 = vld [vmem:[#allocation12 + $0xac] sm:$0xf0] }
 0x7f4   :  { %v15969_v11 = vpop.eup %15968  ;;  %v14349_v42 = vld [vmem:[#allocation12 + $0x290] sm:$0xf]  ;;  %v14094_v28 = vor.u32 %v15564_v53, %v14093_v27  ;;  %v14487_v27 = vld [vmem:[#allocation12 + $0x3b8] sm:$0xf0] }
 0x7f5   :  { %v8802_v38 = vmul.f32 %v15969_v11, %v8800_v10  ;;  %vm8807_vm0 = vweird.f32 %v15969_v11  ;;  %v15971_v58 = vpop.eup %15970  ;;  %v14447_v10 = vld [vmem:[#allocation12 + $0x370] sm:$0xf0]  ;;  %v15628_v6 = vld [vmem:[#allocation12 + $0x2ac] sm:$0xf0] }
 0x7f6   :  { %vm8808_vm2 = vmor %vm8806_vm1, %vm8807_vm0  ;;  %v14450_v23 = vor.u32 %v15648_v35, %v14447_v10  ;;  %v15556_v5 = vld [vmem:[#allocation12 + $0x6c] sm:$0xf0]  ;;  %v15544_v10 = vld [vmem:[#allocation12 + $0x14] sm:$0xf] }
 0x7f7   :  { %v8803_v40 = vsub.f32 1.0, %v8802_v38  ;;  %v15640_v38 = vld [vmem:[#allocation12 + $0x314] sm:$0xf]  ;;  %v14317_v12 = vld [vmem:[#allocation12 + $0x250] sm:$0xf] }
 0x7f8   :  { %v15620_v13 = vld [vmem:[#allocation12 + $0x26c] sm:$0xf0] }
 0x7f9   :  { %v8804_v36 = vmul.f32 %v15969_v11, %v8803_v40  ;;  %v14415_v40 = vld [vmem:[#allocation12 + $0x330] sm:$0xf0]  ;;  %v14029_v57 = vld [vmem:[#allocation12 + $0x10] sm:$0xf] }
 0x7fa   :  { %v15548_v33 = vld [vmem:[#allocation12 + $0x2c] sm:$0xf0] }
 0x7fb   :  { %v8805_v19 = vadd.f32 %v15969_v11, %v8804_v36  ;;  %v14414_v36 = vor.u32 %v15644_v17, %v14413_v21  ;;  %v14285_v15 = vld [vmem:[#allocation12 + $0x210] sm:$0xf]  ;;  %v15669_v21 = vld [vmem:[#allocation12 + $0x3f4] sm:$0xf0]  ;;  %v15601_v17 = vld [vmem:[#allocation12 + $0x1dc] sm:$0xf] }
 0x7fc   :  { %v15612_v56 = vld [vmem:[#allocation12 + $0x22c] sm:$0xf0] }
 0x7fd   :  { %v8809_v43 = vsel %vm8808_vm2, %v15969_v11, %v8805_v19  ;;  %v14159_v11 = vld [vmem:[#allocation12 + $0x130] sm:$0xf0]  ;;  %v15572_v19 = vld [vmem:[#allocation12 + $0xec] sm:$0xf0] }
 0x7fe   :  { %v8814_v8 = vsel %vm8811_vm3, %v8813_v1, %v8809_v43  ;;  %v14162_v1 = vor.u32 %v15576_v45, %v14159_v11  ;;  %v14418_v43 = vor.u32 %v15640_v38, %v14415_v40  ;;  %v14126_v2 = vor.u32 %v15572_v19, %v14125_v30  ;;  %v14263_v38 = vld [vmem:[#allocation12 + $0x1f8] sm:$0xf0] }
 0x7ff   :  { %v8820_v32 = vmul.f32 %v15971_v58, %v8814_v8  ;;  %v14381_v58 = vld [vmem:[#allocation12 + $0x2d0] sm:$0xf]  ;;  %v14030_v45 = vor.u32 %v15548_v33, %v14029_v57  ;;  %v14286_v11 = vor.u32 %v15612_v56, %v14285_v15  ;;  %v15665_v40 = vld [vmem:[#allocation12 + $0x3dc] sm:$0xf]  ;;  %v14133_v56 = vld [vmem:[#allocation12 + $0xd8] sm:$0xf] }
 0x800   :  { %v15636_v8 = vld [vmem:[#allocation12 + $0x2ec] sm:$0xf0]  ;;  %v14167_v57 = vld [vmem:[#allocation12 + $0x138] sm:$0xf0] }
 0x801   :  { %v8821_v46 = vpack.c.bf16 %v8820_v32, %v8820_v32  ;;  %9886 = vst [vmem:[#allocation19] sm:$0xff] %v8820_v32  ;;  %v15568_v32 = vld [vmem:[#allocation12 + $0xd4] sm:$0xf] }
 0x803   :  { %8822 = vst [vmem:[#allocation3] sm:$0xf] %v8821_v46  ;;  %v14127_v46 = vld [vmem:[#allocation12 + $0xf0] sm:$0xf0] }
 0x80a   :  { %v8823_v24 = vld [vmem:[#allocation3] sm:$0xff] }
 0x80b   :  { %v8953_v31 = vunpack.c.l.b16 %v8823_v24  ;;  %v8954_v37 = vunpack.c.h.b16 %v8823_v24  ;;  %v14382_v24 = vor.u32 %v15636_v8, %v14381_v58  ;;  %v15597_v58 = vld [vmem:[#allocation12 + $0x1b4] sm:$0xf0]  ;;  %v14266_v8 = vor.u32 %v15601_v17, %v14263_v38 }
 0x80d   :  { %v17669_v3 = vpack.c.b16 %v8953_v31, %v8953_v31  ;;  %v17671_v26 = vpack.c.b16 %v8954_v37, %v8954_v37  ;;  %v14130_v31 = vor.u32 %v15568_v32, %v14127_v46  ;;  %v14386_v37 = vor.u32 %v15632_v0, %v14383_v14  ;;  %v14485_v46 = vld [vmem:[#allocation12 + $0x398] sm:$0xf]  ;;  %v15593_v14 = vld [vmem:[#allocation12 + $0x19c] sm:$0xf] }
 0x80e   :  { %v15661_v0 = vld [vmem:[#allocation12 + $0x3b4] sm:$0xf0] }
 0x80f   :  { %9607 = vmatmul.bf16.vlgmr.msrb.gmra.mxu0 %v17669_v3  ;;  %9620 = vmatmul.bf16.vlgmr.msrb.gmra.mxu1 %v17671_v26 }
 0x810   :  { %9633 = vmatmul.bf16.vlgmr.msrb.gmra.mxu2 %v17669_v3  ;;  %9646 = vmatmul.bf16.vlgmr.msra.gmra.mxu3 %v17671_v26 }
 0x811   :  { %9703 = vmatpush.bf16.msrb.mxu0 %v14254_v39  ;;  %9716 = vmatpush.bf16.msrb.mxu1 %v14510_v62  ;;  %v14095_v39 = vld [vmem:[#allocation12 + $0xb0] sm:$0xf0] }
 0x812   :  { %9729 = vmatpush.bf16.msrb.mxu2 %v14258_v25  ;;  %9742 = vmatpush.bf16.msra.mxu3 %v14514_v59  ;;  %v15624_v62 = vld [vmem:[#allocation12 + $0x294] sm:$0xf]  ;;  %v14350_v25 = vor.u32 %v15628_v6, %v14349_v42  ;;  %v14061_v59 = vld [vmem:[#allocation12 + $0x50] sm:$0xf]  ;;  %v14098_v50 = vor.u32 %v15560_v16, %v14095_v39  ;;  %v15589_v42 = vld [vmem:[#allocation12 + $0x174] sm:$0xf0] }
 0x813   :  { %v14354_v52 = vor.u32 %v15624_v62, %v14351_v20  ;;  %v14453_v39 = vld [vmem:[#allocation12 + $0x358] sm:$0xf]  ;;  %v15585_v20 = vld [vmem:[#allocation12 + $0x15c] sm:$0xf] }
 0x814   :  { %v15653_v62 = vld [vmem:[#allocation12 + $0x374] sm:$0xf0] }
 0x815   :  { %9704 = vmatpush.bf16.msrb.mxu0 %v14222_v48  ;;  %9717 = vmatpush.bf16.msrb.mxu1 %v14478_v7  ;;  %v14063_v48 = vld [vmem:[#allocation12 + $0x70] sm:$0xf0] }
 0x816   :  { %9730 = vmatpush.bf16.msrb.mxu2 %v14226_v55  ;;  %9743 = vmatpush.bf16.msra.mxu3 %v14482_v47  ;;  %v15616_v7 = vld [vmem:[#allocation12 + $0x254] sm:$0xf]  ;;  %v14062_v55 = vor.u32 %v15556_v5, %v14061_v59  ;;  %v14318_v47 = vor.u32 %v15620_v13, %v14317_v12  ;;  %v14066_v29 = vor.u32 %v15552_v34, %v14063_v48  ;;  %v14455_v59 = vld [vmem:[#allocation12 + $0x378] sm:$0xf0]  ;;  %v15581_v12 = vld [vmem:[#allocation12 + $0x134] sm:$0xf0] }
 0x817   :  { %v14322_v35 = vor.u32 %v15616_v7, %v14319_v63  ;;  %v14421_v48 = vld [vmem:[#allocation12 + $0x318] sm:$0xf]  ;;  %v15577_v63 = vld [vmem:[#allocation12 + $0x11c] sm:$0xf] }
 0x818   :  { %v15645_v7 = vld [vmem:[#allocation12 + $0x334] sm:$0xf0] }
 0x819   :  { %9705 = vmatpush.bf16.msrb.mxu0 %v14190_v51  ;;  %9718 = vmatpush.bf16.msrb.mxu1 %v14446_v54  ;;  %v14031_v51 = vld [vmem:[#allocation12 + $0x30] sm:$0xf0]  ;;  %v14422_v15 = vor.u32 %v15645_v7, %v14421_v48  ;;  %v15681_v7 = vld [vmem:[#allocation16 + $0x38] sm:$0xff] }
 0x81a   :  { %9731 = vmatpush.bf16.msrb.mxu2 %v14194_v9  ;;  %9744 = vmatpush.bf16.msra.mxu3 %v14450_v23  ;;  %v15608_v54 = vld [vmem:[#allocation12 + $0x214] sm:$0xf]  ;;  %v15605_v9 = vld [vmem:[#allocation12 + $0x1f4] sm:$0xf0] }
 0x81b   :  { %v14517_v23 = vld [vmem:[#allocation12 + $0x3d8] sm:$0xf]  ;;  %v14290_v30 = vor.u32 %v15608_v54, %v14287_v60  ;;  %v14262_v19 = vor.u32 %v15605_v9, %v14261_v22  ;;  %v15569_v60 = vld [vmem:[#allocation12 + $0xdc] sm:$0xf] }
 0x81c   :  { %v15637_v54 = vld [vmem:[#allocation12 + $0x2f4] sm:$0xf0]  ;;  %v14135_v22 = vld [vmem:[#allocation12 + $0xf8] sm:$0xf0] }
 0x81d   :  { %9706 = vmatpush.bf16.msrb.mxu0 %v14158_v49  ;;  %9719 = vmatpush.bf16.msrb.mxu1 %v14414_v36  ;;  %v14519_v49 = vld [vmem:[#allocation12 + $0x3f8] sm:$0xf0]  ;;  %v14034_v36 = vor.u32 %v15544_v10, %v14031_v51  ;;  %v14389_v51 = vld [vmem:[#allocation12 + $0x2d8] sm:$0xf]  ;;  %v14138_v38 = vor.u32 %v15569_v60, %v14135_v22 }
 0x81e   :  { %9732 = vmatpush.bf16.msrb.mxu2 %v14162_v1  ;;  %9745 = vmatpush.bf16.msra.mxu3 %v14418_v43  ;;  %v14518_v1 = vor.u32 %v15669_v21, %v14517_v23  ;;  %v14229_v43 = vld [vmem:[#allocation12 + $0x198] sm:$0xf]  ;;  %v14522_v32 = vor.u32 %v15665_v40, %v14519_v49  ;;  %v15633_v9 = vld [vmem:[#allocation12 + $0x2dc] sm:$0xf]  ;;  %v14390_v17 = vor.u32 %v15637_v54, %v14389_v51 }
 0x81f   :  { %9659 = vmatmul.bf16.vlgmr.msra.gmra.mxu0 %v17669_v3  ;;  %9672 = vmatmul.bf16.vlgmr.msra.gmra.mxu1 %v17671_v26  ;;  %v14230_v53 = vor.u32 %v15597_v58, %v14229_v43  ;;  %v14391_v23 = vld [vmem:[#allocation12 + $0x2f8] sm:$0xf0]  ;;  %v14357_v49 = vld [vmem:[#allocation12 + $0x298] sm:$0xf] }
 0x820   :  { %9685 = vmatmul.bf16.vlgmr.msra.gmra.mxu2 %v17669_v3  ;;  %9698 = vmatmul.bf16.vlgmr.msrb.gmra.mxu3 %v17671_v26  ;;  %v14394_v40 = vor.u32 %v15633_v9, %v14391_v23  ;;  %v14359_v43 = vld [vmem:[#allocation12 + $0x2b8] sm:$0xf0] }
 0x821   :  { %9707 = vmatpush.bf16.msrb.mxu0 %v14126_v2  ;;  %9720 = vmatpush.bf16.msrb.mxu1 %v14382_v24  ;;  %v14231_v2 = vld [vmem:[#allocation12 + $0x1b8] sm:$0xf0] }
 0x822   :  { %9733 = vmatpush.bf16.msrb.mxu2 %v14130_v31  ;;  %9746 = vmatpush.bf16.msra.mxu3 %v14386_v37  ;;  %v15657_v24 = vld [vmem:[#allocation12 + $0x39c] sm:$0xf]  ;;  %v14486_v31 = vor.u32 %v15661_v0, %v14485_v46  ;;  %v14197_v37 = vld [vmem:[#allocation12 + $0x158] sm:$0xf]  ;;  %v14234_v6 = vor.u32 %v15593_v14, %v14231_v2 }
 0x823   :  { %v14490_v16 = vor.u32 %v15657_v24, %v14487_v27  ;;  %v14198_v5 = vor.u32 %v15589_v42, %v14197_v37  ;;  %v15557_v46 = vld [vmem:[#allocation12 + $0x74] sm:$0xf0]  ;;  %v15553_v27 = vld [vmem:[#allocation12 + $0x5c] sm:$0xf] }
 0x824   :  { %v14325_v2 = vld [vmem:[#allocation12 + $0x258] sm:$0xf]  ;;  %v14327_v37 = vld [vmem:[#allocation12 + $0x278] sm:$0xf0] }
 0x825   :  { %9708 = vmatpush.bf16.msrb.mxu0 %v14094_v28  ;;  %9721 = vmatpush.bf16.msrb.mxu1 %v14350_v25  ;;  %v14199_v28 = vld [vmem:[#allocation12 + $0x178] sm:$0xf0]  ;;  %v15621_v24 = vld [vmem:[#allocation12 + $0x274] sm:$0xf0] }
 0x826   :  { %9734 = vmatpush.bf16.msrb.mxu2 %v14098_v50  ;;  %9747 = vmatpush.bf16.msra.mxu3 %v14354_v52  ;;  %v15649_v25 = vld [vmem:[#allocation12 + $0x35c] sm:$0xf]  ;;  %v14454_v50 = vor.u32 %v15653_v62, %v14453_v39  ;;  %v14165_v52 = vld [vmem:[#allocation12 + $0x118] sm:$0xf]  ;;  %v14202_v13 = vor.u32 %v15585_v20, %v14199_v28 }
 0x827   :  { %v14458_v34 = vor.u32 %v15649_v25, %v14455_v59  ;;  %v14166_v33 = vor.u32 %v15581_v12, %v14165_v52  ;;  %v15549_v39 = vld [vmem:[#allocation12 + $0x34] sm:$0xf0]  ;;  %v15545_v59 = vld [vmem:[#allocation12 + $0x1c] sm:$0xf] }
 0x828   :  { %v14293_v28 = vld [vmem:[#allocation12 + $0x218] sm:$0xf]  ;;  %v14295_v52 = vld [vmem:[#allocation12 + $0x238] sm:$0xf0] }
 0x829   :  { %9709 = vmatpush.bf16.msrb.mxu0 %v14062_v55  ;;  %9722 = vmatpush.bf16.msrb.mxu1 %v14318_v47  ;;  %v15641_v55 = vld [vmem:[#allocation12 + $0x31c] sm:$0xf]  ;;  %v15613_v25 = vld [vmem:[#allocation12 + $0x234] sm:$0xf0] }
 0x82a   :  { %9735 = vmatpush.bf16.msrb.mxu2 %v14066_v29  ;;  %9748 = vmatpush.bf16.msra.mxu3 %v14322_v35  ;;  %v14423_v47 = vld [vmem:[#allocation12 + $0x338] sm:$0xf0]  ;;  %v15573_v29 = vld [vmem:[#allocation12 + $0xf4] sm:$0xf0]  ;;  %v14170_v35 = vor.u32 %v15577_v63, %v14167_v57  ;;  %v15679_v57 = vld [vmem:[#allocation16 + $0x28] sm:$0xff] }
 0x82b   :  { %v14426_v10 = vor.u32 %v15641_v55, %v14423_v47  ;;  %v14134_v21 = vor.u32 %v15573_v29, %v14133_v56  ;;  %v15680_v63 = vld [vmem:[#allocation16 + $0x30] sm:$0xff]  ;;  %v15678_v55 = vld [vmem:[#allocation16 + $0x20] sm:$0xff]  ;;  %v15677_v47 = vld [vmem:[#allocation16 + $0x18] sm:$0xff] }
 0x82c   :  { %v15674_v56 = vld [vmem:[#allocation16] sm:$0xff]  ;;  %v15670_v29 = vld [vmem:[#allocation6] sm:$0xff] }
 0x82d   :  { %9710 = vmatpush.bf16.msrb.mxu0 %v14030_v45  ;;  %9723 = vmatpush.bf16.msrb.mxu1 %v14286_v11  ;;  %v14101_v45 = vld [vmem:[#allocation12 + $0x98] sm:$0xf] }
 0x82e   :  { %9736 = vmatpush.bf16.msrb.mxu2 %v14034_v36  ;;  %9749 = vmatpush.bf16.msra.mxu3 %v14290_v30  ;;  %v15565_v11 = vld [vmem:[#allocation12 + $0xb4] sm:$0xf0]  ;;  %v15561_v30 = vld [vmem:[#allocation12 + $0x9c] sm:$0xf] }
 0x82f   :  { %v15629_v36 = vld [vmem:[#allocation12 + $0x2b4] sm:$0xf0]  ;;  %v14102_v58 = vor.u32 %v15565_v11, %v14101_v45 }
 0x830   :  { %9711 = vmatmul.bf16.vlgmr.msrb.gmra.mxu0 %v17669_v3  ;;  %9724 = vmatmul.bf16.vlgmr.msrb.gmra.mxu1 %v17671_v26 }
 0x831   :  { %9755 = vmatpush.bf16.msra.mxu0 %v14262_v19  ;;  %9768 = vmatpush.bf16.msra.mxu1 %v14518_v1  ;;  %v14103_v19 = vld [vmem:[#allocation12 + $0xb8] sm:$0xf0] }
 0x832   :  { %9781 = vmatpush.bf16.msra.mxu2 %v14266_v8  ;;  %9794 = vmatpush.bf16.msrb.mxu3 %v14522_v32  ;;  %v15625_v1 = vld [vmem:[#allocation12 + $0x29c] sm:$0xf]  ;;  %v14358_v8 = vor.u32 %v15629_v36, %v14357_v49  ;;  %v14069_v32 = vld [vmem:[#allocation12 + $0x58] sm:$0xf]  ;;  %v14106_v0 = vor.u32 %v15561_v30, %v14103_v19 }
 0x833   :  { %9737 = vmatmul.bf16.vlgmr.msrb.gmra.mxu2 %v17669_v3  ;;  %9750 = vmatmul.bf16.vlgmr.msra.gmra.mxu3 %v17671_v26  ;;  %v14362_v14 = vor.u32 %v15625_v1, %v14359_v43  ;;  %v14070_v42 = vor.u32 %v15557_v46, %v14069_v32 }
 0x835   :  { %9756 = vmatpush.bf16.msra.mxu0 %v14230_v53  ;;  %9769 = vmatpush.bf16.msra.mxu1 %v14486_v31  ;;  %v14071_v53 = vld [vmem:[#allocation12 + $0x78] sm:$0xf0] }
 0x836   :  { %9782 = vmatpush.bf16.msra.mxu2 %v14234_v6  ;;  %9795 = vmatpush.bf16.msrb.mxu3 %v14490_v16  ;;  %v15617_v31 = vld [vmem:[#allocation12 + $0x25c] sm:$0xf]  ;;  %v14326_v6 = vor.u32 %v15621_v24, %v14325_v2  ;;  %v14037_v16 = vld [vmem:[#allocation12 + $0x18] sm:$0xf]  ;;  %v14074_v62 = vor.u32 %v15553_v27, %v14071_v53 }
 0x837   :  { %v14330_v20 = vor.u32 %v15617_v31, %v14327_v37  ;;  %v14038_v12 = vor.u32 %v15549_v39, %v14037_v16 }
 0x839   :  { %9757 = vmatpush.bf16.msra.mxu0 %v14198_v5  ;;  %9770 = vmatpush.bf16.msra.mxu1 %v14454_v50  ;;  %v14039_v5 = vld [vmem:[#allocation12 + $0x38] sm:$0xf0] }
 0x83a   :  { %9783 = vmatpush.bf16.msra.mxu2 %v14202_v13  ;;  %9796 = vmatpush.bf16.msrb.mxu3 %v14458_v34  ;;  %v15609_v50 = vld [vmem:[#allocation12 + $0x21c] sm:$0xf]  ;;  %v14294_v13 = vor.u32 %v15613_v25, %v14293_v28  ;;  %v14042_v34 = vor.u32 %v15545_v59, %v14039_v5 }
 0x83b   :  { %v14298_v48 = vor.u32 %v15609_v50, %v14295_v52 }
 0x83d   :  { %9758 = vmatpush.bf16.msra.mxu0 %v14166_v33  ;;  %9771 = vmatpush.bf16.msra.mxu1 %v14422_v15  ;;  %v15676_v33 = vld [vmem:[#allocation16 + $0x10] sm:$0xff]  ;;  %v15675_v15 = vld [vmem:[#allocation16 + $0x8] sm:$0xff] }
 0x83e   :  { %9784 = vmatpush.bf16.msra.mxu2 %v14170_v35  ;;  %9797 = vmatpush.bf16.msrb.mxu3 %v14426_v10  ;;  %v15671_v35 = vld [vmem:[#allocation6 + $0x8] sm:$0xff] }
 0x841   :  { %9759 = vmatpush.bf16.msra.mxu0 %v14134_v21  ;;  %9772 = vmatpush.bf16.msra.mxu1 %v14390_v17 }
 0x842   :  { %9785 = vmatpush.bf16.msra.mxu2 %v14138_v38  ;;  %9798 = vmatpush.bf16.msrb.mxu3 %v14394_v40 }
 0x845   :  { %9760 = vmatpush.bf16.msra.mxu0 %v14102_v58  ;;  %9773 = vmatpush.bf16.msra.mxu1 %v14358_v8 }
 0x846   :  { %9786 = vmatpush.bf16.msra.mxu2 %v14106_v0  ;;  %9799 = vmatpush.bf16.msrb.mxu3 %v14362_v14 }
 0x849   :  { %9761 = vmatpush.bf16.msra.mxu0 %v14070_v42  ;;  %9774 = vmatpush.bf16.msra.mxu1 %v14326_v6 }
 0x84a   :  { %9787 = vmatpush.bf16.msra.mxu2 %v14074_v62  ;;  %9800 = vmatpush.bf16.msrb.mxu3 %v14330_v20 }
 0x84d   :  { %9762 = vmatpush.bf16.msra.mxu0 %v14038_v12  ;;  %9775 = vmatpush.bf16.msra.mxu1 %v14294_v13 }
 0x84e   :  { %9788 = vmatpush.bf16.msra.mxu2 %v14042_v34  ;;  %9801 = vmatpush.bf16.msrb.mxu3 %v14298_v48 }
 0x850   :  { %9763 = vmatmul.bf16.vlgmr.msra.gmra.mxu0 %v17669_v3  ;;  %9776 = vmatmul.bf16.vlgmr.msra.gmra.mxu1 %v17671_v26 }
 0x851   :  { %9992 = vmatpush.bf16.msrb.mxu0 %v15681_v7  ;;  %9789 = vmatmul.bf16.vlgmr.msra.gmra.mxu2 %v17669_v3  ;;  %v15672_v3 = vld [vmem:[#allocation6 + $0x10] sm:$0xff] }
 0x852   :  { %9802 = vmatmul.bf16.vlgmr.msrb.gmra.mxu3 %v17671_v26 }
 0x855   :  { %9993 = vmatpush.bf16.msrb.mxu0 %v15680_v63 }
 0x859   :  { %9994 = vmatpush.bf16.msrb.mxu0 %v15679_v57 }
 0x85d   :  { %9995 = vmatpush.bf16.msrb.mxu0 %v15678_v55 }
 0x861   :  { %9996 = vmatpush.bf16.msrb.mxu0 %v15677_v47 }
 0x865   :  { %9997 = vmatpush.bf16.msrb.mxu0 %v15676_v33 }
 0x869   :  { %9998 = vmatpush.bf16.msrb.mxu0 %v15675_v15 }
 0x86d   :  { %9999 = vmatpush.bf16.msrb.mxu0 %v15674_v56 }
 0x870   :  { %10000 = vmatmul.bf16.vlgmr.msrb.gmra.mxu0 %v15670_v29 }
 0x880   :  { %10005 = vmatmul.bf16.gmra.mxu0 %v15671_v35 }
 0x88c   :  { %v9608_v26 = vpop.f32.mrf.mxu0  ;;  %v9621_v10 = vpop.f32.mrf.mxu1 }
 0x88d   :  { %v9622_v51 = vadd.f32 %v9621_v10, %v9608_v26 }
 0x88f   :  { %v9807_v54 = vadd.f32 %v9622_v51, %v16540_v44 }
 0x890   :  { %10010 = vmatmul.bf16.gmra.mxu0 %v15672_v3 }
 0x891   :  { %v14523_v60 = vmul.f32 -1.442695, %v9807_v54 }
 0x893   :  { %15972 = vpow2.f32 %v14523_v60  ;;  %v9634_v22 = vpop.f32.mrf.mxu2  ;;  %v9647_v9 = vpop.f32.mrf.mxu3 }
 0x894   :  { %v9648_v23 = vadd.f32 %v9647_v9, %v9634_v22  ;;  %v9610_v21 = vpop.f32.mrf.mxu0  ;;  %v9623_v17 = vpop.f32.mrf.mxu1 }
 0x896   :  { %v9808_v45 = vadd.f32 %v9648_v23, %v16543_v4 }
 0x898   :  { %v14524_v11 = vmul.f32 -1.442695, %v9808_v45 }
 0x899   :  { %v15973_v38 = vpop.eup %15972 }
 0x89a   :  { %v9814_v40 = vadd.f32 1.0, %v15973_v38  ;;  %15974 = vpow2.f32 %v14524_v11 }
 0x89b   :  { %v9636_v49 = vpop.f32.mrf.mxu2  ;;  %v9649_v36 = vpop.f32.mrf.mxu3 }
 0x89c   :  { %15976 = vrcp.f32 %v9814_v40  ;;  %v9660_v30 = vpop.f32.mrf.mxu0  ;;  %v9673_v19 = vpop.f32.mrf.mxu1  ;;  %v9826_v16 = vand.u32 2147483648, %v9814_v40  ;;  %vm9820_vm5 = vweird.f32 %v9814_v40  ;;  %v9824_v28 = vand.u32 2147483647, %v9814_v40 }
 0x89d   :  { %v9674_v2 = vadd.f32 %v9673_v19, %v9660_v30 }
 0x89e   :  { %v9827_v12 = vor.u32 1.1754944e-38, %v9826_v16  ;;  %vm9825_vm9 = vcmp.eq.f32.partialorder %v9824_v28, 8.507059e+37 }
 0x89f   :  { %v9809_v37 = vadd.f32 %v9674_v2, %v16558_v18 }
 0x8a0   :  { %v15975_v1 = vpop.eup %15974 }
 0x8a1   :  { %v9833_v44 = vadd.f32 1.0, %v15975_v1 }
 0x8a2   :  { %v15977_v43 = vpop.eup %15976 }
 0x8a3   :  { %v9816_v58 = vmul.f32 %v15977_v43, %v9814_v40  ;;  %15978 = vrcp.f32 %v9833_v44  ;;  %v9686_v8 = vpop.f32.mrf.mxu2  ;;  %v9699_v32 = vpop.f32.mrf.mxu3  ;;  %vm9821_vm4 = vweird.f32 %v15977_v43  ;;  %v9845_v25 = vand.u32 2147483648, %v9833_v44 }
 0x8a4   :  { %v9700_v46 = vadd.f32 %v9699_v32, %v9686_v8  ;;  %v9662_v0 = vpop.f32.mrf.mxu0  ;;  %v9675_v14 = vpop.f32.mrf.mxu1  ;;  %vm17693_vm6 = vmor %vm9820_vm5, %vm9821_vm4  ;;  %v9843_v5 = vand.u32 2147483647, %v9833_v44  ;;  %vm9839_vm8 = vweird.f32 %v9833_v44 }
 0x8a5   :  { %v9817_v4 = vsub.f32 1.0, %v9816_v58  ;;  %v9846_v48 = vor.u32 1.1754944e-38, %v9845_v25  ;;  %v15731_v0 = vld [vmem:[%s17727_s6] ss:$0 sm:$0xff]  ;;  %s16233_s6 = smov [#allocation18]  }
 0x8a6   :  { %v9810_v24 = vadd.f32 %v9700_v46, %v16553_v61  ;;  %vm9844_vm11 = vcmp.eq.f32.partialorder %v9843_v5, 8.507059e+37  ;;  %s10041_s9 = sshll.u32 %s16233_s6, 4  ;;  %s10042_s9 = int_to_ptr.vmem [resolvable:$true] %s10041_s9 }
 0x8a7   :  { %v9818_v27 = vmul.f32 %v15977_v43, %v9817_v4 }
 0x8a8   :  { %v14525_v53 = vmul.f32 -1.442695, %v9810_v24 }
 0x8a9   :  { %v15979_v31 = vpop.eup %15978  ;;  %v9819_v6 = vadd.f32 %v15977_v43, %v9818_v27 }
 0x8aa   :  { %v9835_v42 = vmul.f32 %v15979_v31, %v9833_v44  ;;  %15980 = vpow2.f32 %v14525_v53  ;;  %vm9840_vm7 = vweird.f32 %v15979_v31 }
 0x8ab   :  { %v9688_v39 = vpop.f32.mrf.mxu2  ;;  %v9701_v62 = vpop.f32.mrf.mxu3  ;;  %15982 = vtanh.f32 %v9809_v37  ;;  %v9823_v18 = vsel %vm17693_vm6, %v15977_v43, %v9819_v6  ;;  %vm9841_vm10 = vmor %vm9839_vm8, %vm9840_vm7 }
 0x8ac   :  { %v9836_v20 = vsub.f32 1.0, %v9835_v42  ;;  %v9828_v7 = vsel %vm9825_vm9, %v9827_v12, %v9823_v18 }
 0x8ad   :  { %v9712_v50 = vpop.f32.mrf.mxu0  ;;  %v9725_v52 = vpop.f32.mrf.mxu1 }
 0x8ae   :  { %v9837_v61 = vmul.f32 %v15979_v31, %v9836_v20 }
 0x8b0   :  { %v15981_v13 = vpop.eup %15980  ;;  %v9838_v34 = vadd.f32 %v15979_v31, %v9837_v61 }
 0x8b1   :  { %v9853_v63 = vadd.f32 1.0, %v15981_v13  ;;  %v15983_v55 = vpop.eup %15982 }
 0x8b2   :  { %v9842_v57 = vsel %vm9841_vm10, %v15979_v31, %v9838_v34  ;;  %v9870_v15 = vmul.f32 %v15983_v55, %v9828_v7 }
 0x8b3   :  { %v9847_v47 = vsel %vm9844_vm11, %v9846_v48, %v9842_v57  ;;  %15984 = vrcp.f32 %v9853_v63  ;;  %v9865_v60 = vand.u32 2147483648, %v9853_v63  ;;  %v9863_v21 = vand.u32 2147483647, %v9853_v63 }
 0x8b4   :  { %v9869_v33 = vmul.f32 %v9847_v47, %v17591_v41  ;;  %vm9859_vm13 = vweird.f32 %v9853_v63 }
 0x8b5   :  { %v9714_v3 = vpop.f32.mrf.mxu0  ;;  %v9727_v26 = vpop.f32.mrf.mxu1  ;;  %v9866_v41 = vor.u32 1.1754944e-38, %v9865_v60  ;;  %vm9864_vm15 = vcmp.eq.f32.partialorder %v9863_v21, 8.507059e+37 }
 0x8b6   :  { %v9738_v56 = vpop.f32.mrf.mxu2  ;;  %v9751_v29 = vpop.f32.mrf.mxu3  ;;  %v9871_v35 = vadd.f32 %v9870_v15, %v9869_v33 }
 0x8b8   :  { %9891 = vst [vmem:[#allocation21 + $0x8] sm:$0xff] %v9871_v35  ;;  %15986 = vtanh.f32 %v9871_v35 }
 0x8b9   :  { %v15985_v10 = vpop.eup %15984 }
 0x8ba   :  { %v9855_v51 = vmul.f32 %v15985_v10, %v9853_v63  ;;  %vm9860_vm12 = vweird.f32 %v15985_v10 }
 0x8bb   :  { %vm9861_vm14 = vmor %vm9859_vm13, %vm9860_vm12 }
 0x8bc   :  { %v9856_v54 = vsub.f32 1.0, %v9855_v51 }
 0x8be   :  { %v9740_v22 = vpop.f32.mrf.mxu2  ;;  %v9753_v9 = vpop.f32.mrf.mxu3  ;;  %v9857_v23 = vmul.f32 %v15985_v10, %v9856_v54 }
 0x8bf   :  { %v15987_v11 = vpop.eup %15986 }
 0x8c0   :  { %v9858_v17 = vadd.f32 %v15985_v10, %v9857_v23 }
 0x8c2   :  { %v9862_v45 = vsel %vm9861_vm14, %v15985_v10, %v9858_v17 }
 0x8c3   :  { %v9867_v38 = vsel %vm9864_vm15, %v9866_v41, %v9862_v45 }
 0x8c4   :  { %v9873_v40 = vmul.f32 %v15987_v11, %v9867_v38 }
 0x8c6   :  { %v9874_v49 = vpack.c.bf16 %v9873_v40, %v9873_v40  ;;  %9888 = vst [vmem:[#allocation19 + $0x8] sm:$0xff] %v9873_v40 }
 0x8c7   :  { %10062 = dma.vmem_to_hbm [thread:$0]  %s10055_s5, 256, %s10057_s1, [#allocation20], %s16221_s27, %s16221_s27, %s16222_s28  }
 0x8c8   :  { %9875 = vst [vmem:[#allocation3 + $0x4] sm:$0xf] %v9874_v49  ;;  %10075 = dma.vmem_to_hbm [thread:$0]  %s10068_s25, 256, %s10070_s29, [#allocation20], %s16221_s27, %s16221_s27, %s16222_s28  }
 0x8c9   :  { %9876 = vst [vmem:[#allocation6 + $0x1c] sm:$0xf] %v9874_v49 }
 0x8cd   :  { %v9764_v36 = vpop.f32.mrf.mxu0  ;;  %v9777_v30 = vpop.f32.mrf.mxu1 }
 0x8d0   :  { %v15673_v19 = vld [vmem:[#allocation6 + $0x18] sm:$0xff] }
 0x8d1   :  { %10015 = vmatmul.bf16.gmra.mxu0 %v15673_v19 }
 0x8d4   :  { %v9790_v1 = vpop.f32.mrf.mxu2 }
 0x8d5   :  { %v9803_v44 = vpop.f32.mrf.mxu3  ;;  %v9766_v43 = vpop.f32.mrf.mxu0 }
 0x8d6   :  { %v9779_v58 = vpop.f32.mrf.mxu1 }
 0x8dc   :  { %v9792_v8 = vpop.f32.mrf.mxu2 }
 0x8dd   :  { %v9805_v32 = vpop.f32.mrf.mxu3 }
 0x8ed   :  { %v10001_v46 = vpop.f32.mrf.mxu0 }
 0x8ee   :  { %v10002_v4 = vadd.f32 %v15731_v0, %v10001_v46 }
 0x8f5   :  { %v10003_v14 = vpop.f32.mrf.mxu0 }
 0x8f6   :  { %v10004_v2 = vadd.f32 %v15731_v0, %v10003_v14 }
 0x8f8   :  { %v15685_v24 = vpack.c.bf16 %v10004_v2, %v10002_v4 }
 0x8fa   :  { %15686 = vst [vmem:[#allocation18] sm:$0xff] %v15685_v24  }
 0x8fd   :  { %v10006_v27 = vpop.f32.mrf.mxu0 }
 0x8fe   :  { %v10007_v31 = vadd.f32 %v15731_v0, %v10006_v27 }
 0x905   :  { %v10008_v53 = vpop.f32.mrf.mxu0 }
 0x906   :  { %v10009_v37 = vadd.f32 %v15731_v0, %v10008_v53 }
 0x908   :  { %v15690_v42 = vpack.c.bf16 %v10009_v37, %v10007_v31 }
 0x90a   :  { %15702 = vst [vmem:[#allocation18 + $0x8] sm:$0xff] %v15690_v42  }
 0x90d   :  { %v10011_v6 = vpop.f32.mrf.mxu0 }
 0x90e   :  { %v10012_v39 = vadd.f32 %v15731_v0, %v10011_v6 }
 0x915   :  { %v10013_v16 = vpop.f32.mrf.mxu0 }
 0x916   :  { %v10014_v62 = vadd.f32 %v15731_v0, %v10013_v16 }
 0x918   :  { %v15695_v20 = vpack.c.bf16 %v10014_v62, %v10012_v39 }
 0x91a   :  { %15703 = vst [vmem:[#allocation18 + $0x10] sm:$0xff] %v15695_v20  }
 0x94e   :  { %v10016_v28 = vpop.f32.mrf.mxu0 }
 0x94f   :  { %v10017_v59 = vadd.f32 %v15731_v0, %v10016_v28 }
 0x956   :  { %v10018_v25 = vpop.f32.mrf.mxu0 }
 0x957   :  { %v10019_v61 = vadd.f32 %v15731_v0, %v10018_v25 }
 0x959   :  { %v15700_v18 = vpack.c.bf16 %v10019_v61, %v10017_v59 }
 0x95b   :  { %15704 = vst [vmem:[#allocation18 + $0x18] sm:$0xff] %v15700_v18  }
 0x95c   :  { %10049 = dma.vmem_to_hbm [thread:$0]  %s10042_s9, 512, %s10044_s0, [#allocation9], %s16228_s20, %s16228_s20, %s16229_s21  }
 0x95d   :  { %16212 = dma.done.wait [#allocation9], 512  }
 0x95e   :  { %16213 = vsyncadd [#allocation9], 4294966784 }
 0x95f   :  { %16214 = dma.done.wait [#allocation20], 512  }
 0x960   :  { %16215 = vsyncadd [#allocation20], 4294966784 }
 0x961   :  { %10088 = vsyncpa [#allocation8], 1 }
 0x962   :  { %10089 = vsyncpa [#allocation11], 1 }
 0x963   :  { %10090 = vsyncpa [#allocation14], 1 }
 0x964   :  { %10091 = vsyncpa [#allocation17], 1 }
 0x965   :  { %10092 = vsyncpa [#allocation9], 1 }
 0x966   :  { %10093 = vsyncpa [#allocation20], 1 }

</bundles_post_ra>
